<compile_context>
chip_gen: v7x
topology: tpu7x:2x2x1
jax: 0.10.0
libtpu: 0.0.40
codegen_flags: <defaults>
</compile_context>

<pallas_src>
import jax
import jax.numpy as jnp
from jax import lax
from jax.experimental import pallas as pl
from jax.experimental.pallas import tpu as pltpu

EMB_DIM = 300
ENC_HID = 512
DEC_HID = 512
ENC_OUT_DIM = 2 * ENC_HID            # 1024 (bidirectional encoder outputs)
STYLE_DIM = 768
VOCAB = 25000
PROJ_IN_DIM = ENC_OUT_DIM + STYLE_DIM  # 1792 -> hidden_projection input
DEC_IN_DIM = ENC_OUT_DIM + EMB_DIM     # 1324 -> decoder GRU input
SUBLANE = 8

_VMEM_SPEC = pl.BlockSpec(memory_space=pltpu.MemorySpace.VMEM)


def _round_up(x, m):
    return ((x + m - 1) // m) * m


def _gru_cell(x_gates, h, whh, bhh, hid):
    """PyTorch GRU cell: gates ordered [r, z, n]; all elementwise math in f32."""
    gh = jnp.dot(h, whh, preferred_element_type=jnp.float32) + bhh
    r = jax.nn.sigmoid(x_gates[:, :hid] + gh[:, :hid])
    z = jax.nn.sigmoid(x_gates[:, hid:2 * hid] + gh[:, hid:2 * hid])
    n = jnp.tanh(x_gates[:, 2 * hid:] + r * gh[:, 2 * hid:])
    return (1.0 - z) * n + z * h


# ----------------------------------------------------------------------------
# Encoder: bidirectional GRU (packed-sequence semantics via length masking).
# Grid axis of size 2 = direction (forward / backward), marked "parallel".
# Data is flat time-major: x_flat[(t*Bp + b), :].
# ----------------------------------------------------------------------------
def encoder_kernel(x_ref, len_ref, wih_ref, whh_ref, bih_ref, bhh_ref,
                   out_ref, hn_ref, xg_ref):
    SB = x_ref.shape[0]
    Bp = len_ref.shape[0]
    S = SB // Bp
    reverse = pl.program_id(0) == 1

    # Hoisted: input-gate contribution for ALL timesteps of this direction (one matmul).
    xg_ref[...] = (jnp.dot(x_ref[...], wih_ref[0],
                           preferred_element_type=jnp.float32) + bih_ref[0])

    lens = len_ref[...]                               # (Bp, 1) int32
    whh = whh_ref[0]
    bhh = bhh_ref[0]

    def body(i, h):
        t = jnp.where(reverse, S - 1 - i, i)
        off = pl.multiple_of(t * Bp, SUBLANE)
        xg = xg_ref[pl.ds(off, Bp), :]                # (Bp, 3*ENC_HID)
        h_new = _gru_cell(xg, h, whh, bhh, ENC_HID)
        valid = t < lens                              # (Bp, 1)
        out_ref[0, pl.ds(off, Bp), :] = jnp.where(valid, h_new,
                                                  jnp.zeros_like(h_new))
        return jnp.where(valid, h_new, h)

    hn_ref[0] = lax.fori_loop(0, S, body, jnp.zeros((Bp, ENC_HID), jnp.float32))


def encoder_forward(x_bse, seq_len, p):
    B, S, _ = x_bse.shape
    Bp = _round_up(B, SUBLANE)
    x_tm = jnp.transpose(x_bse, (1, 0, 2))                        # [S, B, 300]
    x_tm = jnp.pad(x_tm, ((0, 0), (0, Bp - B), (0, 0)))
    x_flat = x_tm.reshape(S * Bp, EMB_DIM)
    lens = jnp.pad(seq_len.astype(jnp.int32), (0, Bp - B)).reshape(Bp, 1)

    wih = jnp.stack([p['enc_wih_f'], p['enc_wih_b']])             # (2, 300, 1536)
    whh = jnp.stack([p['enc_whh_f'], p['enc_whh_b']])             # (2, 512, 1536)
    bih = jnp.stack([p['enc_bih_f'], p['enc_bih_b']])             # (2, 1, 1536)
    bhh = jnp.stack([p['enc_bhh_f'], p['enc_bhh_b']])             # (2, 1, 1536)

    out_s, hn_s = pl.pallas_call(
        encoder_kernel,
        out_shape=(jax.ShapeDtypeStruct((2, S * Bp, ENC_HID), jnp.float32),
                   jax.ShapeDtypeStruct((2, Bp, ENC_HID), jnp.float32)),
        grid=(2,),
        in_specs=[pl.BlockSpec((S * Bp, EMB_DIM), lambda d: (0, 0)),
                  pl.BlockSpec((Bp, 1), lambda d: (0, 0)),
                  pl.BlockSpec((1, EMB_DIM, 3 * ENC_HID), lambda d: (d, 0, 0)),
                  pl.BlockSpec((1, ENC_HID, 3 * ENC_HID), lambda d: (d, 0, 0)),
                  pl.BlockSpec((1, 1, 3 * ENC_HID), lambda d: (d, 0, 0)),
                  pl.BlockSpec((1, 1, 3 * ENC_HID), lambda d: (d, 0, 0))],
        out_specs=(pl.BlockSpec((1, S * Bp, ENC_HID), lambda d: (d, 0, 0)),
                   pl.BlockSpec((1, Bp, ENC_HID), lambda d: (d, 0, 0))),
        scratch_shapes=[pltpu.VMEM((S * Bp, 3 * ENC_HID), jnp.float32)],
        compiler_params=pltpu.CompilerParams(
            dimension_semantics=("parallel",),
            vmem_limit_bytes=32 * 1024 * 1024),
    )(x_flat, lens, wih, whh, bih, bhh)

    out = out_s.reshape(2, S, Bp, ENC_HID)[:, :, :B]              # (2, S, B, 512)
    enc_out = jnp.concatenate([out[0], out[1]], axis=-1)          # (S, B, 1024)
    enc_out = jnp.transpose(enc_out, (1, 0, 2))                   # (B, S, 1024)
    enc_hidden = jnp.concatenate([hn_s[0, :B], hn_s[1, :B]], axis=-1)  # (B, 1024)
    return enc_out, enc_hidden


# ----------------------------------------------------------------------------
# Decoder: hidden projection + per-step (scaled-dot attention -> GRU cell).
# ----------------------------------------------------------------------------
def decoder_kernel(enc_h_ref, style_ref, enc_out_ref, mask_ref, emb_ref,
                   wproj_h_ref, wproj_s_ref, bproj_ref, wattn_ref,
                   wih_c_ref, wih_e_ref, whh_ref, bih_ref, bhh_ref,
                   out_ref, xg_ref):
    Bp = enc_h_ref.shape[0]
    T = emb_ref.shape[0] // Bp

    # hidden_projection(cat([encoder_hidden, style_vector], -1)) as a split matmul.
    h0 = (jnp.dot(enc_h_ref[...], wproj_h_ref[...], preferred_element_type=jnp.float32)
          + jnp.dot(style_ref[...], wproj_s_ref[...], preferred_element_type=jnp.float32)
          + bproj_ref[...])

    # Hoisted: embedding contribution to the GRU input gates for ALL timesteps.
    xg_ref[...] = (jnp.dot(emb_ref[...], wih_e_ref[...],
                           preferred_element_type=jnp.float32) + bih_ref[...])

    # Hoisted loop invariants.
    enc_out = enc_out_ref[...]                        # (Bp, S, 1024)
    mask3 = mask_ref[...][:, None, :] != 0            # (Bp, 1, S)
    wattn = wattn_ref[...]
    wih_c = wih_c_ref[...]
    whh = whh_ref[...]
    bhh = bhh_ref[...]
    neg = jnp.float32(-1e30)

    def body(t, h):
        # ScaleDotAttention: key.bmm(query @ W) -> masked softmax -> weighted sum.
        # (no 1/sqrt(d) scaling, matching the reference module)
        q3 = jnp.dot(h, wattn, preferred_element_type=jnp.float32)[:, None, :]  # (Bp,1,1024)
        scores = jnp.einsum('bqd,bsd->bqs', q3, enc_out,
                            preferred_element_type=jnp.float32)                 # (Bp,1,S)
        scores = jnp.where(mask3, neg, scores)
        scores = scores - jnp.max(scores, axis=-1, keepdims=True)
        pvals = jnp.exp(scores)
        pvals = pvals / jnp.sum(pvals, axis=-1, keepdims=True)
        ctx = jnp.sum(jnp.einsum('bqs,bsd->bqd', pvals, enc_out,
                                 preferred_element_type=jnp.float32), axis=1)   # (Bp,1024)
        # GRU cell on cat([context, emb_t]): context gate matmul + precomputed emb gates.
        off = pl.multiple_of(t * Bp, SUBLANE)
        xg = xg_ref[pl.ds(off, Bp), :] + jnp.dot(ctx, wih_c,
                                                 preferred_element_type=jnp.float32)
        h_new = _gru_cell(xg, h, whh, bhh, DEC_HID)
        out_ref[pl.ds(off, Bp), :] = h_new
        return h_new

    lax.fori_loop(0, T, body, h0)


def decoder_forward(enc_hidden, enc_out, mask, dec_emb, style_vec, p):
    B, T, _ = dec_emb.shape
    Bp = _round_up(B, SUBLANE)
    pad = Bp - B
    enc_h_p = jnp.pad(enc_hidden, ((0, pad), (0, 0)))
    style_p = jnp.pad(style_vec, ((0, pad), (0, 0)))
    enc_out_p = jnp.pad(enc_out, ((0, pad), (0, 0), (0, 0)))
    mask_p = jnp.pad(mask.astype(jnp.int32), ((0, pad), (0, 0)))
    emb_tm = jnp.transpose(dec_emb, (1, 0, 2))                    # [T, B, 300]
    emb_tm = jnp.pad(emb_tm, ((0, 0), (0, pad), (0, 0)))
    emb_flat = emb_tm.reshape(T * Bp, EMB_DIM)

    out_flat = pl.pallas_call(
        decoder_kernel,
        out_shape=jax.ShapeDtypeStruct((T * Bp, DEC_HID), jnp.float32),
        in_specs=[_VMEM_SPEC] * 14,
        out_specs=_VMEM_SPEC,
        scratch_shapes=[pltpu.VMEM((T * Bp, 3 * DEC_HID), jnp.float32)],
        compiler_params=pltpu.CompilerParams(vmem_limit_bytes=48 * 1024 * 1024),
    )(enc_h_p, style_p, enc_out_p, mask_p, emb_flat,
      p['proj_wh'], p['proj_ws'], p['proj_b'],
      p['attn_w'],
      p['dec_wih_c'], p['dec_wih_e'], p['dec_whh'], p['dec_bih'], p['dec_bhh'])
    out = out_flat.reshape(T, Bp, DEC_HID)[:, :B]                 # (T, B, 512)
    return jnp.transpose(out, (1, 0, 2))                          # (B, T, 512)


# ----------------------------------------------------------------------------
# Output projection: bf16 weight streaming, 4096-wide lane-dense tiles,
# f32 accumulation + f32 bias.
# ----------------------------------------------------------------------------
def proj_kernel(x_ref, w_ref, b_ref, o_ref):
    o_ref[...] = (jnp.dot(x_ref[...], w_ref[...],
                          preferred_element_type=jnp.float32) + b_ref[...])


def output_projection(x, w_bf16, b, tn=4096):
    M, K = x.shape
    N = w_bf16.shape[1]
    n_pad = _round_up(N, tn)
    w_p = jnp.pad(w_bf16, ((0, 0), (0, n_pad - N)))
    b_p = jnp.pad(b.reshape(1, N), ((0, 0), (0, n_pad - N)))
    x_bf = x.astype(jnp.bfloat16)
    out = pl.pallas_call(
        proj_kernel,
        out_shape=jax.ShapeDtypeStruct((M, n_pad), jnp.float32),
        grid=(n_pad // tn,),
        in_specs=[pl.BlockSpec((M, K), lambda j: (0, 0)),
                  pl.BlockSpec((K, tn), lambda j: (0, j)),
                  pl.BlockSpec((1, tn), lambda j: (0, j))],
        out_specs=pl.BlockSpec((M, tn), lambda j: (0, j)),
        compiler_params=pltpu.CompilerParams(
            dimension_semantics=("parallel",),
            vmem_limit_bytes=32 * 1024 * 1024),
    )(x_bf, w_p, b_p)
    return out[:, :N]


# ----------------------------------------------------------------------------
# Full Seq2Seq forward.
# ----------------------------------------------------------------------------
def seq2seq_forward(p, sequence, seq_len, style_emb, decoder_input):
    emb_table = p['embedding']
    seq_emb = emb_table[sequence]                                 # [B, S, 300]
    enc_out, enc_hidden = encoder_forward(seq_emb, seq_len, p)
    # TODO(synk): original code builds the mask from the *embedded* sequence
    # ((sequence == 0).byte() after embedding), which cannot broadcast in
    # masked_fill_; we use the intended token-padding mask (token id == 0).
    mask = (sequence == 0)                                        # [B, S]
    dec_emb = emb_table[decoder_input]                            # [B, T, 300]
    style_vec = style_emb[:, -1, :]                               # [B, 768]
    dec_out = decoder_forward(enc_hidden, enc_out, mask, dec_emb, style_vec, p)
    B, T, H = dec_out.shape
    logits = output_projection(dec_out.reshape(B * T, H), p['out_w'], p['out_b'])
    return logits.reshape(B, T, VOCAB)


# ----------------------------------------------------------------------------
# Deterministic parameter init (shapes from the PyTorch __init__).
# ----------------------------------------------------------------------------
def init_params(key):
    ks = jax.random.split(key, 24)

    def unif(k, shape, bound):
        return jax.random.uniform(k, shape, jnp.float32, -bound, bound)

    p = {}
    # nn.Embedding(25000, 300) initialized with np.random.rand -> U[0, 1)
    p['embedding'] = jax.random.uniform(ks[0], (VOCAB, EMB_DIM), jnp.float32)
    # Encoder bidirectional GRU (input 300, hidden 512); PyTorch U(-1/sqrt(H), 1/sqrt(H))
    se = 1.0 / (ENC_HID ** 0.5)
    p['enc_wih_f'] = unif(ks[1], (EMB_DIM, 3 * ENC_HID), se)
    p['enc_whh_f'] = unif(ks[2], (ENC_HID, 3 * ENC_HID), se)
    p['enc_bih_f'] = unif(ks[3], (1, 3 * ENC_HID), se)
    p['enc_bhh_f'] = unif(ks[4], (1, 3 * ENC_HID), se)
    p['enc_wih_b'] = unif(ks[5], (EMB_DIM, 3 * ENC_HID), se)
    p['enc_whh_b'] = unif(ks[6], (ENC_HID, 3 * ENC_HID), se)
    p['enc_bih_b'] = unif(ks[7], (1, 3 * ENC_HID), se)
    p['enc_bhh_b'] = unif(ks[8], (1, 3 * ENC_HID), se)
    # Decoder hidden_projection: Linear(1792, 512) (weight stored transposed, split)
    sp = 1.0 / (PROJ_IN_DIM ** 0.5)
    wproj = unif(ks[9], (PROJ_IN_DIM, DEC_HID), sp)
    p['proj_wh'] = wproj[:ENC_OUT_DIM]
    p['proj_ws'] = wproj[ENC_OUT_DIM:]
    p['proj_b'] = unif(ks[10], (1, DEC_HID), sp)
    # ScaleDotAttention weights [512, 1024], normal(0, sqrt(2/(512+1024)))
    p['attn_w'] = (jax.random.normal(ks[11], (DEC_HID, ENC_OUT_DIM), jnp.float32)
                   * (2.0 / (DEC_HID + ENC_OUT_DIM)) ** 0.5)
    # Decoder GRU (input 1324 = 1024 + 300, hidden 512), input weight split
    sd = 1.0 / (DEC_HID ** 0.5)
    wih = unif(ks[12], (DEC_IN_DIM, 3 * DEC_HID), sd)
    p['dec_wih_c'] = wih[:ENC_OUT_DIM]
    p['dec_wih_e'] = wih[ENC_OUT_DIM:]
    p['dec_whh'] = unif(ks[13], (DEC_HID, 3 * DEC_HID), sd)
    p['dec_bih'] = unif(ks[14], (1, 3 * DEC_HID), sd)
    p['dec_bhh'] = unif(ks[15], (1, 3 * DEC_HID), sd)
    # output_projection: Linear(512, 25000) -- weight streamed as bf16, bias f32.
    so = 1.0 / (DEC_HID ** 0.5)
    p['out_w'] = unif(ks[16], (DEC_HID, VOCAB), so).astype(jnp.bfloat16)
    p['out_b'] = unif(ks[17], (VOCAB,), so)
    return p


if __name__ == "__main__":
    key = jax.random.PRNGKey(0)
    pkey, dkey = jax.random.split(key)
    params = init_params(pkey)

    B, S, T_DEC, T_STYLE = 2, 8, 4, 3
    k1, k2, k3 = jax.random.split(dkey, 3)
    seq_len = jnp.array([S, S - 3], dtype=jnp.int32)
    sequence = jax.random.randint(k1, (B, S), 1, VOCAB, dtype=jnp.int32)
    pos = jnp.arange(S)[None, :]
    sequence = jnp.where(pos < seq_len[:, None], sequence, 0)       # pad id = 0
    decoder_input = jax.random.randint(k2, (B, T_DEC), 1, VOCAB, dtype=jnp.int32)
    style_emb = jax.random.normal(k3, (B, T_STYLE, STYLE_DIM), jnp.float32)

    out = seq2seq_forward(params, sequence, seq_len, style_emb, decoder_input)
    out = jax.block_until_ready(out)
    assert out.shape == (B, T_DEC, VOCAB)
    assert bool(jnp.all(jnp.isfinite(out)))
    print("KERNEL_OK")
</pallas_src>

<mosaic_0001>
module attributes {stable_mosaic.version = 11 : i64} {
  func.func @encoder_kernel(%arg0: i32, %arg1: memref<64x300xf32, #tpu.memory_space<vmem>>, %arg2: memref<8x1xi32, #tpu.memory_space<vmem>>, %arg3: memref<1x300x1536xf32, #tpu.memory_space<vmem>>, %arg4: memref<1x512x1536xf32, #tpu.memory_space<vmem>>, %arg5: memref<1x1x1536xf32, #tpu.memory_space<vmem>>, %arg6: memref<1x1x1536xf32, #tpu.memory_space<vmem>>, %arg7: memref<1x64x512xf32, #tpu.memory_space<vmem>>, %arg8: memref<1x8x512xf32, #tpu.memory_space<vmem>>, %arg9: memref<64x1536xf32, #tpu.memory_space<vmem>>) attributes {dimension_semantics = [#tpu.dimension_semantics<parallel>], iteration_bounds = array<i64: 2>, scalar_prefetch = 0 : i64, scratch_operands = 1 : i64, tpu.core_type = #tpu.core_type<tc>, window_params = [{pipeline_mode = #tpu.pipeline_mode<synchronous>, transform_indices = @transform_0, window_bounds = array<i64: 64, 300>}, {pipeline_mode = #tpu.pipeline_mode<synchronous>, transform_indices = @transform_1, window_bounds = array<i64: 8, 1>}, {transform_indices = @transform_2, window_bounds = array<i64: 1, 300, 1536>}, {transform_indices = @transform_3, window_bounds = array<i64: 1, 512, 1536>}, {transform_indices = @transform_4, window_bounds = array<i64: 1, 1, 1536>}, {transform_indices = @transform_5, window_bounds = array<i64: 1, 1, 1536>}, {transform_indices = @transform_6, window_bounds = array<i64: 1, 64, 512>}, {transform_indices = @transform_7, window_bounds = array<i64: 1, 8, 512>}]} {
    %c1_i32 = arith.constant 1 : i32
    %0 = arith.cmpi eq, %arg0, %c1_i32 : i32
    %c0 = arith.constant 0 : index
    %c0_0 = arith.constant 0 : index
    %1 = vector.load %arg1[%c0, %c0_0] : memref<64x300xf32, #tpu.memory_space<vmem>>, vector<64x300xf32>
    %c0_1 = arith.constant 0 : index
    %c0_2 = arith.constant 0 : index
    %c0_3 = arith.constant 0 : index
    %2 = vector.load %arg3[%c0_1, %c0_2, %c0_3] : memref<1x300x1536xf32, #tpu.memory_space<vmem>>, vector<1x300x1536xf32>
    %3 = vector.shape_cast %2 : vector<1x300x1536xf32> to vector<300x1536xf32>
    %cst = arith.constant dense<0.000000e+00> : vector<64x1536xf32>
    %4 = tpu.matmul %1, %3, %cst {dimension_numbers = #tpu.dot_dimension_numbers<[1], [0], [0], [1], [0, 0, 1, 1], [], []>} : vector<64x300xf32>, vector<300x1536xf32>, vector<64x1536xf32> -> vector<64x1536xf32>
    %c0_4 = arith.constant 0 : index
    %c0_5 = arith.constant 0 : index
    %c0_6 = arith.constant 0 : index
    %5 = vector.load %arg5[%c0_4, %c0_5, %c0_6] : memref<1x1x1536xf32, #tpu.memory_space<vmem>>, vector<1x1x1536xf32>
    %6 = vector.shape_cast %5 : vector<1x1x1536xf32> to vector<1x1536xf32>
    %7 = vector.broadcast %6 : vector<1x1536xf32> to vector<64x1536xf32>
    %8 = arith.addf %4, %7 : vector<64x1536xf32>
    %c0_7 = arith.constant 0 : index
    %c0_8 = arith.constant 0 : index
    %9 = vector.load %arg9[%c0_7, %c0_8] : memref<64x1536xf32, #tpu.memory_space<vmem>>, vector<64x1536xf32>
    tpu.vector_store %arg9[%c0_7, %c0_8], %8 {strides = array<i32>} : memref<64x1536xf32, #tpu.memory_space<vmem>>, vector<64x1536xf32>,
    %c0_9 = arith.constant 0 : index
    %c0_10 = arith.constant 0 : index
    %10 = vector.load %arg2[%c0_9, %c0_10] : memref<8x1xi32, #tpu.memory_space<vmem>>, vector<8x1xi32>
    %c0_11 = arith.constant 0 : index
    %c0_12 = arith.constant 0 : index
    %c0_13 = arith.constant 0 : index
    %11 = vector.load %arg4[%c0_11, %c0_12, %c0_13] : memref<1x512x1536xf32, #tpu.memory_space<vmem>>, vector<1x512x1536xf32>
    %12 = vector.shape_cast %11 : vector<1x512x1536xf32> to vector<512x1536xf32>
    %c0_14 = arith.constant 0 : index
    %c0_15 = arith.constant 0 : index
    %c0_16 = arith.constant 0 : index
    %13 = vector.load %arg6[%c0_14, %c0_15, %c0_16] : memref<1x1x1536xf32, #tpu.memory_space<vmem>>, vector<1x1x1536xf32>
    %14 = vector.shape_cast %13 : vector<1x1x1536xf32> to vector<1x1536xf32>
    %cst_17 = arith.constant 0.000000e+00 : f32
    %15 = vector.broadcast %cst_17 : f32 to vector<8x512xf32>
    %c0_i32 = arith.constant 0 : i32
    %c8_i32 = arith.constant 8 : i32
    %16 = arith.addi %c0_i32, %c8_i32 : i32
    %c1_i32_18 = arith.constant 1 : i32
    %17 = scf.for %arg10 = %c0_i32 to %16 step %c1_i32_18 iter_args(%arg11 = %15) -> (vector<8x512xf32>)  : i32 {
      %c7_i32 = arith.constant 7 : i32
      %21 = arith.subi %c7_i32, %arg10 : i32
      %22 = arith.select %0, %21, %arg10 : i32
      %c8_i32_23 = arith.constant 8 : i32
      %23 = arith.muli %22, %c8_i32_23 : i32
      %24 = tpu.assume_multiple %23, 8 : i32
      %25 = arith.index_cast %24 : i32 to index
      %c0_24 = arith.constant 0 : index
      %26 = vector.load %arg9[%25, %c0_24] : memref<64x1536xf32, #tpu.memory_space<vmem>>, vector<8x1536xf32>
      %cst_25 = arith.constant dense<0.000000e+00> : vector<8x1536xf32>
      %27 = tpu.matmul %arg11, %12, %cst_25 {dimension_numbers = #tpu.dot_dimension_numbers<[1], [0], [0], [1], [0, 0, 1, 1], [], []>} : vector<8x512xf32>, vector<512x1536xf32>, vector<8x1536xf32> -> vector<8x1536xf32>
      %28 = vector.broadcast %14 : vector<1x1536xf32> to vector<8x1536xf32>
      %29 = arith.addf %27, %28 : vector<8x1536xf32>
      %30 = vector.extract_strided_slice %26 {offsets = [0, 0], sizes = [8, 512], strides = [1, 1]} : vector<8x1536xf32> to vector<8x512xf32>
      %31 = vector.extract_strided_slice %29 {offsets = [0, 0], sizes = [8, 512], strides = [1, 1]} : vector<8x1536xf32> to vector<8x512xf32>
      %32 = arith.addf %30, %31 : vector<8x512xf32>
      %33 = arith.negf %32 : vector<8x512xf32>
      %34 = math.exp %33 : vector<8x512xf32>
      %cst_26 = arith.constant 1.000000e+00 : f32
      %35 = vector.broadcast %cst_26 : f32 to vector<8x512xf32>
      %36 = arith.addf %35, %34 : vector<8x512xf32>
      %37 = arith.divf %35, %36 : vector<8x512xf32>
      %38 = vector.extract_strided_slice %26 {offsets = [0, 512], sizes = [8, 512], strides = [1, 1]} : vector<8x1536xf32> to vector<8x512xf32>
      %39 = vector.extract_strided_slice %29 {offsets = [0, 512], sizes = [8, 512], strides = [1, 1]} : vector<8x1536xf32> to vector<8x512xf32>
      %40 = arith.addf %38, %39 : vector<8x512xf32>
      %41 = arith.negf %40 : vector<8x512xf32>
      %42 = math.exp %41 : vector<8x512xf32>
      %cst_27 = arith.constant 1.000000e+00 : f32
      %43 = vector.broadcast %cst_27 : f32 to vector<8x512xf32>
      %44 = arith.addf %43, %42 : vector<8x512xf32>
      %45 = arith.divf %43, %44 : vector<8x512xf32>
      %46 = vector.extract_strided_slice %26 {offsets = [0, 1024], sizes = [8, 512], strides = [1, 1]} : vector<8x1536xf32> to vector<8x512xf32>
      %47 = vector.extract_strided_slice %29 {offsets = [0, 1024], sizes = [8, 512], strides = [1, 1]} : vector<8x1536xf32> to vector<8x512xf32>
      %48 = arith.mulf %37, %47 : vector<8x512xf32>
      %49 = arith.addf %46, %48 : vector<8x512xf32>
      %50 = math.tanh %49 : vector<8x512xf32>
      %cst_28 = arith.constant 1.000000e+00 : f32
      %51 = vector.broadcast %cst_28 : f32 to vector<8x512xf32>
      %52 = arith.subf %51, %45 : vector<8x512xf32>
      %53 = arith.mulf %52, %50 : vector<8x512xf32>
      %54 = arith.mulf %45, %arg11 : vector<8x512xf32>
      %55 = arith.addf %53, %54 : vector<8x512xf32>
      %56 = vector.broadcast %22 : i32 to vector<8x1xi32>
      %57 = arith.cmpi slt, %56, %10 : vector<8x1xi32>
      %cst_29 = arith.constant 0.000000e+00 : f32
      %58 = vector.broadcast %cst_29 : f32 to vector<8x512xf32>
      %59 = vector.shape_cast %57 : vector<8x1xi1> to vector<8x1xi1>
      %60 = vector.broadcast %59 : vector<8x1xi1> to vector<8x512xi1>
      %61 = arith.select %60, %55, %58 : vector<8x512xi1>, vector<8x512xf32>
      %c0_30 = arith.constant 0 : index
      %62 = arith.index_cast %24 : i32 to index
      %c0_31 = arith.constant 0 : index
      %63 = vector.load %arg7[%c0_30, %62, %c0_31] : memref<1x64x512xf32, #tpu.memory_space<vmem>>, vector<1x8x512xf32>
      %64 = vector.shape_cast %63 : vector<1x8x512xf32> to vector<8x512xf32>
      %65 = vector.shape_cast %61 : vector<8x512xf32> to vector<1x8x512xf32>
      tpu.vector_store %arg7[%c0_30, %62, %c0_31], %65 {strides = array<i32>} : memref<1x64x512xf32, #tpu.memory_space<vmem>>, vector<1x8x512xf32>,
      %66 = vector.shape_cast %57 : vector<8x1xi1> to vector<8x1xi1>
      %67 = vector.broadcast %66 : vector<8x1xi1> to vector<8x512xi1>
      %68 = arith.select %67, %55, %arg11 : vector<8x512xi1>, vector<8x512xf32>
      scf.yield %68 : vector<8x512xf32>
    }
    %c8_i32_19 = arith.constant 8 : i32
    %c0_20 = arith.constant 0 : index
    %c0_21 = arith.constant 0 : index
    %c0_22 = arith.constant 0 : index
    %18 = vector.load %arg8[%c0_20, %c0_21, %c0_22] : memref<1x8x512xf32, #tpu.memory_space<vmem>>, vector<1x8x512xf32>
    %19 = vector.shape_cast %18 : vector<1x8x512xf32> to vector<8x512xf32>
    %20 = vector.shape_cast %17 : vector<8x512xf32> to vector<1x8x512xf32>
    tpu.vector_store %arg8[%c0_20, %c0_21, %c0_22], %20 {strides = array<i32>} : memref<1x8x512xf32, #tpu.memory_space<vmem>>, vector<1x8x512xf32>,
    return
  }
  func.func @transform_0(%arg0: i32) -> (i32, i32) {
    %c0_i32 = arith.constant 0 : i32
    %c0_i32_0 = arith.constant 0 : i32
    %c0_i32_1 = arith.constant 0 : i32
    return %c0_i32, %c0_i32_0 : i32, i32
  }
  func.func @transform_1(%arg0: i32) -> (i32, i32) {
    %c0_i32 = arith.constant 0 : i32
    %c0_i32_0 = arith.constant 0 : i32
    %c0_i32_1 = arith.constant 0 : i32
    return %c0_i32, %c0_i32_0 : i32, i32
  }
  func.func @transform_2(%arg0: i32) -> (i32, i32, i32) {
    %c0_i32 = arith.constant 0 : i32
    %c0_i32_0 = arith.constant 0 : i32
    %c0_i32_1 = arith.constant 0 : i32
    return %arg0, %c0_i32, %c0_i32_0 : i32, i32, i32
  }
  func.func @transform_3(%arg0: i32) -> (i32, i32, i32) {
    %c0_i32 = arith.constant 0 : i32
    %c0_i32_0 = arith.constant 0 : i32
    %c0_i32_1 = arith.constant 0 : i32
    return %arg0, %c0_i32, %c0_i32_0 : i32, i32, i32
  }
  func.func @transform_4(%arg0: i32) -> (i32, i32, i32) {
    %c0_i32 = arith.constant 0 : i32
    %c0_i32_0 = arith.constant 0 : i32
    %c0_i32_1 = arith.constant 0 : i32
    return %arg0, %c0_i32, %c0_i32_0 : i32, i32, i32
  }
  func.func @transform_5(%arg0: i32) -> (i32, i32, i32) {
    %c0_i32 = arith.constant 0 : i32
    %c0_i32_0 = arith.constant 0 : i32
    %c0_i32_1 = arith.constant 0 : i32
    return %arg0, %c0_i32, %c0_i32_0 : i32, i32, i32
  }
  func.func @transform_6(%arg0: i32) -> (i32, i32, i32) {
    %c0_i32 = arith.constant 0 : i32
    %c0_i32_0 = arith.constant 0 : i32
    %c0_i32_1 = arith.constant 0 : i32
    return %arg0, %c0_i32, %c0_i32_0 : i32, i32, i32
  }
  func.func @transform_7(%arg0: i32) -> (i32, i32, i32) {
    %c0_i32 = arith.constant 0 : i32
    %c0_i32_0 = arith.constant 0 : i32
    %c0_i32_1 = arith.constant 0 : i32
    return %arg0, %c0_i32, %c0_i32_0 : i32, i32, i32
  }
}

</mosaic_0001>

<bundles_post_ra>
// kernel: tpu_custom_call.1
= control target key start
LH: loop header
LB: loop body
LE: loop exit
PB: predicated region body
PF: predicated region fallthrough
CT: control target
= control target key end

     0   :  { %s10725_s0 = inlined_call_operand.vmem [shape: f32[64,300], index: 0, kind: input, shape index: {}]   ;;  %s10726_s1 = inlined_call_operand.vmem [shape: s32[8,1], index: 1, kind: input, shape index: {}]   ;;  %s10727_s2 = inlined_call_operand.vmem [shape: f32[2,300,1536], index: 2, kind: input, shape index: {}]   ;;  %s10728_s3 = inlined_call_operand.vmem [shape: f32[2,512,1536], index: 3, kind: input, shape index: {}]   ;;  %s10729_s4 = inlined_call_operand.vmem [shape: f32[2,1,1536], index: 4, kind: input, shape index: {}]   ;;  %s10730_s5 = inlined_call_operand.vmem [shape: f32[2,1,1536], index: 5, kind: input, shape index: {}]   ;;  %s10731_s6 = inlined_call_operand.hbm [shape: f32[2,64,512], index: 6, kind: output, shape index: {0}]   ;;  %s10732_s7 = inlined_call_operand.hbm [shape: f32[2,8,512], index: 7, kind: output, shape index: {1}]  }
   0x1   :  { %10753 = sst [smem:[#allocation759_spill]] %s10725_s0 }
   0x2   :  { %10754 = sst [smem:[#allocation760_spill]] %s10726_s1 }
   0x3   :  { %10755 = sst [smem:[#allocation761_spill]] %s10727_s2 }
   0x4   :  { %13 = vsyncpa [#allocation4], 0 }
   0x5   :  { %15 = vsyncpa [#allocation4 + $0x1], 0 }
   0x6   :  { %16 = vsyncpa [#allocation6], 0 }
   0x7   :  { %18 = vsyncpa [#allocation6 + $0x1], 0  ;;  %s6294_s24 = smov 0   ;;  %s6296_s25 = smov 0  }
   0x8   :  { %s6298_s26 = smov 0   ;;  %s6300_s27 = smov 0  }
   0x9 LB: > { %s6315_s28 = sadd.s32 4294967295, %s6225_s27   ;;  %s4410_s29 = sadd.s32 4294967294, %s6225_s27   ;;  %s6225_s27 = sphi %s6300_s27, %s12275_s27   ;;  %s6221_s26 = sphi %s6298_s26, %s12274_s26   ;;  %s6217_s25 = sphi %s6296_s25, %s12273_s25   ;;  %s6213_s24 = sphi %s6294_s24, %s12272_s24  }
   0xa   : > { %s6319_s30 = sadd.s32 1, %s6225_s27   ;;  %s177_s8 = sadd.s32 1, %s6221_s26 }
   0xb   : > { %s174_s9 = ssub.s32 %s6225_s27, %s6319_s30  ;;  %p187_p0 = scmp.ne.s32.totalorder %s6221_s26, %s6217_s25 }
   0xc   : > { %p175_p1 = scmp.eq.s32.totalorder %s174_s9, 0  ;;  %p188_p2 = scmp.eq.s32.totalorder %s6315_s28, 1 }
   0xd   : > { %p193_p3 = scmp.ne.s32.totalorder %s6217_s25, %s6213_s24  ;;  %p194_p4 = scmp.eq.s32.totalorder %s4410_s29, 1 }
   0xe   : > { %s6330_s10 = scalar_select %p175_p1, %s6221_s26, %s177_s8  }
   0xf   : > { %p6334_p5 = por %p188_p2, %p187_p0  ;;  %p6338_p6 = por %p194_p4, %p193_p3 }
  0x10   : > { %p4413_p7 = scmp.ge.s32.totalorder %s6225_s27, 1  ;;  %p274_p8 = scmp.lt.s32.totalorder %s6225_s27, 3 }
  0x12   : > { %p275_p9 = pnand %p4413_p7, %p274_p8 }
  0x14   : > { %278 = sbr.rel (%p275_p9) target bundleno = 1447 (0x5a7), region = 44 }
  0x1b   : > { %s6345_s13 = sand.u32 1, %s6217_s25   ;;  %p324_p10 = scmp.lt.s32.totalorder %s6315_s28, 1  ;;  %vm912_vm0 = vcmask 1043456   ;;  %vm6247_vm1 = vmmov 1   ;;  %vm887_vm3 = vcmask 359424  }
  0x1c   : > { %s10758_s0 = sld [smem:[#allocation759_spill]]  ;;  %s4414_s16 = sshll.u32 %s6345_s13, 8  ;;  %vm6534_vm2 = vmpackc.low %vm912_vm0, %vm6247_vm1 }
  0x1d   : > { %s4415_s17 = sshll.u32 %s6345_s13, 5  ;;  %s10759_s2 = sld [smem:[#allocation761_spill]] }
  0x1e   : > { %s6354_s18 = scalar_select %p324_p10, %s6315_s28, 1 }
  0x1f   : > { %s10769_s1 = sld [smem:[#allocation760_spill]] }
  0x20   : > { %s5954_s19 = smul.u32 3648, %s6354_s18 }
  0x21   : > { %s5956_s20 = smul.u32 12, %s6354_s18 }
  0x22   : > { %v344_v0 = vld [vmem:[%s10758_s0 + $0x8] sm:$0xff]  ;;  %s5955_s15 = smul.u32 6144, %s6354_s18 }
  0x23   : > { %1013 = vmatprep.mubr.f32.mxu0 %v344_v0  ;;  %1239 = vmatprep.mubr.f32.mxu1 %v344_v0  ;;  %s6360_s22 = scalar_lea.vmem %s10759_s2, %s5954_s19  ;;  %s7203_s9 = scalar_lea.vmem %s10729_s4, %s5956_s20 }
  0x24   : > { %v368_v1 = vld [vmem:[%s6360_s22 + $0x8] sm:$0xff]  ;;  %v370_v3 = vld [vmem:[%s6360_s22 + $0x18] sm:$0xff]  ;;  %v367_v6 = vld [vmem:[%s6360_s22] sm:$0xff]  ;;  %s7329_s23 = scalar_lea.vmem %s10728_s3, %s5955_s15  ;;  %s9742_s15 = smov 0  }
  0x25   : > { %v380_v2 = vld [vmem:[%s6360_s22 + $0x68] sm:$0xff]  ;;  %v382_v5 = vld [vmem:[%s6360_s22 + $0x78] sm:$0xff]  ;;  %v379_v7 = vld [vmem:[%s6360_s22 + $0x60] sm:$0xff] }
  0x26   : > { %v4502_v4 = vpack.c.bf16 %v380_v2, %v368_v1  ;;  %v4580_v8 = vpack.c.bf16 %v382_v5, %v370_v3  ;;  %v4504_v9 = vpack.c.bf16 %v379_v7, %v367_v6  ;;  %v369_v10 = vld [vmem:[%s6360_s22 + $0x10] sm:$0xff]  ;;  %v392_v12 = vld [vmem:[%s6360_s22 + $0xc8] sm:$0xff]  ;;  %v394_v15 = vld [vmem:[%s6360_s22 + $0xd8] sm:$0xff] }
  0x27   : > { %v381_v11 = vld [vmem:[%s6360_s22 + $0x70] sm:$0xff]  ;;  %v404_v14 = vld [vmem:[%s6360_s22 + $0x128] sm:$0xff]  ;;  %v406_v16 = vld [vmem:[%s6360_s22 + $0x138] sm:$0xff] }
  0x28   : > { %4503 = vmatprep.subr.bf16.mxu0 %v4502_v4  ;;  %v4582_v13 = vpack.c.bf16 %v381_v11, %v369_v10  ;;  %4581 = vmatprep.subr.bf16.mxu1 %v4580_v8  ;;  %v4506_v17 = vpack.c.bf16 %v404_v14, %v392_v12  ;;  %v4584_v18 = vpack.c.bf16 %v406_v16, %v394_v15  ;;  %v391_v19 = vld [vmem:[%s6360_s22 + $0xc0] sm:$0xff]  ;;  %v393_v21 = vld [vmem:[%s6360_s22 + $0xd0] sm:$0xff]  ;;  %v416_v24 = vld [vmem:[%s6360_s22 + $0x188] sm:$0xff] }
  0x29   : > { %4505 = vmatpush1.bf16.msra.mxu0 %v4504_v9  ;;  %v403_v20 = vld [vmem:[%s6360_s22 + $0x120] sm:$0xff]  ;;  %v405_v23 = vld [vmem:[%s6360_s22 + $0x130] sm:$0xff]  ;;  %v428_v25 = vld [vmem:[%s6360_s22 + $0x1e8] sm:$0xff] }
  0x2a   : > { %4583 = vmatpush1.bf16.msra.mxu1 %v4582_v13  ;;  %v4508_v22 = vpack.c.bf16 %v403_v20, %v391_v19  ;;  %4507 = vmatprep.subr.bf16.mxu0 %v4506_v17  ;;  %v4586_v26 = vpack.c.bf16 %v405_v23, %v393_v21  ;;  %v4510_v27 = vpack.c.bf16 %v428_v25, %v416_v24  ;;  %v418_v28 = vld [vmem:[%s6360_s22 + $0x198] sm:$0xff]  ;;  %v415_v30 = vld [vmem:[%s6360_s22 + $0x180] sm:$0xff]  ;;  %v417_v33 = vld [vmem:[%s6360_s22 + $0x190] sm:$0xff] }
  0x2b   : > { %4585 = vmatprep.subr.bf16.mxu1 %v4584_v18  ;;  %v430_v29 = vld [vmem:[%s6360_s22 + $0x1f8] sm:$0xff]  ;;  %v427_v32 = vld [vmem:[%s6360_s22 + $0x1e0] sm:$0xff]  ;;  %v429_v34 = vld [vmem:[%s6360_s22 + $0x1f0] sm:$0xff] }
  0x2c   : > { %v4588_v31 = vpack.c.bf16 %v430_v29, %v418_v28  ;;  %v4512_v35 = vpack.c.bf16 %v427_v32, %v415_v30  ;;  %v440_v36 = vld [vmem:[%s6360_s22 + $0x248] sm:$0xff]  ;;  %v442_v38 = vld [vmem:[%s6360_s22 + $0x258] sm:$0xff]  ;;  %v4590_v39 = vpack.c.bf16 %v429_v34, %v417_v33  ;;  %v439_v42 = vld [vmem:[%s6360_s22 + $0x240] sm:$0xff] }
  0x2d   : > { %4509 = vmatpush1.bf16.msra.mxu0 %v4508_v22  ;;  %v452_v37 = vld [vmem:[%s6360_s22 + $0x2a8] sm:$0xff]  ;;  %v454_v41 = vld [vmem:[%s6360_s22 + $0x2b8] sm:$0xff]  ;;  %v451_v43 = vld [vmem:[%s6360_s22 + $0x2a0] sm:$0xff] }
  0x2e   : > { %4587 = vmatpush1.bf16.msra.mxu1 %v4586_v26  ;;  %4511 = vmatprep.subr.bf16.mxu0 %v4510_v27  ;;  %v4514_v40 = vpack.c.bf16 %v452_v37, %v440_v36  ;;  %v4592_v44 = vpack.c.bf16 %v454_v41, %v442_v38  ;;  %v441_v45 = vld [vmem:[%s6360_s22 + $0x250] sm:$0xff]  ;;  %v464_v47 = vld [vmem:[%s6360_s22 + $0x308] sm:$0xff]  ;;  %v466_v49 = vld [vmem:[%s6360_s22 + $0x318] sm:$0xff]  ;;  %v4516_v51 = vpack.c.bf16 %v451_v43, %v439_v42 }
  0x2f   : > { %4589 = vmatprep.subr.bf16.mxu1 %v4588_v31  ;;  %v453_v46 = vld [vmem:[%s6360_s22 + $0x2b0] sm:$0xff]  ;;  %v476_v48 = vld [vmem:[%s6360_s22 + $0x368] sm:$0xff]  ;;  %v478_v50 = vld [vmem:[%s6360_s22 + $0x378] sm:$0xff] }
  0x30   : > { %v4594_v52 = vpack.c.bf16 %v453_v46, %v441_v45  ;;  %v4518_v53 = vpack.c.bf16 %v476_v48, %v464_v47  ;;  %v463_v54 = vld [vmem:[%s6360_s22 + $0x300] sm:$0xff]  ;;  %v465_v56 = vld [vmem:[%s6360_s22 + $0x310] sm:$0xff]  ;;  %v4596_v57 = vpack.c.bf16 %v478_v50, %v466_v49  ;;  %v488_v59 = vld [vmem:[%s6360_s22 + $0x3c8] sm:$0xff] }
  0x31   : > { %4513 = vmatpush1.bf16.msra.mxu0 %v4512_v35  ;;  %v475_v55 = vld [vmem:[%s6360_s22 + $0x360] sm:$0xff]  ;;  %v477_v58 = vld [vmem:[%s6360_s22 + $0x370] sm:$0xff]  ;;  %v500_v60 = vld [vmem:[%s6360_s22 + $0x428] sm:$0xff] }
  0x32   : > { %4591 = vmatpush1.bf16.msra.mxu1 %v4590_v39  ;;  %4515 = vmatprep.subr.bf16.mxu0 %v4514_v40  ;;  %v490_v61 = vld [vmem:[%s6360_s22 + $0x3d8] sm:$0xff]  ;;  %v4520_v63 = vpack.c.bf16 %v475_v55, %v463_v54  ;;  %v4598_v0 = vpack.c.bf16 %v477_v58, %v465_v56  ;;  %v4522_v1 = vpack.c.bf16 %v500_v60, %v488_v59  ;;  %v487_v2 = vld [vmem:[%s6360_s22 + $0x3c0] sm:$0xff]  ;;  %v489_v4 = vld [vmem:[%s6360_s22 + $0x3d0] sm:$0xff] }
  0x33   : > { %4593 = vmatprep.subr.bf16.mxu1 %v4592_v44  ;;  %v502_v62 = vld [vmem:[%s6360_s22 + $0x438] sm:$0xff]  ;;  %v499_v3 = vld [vmem:[%s6360_s22 + $0x420] sm:$0xff]  ;;  %v501_v6 = vld [vmem:[%s6360_s22 + $0x430] sm:$0xff] }
  0x34   : > { %v4600_v5 = vpack.c.bf16 %v502_v62, %v490_v61  ;;  %v512_v7 = vld [vmem:[%s6360_s22 + $0x488] sm:$0xff]  ;;  %v514_v9 = vld [vmem:[%s6360_s22 + $0x498] sm:$0xff]  ;;  %v4524_v11 = vpack.c.bf16 %v499_v3, %v487_v2  ;;  %v4602_v12 = vpack.c.bf16 %v501_v6, %v489_v4  ;;  %v511_v14 = vld [vmem:[%s6360_s22 + $0x480] sm:$0xff] }
  0x35   : > { %4517 = vmatpush1.bf16.msra.mxu0 %v4516_v51  ;;  %v524_v8 = vld [vmem:[%s6360_s22 + $0x4e8] sm:$0xff]  ;;  %v526_v10 = vld [vmem:[%s6360_s22 + $0x4f8] sm:$0xff]  ;;  %v523_v15 = vld [vmem:[%s6360_s22 + $0x4e0] sm:$0xff] }
  0x36   : > { %4595 = vmatpush1.bf16.msra.mxu1 %v4594_v52  ;;  %4519 = vmatprep.subr.bf16.mxu0 %v4518_v53  ;;  %v4526_v13 = vpack.c.bf16 %v524_v8, %v512_v7  ;;  %v513_v16 = vld [vmem:[%s6360_s22 + $0x490] sm:$0xff]  ;;  %v4604_v17 = vpack.c.bf16 %v526_v10, %v514_v9  ;;  %v536_v19 = vld [vmem:[%s6360_s22 + $0x548] sm:$0xff]  ;;  %v538_v21 = vld [vmem:[%s6360_s22 + $0x558] sm:$0xff]  ;;  %v4528_v23 = vpack.c.bf16 %v523_v15, %v511_v14 }
  0x37   : > { %4597 = vmatprep.subr.bf16.mxu1 %v4596_v57  ;;  %v525_v18 = vld [vmem:[%s6360_s22 + $0x4f0] sm:$0xff]  ;;  %v548_v20 = vld [vmem:[%s6360_s22 + $0x5a8] sm:$0xff]  ;;  %v550_v22 = vld [vmem:[%s6360_s22 + $0x5b8] sm:$0xff] }
  0x38   : > { %v4606_v24 = vpack.c.bf16 %v525_v18, %v513_v16  ;;  %v4530_v25 = vpack.c.bf16 %v548_v20, %v536_v19  ;;  %v535_v26 = vld [vmem:[%s6360_s22 + $0x540] sm:$0xff]  ;;  %v537_v28 = vld [vmem:[%s6360_s22 + $0x550] sm:$0xff]  ;;  %v4608_v29 = vpack.c.bf16 %v550_v22, %v538_v21  ;;  %v560_v31 = vld [vmem:[%s6360_s22 + $0x608] sm:$0xff] }
  0x39   : > { %4521 = vmatpush1.bf16.msra.mxu0 %v4520_v63  ;;  %v547_v27 = vld [vmem:[%s6360_s22 + $0x5a0] sm:$0xff]  ;;  %v549_v30 = vld [vmem:[%s6360_s22 + $0x5b0] sm:$0xff]  ;;  %v572_v32 = vld [vmem:[%s6360_s22 + $0x668] sm:$0xff] }
  0x3a   : > { %4599 = vmatpush1.bf16.msra.mxu1 %v4598_v0  ;;  %4523 = vmatprep.subr.bf16.mxu0 %v4522_v1  ;;  %v562_v33 = vld [vmem:[%s6360_s22 + $0x618] sm:$0xff]  ;;  %v4532_v35 = vpack.c.bf16 %v547_v27, %v535_v26  ;;  %v4610_v36 = vpack.c.bf16 %v549_v30, %v537_v28  ;;  %v4534_v37 = vpack.c.bf16 %v572_v32, %v560_v31  ;;  %v559_v38 = vld [vmem:[%s6360_s22 + $0x600] sm:$0xff]  ;;  %v561_v40 = vld [vmem:[%s6360_s22 + $0x610] sm:$0xff] }
  0x3b   : > { %4601 = vmatprep.subr.bf16.mxu1 %v4600_v5  ;;  %v574_v34 = vld [vmem:[%s6360_s22 + $0x678] sm:$0xff]  ;;  %v571_v39 = vld [vmem:[%s6360_s22 + $0x660] sm:$0xff]  ;;  %v573_v42 = vld [vmem:[%s6360_s22 + $0x670] sm:$0xff] }
  0x3c   : > { %v4612_v41 = vpack.c.bf16 %v574_v34, %v562_v33  ;;  %v584_v43 = vld [vmem:[%s6360_s22 + $0x6c8] sm:$0xff]  ;;  %v586_v45 = vld [vmem:[%s6360_s22 + $0x6d8] sm:$0xff]  ;;  %v4536_v47 = vpack.c.bf16 %v571_v39, %v559_v38  ;;  %v4614_v48 = vpack.c.bf16 %v573_v42, %v561_v40  ;;  %v583_v50 = vld [vmem:[%s6360_s22 + $0x6c0] sm:$0xff] }
  0x3d   : > { %4525 = vmatpush1.bf16.msra.mxu0 %v4524_v11  ;;  %v596_v44 = vld [vmem:[%s6360_s22 + $0x728] sm:$0xff]  ;;  %v598_v46 = vld [vmem:[%s6360_s22 + $0x738] sm:$0xff]  ;;  %v595_v51 = vld [vmem:[%s6360_s22 + $0x720] sm:$0xff] }
  0x3e   : > { %4603 = vmatpush1.bf16.msra.mxu1 %v4602_v12  ;;  %4527 = vmatprep.subr.bf16.mxu0 %v4526_v13  ;;  %v4538_v49 = vpack.c.bf16 %v596_v44, %v584_v43  ;;  %v585_v52 = vld [vmem:[%s6360_s22 + $0x6d0] sm:$0xff]  ;;  %v4616_v53 = vpack.c.bf16 %v598_v46, %v586_v45  ;;  %v608_v55 = vld [vmem:[%s6360_s22 + $0x788] sm:$0xff]  ;;  %v610_v57 = vld [vmem:[%s6360_s22 + $0x798] sm:$0xff]  ;;  %v4540_v59 = vpack.c.bf16 %v595_v51, %v583_v50 }
  0x3f   : > { %4605 = vmatprep.subr.bf16.mxu1 %v4604_v17  ;;  %v597_v54 = vld [vmem:[%s6360_s22 + $0x730] sm:$0xff]  ;;  %v620_v56 = vld [vmem:[%s6360_s22 + $0x7e8] sm:$0xff]  ;;  %v622_v58 = vld [vmem:[%s6360_s22 + $0x7f8] sm:$0xff] }
  0x40   : > { %v4618_v60 = vpack.c.bf16 %v597_v54, %v585_v52  ;;  %v4542_v61 = vpack.c.bf16 %v620_v56, %v608_v55  ;;  %v607_v62 = vld [vmem:[%s6360_s22 + $0x780] sm:$0xff]  ;;  %v609_v0 = vld [vmem:[%s6360_s22 + $0x790] sm:$0xff]  ;;  %v4620_v1 = vpack.c.bf16 %v622_v58, %v610_v57  ;;  %v632_v3 = vld [vmem:[%s6360_s22 + $0x848] sm:$0xff] }
  0x41   : > { %4529 = vmatpush1.bf16.msra.mxu0 %v4528_v23  ;;  %v619_v63 = vld [vmem:[%s6360_s22 + $0x7e0] sm:$0xff]  ;;  %v621_v2 = vld [vmem:[%s6360_s22 + $0x7f0] sm:$0xff]  ;;  %v644_v4 = vld [vmem:[%s6360_s22 + $0x8a8] sm:$0xff] }
  0x42   : > { %4607 = vmatpush1.bf16.msra.mxu1 %v4606_v24  ;;  %4531 = vmatprep.subr.bf16.mxu0 %v4530_v25  ;;  %v634_v5 = vld [vmem:[%s6360_s22 + $0x858] sm:$0xff]  ;;  %v4544_v7 = vpack.c.bf16 %v619_v63, %v607_v62  ;;  %v4622_v8 = vpack.c.bf16 %v621_v2, %v609_v0  ;;  %v4546_v9 = vpack.c.bf16 %v644_v4, %v632_v3  ;;  %v631_v10 = vld [vmem:[%s6360_s22 + $0x840] sm:$0xff]  ;;  %v633_v12 = vld [vmem:[%s6360_s22 + $0x850] sm:$0xff] }
  0x43   : > { %4609 = vmatprep.subr.bf16.mxu1 %v4608_v29  ;;  %v646_v6 = vld [vmem:[%s6360_s22 + $0x8b8] sm:$0xff]  ;;  %v643_v11 = vld [vmem:[%s6360_s22 + $0x8a0] sm:$0xff]  ;;  %v645_v14 = vld [vmem:[%s6360_s22 + $0x8b0] sm:$0xff] }
  0x44   : > { %v4624_v13 = vpack.c.bf16 %v646_v6, %v634_v5  ;;  %v656_v15 = vld [vmem:[%s6360_s22 + $0x908] sm:$0xff]  ;;  %v658_v17 = vld [vmem:[%s6360_s22 + $0x918] sm:$0xff]  ;;  %v4548_v19 = vpack.c.bf16 %v643_v11, %v631_v10  ;;  %v4626_v20 = vpack.c.bf16 %v645_v14, %v633_v12  ;;  %v655_v22 = vld [vmem:[%s6360_s22 + $0x900] sm:$0xff] }
  0x45   : > { %4533 = vmatpush1.bf16.msra.mxu0 %v4532_v35  ;;  %v668_v16 = vld [vmem:[%s6360_s22 + $0x968] sm:$0xff]  ;;  %v670_v18 = vld [vmem:[%s6360_s22 + $0x978] sm:$0xff]  ;;  %v667_v23 = vld [vmem:[%s6360_s22 + $0x960] sm:$0xff] }
  0x46   : > { %4611 = vmatpush1.bf16.msra.mxu1 %v4610_v36  ;;  %4535 = vmatprep.subr.bf16.mxu0 %v4534_v37  ;;  %v4550_v21 = vpack.c.bf16 %v668_v16, %v656_v15  ;;  %v657_v24 = vld [vmem:[%s6360_s22 + $0x910] sm:$0xff]  ;;  %v4628_v25 = vpack.c.bf16 %v670_v18, %v658_v17  ;;  %v680_v27 = vld [vmem:[%s6360_s22 + $0x9c8] sm:$0xff]  ;;  %v682_v29 = vld [vmem:[%s6360_s22 + $0x9d8] sm:$0xff]  ;;  %v4552_v31 = vpack.c.bf16 %v667_v23, %v655_v22 }
  0x47   : > { %4613 = vmatprep.subr.bf16.mxu1 %v4612_v41  ;;  %v669_v26 = vld [vmem:[%s6360_s22 + $0x970] sm:$0xff]  ;;  %v692_v28 = vld [vmem:[%s6360_s22 + $0xa28] sm:$0xff]  ;;  %v694_v30 = vld [vmem:[%s6360_s22 + $0xa38] sm:$0xff] }
  0x48   : > { %v4630_v32 = vpack.c.bf16 %v669_v26, %v657_v24  ;;  %v4554_v33 = vpack.c.bf16 %v692_v28, %v680_v27  ;;  %v679_v34 = vld [vmem:[%s6360_s22 + $0x9c0] sm:$0xff]  ;;  %v681_v36 = vld [vmem:[%s6360_s22 + $0x9d0] sm:$0xff]  ;;  %v4632_v37 = vpack.c.bf16 %v694_v30, %v682_v29  ;;  %v704_v39 = vld [vmem:[%s6360_s22 + $0xa88] sm:$0xff] }
  0x49   : > { %4537 = vmatpush1.bf16.msra.mxu0 %v4536_v47  ;;  %v691_v35 = vld [vmem:[%s6360_s22 + $0xa20] sm:$0xff]  ;;  %v693_v38 = vld [vmem:[%s6360_s22 + $0xa30] sm:$0xff]  ;;  %v716_v40 = vld [vmem:[%s6360_s22 + $0xae8] sm:$0xff] }
  0x4a   : > { %4615 = vmatpush1.bf16.msra.mxu1 %v4614_v48  ;;  %4539 = vmatprep.subr.bf16.mxu0 %v4538_v49  ;;  %v706_v41 = vld [vmem:[%s6360_s22 + $0xa98] sm:$0xff]  ;;  %v4556_v43 = vpack.c.bf16 %v691_v35, %v679_v34  ;;  %v4634_v44 = vpack.c.bf16 %v693_v38, %v681_v36  ;;  %v4558_v45 = vpack.c.bf16 %v716_v40, %v704_v39  ;;  %v703_v46 = vld [vmem:[%s6360_s22 + $0xa80] sm:$0xff]  ;;  %v705_v48 = vld [vmem:[%s6360_s22 + $0xa90] sm:$0xff] }
  0x4b   : > { %4617 = vmatprep.subr.bf16.mxu1 %v4616_v53  ;;  %v718_v42 = vld [vmem:[%s6360_s22 + $0xaf8] sm:$0xff]  ;;  %v715_v47 = vld [vmem:[%s6360_s22 + $0xae0] sm:$0xff]  ;;  %v717_v50 = vld [vmem:[%s6360_s22 + $0xaf0] sm:$0xff] }
  0x4c   : > { %v4636_v49 = vpack.c.bf16 %v718_v42, %v706_v41  ;;  %v728_v51 = vld [vmem:[%s6360_s22 + $0xb48] sm:$0xff]  ;;  %v730_v53 = vld [vmem:[%s6360_s22 + $0xb58] sm:$0xff]  ;;  %v4560_v55 = vpack.c.bf16 %v715_v47, %v703_v46  ;;  %v4638_v56 = vpack.c.bf16 %v717_v50, %v705_v48  ;;  %v727_v58 = vld [vmem:[%s6360_s22 + $0xb40] sm:$0xff] }
  0x4d   : > { %4541 = vmatpush1.bf16.msra.mxu0 %v4540_v59  ;;  %v740_v52 = vld [vmem:[%s6360_s22 + $0xba8] sm:$0xff]  ;;  %v742_v54 = vld [vmem:[%s6360_s22 + $0xbb8] sm:$0xff]  ;;  %v739_v59 = vld [vmem:[%s6360_s22 + $0xba0] sm:$0xff] }
  0x4e   : > { %4619 = vmatpush1.bf16.msra.mxu1 %v4618_v60  ;;  %4543 = vmatprep.subr.bf16.mxu0 %v4542_v61  ;;  %v4562_v57 = vpack.c.bf16 %v740_v52, %v728_v51  ;;  %v729_v60 = vld [vmem:[%s6360_s22 + $0xb50] sm:$0xff]  ;;  %v4640_v61 = vpack.c.bf16 %v742_v54, %v730_v53  ;;  %v752_v63 = vld [vmem:[%s6360_s22 + $0xc08] sm:$0xff]  ;;  %v766_v2 = vld [vmem:[%s6360_s22 + $0xc78] sm:$0xff]  ;;  %v4564_v3 = vpack.c.bf16 %v739_v59, %v727_v58 }
  0x4f   : > { %4621 = vmatprep.subr.bf16.mxu1 %v4620_v1  ;;  %v741_v62 = vld [vmem:[%s6360_s22 + $0xbb0] sm:$0xff]  ;;  %v764_v0 = vld [vmem:[%s6360_s22 + $0xc68] sm:$0xff]  ;;  %v754_v1 = vld [vmem:[%s6360_s22 + $0xc18] sm:$0xff] }
  0x50   : > { %v4642_v4 = vpack.c.bf16 %v741_v62, %v729_v60  ;;  %v4566_v5 = vpack.c.bf16 %v764_v0, %v752_v63  ;;  %v751_v6 = vld [vmem:[%s6360_s22 + $0xc00] sm:$0xff]  ;;  %v765_v10 = vld [vmem:[%s6360_s22 + $0xc70] sm:$0xff]  ;;  %v776_v11 = vld [vmem:[%s6360_s22 + $0xcc8] sm:$0xff] }
  0x51   : > { %4545 = vmatpush1.bf16.msra.mxu0 %v4544_v7  ;;  %v763_v7 = vld [vmem:[%s6360_s22 + $0xc60] sm:$0xff]  ;;  %v788_v12 = vld [vmem:[%s6360_s22 + $0xd28] sm:$0xff]  ;;  %v778_v15 = vld [vmem:[%s6360_s22 + $0xcd8] sm:$0xff] }
  0x52   : > { %4623 = vmatpush1.bf16.msra.mxu1 %v4622_v8  ;;  %4547 = vmatprep.subr.bf16.mxu0 %v4546_v9  ;;  %v4644_v8 = vpack.c.bf16 %v766_v2, %v754_v1  ;;  %v753_v9 = vld [vmem:[%s6360_s22 + $0xc10] sm:$0xff]  ;;  %v4568_v14 = vpack.c.bf16 %v763_v7, %v751_v6  ;;  %v790_v16 = vld [vmem:[%s6360_s22 + $0xd38] sm:$0xff]  ;;  %v6510_v18 = vld [vmem:[%s10758_s0 + $0x20] sm:$0xff]  ;;  %v6248_v1 = vmov 0.0  }
  0x53   : > { %4625 = vmatprep.subr.bf16.mxu1 %v4624_v13  ;;  %v6503_v13 = vld [vmem:[%s10758_s0] sm:$0xff]  ;;  %v4646_v17 = vpack.c.bf16 %v765_v10, %v753_v9  ;;  %v777_v22 = vld [vmem:[%s6360_s22 + $0xcd0] sm:$0xff]  ;;  %v4648_v23 = vpack.c.bf16 %v790_v16, %v778_v15  ;;  %v812_v26 = vld [vmem:[%s6360_s22 + $0xde8] sm:$0xf] }
  0x54   : > { %v789_v24 = vld [vmem:[%s6360_s22 + $0xd30] sm:$0xff]  ;;  %v6523_v27 = vld [vmem:[%s10758_s0 + $0x18] sm:$0xff]  ;;  %v799_v35 = vld [vmem:[%s6360_s22 + $0xd80] sm:$0xff] }
  0x55   : > { %4549 = vmatpush1.bf16.msra.mxu0 %v4548_v19  ;;  %v4570_v19 = vpack.c.bf16 %v788_v12, %v776_v11  ;;  %v802_v28 = vld [vmem:[%s6360_s22 + $0xd98] sm:$0xff]  ;;  %v811_v36 = vld [vmem:[%s6360_s22 + $0xde0] sm:$0xf]  ;;  %v813_v39 = vld [vmem:[%s6360_s22 + $0xdf0] sm:$0xf] }
  0x56   : > { %4627 = vmatpush1.bf16.msra.mxu1 %v4626_v20  ;;  %4551 = vmatprep.subr.bf16.mxu0 %v4550_v21  ;;  %v775_v20 = vld [vmem:[%s6360_s22 + $0xcc0] sm:$0xff]  ;;  %v814_v29 = vld [vmem:[%s6360_s22 + $0xdf8] sm:$0xf]  ;;  %v372_v40 = vld [vmem:[%s6360_s22 + $0x28] sm:$0xff]  ;;  %v4577_v46 = vpack.c.bf16 %v811_v36, %v799_v35 }
  0x57   : > { %4629 = vmatprep.subr.bf16.mxu1 %v4628_v25  ;;  %v787_v21 = vld [vmem:[%s6360_s22 + $0xd20] sm:$0xff]  ;;  %v800_v25 = vld [vmem:[%s6360_s22 + $0xd88] sm:$0xff]  ;;  %v6531_v30 = vld [vmem:[%s10758_s0 + $0x38] sm:$0xff]  ;;  %v4652_v38 = vpack.c.bf16 %v814_v29, %v802_v28 }
  0x58   : > { %v4574_v34 = vpack.c.bf16 %v812_v26, %v800_v25  ;;  %v384_v41 = vld [vmem:[%s6360_s22 + $0x88] sm:$0xff]  ;;  %v6551_v42 = vld [vmem:[%s10758_s0 + $0x30] sm:$0xff]  ;;  %v6589_v52 = vld [vmem:[%s10758_s0 + $0x60] sm:$0xff] }
  0x59   : > { %4553 = vmatpush1.bf16.msra.mxu0 %v4552_v31  ;;  %v4572_v31 = vpack.c.bf16 %v787_v21, %v775_v20  ;;  %v4658_v48 = vpack.c.bf16 %v384_v41, %v372_v40  ;;  %v6571_v50 = vld [vmem:[%s10758_s0 + $0x48] sm:$0xff]  ;;  %v6595_v53 = vld [vmem:[%s10758_s0 + $0x80] sm:$0xff]  ;;  %v6603_v54 = vld [vmem:[%s10758_s0 + $0x78] sm:$0xff] }
  0x5a   : > { %4631 = vmatpush1.bf16.msra.mxu1 %v4630_v32  ;;  %4555 = vmatprep.subr.bf16.mxu0 %v4554_v33  ;;  %v4650_v33 = vpack.c.bf16 %v789_v24, %v777_v22  ;;  %v6577_v51 = vld [vmem:[%s10758_s0 + $0x68] sm:$0xff]  ;;  %v371_v59 = vld [vmem:[%s6360_s22 + $0x20] sm:$0xff]  ;;  %v385_v62 = vld [vmem:[%s6360_s22 + $0x90] sm:$0xff] }
  0x5b   : > { %4633 = vmatprep.subr.bf16.mxu1 %v4632_v37  ;;  %v801_v37 = vld [vmem:[%s6360_s22 + $0xd90] sm:$0xff]  ;;  %v6631_v58 = vld [vmem:[%s10758_s0 + $0xa8] sm:$0xff]  ;;  %v383_v60 = vld [vmem:[%s6360_s22 + $0x80] sm:$0xff] }
  0x5c   : > { %v4655_v47 = vpack.c.bf16 %v813_v39, %v801_v37  ;;  %v396_v63 = vld [vmem:[%s6360_s22 + $0xe8] sm:$0xff]  ;;  %v6646_v2 = vld [vmem:[%s10758_s0 + $0x10] sm:$0xff]  ;;  %v395_v7 = vld [vmem:[%s6360_s22 + $0xe0] sm:$0xff] }
  0x5d   : > { %4557 = vmatpush1.bf16.msra.mxu0 %v4556_v43  ;;  %v374_v43 = vld [vmem:[%s6360_s22 + $0x38] sm:$0xff]  ;;  %v408_v0 = vld [vmem:[%s6360_s22 + $0x148] sm:$0xff]  ;;  %v397_v10 = vld [vmem:[%s6360_s22 + $0xf0] sm:$0xff] }
  0x5e   : > { %4635 = vmatpush1.bf16.msra.mxu1 %v4634_v44  ;;  %4559 = vmatprep.subr.bf16.mxu0 %v4558_v45  ;;  %v386_v44 = vld [vmem:[%s6360_s22 + $0x98] sm:$0xff]  ;;  %v6559_v45 = vld [vmem:[%s10758_s0 + $0x50] sm:$0xff]  ;;  %v4662_v9 = vpack.c.bf16 %v408_v0, %v396_v63  ;;  %v432_v15 = vld [vmem:[%s6360_s22 + $0x208] sm:$0xff] }
  0x5f   : > { %4637 = vmatprep.subr.bf16.mxu1 %v4636_v49  ;;  %v4736_v49 = vpack.c.bf16 %v386_v44, %v374_v43  ;;  %v409_v11 = vld [vmem:[%s6360_s22 + $0x150] sm:$0xff]  ;;  %v6664_v16 = vld [vmem:[%s10758_s0 + $0x28] sm:$0xff]  ;;  %v434_v20 = vld [vmem:[%s6360_s22 + $0x218] sm:$0xff] }
  0x60   : > { %v4742_v21 = vpack.c.bf16 %v409_v11, %v397_v10  ;;  %v419_v22 = vld [vmem:[%s6360_s22 + $0x1a0] sm:$0xff]  ;;  %v421_v25 = vld [vmem:[%s6360_s22 + $0x1b0] sm:$0xff]  ;;  %v444_v29 = vld [vmem:[%s6360_s22 + $0x268] sm:$0xff] }
  0x61   : > { %4561 = vmatpush1.bf16.msra.mxu0 %v4560_v55  ;;  %v6609_v55 = vld [vmem:[%s10758_s0 + $0x98] sm:$0xff]  ;;  %v433_v26 = vld [vmem:[%s6360_s22 + $0x210] sm:$0xff]  ;;  %v455_v39 = vld [vmem:[%s6360_s22 + $0x2c0] sm:$0xff] }
  0x62   : > { %4639 = vmatpush1.bf16.msra.mxu1 %v4638_v56  ;;  %4563 = vmatprep.subr.bf16.mxu0 %v4562_v57  ;;  %v6617_v56 = vld [vmem:[%s10758_s0 + $0x90] sm:$0xff]  ;;  %v446_v35 = vld [vmem:[%s6360_s22 + $0x278] sm:$0xff]  ;;  %v4746_v37 = vpack.c.bf16 %v433_v26, %v421_v25  ;;  %v479_v63 = vld [vmem:[%s6360_s22 + $0x380] sm:$0xff] }
  0x63   : > { %4641 = vmatprep.subr.bf16.mxu1 %v4640_v61  ;;  %v6623_v57 = vld [vmem:[%s10758_s0 + $0xb0] sm:$0xff]  ;;  %v458_v36 = vld [vmem:[%s6360_s22 + $0x2d8] sm:$0xff]  ;;  %v6056_v32 = vld [vmem:[%s10758_s0 + $0x80] sm:$0xff] }
  0x64   : > { %v373_v61 = vld [vmem:[%s6360_s22 + $0x30] sm:$0xff]  ;;  %v4748_v44 = vpack.c.bf16 %v458_v36, %v446_v35  ;;  %v494_v10 = vld [vmem:[%s6360_s22 + $0x3f8] sm:$0xff] }
  0x65   : > { %4565 = vmatpush1.bf16.msra.mxu0 %v4564_v3  ;;  %v4660_v3 = vpack.c.bf16 %v383_v60, %v371_v59  ;;  %v4738_v6 = vpack.c.bf16 %v385_v62, %v373_v61  ;;  %v445_v41 = vld [vmem:[%s6360_s22 + $0x270] sm:$0xff]  ;;  %v470_v59 = vld [vmem:[%s6360_s22 + $0x338] sm:$0xff]  ;;  %v467_v62 = vld [vmem:[%s6360_s22 + $0x320] sm:$0xff] }
  0x66   : > { %4643 = vmatpush1.bf16.msra.mxu1 %v4642_v4  ;;  %4567 = vmatprep.subr.bf16.mxu0 %v4566_v5  ;;  %v398_v4 = vld [vmem:[%s6360_s22 + $0xf8] sm:$0xff]  ;;  %v457_v43 = vld [vmem:[%s6360_s22 + $0x2d0] sm:$0xff] }
  0x67   : > { %4645 = vmatprep.subr.bf16.mxu1 %v4644_v8  ;;  %v410_v5 = vld [vmem:[%s6360_s22 + $0x158] sm:$0xff]  ;;  %v407_v8 = vld [vmem:[%s6360_s22 + $0x140] sm:$0xff]  ;;  %v4750_v61 = vpack.c.bf16 %v457_v43, %v445_v41  ;;  %v517_v36 = vld [vmem:[%s6360_s22 + $0x4b0] sm:$0xff] }
  0x68   : > { %1014 = vmatmul.mubr.f32.vlgmr.msra.gmra.mrb[0].mxu0 %v6503_v13  ;;  %v4740_v12 = vpack.c.bf16 %v410_v5, %v398_v4  ;;  %v482_v60 = vld [vmem:[%s6360_s22 + $0x398] sm:$0xff]  ;;  %v481_v4 = vld [vmem:[%s6360_s22 + $0x390] sm:$0xff]  ;;  %v6759_v41 = vld [vmem:[%s10758_s0 + $0xa0] sm:$0xff] }
  0x69   : > { %1240 = vmatmul.mubr.f32.vlgmr.msra.gmra.mrb[0].mxu1 %v6503_v13  ;;  %4569 = vmatpush1.bf16.msra.mxu0 %v4568_v14  ;;  %v420_v14 = vld [vmem:[%s6360_s22 + $0x1a8] sm:$0xff]  ;;  %v4752_v5 = vpack.c.bf16 %v482_v60, %v470_v59  ;;  %v506_v11 = vld [vmem:[%s6360_s22 + $0x458] sm:$0xff]  ;;  %v551_v59 = vld [vmem:[%s6360_s22 + $0x5c0] sm:$0xff] }
  0x6a   : > { %4647 = vmatpush1.bf16.msra.mxu1 %v4646_v17  ;;  %1019 = vmatprep.mubr.f32.mxu0 %v6510_v18  ;;  %v4664_v17 = vpack.c.bf16 %v407_v8, %v395_v7  ;;  %v4666_v24 = vpack.c.bf16 %v432_v15, %v420_v14  ;;  %v504_v7 = vld [vmem:[%s6360_s22 + $0x448] sm:$0xff]  ;;  %v6721_v8 = vld [vmem:[%s10758_s0 + $0x70] sm:$0xff]  ;;  %v491_v14 = vld [vmem:[%s6360_s22 + $0x3e0] sm:$0xff] }
  0x6b   : > { %1245 = vmatprep.mubr.f32.mxu1 %v6510_v18  ;;  %4571 = vmatprep.subr.bf16.mxu0 %v4570_v19  ;;  %v422_v19 = vld [vmem:[%s6360_s22 + $0x1b8] sm:$0xff]  ;;  %v503_v15 = vld [vmem:[%s6360_s22 + $0x440] sm:$0xff]  ;;  %v541_v60 = vld [vmem:[%s6360_s22 + $0x570] sm:$0xff] }
  0x6c   : > { %1020 = vmatmul.mubr.f32.gmra.mrb[2].mxu0 %v6523_v27  ;;  %4649 = vmatprep.subr.bf16.mxu1 %v4648_v23  ;;  %v431_v23 = vld [vmem:[%s6360_s22 + $0x200] sm:$0xff]  ;;  %v4744_v28 = vpack.c.bf16 %v434_v20, %v422_v19  ;;  %v493_v19 = vld [vmem:[%s6360_s22 + $0x3f0] sm:$0xff]  ;;  %v4680_v25 = vpack.c.bf16 %v503_v15, %v491_v14  ;;  %v518_v26 = vld [vmem:[%s6360_s22 + $0x4b8] sm:$0xff] }
  0x6d   : > { %1246 = vmatmul.mubr.f32.gmra.mrb[2].mxu1 %v6523_v27  ;;  %1025 = vmatprep.mubr.f32.mxu0 %v6531_v30  ;;  %v505_v20 = vld [vmem:[%s6360_s22 + $0x450] sm:$0xff] }
  0x6e   : > { %1251 = vmatprep.mubr.f32.mxu1 %v6531_v30  ;;  %4573 = vmatpush1.bf16.msra.mxu0 %v4572_v31  ;;  %v456_v31 = vld [vmem:[%s6360_s22 + $0x2c8] sm:$0xff]  ;;  %v565_v14 = vld [vmem:[%s6360_s22 + $0x630] sm:$0xff] }
  0x6f   : > { %4651 = vmatpush1.bf16.msra.mxu1 %v4650_v33  ;;  %4576 = vmatprep.subr.msk.bf16.mxu0 %vm6534_vm2, %v4574_v34  ;;  %v6683_v33 = vld [vmem:[%s10758_s0 + $0x40] sm:$0xff]  ;;  %v4668_v34 = vpack.c.bf16 %v431_v23, %v419_v22  ;;  %v4670_v40 = vpack.c.bf16 %v456_v31, %v444_v29  ;;  %v516_v22 = vld [vmem:[%s6360_s22 + $0x4a8] sm:$0xff]  ;;  %v4758_v29 = vpack.c.bf16 %v505_v20, %v493_v19 }
  0x70   : > { %1026 = vmatmul.mubr.f32.gmra.mrb[4].mxu0 %v6551_v42  ;;  %4654 = vmatprep.subr.msk.bf16.mxu1 %vm6534_vm2, %v4652_v38  ;;  %v443_v38 = vld [vmem:[%s6360_s22 + $0x260] sm:$0xff]  ;;  %v528_v23 = vld [vmem:[%s6360_s22 + $0x508] sm:$0xff] }
  0x71   : > { %1252 = vmatmul.mubr.f32.gmra.mrb[4].mxu1 %v6551_v42  ;;  %1031 = vmatprep.mubr.f32.mxu0 %v6559_v45  ;;  %v515_v31 = vld [vmem:[%s6360_s22 + $0x4a0] sm:$0xff]  ;;  %v4682_v35 = vpack.c.bf16 %v528_v23, %v516_v22  ;;  %v588_v19 = vld [vmem:[%s6360_s22 + $0x6e8] sm:$0xff]  ;;  %v602_v22 = vld [vmem:[%s6360_s22 + $0x758] sm:$0xff] }
  0x72   : > { %1257 = vmatprep.mubr.f32.mxu1 %v6559_v45  ;;  %4579 = vmatpush1.bf16.msk.msra.mxu0 %vm6534_vm2, %v4577_v46  ;;  %v468_v46 = vld [vmem:[%s6360_s22 + $0x328] sm:$0xff] }
  0x73   : > { %4657 = vmatpush1.bf16.msk.msra.mxu1 %vm6534_vm2, %v4655_v47  ;;  %4659 = vmatprep.subr.bf16.mxu0 %v4658_v48  ;;  %v480_v47 = vld [vmem:[%s6360_s22 + $0x388] sm:$0xff]  ;;  %v6702_v48 = vld [vmem:[%s10758_s0 + $0x58] sm:$0xff] }
  0x74   : > { %1032 = vmatmul.mubr.f32.gmra.mrb[6].mxu0 %v6571_v50  ;;  %4737 = vmatprep.subr.bf16.mxu1 %v4736_v49  ;;  %v4672_v49 = vpack.c.bf16 %v455_v39, %v443_v38  ;;  %v4674_v0 = vpack.c.bf16 %v480_v47, %v468_v46  ;;  %v540_v39 = vld [vmem:[%s6360_s22 + $0x568] sm:$0xff]  ;;  %v554_v46 = vld [vmem:[%s6360_s22 + $0x5d8] sm:$0xff] }
  0x75   : > { %1258 = vmatmul.mubr.f32.gmra.mrb[6].mxu1 %v6571_v50  ;;  %1037 = vmatprep.mubr.f32.mxu0 %v6577_v51  ;;  %v600_v20 = vld [vmem:[%s6360_s22 + $0x748] sm:$0xff] }
  0x76   : > { %1263 = vmatprep.mubr.f32.mxu1 %v6577_v51 }
  0x78   : > { %1038 = vmatmul.mubr.f32.gmra.mrb[8].mxu0 %v6589_v52 }
  0x79   : > { %1264 = vmatmul.mubr.f32.gmra.mrb[8].mxu1 %v6589_v52  ;;  %1043 = vmatprep.mubr.f32.mxu0 %v6595_v53 }
  0x7a   : > { %1269 = vmatprep.mubr.f32.mxu1 %v6595_v53 }
  0x7c   : > { %1044 = vmatmul.mubr.f32.gmra.mrb[10].mxu0 %v6603_v54 }
  0x7d   : > { %1270 = vmatmul.mubr.f32.gmra.mrb[10].mxu1 %v6603_v54  ;;  %1049 = vmatprep.mubr.f32.mxu0 %v6609_v55 }
  0x7e   : > { %1275 = vmatprep.mubr.f32.mxu1 %v6609_v55 }
  0x80   : > { %1050 = vmatmul.mubr.f32.gmra.mrb[12].mxu0 %v6617_v56 }
  0x81   : > { %1276 = vmatmul.mubr.f32.gmra.mrb[12].mxu1 %v6617_v56  ;;  %1055 = vmatprep.mubr.f32.mxu0 %v6623_v57 }
  0x82   : > { %1281 = vmatprep.mubr.f32.mxu1 %v6623_v57 }
  0x84   : > { %1056 = vmatmul.mubr.f32.gmra.mrb[14].mxu0 %v6631_v58 }
  0x85   : > { %1282 = vmatmul.mubr.f32.gmra.mrb[14].mxu1 %v6631_v58  ;;  %1126 = vmatprep.mubr.f32.mxu0 %v6248_v1 }
  0x86   : > { %1352 = vmatprep.mubr.f32.mxu1 %v6248_v1 }
  0x88   : > { %4420 = vmatmul.mubr.msk.f32.vlgmr.msra.gmra.mrb[0].mxu0 %vm887_vm3, %v6646_v2 }
  0x89   : > { %4430 = vmatmul.mubr.msk.f32.vlgmr.msra.gmra.mrb[0].mxu1 %vm887_vm3, %v6646_v2  ;;  %4661 = vmatpush1.bf16.msra.mxu0 %v4660_v3  ;;  %v469_v3 = vld [vmem:[%s6360_s22 + $0x330] sm:$0xff] }
  0x8a   : > { %4739 = vmatpush1.bf16.msra.mxu1 %v4738_v6  ;;  %1132 = vmatprep.mubr.f32.mxu0 %v6248_v1  ;;  %v492_v6 = vld [vmem:[%s6360_s22 + $0x3e8] sm:$0xff] }
  0x8b   : > { %1358 = vmatprep.mubr.f32.mxu1 %v6248_v1  ;;  %4663 = vmatprep.subr.bf16.mxu0 %v4662_v9  ;;  %v4676_v9 = vpack.c.bf16 %v479_v63, %v467_v62  ;;  %v553_v62 = vld [vmem:[%s6360_s22 + $0x5d0] sm:$0xff]  ;;  %v564_v63 = vld [vmem:[%s6360_s22 + $0x628] sm:$0xff] }
  0x8c   : > { %4741 = vmatprep.subr.bf16.mxu1 %v4740_v12  ;;  %4421 = vmatmul.mubr.msk.f32.gmra.mrb[2].mxu0 %vm887_vm3, %v6664_v16  ;;  %v4754_v12 = vpack.c.bf16 %v481_v4, %v469_v3  ;;  %v566_v4 = vld [vmem:[%s6360_s22 + $0x638] sm:$0xff] }
  0x8d   : > { %4431 = vmatmul.mubr.msk.f32.gmra.mrb[2].mxu1 %vm887_vm3, %v6664_v16  ;;  %4665 = vmatpush1.bf16.msra.mxu0 %v4664_v17  ;;  %v4678_v17 = vpack.c.bf16 %v504_v7, %v492_v6  ;;  %v6780_v6 = vld [vmem:[%s10758_s0 + $0xb8] sm:$0xff] }
  0x8e   : > { %4743 = vmatpush1.bf16.msra.mxu1 %v4742_v21  ;;  %1138 = vmatprep.mubr.f32.mxu0 %v6248_v1  ;;  %v4756_v21 = vpack.c.bf16 %v506_v11, %v494_v10  ;;  %v563_v11 = vld [vmem:[%s6360_s22 + $0x620] sm:$0xff] }
  0x8f   : > { %1364 = vmatprep.mubr.f32.mxu1 %v6248_v1  ;;  %4667 = vmatprep.subr.bf16.mxu0 %v4666_v24  ;;  %v6740_v24 = vld [vmem:[%s10758_s0 + $0x88] sm:$0xff] }
  0x90   : > { %4745 = vmatprep.subr.bf16.mxu1 %v4744_v28  ;;  %4422 = vmatmul.mubr.msk.f32.gmra.mrb[4].mxu0 %vm887_vm3, %v6683_v33  ;;  %v530_v28 = vld [vmem:[%s6360_s22 + $0x518] sm:$0xff] }
  0x91   : > { %4432 = vmatmul.mubr.msk.f32.gmra.mrb[4].mxu1 %vm887_vm3, %v6683_v33  ;;  %4669 = vmatpush1.bf16.msra.mxu0 %v4668_v34  ;;  %v527_v34 = vld [vmem:[%s6360_s22 + $0x500] sm:$0xff]  ;;  %v4760_v38 = vpack.c.bf16 %v530_v28, %v518_v26  ;;  %v4694_v26 = vpack.c.bf16 %v600_v20, %v588_v19  ;;  %v662_v19 = vld [vmem:[%s6360_s22 + $0x938] sm:$0xff] }
  0x92   : > { %4747 = vmatpush1.bf16.msra.mxu1 %v4746_v37  ;;  %1144 = vmatprep.mubr.f32.mxu0 %v6248_v1  ;;  %v529_v37 = vld [vmem:[%s6360_s22 + $0x510] sm:$0xff]  ;;  %v4684_v43 = vpack.c.bf16 %v527_v34, %v515_v31  ;;  %v587_v28 = vld [vmem:[%s6360_s22 + $0x6e0] sm:$0xff]  ;;  %v674_v20 = vld [vmem:[%s6360_s22 + $0x998] sm:$0xff] }
  0x93   : > { %1370 = vmatprep.mubr.f32.mxu1 %v6248_v1  ;;  %4671 = vmatprep.subr.bf16.mxu0 %v4670_v40  ;;  %v552_v40 = vld [vmem:[%s6360_s22 + $0x5c8] sm:$0xff]  ;;  %v4762_v47 = vpack.c.bf16 %v529_v37, %v517_v36  ;;  %v589_v31 = vld [vmem:[%s6360_s22 + $0x6f0] sm:$0xff] }
  0x94   : > { %4749 = vmatprep.subr.bf16.mxu1 %v4748_v44  ;;  %4423 = vmatmul.mubr.msk.f32.gmra.mrb[6].mxu0 %vm887_vm3, %v6702_v48  ;;  %v542_v44 = vld [vmem:[%s6360_s22 + $0x578] sm:$0xff]  ;;  %v612_v36 = vld [vmem:[%s6360_s22 + $0x7a8] sm:$0xff] }
  0x95   : > { %4433 = vmatmul.mubr.msk.f32.gmra.mrb[6].mxu1 %vm887_vm3, %v6702_v48  ;;  %4673 = vmatpush1.bf16.msra.mxu0 %v4672_v49  ;;  %v539_v49 = vld [vmem:[%s6360_s22 + $0x560] sm:$0xff]  ;;  %v4764_v3 = vpack.c.bf16 %v554_v46, %v542_v44  ;;  %v624_v37 = vld [vmem:[%s6360_s22 + $0x808] sm:$0xff] }
  0x96   : > { %4751 = vmatpush1.bf16.msra.mxu1 %v4750_v61  ;;  %1150 = vmatprep.mubr.f32.mxu0 %v6248_v1  ;;  %v4686_v61 = vpack.c.bf16 %v552_v40, %v540_v39  ;;  %v4688_v7 = vpack.c.bf16 %v551_v59, %v539_v49  ;;  %v614_v39 = vld [vmem:[%s6360_s22 + $0x7b8] sm:$0xff]  ;;  %v4698_v46 = vpack.c.bf16 %v624_v37, %v612_v36  ;;  %v623_v49 = vld [vmem:[%s6360_s22 + $0x800] sm:$0xff]  ;;  %v613_v59 = vld [vmem:[%s6360_s22 + $0x7b0] sm:$0xff] }
  0x97   : > { %1376 = vmatprep.mubr.f32.mxu1 %v6248_v1  ;;  %4675 = vmatprep.subr.bf16.mxu0 %v4674_v0  ;;  %v576_v0 = vld [vmem:[%s6360_s22 + $0x688] sm:$0xff]  ;;  %v626_v40 = vld [vmem:[%s6360_s22 + $0x818] sm:$0xff] }
  0x98   : > { %4753 = vmatprep.subr.bf16.mxu1 %v4752_v5  ;;  %4424 = vmatmul.mubr.msk.f32.gmra.mrb[8].mxu0 %vm887_vm3, %v6721_v8  ;;  %v578_v5 = vld [vmem:[%s6360_s22 + $0x698] sm:$0xff]  ;;  %v4690_v10 = vpack.c.bf16 %v576_v0, %v564_v63  ;;  %v648_v63 = vld [vmem:[%s6360_s22 + $0x8c8] sm:$0xff] }
  0x99   : > { %4434 = vmatmul.mubr.msk.f32.gmra.mrb[8].mxu1 %vm887_vm3, %v6721_v8  ;;  %4677 = vmatpush1.bf16.msra.mxu0 %v4676_v9  ;;  %v4766_v9 = vpack.c.bf16 %v553_v62, %v541_v60  ;;  %v4768_v15 = vpack.c.bf16 %v578_v5, %v566_v4  ;;  %v4776_v60 = vpack.c.bf16 %v626_v40, %v614_v39  ;;  %v636_v62 = vld [vmem:[%s6360_s22 + $0x868] sm:$0xff]  ;;  %v638_v0 = vld [vmem:[%s6360_s22 + $0x878] sm:$0xff] }
  0x9a   : > { %4755 = vmatpush1.bf16.msra.mxu1 %v4754_v12  ;;  %1156 = vmatprep.mubr.f32.mxu0 %v6248_v1  ;;  %v575_v12 = vld [vmem:[%s6360_s22 + $0x680] sm:$0xff]  ;;  %v686_v36 = vld [vmem:[%s6360_s22 + $0x9f8] sm:$0xff] }
  0x9b   : > { %1382 = vmatprep.mubr.f32.mxu1 %v6248_v1  ;;  %4679 = vmatprep.subr.bf16.mxu0 %v4678_v17  ;;  %v577_v17 = vld [vmem:[%s6360_s22 + $0x690] sm:$0xff]  ;;  %v4692_v23 = vpack.c.bf16 %v575_v12, %v563_v11  ;;  %v698_v37 = vld [vmem:[%s6360_s22 + $0xa58] sm:$0xff] }
  0x9c   : > { %4757 = vmatprep.subr.bf16.mxu1 %v4756_v21  ;;  %4425 = vmatmul.mubr.msk.f32.gmra.mrb[10].mxu0 %vm887_vm3, %v6740_v24  ;;  %v590_v21 = vld [vmem:[%s6360_s22 + $0x6f8] sm:$0xff]  ;;  %v637_v11 = vld [vmem:[%s6360_s22 + $0x870] sm:$0xff] }
  0x9d   : > { %4435 = vmatmul.mubr.msk.f32.gmra.mrb[10].mxu1 %vm887_vm3, %v6740_v24  ;;  %4681 = vmatpush1.bf16.msra.mxu0 %v4680_v25  ;;  %v4770_v25 = vpack.c.bf16 %v577_v17, %v565_v14  ;;  %v4772_v34 = vpack.c.bf16 %v602_v22, %v590_v21  ;;  %v649_v14 = vld [vmem:[%s6360_s22 + $0x8d0] sm:$0xff]  ;;  %v672_v17 = vld [vmem:[%s6360_s22 + $0x988] sm:$0xff] }
  0x9e   : > { %4759 = vmatpush1.bf16.msra.mxu1 %v4758_v29  ;;  %1162 = vmatprep.mubr.f32.mxu0 %v6248_v1  ;;  %v599_v29 = vld [vmem:[%s6360_s22 + $0x740] sm:$0xff]  ;;  %v4782_v22 = vpack.c.bf16 %v649_v14, %v637_v11  ;;  %v721_v11 = vld [vmem:[%s6360_s22 + $0xb10] sm:$0xff]  ;;  %v744_v14 = vld [vmem:[%s6360_s22 + $0xbc8] sm:$0xff] }
  0x9f   : > { %1388 = vmatprep.mubr.f32.mxu1 %v6248_v1  ;;  %4683 = vmatprep.subr.bf16.mxu0 %v4682_v35  ;;  %v601_v35 = vld [vmem:[%s6360_s22 + $0x750] sm:$0xff] }
  0xa0   : > { %4761 = vmatprep.subr.bf16.mxu1 %v4760_v38  ;;  %4426 = vmatmul.mubr.msk.f32.gmra.mrb[12].mxu0 %vm887_vm3, %v6759_v41  ;;  %v6805_v38 = vld [vmem:[%s10758_s0 + $0x8] sm:$0xff]  ;;  %v4774_v44 = vpack.c.bf16 %v601_v35, %v589_v31  ;;  %v673_v31 = vld [vmem:[%s6360_s22 + $0x990] sm:$0xff] }
  0xa1   : > { %4436 = vmatmul.mubr.msk.f32.gmra.mrb[12].mxu1 %vm887_vm3, %v6759_v41  ;;  %4685 = vmatpush1.bf16.msra.mxu0 %v4684_v43  ;;  %v4696_v43 = vpack.c.bf16 %v599_v29, %v587_v28  ;;  %v661_v28 = vld [vmem:[%s6360_s22 + $0x930] sm:$0xff]  ;;  %v4784_v29 = vpack.c.bf16 %v674_v20, %v662_v19  ;;  %v696_v35 = vld [vmem:[%s6360_s22 + $0xa48] sm:$0xff] }
  0xa2   : > { %4763 = vmatpush1.bf16.msra.mxu1 %v4762_v47  ;;  %1168 = vmatprep.mubr.f32.mxu0 %v6248_v1  ;;  %v611_v47 = vld [vmem:[%s6360_s22 + $0x7a0] sm:$0xff]  ;;  %v4786_v40 = vpack.c.bf16 %v673_v31, %v661_v28  ;;  %v745_v28 = vld [vmem:[%s6360_s22 + $0xbd0] sm:$0xff]  ;;  %v768_v31 = vld [vmem:[%s6360_s22 + $0xc88] sm:$0xff] }
  0xa3   : > { %1394 = vmatprep.mubr.f32.mxu1 %v6248_v1  ;;  %4687 = vmatprep.subr.bf16.mxu0 %v4686_v61  ;;  %v625_v61 = vld [vmem:[%s6360_s22 + $0x810] sm:$0xff]  ;;  %v4700_v4 = vpack.c.bf16 %v623_v49, %v611_v47  ;;  %v4788_v49 = vpack.c.bf16 %v698_v37, %v686_v36 }
  0xa4   : > { %4765 = vmatprep.subr.bf16.mxu1 %v4764_v3  ;;  %4427 = vmatmul.mubr.msk.f32.gmra.mrb[14].mxu0 %vm887_vm3, %v6780_v6  ;;  %v650_v3 = vld [vmem:[%s6360_s22 + $0x8d8] sm:$0xff]  ;;  %v4778_v5 = vpack.c.bf16 %v625_v61, %v613_v59  ;;  %v685_v47 = vld [vmem:[%s6360_s22 + $0x9f0] sm:$0xff]  ;;  %v720_v61 = vld [vmem:[%s6360_s22 + $0xb08] sm:$0xff] }
  0xa5   : > { %4437 = vmatmul.mubr.msk.f32.gmra.mrb[14].mxu1 %vm887_vm3, %v6780_v6  ;;  %4689 = vmatpush1.bf16.msra.mxu0 %v4688_v7  ;;  %v4702_v7 = vpack.c.bf16 %v648_v63, %v636_v62  ;;  %v4780_v12 = vpack.c.bf16 %v650_v3, %v638_v0  ;;  %v697_v59 = vld [vmem:[%s6360_s22 + $0xa50] sm:$0xff]  ;;  %v710_v62 = vld [vmem:[%s6360_s22 + $0xab8] sm:$0xff] }
  0xa6   : > { %4767 = vmatpush1.bf16.msra.mxu1 %v4766_v9  ;;  %4691 = vmatprep.subr.bf16.mxu0 %v4690_v10  ;;  %v635_v9 = vld [vmem:[%s6360_s22 + $0x860] sm:$0xff]  ;;  %v722_v63 = vld [vmem:[%s6360_s22 + $0xb18] sm:$0xff]  ;;  %v4790_v3 = vpack.c.bf16 %v697_v59, %v685_v47  ;;  %v769_v47 = vld [vmem:[%s6360_s22 + $0xc90] sm:$0xff] }
  0xa7   : > { %4769 = vmatprep.subr.bf16.mxu1 %v4768_v15  ;;  %1465 = vmatprep.mubr.f32.mxu0 %v6805_v38  ;;  %v647_v10 = vld [vmem:[%s6360_s22 + $0x8c0] sm:$0xff]  ;;  %v660_v15 = vld [vmem:[%s6360_s22 + $0x928] sm:$0xff] }
  0xa8   : > { %1691 = vmatprep.mubr.f32.mxu1 %v6805_v38  ;;  %v4704_v21 = vpack.c.bf16 %v647_v10, %v635_v9  ;;  %v709_v9 = vld [vmem:[%s6360_s22 + $0xab0] sm:$0xff]  ;;  %v4792_v10 = vpack.c.bf16 %v722_v63, %v710_v62  ;;  %v792_v59 = vld [vmem:[%s6360_s22 + $0xd48] sm:$0xff]  ;;  %v794_v62 = vld [vmem:[%s6360_s22 + $0xd58] sm:$0xff] }
  0xa9   : > { %4693 = vmatpush1.bf16.msra.mxu0 %v4692_v23  ;;  %v4706_v23 = vpack.c.bf16 %v672_v17, %v660_v15  ;;  %v734_v15 = vld [vmem:[%s6360_s22 + $0xb78] sm:$0xff]  ;;  %v4794_v20 = vpack.c.bf16 %v721_v11, %v709_v9  ;;  %v793_v9 = vld [vmem:[%s6360_s22 + $0xd50] sm:$0xff]  ;;  %v816_v11 = vld [vmem:[%s6360_s22 + $0xe08] sm:$0xf] }
  0xaa   : > { %4771 = vmatpush1.bf16.msra.mxu1 %v4770_v25  ;;  %4695 = vmatprep.subr.bf16.mxu0 %v4694_v26  ;;  %v659_v25 = vld [vmem:[%s6360_s22 + $0x920] sm:$0xff]  ;;  %v746_v17 = vld [vmem:[%s6360_s22 + $0xbd8] sm:$0xff] }
  0xab   : > { %4773 = vmatprep.subr.bf16.mxu1 %v4772_v34  ;;  %v671_v26 = vld [vmem:[%s6360_s22 + $0x980] sm:$0xff]  ;;  %v684_v34 = vld [vmem:[%s6360_s22 + $0x9e8] sm:$0xff] }
  0xac   : > { %v4708_v39 = vpack.c.bf16 %v671_v26, %v659_v25  ;;  %v733_v25 = vld [vmem:[%s6360_s22 + $0xb70] sm:$0xff]  ;;  %v4796_v26 = vpack.c.bf16 %v746_v17, %v734_v15 }
  0xad   : > { %4697 = vmatpush1.bf16.msra.mxu0 %v4696_v43  ;;  %v4710_v43 = vpack.c.bf16 %v696_v35, %v684_v34  ;;  %v758_v34 = vld [vmem:[%s6360_s22 + $0xc38] sm:$0xff]  ;;  %v4798_v37 = vpack.c.bf16 %v745_v28, %v733_v25  ;;  %v376_v25 = vld [vmem:[%s6360_s22 + $0x48] sm:$0xff] }
  0xae   : > { %4775 = vmatpush1.bf16.msra.mxu1 %v4774_v44  ;;  %4699 = vmatprep.subr.bf16.mxu0 %v4698_v46  ;;  %v683_v44 = vld [vmem:[%s6360_s22 + $0x9e0] sm:$0xff]  ;;  %v770_v35 = vld [vmem:[%s6360_s22 + $0xc98] sm:$0xff] }
  0xaf   : > { %4777 = vmatprep.subr.bf16.mxu1 %v4776_v60  ;;  %v695_v46 = vld [vmem:[%s6360_s22 + $0xa40] sm:$0xff]  ;;  %v708_v60 = vld [vmem:[%s6360_s22 + $0xaa8] sm:$0xff]  ;;  %v378_v28 = vld [vmem:[%s6360_s22 + $0x58] sm:$0xff] }
  0xb0   : > { %v4712_v0 = vpack.c.bf16 %v695_v46, %v683_v44  ;;  %v4800_v44 = vpack.c.bf16 %v770_v35, %v758_v34  ;;  %v757_v46 = vld [vmem:[%s6360_s22 + $0xc30] sm:$0xff]  ;;  %v411_v35 = vld [vmem:[%s6360_s22 + $0x160] sm:$0xff] }
  0xb1   : > { %4701 = vmatpush1.bf16.msra.mxu0 %v4700_v4  ;;  %v4714_v4 = vpack.c.bf16 %v720_v61, %v708_v60  ;;  %v782_v61 = vld [vmem:[%s6360_s22 + $0xcf8] sm:$0xff]  ;;  %v4802_v63 = vpack.c.bf16 %v769_v47, %v757_v46 }
  0xb2   : > { %4779 = vmatpush1.bf16.msra.mxu1 %v4778_v5  ;;  %4703 = vmatprep.subr.bf16.mxu0 %v4702_v7  ;;  %v707_v5 = vld [vmem:[%s6360_s22 + $0xaa0] sm:$0xff]  ;;  %v426_v46 = vld [vmem:[%s6360_s22 + $0x1d8] sm:$0xff] }
  0xb3   : > { %4781 = vmatprep.subr.bf16.mxu1 %v4780_v12  ;;  %v719_v7 = vld [vmem:[%s6360_s22 + $0xb00] sm:$0xff]  ;;  %v732_v12 = vld [vmem:[%s6360_s22 + $0xb68] sm:$0xff]  ;;  %v438_v47 = vld [vmem:[%s6360_s22 + $0x238] sm:$0xff] }
  0xb4   : > { %v4716_v19 = vpack.c.bf16 %v719_v7, %v707_v5  ;;  %v781_v5 = vld [vmem:[%s6360_s22 + $0xcf0] sm:$0xff]  ;;  %v4804_v7 = vpack.c.bf16 %v794_v62, %v782_v61 }
  0xb5   : > { %4705 = vmatpush1.bf16.msra.mxu0 %v4704_v21  ;;  %v4718_v21 = vpack.c.bf16 %v744_v14, %v732_v12  ;;  %v806_v12 = vld [vmem:[%s6360_s22 + $0xdb8] sm:$0xff]  ;;  %v4806_v17 = vpack.c.bf16 %v793_v9, %v781_v5  ;;  %v437_v62 = vld [vmem:[%s6360_s22 + $0x230] sm:$0xff] }
  0xb6   : > { %4783 = vmatpush1.bf16.msra.mxu1 %v4782_v22  ;;  %4707 = vmatprep.subr.bf16.mxu0 %v4706_v23  ;;  %v731_v22 = vld [vmem:[%s6360_s22 + $0xb60] sm:$0xff]  ;;  %v818_v14 = vld [vmem:[%s6360_s22 + $0xe18] sm:$0xf] }
  0xb7   : > { %4785 = vmatprep.subr.bf16.mxu1 %v4784_v29  ;;  %v743_v23 = vld [vmem:[%s6360_s22 + $0xbc0] sm:$0xff]  ;;  %v756_v29 = vld [vmem:[%s6360_s22 + $0xc28] sm:$0xff]  ;;  %v450_v5 = vld [vmem:[%s6360_s22 + $0x298] sm:$0xff] }
  0xb8   : > { %v4720_v36 = vpack.c.bf16 %v743_v23, %v731_v22  ;;  %v4808_v22 = vpack.c.bf16 %v818_v14, %v806_v12  ;;  %v817_v23 = vld [vmem:[%s6360_s22 + $0xe10] sm:$0xf] }
  0xb9   : > { %4709 = vmatpush1.bf16.msra.mxu0 %v4708_v39  ;;  %v4722_v39 = vpack.c.bf16 %v768_v31, %v756_v29  ;;  %v461_v14 = vld [vmem:[%s6360_s22 + $0x2f0] sm:$0xff] }
  0xba   : > { %4787 = vmatpush1.bf16.msra.mxu1 %v4786_v40  ;;  %4711 = vmatprep.subr.bf16.mxu0 %v4710_v43  ;;  %v755_v40 = vld [vmem:[%s6360_s22 + $0xc20] sm:$0xff] }
  0xbb   : > { %4789 = vmatprep.subr.bf16.mxu1 %v4788_v49  ;;  %v767_v43 = vld [vmem:[%s6360_s22 + $0xc80] sm:$0xff]  ;;  %v780_v49 = vld [vmem:[%s6360_s22 + $0xce8] sm:$0xff] }
  0xbc   : > { %v4724_v60 = vpack.c.bf16 %v767_v43, %v755_v40  ;;  %v424_v40 = vld [vmem:[%s6360_s22 + $0x1c8] sm:$0xff] }
  0xbd   : > { %4713 = vmatpush1.bf16.msra.mxu0 %v4712_v0  ;;  %v4726_v0 = vpack.c.bf16 %v792_v59, %v780_v49  ;;  %v436_v43 = vld [vmem:[%s6360_s22 + $0x228] sm:$0xff]  ;;  %v423_v59 = vld [vmem:[%s6360_s22 + $0x1c0] sm:$0xff] }
  0xbe   : > { %4791 = vmatpush1.bf16.msra.mxu1 %v4790_v3  ;;  %4715 = vmatprep.subr.bf16.mxu0 %v4714_v4  ;;  %v779_v3 = vld [vmem:[%s6360_s22 + $0xce0] sm:$0xff]  ;;  %v4822_v61 = vpack.c.bf16 %v436_v43, %v424_v40  ;;  %v533_v40 = vld [vmem:[%s6360_s22 + $0x530] sm:$0xff] }
  0xbf   : > { %4793 = vmatprep.subr.bf16.mxu1 %v4792_v10  ;;  %v791_v4 = vld [vmem:[%s6360_s22 + $0xd40] sm:$0xff]  ;;  %v804_v10 = vld [vmem:[%s6360_s22 + $0xda8] sm:$0xff] }
  0xc0   : > { %v4728_v15 = vpack.c.bf16 %v791_v4, %v779_v3  ;;  %v460_v3 = vld [vmem:[%s6360_s22 + $0x2e8] sm:$0xff] }
  0xc1   : > { %4717 = vmatpush1.bf16.msra.mxu0 %v4716_v19  ;;  %v4730_v19 = vpack.c.bf16 %v816_v11, %v804_v10  ;;  %v447_v10 = vld [vmem:[%s6360_s22 + $0x280] sm:$0xff] }
  0xc2   : > { %4795 = vmatpush1.bf16.msra.mxu1 %v4794_v20  ;;  %4719 = vmatprep.subr.bf16.mxu0 %v4718_v21  ;;  %v803_v20 = vld [vmem:[%s6360_s22 + $0xda0] sm:$0xff] }
  0xc3   : > { %4797 = vmatprep.subr.bf16.mxu1 %v4796_v26  ;;  %v815_v21 = vld [vmem:[%s6360_s22 + $0xe00] sm:$0xf]  ;;  %v388_v26 = vld [vmem:[%s6360_s22 + $0xa8] sm:$0xff] }
  0xc4   : > { %v4733_v29 = vpack.c.bf16 %v815_v21, %v803_v20  ;;  %v4814_v34 = vpack.c.bf16 %v388_v26, %v376_v25  ;;  %v459_v11 = vld [vmem:[%s6360_s22 + $0x2e0] sm:$0xff]  ;;  %v474_v21 = vld [vmem:[%s6360_s22 + $0x358] sm:$0xff] }
  0xc5   : > { %4721 = vmatpush1.bf16.msra.mxu0 %v4720_v36  ;;  %v4828_v20 = vpack.c.bf16 %v459_v11, %v447_v10  ;;  %v483_v25 = vld [vmem:[%s6360_s22 + $0x3a0] sm:$0xff] }
  0xc6   : > { %4799 = vmatpush1.bf16.msra.mxu1 %v4798_v37  ;;  %4723 = vmatprep.subr.bf16.mxu0 %v4722_v39  ;;  %v401_v37 = vld [vmem:[%s6360_s22 + $0x110] sm:$0xff] }
  0xc7   : > { %4801 = vmatprep.subr.bf16.mxu1 %v4800_v44  ;;  %v413_v39 = vld [vmem:[%s6360_s22 + $0x170] sm:$0xff] }
  0xc8   : > { %1466 = vmatmul.mubr.f32.vlgmr.msra.gmra.mrb[16].mxu0 %v6503_v13  ;;  %v4898_v49 = vpack.c.bf16 %v413_v39, %v401_v37  ;;  %v519_v37 = vld [vmem:[%s6360_s22 + $0x4c0] sm:$0xff] }
  0xc9   : > { %1692 = vmatmul.mubr.f32.vlgmr.msra.gmra.mrb[16].mxu1 %v6503_v13  ;;  %4725 = vmatpush1.bf16.msra.mxu0 %v4724_v60  ;;  %v805_v13 = vld [vmem:[%s6360_s22 + $0xdb0] sm:$0xff]  ;;  %v435_v60 = vld [vmem:[%s6360_s22 + $0x220] sm:$0xff] }
  0xca   : > { %4803 = vmatpush1.bf16.msra.mxu1 %v4802_v63  ;;  %1471 = vmatprep.mubr.f32.mxu0 %v6510_v18  ;;  %v4811_v31 = vpack.c.bf16 %v817_v23, %v805_v13  ;;  %v4900_v63 = vpack.c.bf16 %v438_v47, %v426_v46  ;;  %v4824_v4 = vpack.c.bf16 %v435_v60, %v423_v59  ;;  %v486_v13 = vld [vmem:[%s6360_s22 + $0x3b8] sm:$0xff]  ;;  %v471_v23 = vld [vmem:[%s6360_s22 + $0x340] sm:$0xff]  ;;  %v556_v46 = vld [vmem:[%s6360_s22 + $0x5e8] sm:$0xff] }
  0xcb   : > { %1697 = vmatprep.mubr.f32.mxu1 %v6510_v18  ;;  %4727 = vmatprep.subr.bf16.mxu0 %v4726_v0  ;;  %v390_v18 = vld [vmem:[%s6360_s22 + $0xb8] sm:$0xff]  ;;  %v448_v0 = vld [vmem:[%s6360_s22 + $0x288] sm:$0xff]  ;;  %v531_v39 = vld [vmem:[%s6360_s22 + $0x520] sm:$0xff] }
  0xcc   : > { %1472 = vmatmul.mubr.f32.gmra.mrb[18].mxu0 %v6523_v27  ;;  %4805 = vmatprep.subr.bf16.mxu1 %v4804_v7  ;;  %v462_v7 = vld [vmem:[%s6360_s22 + $0x2f8] sm:$0xff]  ;;  %v4826_v12 = vpack.c.bf16 %v460_v3, %v448_v0  ;;  %v4840_v47 = vpack.c.bf16 %v531_v39, %v519_v37  ;;  %v568_v0 = vld [vmem:[%s6360_s22 + $0x648] sm:$0xff]  ;;  %v651_v37 = vld [vmem:[%s6360_s22 + $0x8e0] sm:$0xff] }
  0xcd   : > { %1698 = vmatmul.mubr.f32.gmra.mrb[18].mxu1 %v6523_v27  ;;  %1477 = vmatprep.mubr.f32.mxu0 %v6531_v30  ;;  %v4892_v27 = vpack.c.bf16 %v390_v18, %v378_v28  ;;  %v485_v28 = vld [vmem:[%s6360_s22 + $0x3b0] sm:$0xff]  ;;  %v4908_v18 = vpack.c.bf16 %v486_v13, %v474_v21  ;;  %v558_v59 = vld [vmem:[%s6360_s22 + $0x5f8] sm:$0xff]  ;;  %v580_v3 = vld [vmem:[%s6360_s22 + $0x6a8] sm:$0xff] }
  0xce   : > { %1703 = vmatprep.mubr.f32.mxu1 %v6531_v30  ;;  %4729 = vmatpush1.bf16.msra.mxu0 %v4728_v15  ;;  %v375_v30 = vld [vmem:[%s6360_s22 + $0x40] sm:$0xff]  ;;  %v4904_v15 = vpack.c.bf16 %v462_v7, %v450_v5  ;;  %v570_v5 = vld [vmem:[%s6360_s22 + $0x658] sm:$0xff]  ;;  %v4846_v11 = vpack.c.bf16 %v580_v3, %v568_v0  ;;  %v641_v39 = vld [vmem:[%s6360_s22 + $0x890] sm:$0xff] }
  0xcf   : > { %4807 = vmatpush1.bf16.msra.mxu1 %v4806_v17  ;;  %4732 = vmatprep.subr.msk.bf16.mxu0 %vm6534_vm2, %v4730_v19  ;;  %v472_v17 = vld [vmem:[%s6360_s22 + $0x348] sm:$0xff]  ;;  %v582_v7 = vld [vmem:[%s6360_s22 + $0x6b8] sm:$0xff] }
  0xd0   : > { %1478 = vmatmul.mubr.f32.gmra.mrb[20].mxu0 %v6551_v42  ;;  %4810 = vmatprep.subr.msk.bf16.mxu1 %vm6534_vm2, %v4808_v22  ;;  %v484_v19 = vld [vmem:[%s6360_s22 + $0x3a8] sm:$0xff]  ;;  %v606_v21 = vld [vmem:[%s6360_s22 + $0x778] sm:$0xff] }
  0xd1   : > { %1704 = vmatmul.mubr.f32.gmra.mrb[20].mxu1 %v6551_v42  ;;  %1483 = vmatprep.mubr.f32.mxu0 %v6559_v45  ;;  %v387_v42 = vld [vmem:[%s6360_s22 + $0xa0] sm:$0xff]  ;;  %v4830_v26 = vpack.c.bf16 %v484_v19, %v472_v17  ;;  %v581_v17 = vld [vmem:[%s6360_s22 + $0x6b0] sm:$0xff]  ;;  %v604_v19 = vld [vmem:[%s6360_s22 + $0x768] sm:$0xff] }
  0xd2   : > { %1709 = vmatprep.mubr.f32.mxu1 %v6559_v45  ;;  %4735 = vmatpush1.bf16.msk.msra.mxu0 %vm6534_vm2, %v4733_v29  ;;  %v377_v45 = vld [vmem:[%s6360_s22 + $0x50] sm:$0xff]  ;;  %v496_v29 = vld [vmem:[%s6360_s22 + $0x408] sm:$0xff]  ;;  %v690_v3 = vld [vmem:[%s6360_s22 + $0xa18] sm:$0xff] }
  0xd3   : > { %4813 = vmatpush1.bf16.msk.msra.mxu1 %vm6534_vm2, %v4811_v31  ;;  %4815 = vmatprep.subr.bf16.mxu0 %v4814_v34  ;;  %v508_v31 = vld [vmem:[%s6360_s22 + $0x468] sm:$0xff]  ;;  %v4832_v34 = vpack.c.bf16 %v483_v25, %v471_v23  ;;  %v591_v25 = vld [vmem:[%s6360_s22 + $0x700] sm:$0xff] }
  0xd4   : > { %1484 = vmatmul.mubr.f32.gmra.mrb[22].mxu0 %v6571_v50  ;;  %4893 = vmatprep.subr.bf16.mxu1 %v4892_v27  ;;  %v498_v27 = vld [vmem:[%s6360_s22 + $0x418] sm:$0xff]  ;;  %v700_v0 = vld [vmem:[%s6360_s22 + $0xa68] sm:$0xff] }
  0xd5   : > { %1710 = vmatmul.mubr.f32.gmra.mrb[22].mxu1 %v6571_v50  ;;  %1489 = vmatprep.mubr.f32.mxu0 %v6577_v51  ;;  %v389_v50 = vld [vmem:[%s6360_s22 + $0xb0] sm:$0xff] }
  0xd6   : > { %1715 = vmatprep.mubr.f32.mxu1 %v6577_v51  ;;  %v400_v51 = vld [vmem:[%s6360_s22 + $0x108] sm:$0xff] }
  0xd8   : > { %1490 = vmatmul.mubr.f32.gmra.mrb[24].mxu0 %v6589_v52 }
  0xd9   : > { %1716 = vmatmul.mubr.f32.gmra.mrb[24].mxu1 %v6589_v52  ;;  %1495 = vmatprep.mubr.f32.mxu0 %v6595_v53  ;;  %v412_v52 = vld [vmem:[%s6360_s22 + $0x168] sm:$0xff] }
  0xda   : > { %1721 = vmatprep.mubr.f32.mxu1 %v6595_v53  ;;  %v4816_v53 = vpack.c.bf16 %v387_v42, %v375_v30  ;;  %v4818_v36 = vpack.c.bf16 %v412_v52, %v400_v51  ;;  %v510_v30 = vld [vmem:[%s6360_s22 + $0x478] sm:$0xff]  ;;  %v4834_v51 = vpack.c.bf16 %v508_v31, %v496_v29  ;;  %v509_v52 = vld [vmem:[%s6360_s22 + $0x470] sm:$0xff]  ;;  %v616_v29 = vld [vmem:[%s6360_s22 + $0x7c8] sm:$0xff] }
  0xdb   : > { %v628_v31 = vld [vmem:[%s6360_s22 + $0x828] sm:$0xff] }
  0xdc   : > { %1496 = vmatmul.mubr.f32.gmra.mrb[26].mxu0 %v6603_v54 }
  0xdd   : > { %1722 = vmatmul.mubr.f32.gmra.mrb[26].mxu1 %v6603_v54  ;;  %1501 = vmatprep.mubr.f32.mxu0 %v6609_v55  ;;  %v402_v54 = vld [vmem:[%s6360_s22 + $0x118] sm:$0xff] }
  0xde   : > { %1727 = vmatprep.mubr.f32.mxu1 %v6609_v55  ;;  %v414_v55 = vld [vmem:[%s6360_s22 + $0x178] sm:$0xff] }
  0xe0   : > { %1502 = vmatmul.mubr.f32.gmra.mrb[28].mxu0 %v6617_v56 }
  0xe1   : > { %1728 = vmatmul.mubr.f32.gmra.mrb[28].mxu1 %v6617_v56  ;;  %1507 = vmatprep.mubr.f32.mxu0 %v6623_v57  ;;  %v4894_v56 = vpack.c.bf16 %v389_v50, %v377_v45  ;;  %v495_v45 = vld [vmem:[%s6360_s22 + $0x400] sm:$0xff] }
  0xe2   : > { %1733 = vmatprep.mubr.f32.mxu1 %v6623_v57  ;;  %v399_v57 = vld [vmem:[%s6360_s22 + $0x100] sm:$0xff] }
  0xe3   : > { %v4820_v44 = vpack.c.bf16 %v411_v35, %v399_v57  ;;  %v507_v50 = vld [vmem:[%s6360_s22 + $0x460] sm:$0xff]  ;;  %v522_v57 = vld [vmem:[%s6360_s22 + $0x4d8] sm:$0xff] }
  0xe4   : > { %1508 = vmatmul.mubr.f32.gmra.mrb[30].mxu0 %v6631_v58  ;;  %v534_v35 = vld [vmem:[%s6360_s22 + $0x538] sm:$0xff] }
  0xe5   : > { %1734 = vmatmul.mubr.f32.gmra.mrb[30].mxu1 %v6631_v58  ;;  %1578 = vmatprep.mubr.f32.mxu0 %v6248_v1  ;;  %v4896_v58 = vpack.c.bf16 %v414_v55, %v402_v54  ;;  %v520_v54 = vld [vmem:[%s6360_s22 + $0x4c8] sm:$0xff]  ;;  %v4916_v43 = vpack.c.bf16 %v534_v35, %v522_v57 }
  0xe6   : > { %1804 = vmatprep.mubr.f32.mxu1 %v6248_v1  ;;  %v532_v55 = vld [vmem:[%s6360_s22 + $0x528] sm:$0xff] }
  0xe8   : > { %4440 = vmatmul.mubr.msk.f32.vlgmr.msra.gmra.mrb[16].mxu0 %vm887_vm3, %v6646_v2 }
  0xe9   : > { %4450 = vmatmul.mubr.msk.f32.vlgmr.msra.gmra.mrb[16].mxu1 %vm887_vm3, %v6646_v2  ;;  %4817 = vmatpush1.bf16.msra.mxu0 %v4816_v53  ;;  %v425_v2 = vld [vmem:[%s6360_s22 + $0x1d0] sm:$0xff]  ;;  %v4912_v53 = vpack.c.bf16 %v510_v30, %v498_v27 }
  0xea   : > { %4895 = vmatpush1.bf16.msra.mxu1 %v4894_v56  ;;  %1584 = vmatprep.mubr.f32.mxu0 %v6248_v1  ;;  %v4902_v9 = vpack.c.bf16 %v437_v62, %v425_v2  ;;  %v4836_v56 = vpack.c.bf16 %v507_v50, %v495_v45  ;;  %v555_v2 = vld [vmem:[%s6360_s22 + $0x5e0] sm:$0xff]  ;;  %v545_v62 = vld [vmem:[%s6360_s22 + $0x590] sm:$0xff] }
  0xeb   : > { %1810 = vmatprep.mubr.f32.mxu1 %v6248_v1  ;;  %4819 = vmatprep.subr.bf16.mxu0 %v4818_v36  ;;  %v615_v45 = vld [vmem:[%s6360_s22 + $0x7c0] sm:$0xff] }
  0xec   : > { %4897 = vmatprep.subr.bf16.mxu1 %v4896_v58  ;;  %4441 = vmatmul.mubr.msk.f32.gmra.mrb[18].mxu0 %vm887_vm3, %v6664_v16  ;;  %v4838_v58 = vpack.c.bf16 %v532_v55, %v520_v54  ;;  %v627_v50 = vld [vmem:[%s6360_s22 + $0x820] sm:$0xff]  ;;  %v642_v54 = vld [vmem:[%s6360_s22 + $0x898] sm:$0xff] }
  0xed   : > { %4451 = vmatmul.mubr.msk.f32.gmra.mrb[18].mxu1 %vm887_vm3, %v6664_v16  ;;  %4821 = vmatpush1.bf16.msra.mxu0 %v4820_v44  ;;  %v449_v16 = vld [vmem:[%s6360_s22 + $0x290] sm:$0xff]  ;;  %v544_v44 = vld [vmem:[%s6360_s22 + $0x588] sm:$0xff]  ;;  %v654_v55 = vld [vmem:[%s6360_s22 + $0x8f8] sm:$0xff] }
  0xee   : > { %4899 = vmatpush1.bf16.msra.mxu1 %v4898_v49  ;;  %1590 = vmatprep.mubr.f32.mxu0 %v6248_v1  ;;  %v4906_v22 = vpack.c.bf16 %v461_v14, %v449_v16  ;;  %v546_v49 = vld [vmem:[%s6360_s22 + $0x598] sm:$0xff]  ;;  %v579_v16 = vld [vmem:[%s6360_s22 + $0x6a0] sm:$0xff]  ;;  %v569_v14 = vld [vmem:[%s6360_s22 + $0x650] sm:$0xff] }
  0xef   : > { %1816 = vmatprep.mubr.f32.mxu1 %v6248_v1  ;;  %4823 = vmatprep.subr.bf16.mxu0 %v4822_v61  ;;  %v543_v61 = vld [vmem:[%s6360_s22 + $0x580] sm:$0xff] }
  0xf0   : > { %4901 = vmatprep.subr.bf16.mxu1 %v4900_v63  ;;  %4442 = vmatmul.mubr.msk.f32.gmra.mrb[20].mxu0 %vm887_vm3, %v6683_v33  ;;  %v4842_v63 = vpack.c.bf16 %v556_v46, %v544_v44  ;;  %v666_v44 = vld [vmem:[%s6360_s22 + $0x958] sm:$0xff] }
  0xf1   : > { %4452 = vmatmul.mubr.msk.f32.gmra.mrb[20].mxu1 %vm887_vm3, %v6683_v33  ;;  %4825 = vmatpush1.bf16.msra.mxu0 %v4824_v4  ;;  %v473_v33 = vld [vmem:[%s6360_s22 + $0x350] sm:$0xff]  ;;  %v4920_v4 = vpack.c.bf16 %v558_v59, %v546_v49  ;;  %v678_v46 = vld [vmem:[%s6360_s22 + $0x9b8] sm:$0xff] }
  0xf2   : > { %4903 = vmatpush1.bf16.msra.mxu1 %v4902_v9  ;;  %1596 = vmatprep.mubr.f32.mxu0 %v6248_v1  ;;  %v4910_v42 = vpack.c.bf16 %v485_v28, %v473_v33  ;;  %v4844_v9 = vpack.c.bf16 %v555_v2, %v543_v61  ;;  %v593_v33 = vld [vmem:[%s6360_s22 + $0x710] sm:$0xff]  ;;  %v675_v61 = vld [vmem:[%s6360_s22 + $0x9a0] sm:$0xff] }
  0xf3   : > { %1822 = vmatprep.mubr.f32.mxu1 %v6248_v1  ;;  %4827 = vmatprep.subr.bf16.mxu0 %v4826_v12  ;;  %v567_v12 = vld [vmem:[%s6360_s22 + $0x640] sm:$0xff]  ;;  %v665_v2 = vld [vmem:[%s6360_s22 + $0x950] sm:$0xff] }
  0xf4   : > { %4905 = vmatprep.subr.bf16.mxu1 %v4904_v15  ;;  %4443 = vmatmul.mubr.msk.f32.gmra.mrb[22].mxu0 %vm887_vm3, %v6702_v48  ;;  %v4924_v15 = vpack.c.bf16 %v582_v7, %v570_v5  ;;  %v4848_v13 = vpack.c.bf16 %v579_v16, %v567_v12  ;;  %v689_v12 = vld [vmem:[%s6360_s22 + $0xa10] sm:$0xff] }
  0xf5   : > { %4453 = vmatmul.mubr.msk.f32.gmra.mrb[22].mxu1 %vm887_vm3, %v6702_v48  ;;  %4829 = vmatpush1.bf16.msra.mxu0 %v4828_v20  ;;  %v497_v48 = vld [vmem:[%s6360_s22 + $0x410] sm:$0xff]  ;;  %v594_v20 = vld [vmem:[%s6360_s22 + $0x718] sm:$0xff] }
  0xf6   : > { %4907 = vmatpush1.bf16.msra.mxu1 %v4906_v22  ;;  %1602 = vmatprep.mubr.f32.mxu0 %v6248_v1  ;;  %v4914_v36 = vpack.c.bf16 %v509_v52, %v497_v48  ;;  %v4926_v22 = vpack.c.bf16 %v581_v17, %v569_v14  ;;  %v4928_v28 = vpack.c.bf16 %v606_v21, %v594_v20  ;;  %v629_v52 = vld [vmem:[%s6360_s22 + $0x830] sm:$0xff]  ;;  %v724_v17 = vld [vmem:[%s6360_s22 + $0xb28] sm:$0xff] }
  0xf7   : > { %1828 = vmatprep.mubr.f32.mxu1 %v6248_v1  ;;  %4831 = vmatprep.subr.bf16.mxu0 %v4830_v26  ;;  %v603_v26 = vld [vmem:[%s6360_s22 + $0x760] sm:$0xff]  ;;  %v701_v14 = vld [vmem:[%s6360_s22 + $0xa70] sm:$0xff] }
  0xf8   : > { %4909 = vmatprep.subr.bf16.mxu1 %v4908_v18  ;;  %4444 = vmatmul.mubr.msk.f32.gmra.mrb[24].mxu0 %vm887_vm3, %v6721_v8  ;;  %v605_v18 = vld [vmem:[%s6360_s22 + $0x770] sm:$0xff]  ;;  %v4852_v27 = vpack.c.bf16 %v603_v26, %v591_v25  ;;  %v4946_v21 = vpack.c.bf16 %v701_v14, %v689_v12  ;;  %v6049_v12 = vld [vmem:[%s10758_s0 + $0x18] sm:$0xff] }
  0xf9   : > { %4454 = vmatmul.mubr.msk.f32.gmra.mrb[24].mxu1 %vm887_vm3, %v6721_v8  ;;  %4833 = vmatpush1.bf16.msra.mxu0 %v4832_v34  ;;  %v521_v8 = vld [vmem:[%s6360_s22 + $0x4d0] sm:$0xff]  ;;  %v630_v34 = vld [vmem:[%s6360_s22 + $0x838] sm:$0xff]  ;;  %v4930_v30 = vpack.c.bf16 %v605_v18, %v593_v33  ;;  %v748_v18 = vld [vmem:[%s6360_s22 + $0xbe8] sm:$0xff] }
  0xfa   : > { %4911 = vmatpush1.bf16.msra.mxu1 %v4910_v42  ;;  %1608 = vmatprep.mubr.f32.mxu0 %v6248_v1  ;;  %v4918_v60 = vpack.c.bf16 %v533_v40, %v521_v8  ;;  %v4854_v42 = vpack.c.bf16 %v628_v31, %v616_v29  ;;  %v653_v8 = vld [vmem:[%s6360_s22 + $0x8f0] sm:$0xff]  ;;  %v664_v40 = vld [vmem:[%s6360_s22 + $0x948] sm:$0xff]  ;;  %v738_v29 = vld [vmem:[%s6360_s22 + $0xb98] sm:$0xff] }
  0xfb   : > { %1834 = vmatprep.mubr.f32.mxu1 %v6248_v1  ;;  %4835 = vmatprep.subr.bf16.mxu0 %v4834_v51  ;;  %v617_v51 = vld [vmem:[%s6360_s22 + $0x7d0] sm:$0xff]  ;;  %v4938_v49 = vpack.c.bf16 %v653_v8, %v641_v39  ;;  %v750_v31 = vld [vmem:[%s6360_s22 + $0xbf8] sm:$0xff]  ;;  %v796_v8 = vld [vmem:[%s6360_s22 + $0xd68] sm:$0xff] }
  0xfc   : > { %4913 = vmatprep.subr.bf16.mxu1 %v4912_v53  ;;  %4445 = vmatmul.mubr.msk.f32.gmra.mrb[26].mxu0 %vm887_vm3, %v6740_v24  ;;  %v640_v53 = vld [vmem:[%s6360_s22 + $0x888] sm:$0xff]  ;;  %v4934_v57 = vpack.c.bf16 %v629_v52, %v617_v51  ;;  %v713_v25 = vld [vmem:[%s6360_s22 + $0xad0] sm:$0xff] }
  0xfd   : > { %4455 = vmatmul.mubr.msk.f32.gmra.mrb[26].mxu1 %vm887_vm3, %v6740_v24  ;;  %4837 = vmatpush1.bf16.msra.mxu0 %v4836_v56  ;;  %v557_v24 = vld [vmem:[%s6360_s22 + $0x5f0] sm:$0xff]  ;;  %v4856_v56 = vpack.c.bf16 %v627_v50, %v615_v45  ;;  %v4952_v50 = vpack.c.bf16 %v750_v31, %v738_v29  ;;  %v772_v52 = vld [vmem:[%s6360_s22 + $0xca8] sm:$0xff] }
  0xfe   : > { %4915 = vmatpush1.bf16.msra.mxu1 %v4914_v36  ;;  %1614 = vmatprep.mubr.f32.mxu0 %v6248_v1  ;;  %v4922_v10 = vpack.c.bf16 %v557_v24, %v545_v62  ;;  %v639_v36 = vld [vmem:[%s6360_s22 + $0x880] sm:$0xff]  ;;  %v4940_v62 = vpack.c.bf16 %v678_v46, %v666_v44  ;;  %v688_v24 = vld [vmem:[%s6360_s22 + $0xa08] sm:$0xff]  ;;  %v725_v33 = vld [vmem:[%s6360_s22 + $0xb30] sm:$0xff] }
  0xff   : > { %1840 = vmatprep.mubr.f32.mxu1 %v6248_v1  ;;  %4839 = vmatprep.subr.bf16.mxu0 %v4838_v58  ;;  %v4936_v58 = vpack.c.bf16 %v654_v55, %v642_v54  ;;  %v737_v45 = vld [vmem:[%s6360_s22 + $0xb90] sm:$0xff]  ;;  %v798_v44 = vld [vmem:[%s6360_s22 + $0xd78] sm:$0xff]  ;;  %v6063_v31 = vld [vmem:[%s10758_s0 + $0x28] sm:$0xff] }
 0x100   : > { %4917 = vmatprep.subr.bf16.mxu1 %v4916_v43  ;;  %4446 = vmatmul.mubr.msk.f32.gmra.mrb[28].mxu0 %vm887_vm3, %v6759_v41  ;;  %v676_v43 = vld [vmem:[%s6360_s22 + $0x9a8] sm:$0xff]  ;;  %v749_v51 = vld [vmem:[%s6360_s22 + $0xbf0] sm:$0xff] }
 0x101   : > { %4456 = vmatmul.mubr.msk.f32.gmra.mrb[28].mxu1 %vm887_vm3, %v6759_v41  ;;  %4841 = vmatpush1.bf16.msra.mxu0 %v4840_v47  ;;  %v592_v41 = vld [vmem:[%s6360_s22 + $0x708] sm:$0xff]  ;;  %v4860_v47 = vpack.c.bf16 %v651_v37, %v639_v36  ;;  %v4862_v59 = vpack.c.bf16 %v676_v43, %v664_v40  ;;  %v4954_v55 = vpack.c.bf16 %v749_v51, %v737_v45  ;;  %v761_v37 = vld [vmem:[%s6360_s22 + $0xc50] sm:$0xff]  ;;  %v786_v43 = vld [vmem:[%s6360_s22 + $0xd18] sm:$0xff] }
 0x102   : > { %4919 = vmatpush1.bf16.msra.mxu1 %v4918_v60  ;;  %1620 = vmatprep.mubr.f32.mxu0 %v6248_v1  ;;  %v4850_v23 = vpack.c.bf16 %v604_v19, %v592_v41  ;;  %v663_v60 = vld [vmem:[%s6360_s22 + $0x940] sm:$0xff]  ;;  %v714_v41 = vld [vmem:[%s6360_s22 + $0xad8] sm:$0xff]  ;;  %v773_v39 = vld [vmem:[%s6360_s22 + $0xcb0] sm:$0xff] }
 0x103   : > { %1846 = vmatprep.mubr.f32.mxu1 %v6248_v1  ;;  %4843 = vmatprep.subr.bf16.mxu0 %v4842_v63  ;;  %v677_v63 = vld [vmem:[%s6360_s22 + $0x9b0] sm:$0xff]  ;;  %v4864_v5 = vpack.c.bf16 %v675_v61, %v663_v60  ;;  %v726_v19 = vld [vmem:[%s6360_s22 + $0xb38] sm:$0xff]  ;;  %v4958_v46 = vpack.c.bf16 %v773_v39, %v761_v37  ;;  %v6047_v61 = vld [vmem:[%s10758_s0] sm:$0xff] }
 0x104   : > { %4921 = vmatprep.subr.bf16.mxu1 %v4920_v4  ;;  %4447 = vmatmul.mubr.msk.f32.gmra.mrb[30].mxu0 %vm887_vm3, %v6780_v6  ;;  %v702_v4 = vld [vmem:[%s6360_s22 + $0xa78] sm:$0xff]  ;;  %v4942_v7 = vpack.c.bf16 %v677_v63, %v665_v2  ;;  %v4948_v26 = vpack.c.bf16 %v726_v19, %v714_v41  ;;  %v785_v60 = vld [vmem:[%s6360_s22 + $0xd10] sm:$0xff]  ;;  %v4960_v2 = vpack.c.bf16 %v798_v44, %v786_v43  ;;  %v808_v63 = vld [vmem:[%s6360_s22 + $0xdc8] sm:$0xff] }
 0x105   : > { %4457 = vmatmul.mubr.msk.f32.gmra.mrb[30].mxu1 %vm887_vm3, %v6780_v6  ;;  %4845 = vmatpush1.bf16.msra.mxu0 %v4844_v9  ;;  %v618_v6 = vld [vmem:[%s6360_s22 + $0x7d8] sm:$0xff]  ;;  %v4866_v9 = vpack.c.bf16 %v700_v0, %v688_v24  ;;  %v4944_v16 = vpack.c.bf16 %v702_v4, %v690_v3  ;;  %v820_v24 = vld [vmem:[%s6360_s22 + $0xe28] sm:$0xf]  ;;  %v6048_v4 = vld [vmem:[%s10758_s0 + $0x20] sm:$0xff] }
 0x106   : > { %4923 = vmatpush1.bf16.msra.mxu1 %v4922_v10  ;;  %4847 = vmatprep.subr.bf16.mxu0 %v4846_v11  ;;  %v4932_v48 = vpack.c.bf16 %v630_v34, %v618_v6  ;;  %v687_v10 = vld [vmem:[%s6360_s22 + $0xa00] sm:$0xff]  ;;  %v4950_v34 = vpack.c.bf16 %v725_v33, %v713_v25  ;;  %v810_v0 = vld [vmem:[%s6360_s22 + $0xdd8] sm:$0xff]  ;;  %v809_v14 = vld [vmem:[%s6360_s22 + $0xdd0] sm:$0xff] }
 0x107   : > { %4925 = vmatprep.subr.bf16.mxu1 %v4924_v15  ;;  %1917 = vmatprep.mubr.f32.mxu0 %v6805_v38  ;;  %v699_v11 = vld [vmem:[%s6360_s22 + $0xa60] sm:$0xff]  ;;  %v712_v15 = vld [vmem:[%s6360_s22 + $0xac8] sm:$0xff]  ;;  %v822_v3 = vld [vmem:[%s6360_s22 + $0xe38] sm:$0xf] }
 0x108   : > { %2143 = vmatprep.mubr.f32.mxu1 %v6805_v38  ;;  %v652_v38 = vld [vmem:[%s6360_s22 + $0x8e8] sm:$0xff]  ;;  %v4868_v20 = vpack.c.bf16 %v699_v11, %v687_v10  ;;  %v807_v10 = vld [vmem:[%s6360_s22 + $0xdc0] sm:$0xff]  ;;  %v6057_v25 = vld [vmem:[%s10758_s0 + $0x78] sm:$0xff] }
 0x109   : > { %4849 = vmatpush1.bf16.msra.mxu0 %v4848_v13  ;;  %v4858_v35 = vpack.c.bf16 %v652_v38, %v640_v53  ;;  %v4870_v13 = vpack.c.bf16 %v724_v17, %v712_v15  ;;  %v762_v53 = vld [vmem:[%s6360_s22 + $0xc58] sm:$0xff]  ;;  %v819_v11 = vld [vmem:[%s6360_s22 + $0xe20] sm:$0xf]  ;;  %v821_v15 = vld [vmem:[%s6360_s22 + $0xe30] sm:$0xf] }
 0x10a   : > { %4927 = vmatpush1.bf16.msra.mxu1 %v4926_v22  ;;  %4851 = vmatprep.subr.bf16.mxu0 %v4850_v23  ;;  %v711_v22 = vld [vmem:[%s6360_s22 + $0xac0] sm:$0xff]  ;;  %v774_v38 = vld [vmem:[%s6360_s22 + $0xcb8] sm:$0xff]  ;;  %v4889_v41 = vpack.c.bf16 %v819_v11, %v807_v10  ;;  %v4967_v19 = vpack.c.bf16 %v821_v15, %v809_v14  ;;  %v6059_v33 = vld [vmem:[%s10758_s0 + $0x90] sm:$0xff] }
 0x10b   : > { %4929 = vmatprep.subr.bf16.mxu1 %v4928_v28  ;;  %v723_v23 = vld [vmem:[%s6360_s22 + $0xb20] sm:$0xff]  ;;  %v736_v28 = vld [vmem:[%s6360_s22 + $0xb88] sm:$0xff]  ;;  %v4956_v36 = vpack.c.bf16 %v774_v38, %v762_v53  ;;  %v6050_v17 = vld [vmem:[%s10758_s0 + $0x38] sm:$0xff] }
 0x10c   : > { %v4872_v6 = vpack.c.bf16 %v723_v23, %v711_v22  ;;  %v6054_v22 = vld [vmem:[%s10758_s0 + $0x68] sm:$0xff]  ;;  %v6055_v23 = vld [vmem:[%s10758_s0 + $0x60] sm:$0xff]  ;;  %v6062_v29 = vld [vmem:[%s10758_s0 + $0x10] sm:$0xff] }
 0x10d   : > { %4853 = vmatpush1.bf16.msra.mxu0 %v4852_v27  ;;  %v4874_v27 = vpack.c.bf16 %v748_v18, %v736_v28  ;;  %v6060_v28 = vld [vmem:[%s10758_s0 + $0xb0] sm:$0xff]  ;;  %v6061_v18 = vld [vmem:[%s10758_s0 + $0xa8] sm:$0xff]  ;;  %v7215_v45 = vld [vmem:[%s7203_s9] sm:$0xff] }
 0x10e   : > { %4931 = vmatpush1.bf16.msra.mxu1 %v4930_v30  ;;  %4855 = vmatprep.subr.bf16.mxu0 %v4854_v42  ;;  %v735_v30 = vld [vmem:[%s6360_s22 + $0xb80] sm:$0xff] }
 0x10f   : > { %4933 = vmatprep.subr.bf16.mxu1 %v4932_v48  ;;  %v747_v42 = vld [vmem:[%s6360_s22 + $0xbe0] sm:$0xff]  ;;  %v760_v48 = vld [vmem:[%s6360_s22 + $0xc48] sm:$0xff] }
 0x110   : > { %v4876_v54 = vpack.c.bf16 %v747_v42, %v735_v30  ;;  %v6065_v30 = vld [vmem:[%s10758_s0 + $0x58] sm:$0xff]  ;;  %v6068_v44 = vld [vmem:[%s10758_s0 + $0xa0] sm:$0xff] }
 0x111   : > { %4857 = vmatpush1.bf16.msra.mxu0 %v4856_v56  ;;  %v4878_v56 = vpack.c.bf16 %v772_v52, %v760_v48  ;;  %v6066_v52 = vld [vmem:[%s10758_s0 + $0x70] sm:$0xff] }
 0x112   : > { %4935 = vmatpush1.bf16.msra.mxu1 %v4934_v57  ;;  %4859 = vmatprep.subr.bf16.mxu0 %v4858_v35  ;;  %v759_v57 = vld [vmem:[%s6360_s22 + $0xc40] sm:$0xff] }
 0x113   : > { %4937 = vmatprep.subr.bf16.mxu1 %v4936_v58  ;;  %v771_v35 = vld [vmem:[%s6360_s22 + $0xca0] sm:$0xff]  ;;  %v784_v58 = vld [vmem:[%s6360_s22 + $0xd08] sm:$0xff] }
 0x114   : > { %v4880_v40 = vpack.c.bf16 %v771_v35, %v759_v57  ;;  %v6067_v57 = vld [vmem:[%s10758_s0 + $0x88] sm:$0xff] }
 0x115   : > { %4861 = vmatpush1.bf16.msra.mxu0 %v4860_v47  ;;  %v4882_v47 = vpack.c.bf16 %v796_v8, %v784_v58 }
 0x116   : > { %4939 = vmatpush1.bf16.msra.mxu1 %v4938_v49  ;;  %4863 = vmatprep.subr.bf16.mxu0 %v4862_v59  ;;  %v783_v49 = vld [vmem:[%s6360_s22 + $0xd00] sm:$0xff] }
 0x117   : > { %4941 = vmatprep.subr.bf16.mxu1 %v4940_v62  ;;  %v795_v59 = vld [vmem:[%s6360_s22 + $0xd60] sm:$0xff]  ;;  %v797_v62 = vld [vmem:[%s6360_s22 + $0xd70] sm:$0xff]  ;;  %s341_s22 = scalar_lea.vmem %s10730_s5, %s5956_s20  ;;  %s9728_s20 = scalar_lea.vmem [#allocation3], %s4414_s16 }
 0x119   : > { %4865 = vmatpush1.bf16.msra.mxu0 %v4864_v5  ;;  %v4884_v5 = vpack.c.bf16 %v795_v59, %v783_v49 }
 0x11a   : > { %4943 = vmatpush1.bf16.msra.mxu1 %v4942_v7  ;;  %4867 = vmatprep.subr.bf16.mxu0 %v4866_v9  ;;  %v4962_v7 = vpack.c.bf16 %v797_v62, %v785_v60  ;;  %v4886_v9 = vpack.c.bf16 %v820_v24, %v808_v63  ;;  %v6069_v63 = vld [vmem:[%s10758_s0 + $0xb8] sm:$0xff] }
 0x11b   : > { %4945 = vmatprep.subr.bf16.mxu1 %v4944_v16  ;;  %v4964_v16 = vpack.c.bf16 %v822_v3, %v810_v0 }
 0x11d   : > { %4869 = vmatpush1.bf16.msra.mxu0 %v4868_v20  ;;  %v6051_v20 = vld [vmem:[%s10758_s0 + $0x30] sm:$0xff] }
 0x11e   : > { %4947 = vmatpush1.bf16.msra.mxu1 %v4946_v21  ;;  %4871 = vmatprep.subr.bf16.mxu0 %v4870_v13  ;;  %v6052_v21 = vld [vmem:[%s10758_s0 + $0x50] sm:$0xff]  ;;  %v6053_v13 = vld [vmem:[%s10758_s0 + $0x48] sm:$0xff] }
 0x11f   : > { %4949 = vmatprep.subr.bf16.mxu1 %v4948_v26  ;;  %v6058_v26 = vld [vmem:[%s10758_s0 + $0x98] sm:$0xff] }
 0x121   : > { %4873 = vmatpush1.bf16.msra.mxu0 %v4872_v6  ;;  %v827_v6 = vlaneseq }
 0x122   : > { %4951 = vmatpush1.bf16.msra.mxu1 %v4950_v34  ;;  %4875 = vmatprep.subr.bf16.mxu0 %v4874_v27  ;;  %v6064_v34 = vld [vmem:[%s10758_s0 + $0x40] sm:$0xff] }
 0x123   : > { %4953 = vmatprep.subr.bf16.mxu1 %v4952_v50  ;;  %v7193_v27 = vshrl.u32 %v827_v6, 7 }
 0x125   : > { %4877 = vmatpush1.bf16.msra.mxu0 %v4876_v54  ;;  %10762 = vst [vmem:[#allocation9_spill] sm:$0xff] %v7193_v27  ;;  %v7210_v42 = vsub.s32 0, %v7193_v27  ;;  %v7218_v50 = vsub.s32 2, %v7193_v27  ;;  %v7221_v51 = vsub.s32 1, %v7193_v27  ;;  %v7225_v48 = vsub.s32 3, %v7193_v27 }
 0x126   : > { %4955 = vmatpush1.bf16.msra.mxu1 %v4954_v55  ;;  %4879 = vmatprep.subr.bf16.mxu0 %v4878_v56 }
 0x127   : > { %4957 = vmatprep.subr.bf16.mxu1 %v4956_v36  ;;  %10763 = vst [vmem:[#allocation10_spill] sm:$0xff] %v7210_v42  ;;  %10764 = vst [vmem:[#allocation11_spill] sm:$0xff] %v7218_v50  ;;  %v7233_v53 = vrot.slane %v7215_v45, %v7210_v42  ;;  %v7239_v38 = vrot.slane %v7215_v45, %v7218_v50  ;;  %v7243_v54 = vrot.slane %v7215_v45, %v7221_v51 }
 0x128   : > { %1918 = vmatmul.mubr.f32.vlgmr.msra.gmra.mrb[32].mxu0 %v6047_v61  ;;  %10765 = vst [vmem:[#allocation12_spill] sm:$0xff] %v7221_v51  ;;  %10766 = vst [vmem:[#allocation13_spill] sm:$0xff] %v7225_v48  ;;  %v7248_v55 = vrot.slane %v7215_v45, %v7225_v48 }
 0x129   : > { %2144 = vmatmul.mubr.f32.vlgmr.msra.gmra.mrb[32].mxu1 %v6047_v61  ;;  %4881 = vmatpush1.bf16.msra.mxu0 %v4880_v40 }
 0x12a   : > { %4959 = vmatpush1.bf16.msra.mxu1 %v4958_v46  ;;  %1923 = vmatprep.mubr.f32.mxu0 %v6048_v4 }
 0x12b   : > { %2149 = vmatprep.mubr.f32.mxu1 %v6048_v4  ;;  %4883 = vmatprep.subr.bf16.mxu0 %v4882_v47 }
 0x12c   : > { %1924 = vmatmul.mubr.f32.gmra.mrb[34].mxu0 %v6049_v12  ;;  %4961 = vmatprep.subr.bf16.mxu1 %v4960_v2 }
 0x12d   : > { %2150 = vmatmul.mubr.f32.gmra.mrb[34].mxu1 %v6049_v12  ;;  %1929 = vmatprep.mubr.f32.mxu0 %v6050_v17 }
 0x12e   : > { %2155 = vmatprep.mubr.f32.mxu1 %v6050_v17  ;;  %4885 = vmatpush1.bf16.msra.mxu0 %v4884_v5 }
 0x12f   : > { %4963 = vmatpush1.bf16.msra.mxu1 %v4962_v7  ;;  %4888 = vmatprep.subr.msk.bf16.mxu0 %vm6534_vm2, %v4886_v9 }
 0x130   : > { %1930 = vmatmul.mubr.f32.gmra.mrb[36].mxu0 %v6051_v20  ;;  %4966 = vmatprep.subr.msk.bf16.mxu1 %vm6534_vm2, %v4964_v16 }
 0x131   : > { %2156 = vmatmul.mubr.f32.gmra.mrb[36].mxu1 %v6051_v20  ;;  %1935 = vmatprep.mubr.f32.mxu0 %v6052_v21 }
 0x132   : > { %2161 = vmatprep.mubr.f32.mxu1 %v6052_v21  ;;  %4891 = vmatpush1.bf16.msk.msra.mxu0 %vm6534_vm2, %v4889_v41 }
 0x133   : > { %4969 = vmatpush1.bf16.msk.msra.mxu1 %vm6534_vm2, %v4967_v19 }
 0x134   : > { %1936 = vmatmul.mubr.f32.gmra.mrb[38].mxu0 %v6053_v13 }
 0x135   : > { %2162 = vmatmul.mubr.f32.gmra.mrb[38].mxu1 %v6053_v13  ;;  %1941 = vmatprep.mubr.f32.mxu0 %v6054_v22 }
 0x136   : > { %2167 = vmatprep.mubr.f32.mxu1 %v6054_v22 }
 0x138   : > { %1942 = vmatmul.mubr.f32.gmra.mrb[40].mxu0 %v6055_v23 }
 0x139   : > { %2168 = vmatmul.mubr.f32.gmra.mrb[40].mxu1 %v6055_v23  ;;  %1947 = vmatprep.mubr.f32.mxu0 %v6056_v32 }
 0x13a   : > { %2173 = vmatprep.mubr.f32.mxu1 %v6056_v32 }
 0x13c   : > { %1948 = vmatmul.mubr.f32.gmra.mrb[42].mxu0 %v6057_v25 }
 0x13d   : > { %2174 = vmatmul.mubr.f32.gmra.mrb[42].mxu1 %v6057_v25  ;;  %1953 = vmatprep.mubr.f32.mxu0 %v6058_v26 }
 0x13e   : > { %2179 = vmatprep.mubr.f32.mxu1 %v6058_v26 }
 0x140   : > { %1954 = vmatmul.mubr.f32.gmra.mrb[44].mxu0 %v6059_v33 }
 0x141   : > { %2180 = vmatmul.mubr.f32.gmra.mrb[44].mxu1 %v6059_v33  ;;  %1959 = vmatprep.mubr.f32.mxu0 %v6060_v28 }
 0x142   : > { %2185 = vmatprep.mubr.f32.mxu1 %v6060_v28 }
 0x144   : > { %1960 = vmatmul.mubr.f32.gmra.mrb[46].mxu0 %v6061_v18 }
 0x145   : > { %2186 = vmatmul.mubr.f32.gmra.mrb[46].mxu1 %v6061_v18  ;;  %2030 = vmatprep.mubr.f32.mxu0 %v6248_v1 }
 0x146   : > { %2256 = vmatprep.mubr.f32.mxu1 %v6248_v1 }
 0x148   : > { %4460 = vmatmul.mubr.msk.f32.vlgmr.msra.gmra.mrb[32].mxu0 %vm887_vm3, %v6062_v29 }
 0x149   : > { %4470 = vmatmul.mubr.msk.f32.vlgmr.msra.gmra.mrb[32].mxu1 %vm887_vm3, %v6062_v29  ;;  %2036 = vmatprep.mubr.f32.mxu0 %v6248_v1 }
 0x14a   : > { %2262 = vmatprep.mubr.f32.mxu1 %v6248_v1 }
 0x14c   : > { %4461 = vmatmul.mubr.msk.f32.gmra.mrb[34].mxu0 %vm887_vm3, %v6063_v31 }
 0x14d   : > { %4471 = vmatmul.mubr.msk.f32.gmra.mrb[34].mxu1 %vm887_vm3, %v6063_v31  ;;  %2042 = vmatprep.mubr.f32.mxu0 %v6248_v1 }
 0x14e   : > { %2268 = vmatprep.mubr.f32.mxu1 %v6248_v1 }
 0x150   : > { %4462 = vmatmul.mubr.msk.f32.gmra.mrb[36].mxu0 %vm887_vm3, %v6064_v34 }
 0x151   : > { %4472 = vmatmul.mubr.msk.f32.gmra.mrb[36].mxu1 %vm887_vm3, %v6064_v34  ;;  %2048 = vmatprep.mubr.f32.mxu0 %v6248_v1 }
 0x152   : > { %2274 = vmatprep.mubr.f32.mxu1 %v6248_v1 }
 0x154   : > { %4463 = vmatmul.mubr.msk.f32.gmra.mrb[38].mxu0 %vm887_vm3, %v6065_v30 }
 0x155   : > { %4473 = vmatmul.mubr.msk.f32.gmra.mrb[38].mxu1 %vm887_vm3, %v6065_v30  ;;  %2054 = vmatprep.mubr.f32.mxu0 %v6248_v1 }
 0x156   : > { %2280 = vmatprep.mubr.f32.mxu1 %v6248_v1 }
 0x158   : > { %4464 = vmatmul.mubr.msk.f32.gmra.mrb[40].mxu0 %vm887_vm3, %v6066_v52 }
 0x159   : > { %4474 = vmatmul.mubr.msk.f32.gmra.mrb[40].mxu1 %vm887_vm3, %v6066_v52  ;;  %2060 = vmatprep.mubr.f32.mxu0 %v6248_v1 }
 0x15a   : > { %2286 = vmatprep.mubr.f32.mxu1 %v6248_v1 }
 0x15b   : > { %v1128_v56 = vpop.f32.mrb[0].mxu0 }
 0x15c   : > { %4465 = vmatmul.mubr.msk.f32.gmra.mrb[42].mxu0 %vm887_vm3, %v6067_v57  ;;  %v5738_v35 = vadd.f32 %v1128_v56, %v7233_v53  ;;  %v1354_v36 = vpop.f32.mrb[0].mxu1  ;;  %v1130_v37 = vpop.f32.mrb[1].mxu0 }
 0x15d   : > { %4475 = vmatmul.mubr.msk.f32.gmra.mrb[42].mxu1 %vm887_vm3, %v6067_v57  ;;  %v5754_v39 = vadd.f32 %v1354_v36, %v7239_v38  ;;  %v5739_v58 = vadd.f32 %v1130_v37, %v7243_v54  ;;  %v1356_v8 = vpop.f32.mrb[1].mxu1  ;;  %2066 = vmatprep.mubr.f32.mxu0 %v6248_v1 }
 0x15e   : > { %2305 = vst [vmem:[#allocation2] sm:$0xff] %v5738_v35  ;;  %v5755_v40 = vadd.f32 %v1356_v8, %v7248_v55  ;;  %2292 = vmatprep.mubr.f32.mxu1 %v6248_v1 }
 0x15f   : > { %2307 = vst [vmem:[#allocation2 + $0x10] sm:$0xff] %v5754_v39  ;;  %2306 = vst [vmem:[#allocation2 + $0x8] sm:$0xff] %v5739_v58  ;;  %v1134_v43 = vpop.f32.mrb[2].mxu0 }
 0x160   : > { %2308 = vst [vmem:[#allocation2 + $0x18] sm:$0xff] %v5755_v40  ;;  %4466 = vmatmul.mubr.msk.f32.gmra.mrb[44].mxu0 %vm887_vm3, %v6068_v44  ;;  %v5740_v46 = vadd.f32 %v1134_v43, %v7233_v53  ;;  %v1360_v47 = vpop.f32.mrb[2].mxu1  ;;  %v1136_v49 = vpop.f32.mrb[3].mxu0 }
 0x161   : > { %4476 = vmatmul.mubr.msk.f32.gmra.mrb[44].mxu1 %vm887_vm3, %v6068_v44  ;;  %v5756_v59 = vadd.f32 %v1360_v47, %v7239_v38  ;;  %v5741_v60 = vadd.f32 %v1136_v49, %v7243_v54  ;;  %v1362_v61 = vpop.f32.mrb[3].mxu1  ;;  %2072 = vmatprep.mubr.f32.mxu0 %v6248_v1  ;;  %v10736_v49 = vsub.s32 4, %v7193_v27 }
 0x162   : > { %2317 = vst [vmem:[#allocation2 + $0x60] sm:$0xff] %v5740_v46  ;;  %v5757_v2 = vadd.f32 %v1362_v61, %v7248_v55  ;;  %2298 = vmatprep.mubr.f32.mxu1 %v6248_v1 }
 0x163   : > { %2319 = vst [vmem:[#allocation2 + $0x70] sm:$0xff] %v5756_v59  ;;  %2318 = vst [vmem:[#allocation2 + $0x68] sm:$0xff] %v5741_v60  ;;  %v1140_v62 = vpop.f32.mrb[4].mxu0  ;;  %v10735_v59 = vsub.s32 6, %v7193_v27  ;;  %v10733_v60 = vsub.s32 7, %v7193_v27 }
 0x164   : > { %2320 = vst [vmem:[#allocation2 + $0x78] sm:$0xff] %v5757_v2  ;;  %4467 = vmatmul.mubr.msk.f32.gmra.mrb[46].mxu0 %vm887_vm3, %v6069_v63  ;;  %v5742_v24 = vadd.f32 %v1140_v62, %v7233_v53  ;;  %v1366_v0 = vpop.f32.mrb[4].mxu1  ;;  %v1142_v3 = vpop.f32.mrb[5].mxu0 }
 0x165   : > { %4477 = vmatmul.mubr.msk.f32.gmra.mrb[46].mxu1 %vm887_vm3, %v6069_v63  ;;  %v5758_v4 = vadd.f32 %v1366_v0, %v7239_v38  ;;  %v5743_v1 = vadd.f32 %v1142_v3, %v7243_v54  ;;  %v1368_v5 = vpop.f32.mrb[5].mxu1  ;;  %v7324_v61 = vrot.slane %v7215_v45, %v10733_v60  ;;  %v7339_v0 = vld [vmem:[%s341_s22 + $0x8] sm:$0xf]  ;;  %v7344_v3 = vld [vmem:[%s10769_s1] sm:$0xff]  ;;  %v7488_v60 = vld [vmem:[%s7329_s23 + $0x150] sm:$0xff] }
 0x166   : > { %2329 = vst [vmem:[#allocation2 + $0xc0] sm:$0xff] %v5742_v24  ;;  %v5759_v7 = vadd.f32 %v1368_v5, %v7248_v55  ;;  %v7337_v24 = vld [vmem:[%s341_s22] sm:$0xff]  ;;  %10768 = vst [vmem:[#allocation15_spill] sm:$0xff] %v7339_v0  ;;  %v7504_v0 = vld [vmem:[%s7329_s23 + $0x178] sm:$0xff] }
 0x167   : > { %2331 = vst [vmem:[#allocation2 + $0xd0] sm:$0xff] %v5758_v4  ;;  %2330 = vst [vmem:[#allocation2 + $0xc8] sm:$0xff] %v5743_v1  ;;  %v1146_v9 = vpop.f32.mrb[6].mxu0 }
 0x168   : > { %2332 = vst [vmem:[#allocation2 + $0xd8] sm:$0xff] %v5759_v7  ;;  %v5744_v10 = vadd.f32 %v1146_v9, %v7233_v53  ;;  %v1372_v11 = vpop.f32.mrb[6].mxu1  ;;  %v1148_v12 = vpop.f32.mrb[7].mxu0  ;;  %10767 = vst [vmem:[#allocation14_spill] sm:$0xff] %v7337_v24  ;;  %v7349_v7 = vld [vmem:[%s7329_s23] sm:$0xff]  ;;  %v7352_v9 = vld [vmem:[%s7329_s23 + $0x8] sm:$0xff] }
 0x169   : > { %v5760_v16 = vadd.f32 %v1372_v11, %v7239_v38  ;;  %v5745_v14 = vadd.f32 %v1148_v12, %v7243_v54  ;;  %v1374_v15 = vpop.f32.mrb[7].mxu1  ;;  %10770 = vst [vmem:[#allocation16_spill] sm:$0xff] %v7344_v3  ;;  %10771 = vst [vmem:[#allocation17_spill] sm:$0xff] %v7349_v7  ;;  %v7359_v12 = vld [vmem:[%s7329_s23 + $0x18] sm:$0xff]  ;;  %v7509_v3 = vld [vmem:[%s7329_s23 + $0x180] sm:$0xff] }
 0x16a   : > { %2341 = vst [vmem:[#allocation2 + $0x120] sm:$0xff] %v5744_v10  ;;  %v5761_v17 = vadd.f32 %v1374_v15, %v7248_v55  ;;  %10772 = vst [vmem:[#allocation18_spill] sm:$0xff] %v7352_v9  ;;  %v7355_v10 = vld [vmem:[%s7329_s23 + $0x10] sm:$0xff] }
 0x16b   : > { %2343 = vst [vmem:[#allocation2 + $0x130] sm:$0xff] %v5760_v16  ;;  %2342 = vst [vmem:[#allocation2 + $0x128] sm:$0xff] %v5745_v14  ;;  %v1152_v41 = vpop.f32.mrb[8].mxu0  ;;  %v7362_v16 = vld [vmem:[%s7329_s23 + $0x20] sm:$0xff]  ;;  %v7365_v14 = vld [vmem:[%s7329_s23 + $0x28] sm:$0xff] }
 0x16c   : > { %2344 = vst [vmem:[#allocation2 + $0x138] sm:$0xff] %v5761_v17  ;;  %v5746_v19 = vadd.f32 %v1152_v41, %v7233_v53  ;;  %v1378_v20 = vpop.f32.mrb[8].mxu1  ;;  %v1154_v21 = vpop.f32.mrb[9].mxu0  ;;  %10773 = vst [vmem:[#allocation19_spill] sm:$0xff] %v7355_v10  ;;  %v7368_v17 = vld [vmem:[%s7329_s23 + $0x30] sm:$0xff]  ;;  %v7371_v41 = vld [vmem:[%s7329_s23 + $0x38] sm:$0xff] }
 0x16d   : > { %v5762_v13 = vadd.f32 %v1378_v20, %v7239_v38  ;;  %v5747_v22 = vadd.f32 %v1154_v21, %v7243_v54  ;;  %v1380_v23 = vpop.f32.mrb[9].mxu1  ;;  %10774 = vst [vmem:[#allocation20_spill] sm:$0xff] %v7359_v12  ;;  %10775 = vst [vmem:[#allocation21_spill] sm:$0xff] %v7362_v16  ;;  %v7831_v16 = vld [vmem:[%s7329_s23 + $0x4b8] sm:$0xff] }
 0x16e   : > { %2353 = vst [vmem:[#allocation2 + $0x180] sm:$0xff] %v5746_v19  ;;  %v5763_v32 = vadd.f32 %v1380_v23, %v7248_v55  ;;  %10776 = vst [vmem:[#allocation22_spill] sm:$0xff] %v7365_v14  ;;  %v7374_v19 = vld [vmem:[%s7329_s23 + $0x40] sm:$0xff]  ;;  %v7381_v23 = vld [vmem:[%s7329_s23 + $0x50] sm:$0xff] }
 0x16f   : > { %2355 = vst [vmem:[#allocation2 + $0x190] sm:$0xff] %v5762_v13  ;;  %2354 = vst [vmem:[#allocation2 + $0x188] sm:$0xff] %v5747_v22  ;;  %v1158_v25 = vpop.f32.mrb[10].mxu0  ;;  %v7378_v22 = vld [vmem:[%s7329_s23 + $0x48] sm:$0xff]  ;;  %v7867_v14 = vld [vmem:[%s7329_s23 + $0x518] sm:$0xff] }
 0x170   : > { %2356 = vst [vmem:[#allocation2 + $0x198] sm:$0xff] %v5763_v32  ;;  %v5748_v26 = vadd.f32 %v1158_v25, %v7233_v53  ;;  %v1384_v33 = vpop.f32.mrb[10].mxu1  ;;  %v1160_v28 = vpop.f32.mrb[11].mxu0  ;;  %10777 = vst [vmem:[#allocation23_spill] sm:$0xff] %v7368_v17  ;;  %v7384_v32 = vld [vmem:[%s7329_s23 + $0x58] sm:$0xff]  ;;  %v7801_v17 = vld [vmem:[%s7329_s23 + $0x468] sm:$0xff] }
 0x171   : > { %v5764_v18 = vadd.f32 %v1384_v33, %v7239_v38  ;;  %v5749_v29 = vadd.f32 %v1160_v28, %v7243_v54  ;;  %v1386_v31 = vpop.f32.mrb[11].mxu1  ;;  %10778 = vst [vmem:[#allocation24_spill] sm:$0xff] %v7371_v41  ;;  %10779 = vst [vmem:[#allocation25_spill] sm:$0xff] %v7374_v19  ;;  %v7389_v28 = vld [vmem:[%s7329_s23 + $0x60] sm:$0xff]  ;;  %v7555_v19 = vld [vmem:[%s7329_s23 + $0x1f0] sm:$0xff] }
 0x172   : > { %2365 = vst [vmem:[#allocation2 + $0x1e0] sm:$0xff] %v5748_v26  ;;  %v5765_v6 = vadd.f32 %v1386_v31, %v7248_v55  ;;  %10780 = vst [vmem:[#allocation26_spill] sm:$0xff] %v7378_v22  ;;  %v7837_v41 = vld [vmem:[%s7329_s23 + $0x4c8] sm:$0xff] }
 0x173   : > { %2367 = vst [vmem:[#allocation2 + $0x1f0] sm:$0xff] %v5764_v18  ;;  %2366 = vst [vmem:[#allocation2 + $0x1e8] sm:$0xff] %v5749_v29  ;;  %v1164_v34 = vpop.f32.mrb[12].mxu0  ;;  %v7392_v18 = vld [vmem:[%s7329_s23 + $0x68] sm:$0xff]  ;;  %v7395_v29 = vld [vmem:[%s7329_s23 + $0x70] sm:$0xff] }
 0x174   : > { %2368 = vst [vmem:[#allocation2 + $0x1f8] sm:$0xff] %v5765_v6  ;;  %v5750_v30 = vadd.f32 %v1164_v34, %v7233_v53  ;;  %v1390_v52 = vpop.f32.mrb[12].mxu1  ;;  %v1166_v56 = vpop.f32.mrb[13].mxu0  ;;  %10781 = vst [vmem:[#allocation27_spill] sm:$0xff] %v7381_v23  ;;  %v7399_v6 = vld [vmem:[%s7329_s23 + $0x78] sm:$0xff]  ;;  %v7402_v34 = vld [vmem:[%s7329_s23 + $0x80] sm:$0xff] }
 0x175   : > { %v5766_v57 = vadd.f32 %v1390_v52, %v7239_v38  ;;  %v5751_v35 = vadd.f32 %v1166_v56, %v7243_v54  ;;  %v1392_v36 = vpop.f32.mrb[13].mxu1  ;;  %10782 = vst [vmem:[#allocation28_spill] sm:$0xff] %v7384_v32  ;;  %10783 = vst [vmem:[#allocation29_spill] sm:$0xff] %v7389_v28  ;;  %v7408_v56 = vld [vmem:[%s7329_s23 + $0x90] sm:$0xff]  ;;  %v7571_v32 = vld [vmem:[%s7329_s23 + $0x218] sm:$0xff] }
 0x176   : > { %2377 = vst [vmem:[#allocation2 + $0x240] sm:$0xff] %v5750_v30  ;;  %v5767_v37 = vadd.f32 %v1392_v36, %v7248_v55  ;;  %10784 = vst [vmem:[#allocation30_spill] sm:$0xff] %v7392_v18  ;;  %v7405_v30 = vld [vmem:[%s7329_s23 + $0x88] sm:$0xff] }
 0x177   : > { %2379 = vst [vmem:[#allocation2 + $0x250] sm:$0xff] %v5766_v57  ;;  %2378 = vst [vmem:[#allocation2 + $0x248] sm:$0xff] %v5751_v35  ;;  %v1170_v39 = vpop.f32.mrb[14].mxu0  ;;  %v7411_v57 = vld [vmem:[%s7329_s23 + $0x98] sm:$0xff]  ;;  %v7414_v35 = vld [vmem:[%s7329_s23 + $0xa0] sm:$0xff] }
 0x178   : > { %2380 = vst [vmem:[#allocation2 + $0x258] sm:$0xff] %v5767_v37  ;;  %v5752_v58 = vadd.f32 %v1170_v39, %v7233_v53  ;;  %v1396_v8 = vpop.f32.mrb[14].mxu1  ;;  %v1172_v40 = vpop.f32.mrb[15].mxu0  ;;  %v10734_v53 = vsub.s32 5, %v7193_v27  ;;  %10785 = vst [vmem:[#allocation31_spill] sm:$0xff] %v7395_v29 }
 0x179   : > { %v5768_v43 = vadd.f32 %v1396_v8, %v7239_v38  ;;  %v5753_v44 = vadd.f32 %v1172_v40, %v7243_v54  ;;  %v1398_v46 = vpop.f32.mrb[15].mxu1  ;;  %v7308_v38 = vrot.slane %v7215_v45, %v10736_v49  ;;  %v7313_v54 = vrot.slane %v7215_v45, %v10735_v59  ;;  %10786 = vst [vmem:[#allocation32_spill] sm:$0xff] %v7399_v6  ;;  %v7421_v8 = vld [vmem:[%s7329_s23 + $0xb0] sm:$0xff]  ;;  %v7424_v40 = vld [vmem:[%s7329_s23 + $0xb8] sm:$0xff] }
 0x17a   : > { %2389 = vst [vmem:[#allocation2 + $0x2a0] sm:$0xff] %v5752_v58  ;;  %v5769_v47 = vadd.f32 %v1398_v46, %v7248_v55  ;;  %v7318_v55 = vrot.slane %v7215_v45, %v10734_v53  ;;  %10787 = vst [vmem:[#allocation33_spill] sm:$0xff] %v7402_v34  ;;  %v7418_v58 = vld [vmem:[%s7329_s23 + $0xa8] sm:$0xff]  ;;  %v7491_v53 = vld [vmem:[%s7329_s23 + $0x158] sm:$0xff] }
 0x17b   : > { %2391 = vst [vmem:[#allocation2 + $0x2b0] sm:$0xff] %v5768_v43  ;;  %2390 = vst [vmem:[#allocation2 + $0x2a8] sm:$0xff] %v5753_v44  ;;  %v7804_v34 = vld [vmem:[%s7329_s23 + $0x470] sm:$0xff] }
 0x17c   : > { %2392 = vst [vmem:[#allocation2 + $0x2b8] sm:$0xff] %v5769_v47  ;;  %10788 = vst [vmem:[#allocation34_spill] sm:$0xff] %v7405_v30  ;;  %v7429_v47 = vld [vmem:[%s7329_s23 + $0xc0] sm:$0xff]  ;;  %v7840_v30 = vld [vmem:[%s7329_s23 + $0x4d0] sm:$0xff] }
 0x17d   : > { %10789 = vst [vmem:[#allocation35_spill] sm:$0xff] %v7408_v56  ;;  %10790 = vst [vmem:[#allocation36_spill] sm:$0xff] %v7411_v57  ;;  %v7798_v56 = vld [vmem:[%s7329_s23 + $0x460] sm:$0xff] }
 0x17e   : > { %10791 = vst [vmem:[#allocation37_spill] sm:$0xff] %v7414_v35  ;;  %10792 = vst [vmem:[#allocation38_spill] sm:$0xff] %v7418_v58  ;;  %v7549_v35 = vld [vmem:[%s7329_s23 + $0x1e0] sm:$0xff] }
 0x17f   : > { %10793 = vst [vmem:[#allocation39_spill] sm:$0xff] %v7421_v8  ;;  %10794 = vst [vmem:[#allocation40_spill] sm:$0xff] %v7424_v40  ;;  %v7544_v8 = vld [vmem:[%s7329_s23 + $0x1d8] sm:$0xff]  ;;  %v7568_v40 = vld [vmem:[%s7329_s23 + $0x210] sm:$0xff] }
 0x180   : > { %10806 = vst [vmem:[#allocation52_spill] sm:$0xff] %v7488_v60  ;;  %10807 = vst [vmem:[#allocation53_spill] sm:$0xff] %v7491_v53  ;;  %v7726_v60 = vld [vmem:[%s7329_s23 + $0x3a0] sm:$0xff] }
 0x181   : > { %10811 = vst [vmem:[#allocation57_spill] sm:$0xff] %v7504_v0  ;;  %10812 = vst [vmem:[#allocation58_spill] sm:$0xff] %v7509_v3  ;;  %v7528_v0 = vld [vmem:[%s7329_s23 + $0x1b0] sm:$0xff]  ;;  %v7762_v53 = vld [vmem:[%s7329_s23 + $0x400] sm:$0xff] }
 0x182   : > { %10817 = vst [vmem:[#allocation63_spill] sm:$0xff] %v7528_v0  ;;  %10822 = vst [vmem:[#allocation68_spill] sm:$0xff] %v7544_v8  ;;  %v7559_v8 = vld [vmem:[%s7329_s23 + $0x1f8] sm:$0xff]  ;;  %v7834_v57 = vld [vmem:[%s7329_s23 + $0x4c0] sm:$0xff] }
 0x183   : > { %10823 = vst [vmem:[#allocation69_spill] sm:$0xff] %v7555_v19  ;;  %10824 = vst [vmem:[#allocation70_spill] sm:$0xff] %v7559_v8  ;;  %v7584_v0 = vld [vmem:[%s7329_s23 + $0x238] sm:$0xff] }
 0x184   : > { %10827 = vst [vmem:[#allocation73_spill] sm:$0xff] %v7568_v40  ;;  %10828 = vst [vmem:[#allocation74_spill] sm:$0xff] %v7571_v32  ;;  %v7608_v32 = vld [vmem:[%s7329_s23 + $0x270] sm:$0xff] }
 0x185   : > { %10832 = vst [vmem:[#allocation78_spill] sm:$0xff] %v7584_v0  ;;  %v7599_v0 = vld [vmem:[%s7329_s23 + $0x258] sm:$0xff]  ;;  %10839 = vst [vmem:[#allocation85_spill] sm:$0xff] %v7608_v32 }
 0x186   : > { %10836 = vst [vmem:[#allocation82_spill] sm:$0xff] %v7599_v0  ;;  %10867 = vst [vmem:[#allocation113_spill] sm:$0xff] %v7726_v60  ;;  %v7747_v60 = vld [vmem:[%s7329_s23 + $0x3d8] sm:$0xff] }
 0x187   : > { %10876 = vst [vmem:[#allocation122_spill] sm:$0xff] %v7762_v53  ;;  %v7783_v53 = vld [vmem:[%s7329_s23 + $0x438] sm:$0xff]  ;;  %10887 = vst [vmem:[#allocation133_spill] sm:$0xff] %v7798_v56 }
 0x188   : > { %10888 = vst [vmem:[#allocation134_spill] sm:$0xff] %v7801_v17  ;;  %10889 = vst [vmem:[#allocation135_spill] sm:$0xff] %v7804_v34  ;;  %v7819_v56 = vld [vmem:[%s7329_s23 + $0x498] sm:$0xff]  ;;  %v7822_v17 = vld [vmem:[%s7329_s23 + $0x4a0] sm:$0xff] }
 0x189   : > { %10894 = vst [vmem:[#allocation140_spill] sm:$0xff] %v7819_v56  ;;  %10895 = vst [vmem:[#allocation141_spill] sm:$0xff] %v7822_v17  ;;  %v7825_v34 = vld [vmem:[%s7329_s23 + $0x4a8] sm:$0xff]  ;;  %v7843_v17 = vld [vmem:[%s7329_s23 + $0x4d8] sm:$0xff] }
 0x18a   : > { %10896 = vst [vmem:[#allocation142_spill] sm:$0xff] %v7825_v34  ;;  %10898 = vst [vmem:[#allocation144_spill] sm:$0xff] %v7831_v16  ;;  %v7846_v34 = vld [vmem:[%s7329_s23 + $0x4e0] sm:$0xff]  ;;  %v7852_v16 = vld [vmem:[%s7329_s23 + $0x4f0] sm:$0xff] }
 0x18b   : > { %10899 = vst [vmem:[#allocation145_spill] sm:$0xff] %v7834_v57  ;;  %10900 = vst [vmem:[#allocation146_spill] sm:$0xff] %v7837_v41  ;;  %v7855_v57 = vld [vmem:[%s7329_s23 + $0x4f8] sm:$0xff]  ;;  %v7858_v41 = vld [vmem:[%s7329_s23 + $0x500] sm:$0xff] }
 0x18c   : > { %10901 = vst [vmem:[#allocation147_spill] sm:$0xff] %v7840_v30  ;;  %10902 = vst [vmem:[#allocation148_spill] sm:$0xff] %v7843_v17  ;;  %v7861_v30 = vld [vmem:[%s7329_s23 + $0x508] sm:$0xff]  ;;  %v7864_v17 = vld [vmem:[%s7329_s23 + $0x510] sm:$0xff] }
 0x18d   : > { %10903 = vst [vmem:[#allocation149_spill] sm:$0xff] %v7846_v34  ;;  %10905 = vst [vmem:[#allocation151_spill] sm:$0xff] %v7852_v16  ;;  %v7873_v16 = vld [vmem:[%s7329_s23 + $0x528] sm:$0xff]  ;;  %v7876_v34 = vld [vmem:[%s7329_s23 + $0x530] sm:$0xff] }
 0x18e   : > { %10906 = vst [vmem:[#allocation152_spill] sm:$0xff] %v7855_v57  ;;  %10907 = vst [vmem:[#allocation153_spill] sm:$0xff] %v7858_v41  ;;  %v7879_v41 = vld [vmem:[%s7329_s23 + $0x538] sm:$0xff]  ;;  %v8237_v56 = vld [vmem:[%s7329_s23 + $0x8d0] sm:$0xff] }
 0x18f   : > { %10908 = vst [vmem:[#allocation154_spill] sm:$0xff] %v7861_v30  ;;  %10909 = vst [vmem:[#allocation155_spill] sm:$0xff] %v7864_v17  ;;  %v7882_v30 = vld [vmem:[%s7329_s23 + $0x540] sm:$0xff]  ;;  %v7885_v17 = vld [vmem:[%s7329_s23 + $0x548] sm:$0xff] }
 0x190   : > { %10910 = vst [vmem:[#allocation156_spill] sm:$0xff] %v7867_v14  ;;  %10912 = vst [vmem:[#allocation158_spill] sm:$0xff] %v7873_v16  ;;  %v7888_v14 = vld [vmem:[%s7329_s23 + $0x550] sm:$0xff]  ;;  %v7894_v16 = vld [vmem:[%s7329_s23 + $0x560] sm:$0xff] }
 0x191   : > { %10913 = vst [vmem:[#allocation159_spill] sm:$0xff] %v7876_v34  ;;  %10914 = vst [vmem:[#allocation160_spill] sm:$0xff] %v7879_v41  ;;  %v7897_v34 = vld [vmem:[%s7329_s23 + $0x568] sm:$0xff]  ;;  %v7900_v41 = vld [vmem:[%s7329_s23 + $0x570] sm:$0xff] }
 0x192   : > { %10915 = vst [vmem:[#allocation161_spill] sm:$0xff] %v7882_v30  ;;  %10916 = vst [vmem:[#allocation162_spill] sm:$0xff] %v7885_v17  ;;  %v7903_v30 = vld [vmem:[%s7329_s23 + $0x578] sm:$0xff]  ;;  %v7906_v17 = vld [vmem:[%s7329_s23 + $0x580] sm:$0xff] }
 0x193   : > { %10917 = vst [vmem:[#allocation163_spill] sm:$0xff] %v7888_v14  ;;  %10919 = vst [vmem:[#allocation165_spill] sm:$0xff] %v7894_v16  ;;  %v7909_v14 = vld [vmem:[%s7329_s23 + $0x588] sm:$0xff]  ;;  %v7915_v16 = vld [vmem:[%s7329_s23 + $0x598] sm:$0xff] }
 0x194   : > { %10920 = vst [vmem:[#allocation166_spill] sm:$0xff] %v7897_v34  ;;  %10921 = vst [vmem:[#allocation167_spill] sm:$0xff] %v7900_v41  ;;  %v7918_v34 = vld [vmem:[%s7329_s23 + $0x5a0] sm:$0xff]  ;;  %v7921_v41 = vld [vmem:[%s7329_s23 + $0x5a8] sm:$0xff] }
 0x195   : > { %10922 = vst [vmem:[#allocation168_spill] sm:$0xff] %v7903_v30  ;;  %10923 = vst [vmem:[#allocation169_spill] sm:$0xff] %v7906_v17  ;;  %v7924_v30 = vld [vmem:[%s7329_s23 + $0x5b0] sm:$0xff]  ;;  %v7927_v17 = vld [vmem:[%s7329_s23 + $0x5b8] sm:$0xff] }
 0x196   : > { %10924 = vst [vmem:[#allocation170_spill] sm:$0xff] %v7909_v14  ;;  %10926 = vst [vmem:[#allocation172_spill] sm:$0xff] %v7915_v16  ;;  %v7930_v14 = vld [vmem:[%s7329_s23 + $0x5c0] sm:$0xff]  ;;  %v7936_v16 = vld [vmem:[%s7329_s23 + $0x5d0] sm:$0xff] }
 0x197   : > { %10927 = vst [vmem:[#allocation173_spill] sm:$0xff] %v7918_v34  ;;  %10928 = vst [vmem:[#allocation174_spill] sm:$0xff] %v7921_v41  ;;  %v7939_v34 = vld [vmem:[%s7329_s23 + $0x5d8] sm:$0xff]  ;;  %v7942_v41 = vld [vmem:[%s7329_s23 + $0x5e0] sm:$0xff] }
 0x198   : > { %10929 = vst [vmem:[#allocation175_spill] sm:$0xff] %v7924_v30  ;;  %10930 = vst [vmem:[#allocation176_spill] sm:$0xff] %v7927_v17  ;;  %v7945_v30 = vld [vmem:[%s7329_s23 + $0x5e8] sm:$0xff]  ;;  %v7948_v17 = vld [vmem:[%s7329_s23 + $0x5f0] sm:$0xff] }
 0x199   : > { %10931 = vst [vmem:[#allocation177_spill] sm:$0xff] %v7930_v14  ;;  %10933 = vst [vmem:[#allocation179_spill] sm:$0xff] %v7936_v16  ;;  %v7951_v14 = vld [vmem:[%s7329_s23 + $0x5f8] sm:$0xff]  ;;  %v7957_v16 = vld [vmem:[%s7329_s23 + $0x608] sm:$0xff] }
 0x19a   : > { %10934 = vst [vmem:[#allocation180_spill] sm:$0xff] %v7939_v34  ;;  %10935 = vst [vmem:[#allocation181_spill] sm:$0xff] %v7942_v41  ;;  %v7960_v34 = vld [vmem:[%s7329_s23 + $0x610] sm:$0xff]  ;;  %v7963_v41 = vld [vmem:[%s7329_s23 + $0x618] sm:$0xff] }
 0x19b   : > { %10936 = vst [vmem:[#allocation182_spill] sm:$0xff] %v7945_v30  ;;  %10937 = vst [vmem:[#allocation183_spill] sm:$0xff] %v7948_v17  ;;  %v7966_v30 = vld [vmem:[%s7329_s23 + $0x620] sm:$0xff]  ;;  %v7969_v17 = vld [vmem:[%s7329_s23 + $0x628] sm:$0xff] }
 0x19c   : > { %10938 = vst [vmem:[#allocation184_spill] sm:$0xff] %v7951_v14  ;;  %10940 = vst [vmem:[#allocation186_spill] sm:$0xff] %v7957_v16  ;;  %v7972_v14 = vld [vmem:[%s7329_s23 + $0x630] sm:$0xff]  ;;  %v7978_v16 = vld [vmem:[%s7329_s23 + $0x640] sm:$0xff] }
 0x19d   : > { %10941 = vst [vmem:[#allocation187_spill] sm:$0xff] %v7960_v34  ;;  %10942 = vst [vmem:[#allocation188_spill] sm:$0xff] %v7963_v41  ;;  %v7981_v34 = vld [vmem:[%s7329_s23 + $0x648] sm:$0xff]  ;;  %v7984_v41 = vld [vmem:[%s7329_s23 + $0x650] sm:$0xff] }
 0x19e   : > { %10943 = vst [vmem:[#allocation189_spill] sm:$0xff] %v7966_v30  ;;  %10944 = vst [vmem:[#allocation190_spill] sm:$0xff] %v7969_v17  ;;  %v7987_v30 = vld [vmem:[%s7329_s23 + $0x658] sm:$0xff]  ;;  %v7990_v17 = vld [vmem:[%s7329_s23 + $0x660] sm:$0xff] }
 0x19f   : > { %10945 = vst [vmem:[#allocation191_spill] sm:$0xff] %v7972_v14  ;;  %10947 = vst [vmem:[#allocation193_spill] sm:$0xff] %v7978_v16  ;;  %v7993_v14 = vld [vmem:[%s7329_s23 + $0x668] sm:$0xff]  ;;  %v7999_v16 = vld [vmem:[%s7329_s23 + $0x678] sm:$0xff] }
 0x1a0   : > { %10948 = vst [vmem:[#allocation194_spill] sm:$0xff] %v7981_v34  ;;  %10949 = vst [vmem:[#allocation195_spill] sm:$0xff] %v7984_v41  ;;  %v8002_v34 = vld [vmem:[%s7329_s23 + $0x680] sm:$0xff]  ;;  %v8005_v41 = vld [vmem:[%s7329_s23 + $0x688] sm:$0xff] }
 0x1a1   : > { %10950 = vst [vmem:[#allocation196_spill] sm:$0xff] %v7987_v30  ;;  %10951 = vst [vmem:[#allocation197_spill] sm:$0xff] %v7990_v17  ;;  %v8008_v30 = vld [vmem:[%s7329_s23 + $0x690] sm:$0xff]  ;;  %v8011_v17 = vld [vmem:[%s7329_s23 + $0x698] sm:$0xff] }
 0x1a2   : > { %10952 = vst [vmem:[#allocation198_spill] sm:$0xff] %v7993_v14  ;;  %10954 = vst [vmem:[#allocation200_spill] sm:$0xff] %v7999_v16  ;;  %v8014_v14 = vld [vmem:[%s7329_s23 + $0x6a0] sm:$0xff]  ;;  %v8020_v16 = vld [vmem:[%s7329_s23 + $0x6b0] sm:$0xff] }
 0x1a3   : > { %10955 = vst [vmem:[#allocation201_spill] sm:$0xff] %v8002_v34  ;;  %10956 = vst [vmem:[#allocation202_spill] sm:$0xff] %v8005_v41  ;;  %v8023_v34 = vld [vmem:[%s7329_s23 + $0x6b8] sm:$0xff]  ;;  %v8026_v41 = vld [vmem:[%s7329_s23 + $0x6c0] sm:$0xff] }
 0x1a4   : > { %10957 = vst [vmem:[#allocation203_spill] sm:$0xff] %v8008_v30  ;;  %10958 = vst [vmem:[#allocation204_spill] sm:$0xff] %v8011_v17  ;;  %v8029_v30 = vld [vmem:[%s7329_s23 + $0x6c8] sm:$0xff]  ;;  %v8032_v17 = vld [vmem:[%s7329_s23 + $0x6d0] sm:$0xff] }
 0x1a5   : > { %10959 = vst [vmem:[#allocation205_spill] sm:$0xff] %v8014_v14  ;;  %10961 = vst [vmem:[#allocation207_spill] sm:$0xff] %v8020_v16  ;;  %v8035_v14 = vld [vmem:[%s7329_s23 + $0x6d8] sm:$0xff]  ;;  %v8041_v16 = vld [vmem:[%s7329_s23 + $0x6e8] sm:$0xff] }
 0x1a6   : > { %10962 = vst [vmem:[#allocation208_spill] sm:$0xff] %v8023_v34  ;;  %10963 = vst [vmem:[#allocation209_spill] sm:$0xff] %v8026_v41  ;;  %v8044_v34 = vld [vmem:[%s7329_s23 + $0x6f0] sm:$0xff]  ;;  %v8047_v41 = vld [vmem:[%s7329_s23 + $0x6f8] sm:$0xff] }
 0x1a7   : > { %10964 = vst [vmem:[#allocation210_spill] sm:$0xff] %v8029_v30  ;;  %10965 = vst [vmem:[#allocation211_spill] sm:$0xff] %v8032_v17  ;;  %v8050_v30 = vld [vmem:[%s7329_s23 + $0x700] sm:$0xff]  ;;  %v8053_v17 = vld [vmem:[%s7329_s23 + $0x708] sm:$0xff] }
 0x1a8   : > { %10966 = vst [vmem:[#allocation212_spill] sm:$0xff] %v8035_v14  ;;  %10968 = vst [vmem:[#allocation214_spill] sm:$0xff] %v8041_v16  ;;  %v8056_v14 = vld [vmem:[%s7329_s23 + $0x710] sm:$0xff]  ;;  %v8062_v16 = vld [vmem:[%s7329_s23 + $0x720] sm:$0xff] }
 0x1a9   : > { %10969 = vst [vmem:[#allocation215_spill] sm:$0xff] %v8044_v34  ;;  %10970 = vst [vmem:[#allocation216_spill] sm:$0xff] %v8047_v41  ;;  %v8065_v34 = vld [vmem:[%s7329_s23 + $0x728] sm:$0xff]  ;;  %v8068_v41 = vld [vmem:[%s7329_s23 + $0x730] sm:$0xff] }
 0x1aa   : > { %10971 = vst [vmem:[#allocation217_spill] sm:$0xff] %v8050_v30  ;;  %10972 = vst [vmem:[#allocation218_spill] sm:$0xff] %v8053_v17  ;;  %v8071_v30 = vld [vmem:[%s7329_s23 + $0x738] sm:$0xff]  ;;  %v8074_v17 = vld [vmem:[%s7329_s23 + $0x740] sm:$0xff] }
 0x1ab   : > { %10973 = vst [vmem:[#allocation219_spill] sm:$0xff] %v8056_v14  ;;  %10975 = vst [vmem:[#allocation221_spill] sm:$0xff] %v8062_v16  ;;  %v8077_v14 = vld [vmem:[%s7329_s23 + $0x748] sm:$0xff]  ;;  %v8083_v16 = vld [vmem:[%s7329_s23 + $0x758] sm:$0xff] }
 0x1ac   : > { %10976 = vst [vmem:[#allocation222_spill] sm:$0xff] %v8065_v34  ;;  %10977 = vst [vmem:[#allocation223_spill] sm:$0xff] %v8068_v41  ;;  %v8086_v34 = vld [vmem:[%s7329_s23 + $0x760] sm:$0xff]  ;;  %v8089_v41 = vld [vmem:[%s7329_s23 + $0x768] sm:$0xff] }
 0x1ad   : > { %10978 = vst [vmem:[#allocation224_spill] sm:$0xff] %v8071_v30  ;;  %10979 = vst [vmem:[#allocation225_spill] sm:$0xff] %v8074_v17  ;;  %v8092_v30 = vld [vmem:[%s7329_s23 + $0x770] sm:$0xff]  ;;  %v8095_v17 = vld [vmem:[%s7329_s23 + $0x778] sm:$0xff] }
 0x1ae   : > { %10980 = vst [vmem:[#allocation226_spill] sm:$0xff] %v8077_v14  ;;  %10982 = vst [vmem:[#allocation228_spill] sm:$0xff] %v8083_v16  ;;  %v8098_v14 = vld [vmem:[%s7329_s23 + $0x780] sm:$0xff]  ;;  %v8104_v16 = vld [vmem:[%s7329_s23 + $0x790] sm:$0xff] }
 0x1af   : > { %10983 = vst [vmem:[#allocation229_spill] sm:$0xff] %v8086_v34  ;;  %10984 = vst [vmem:[#allocation230_spill] sm:$0xff] %v8089_v41  ;;  %v8107_v34 = vld [vmem:[%s7329_s23 + $0x798] sm:$0xff]  ;;  %v8110_v41 = vld [vmem:[%s7329_s23 + $0x7a0] sm:$0xff] }
 0x1b0   : > { %10985 = vst [vmem:[#allocation231_spill] sm:$0xff] %v8092_v30  ;;  %10986 = vst [vmem:[#allocation232_spill] sm:$0xff] %v8095_v17  ;;  %v8113_v30 = vld [vmem:[%s7329_s23 + $0x7a8] sm:$0xff]  ;;  %v8116_v17 = vld [vmem:[%s7329_s23 + $0x7b0] sm:$0xff] }
 0x1b1   : > { %10987 = vst [vmem:[#allocation233_spill] sm:$0xff] %v8098_v14  ;;  %10989 = vst [vmem:[#allocation235_spill] sm:$0xff] %v8104_v16  ;;  %v8119_v14 = vld [vmem:[%s7329_s23 + $0x7b8] sm:$0xff]  ;;  %v8125_v16 = vld [vmem:[%s7329_s23 + $0x7c8] sm:$0xff] }
 0x1b2   : > { %10990 = vst [vmem:[#allocation236_spill] sm:$0xff] %v8107_v34  ;;  %10991 = vst [vmem:[#allocation237_spill] sm:$0xff] %v8110_v41  ;;  %v8128_v34 = vld [vmem:[%s7329_s23 + $0x7d0] sm:$0xff]  ;;  %v8131_v41 = vld [vmem:[%s7329_s23 + $0x7d8] sm:$0xff] }
 0x1b3   : > { %10992 = vst [vmem:[#allocation238_spill] sm:$0xff] %v8113_v30  ;;  %10993 = vst [vmem:[#allocation239_spill] sm:$0xff] %v8116_v17  ;;  %v8134_v30 = vld [vmem:[%s7329_s23 + $0x7e0] sm:$0xff]  ;;  %v8137_v17 = vld [vmem:[%s7329_s23 + $0x7e8] sm:$0xff] }
 0x1b4   : > { %10994 = vst [vmem:[#allocation240_spill] sm:$0xff] %v8119_v14  ;;  %10996 = vst [vmem:[#allocation242_spill] sm:$0xff] %v8125_v16  ;;  %v8140_v14 = vld [vmem:[%s7329_s23 + $0x7f0] sm:$0xff]  ;;  %v8146_v16 = vld [vmem:[%s7329_s23 + $0x800] sm:$0xff] }
 0x1b5   : > { %10997 = vst [vmem:[#allocation243_spill] sm:$0xff] %v8128_v34  ;;  %10998 = vst [vmem:[#allocation244_spill] sm:$0xff] %v8131_v41  ;;  %v8149_v34 = vld [vmem:[%s7329_s23 + $0x808] sm:$0xff]  ;;  %v8168_v57 = vld [vmem:[%s7329_s23 + $0x838] sm:$0xff] }
 0x1b6   : > { %10999 = vst [vmem:[#allocation245_spill] sm:$0xff] %v8134_v30  ;;  %11000 = vst [vmem:[#allocation246_spill] sm:$0xff] %v8137_v17  ;;  %v824_v41 = vld [vmem:[%s7203_s9 + $0x8] sm:$0xf]  ;;  %v8156_v30 = vld [vmem:[%s7329_s23 + $0x818] sm:$0xff]  ;;  %s9732_s9 = scalar_lea.vmem [#allocation5], %s4415_s17 }
 0x1b7   : > { %11001 = vst [vmem:[#allocation247_spill] sm:$0xff] %v8140_v14  ;;  %11003 = vst [vmem:[#allocation249_spill] sm:$0xff] %v8146_v16  ;;  %v8159_v17 = vld [vmem:[%s7329_s23 + $0x820] sm:$0xff]  ;;  %v8162_v14 = vld [vmem:[%s7329_s23 + $0x828] sm:$0xff] }
 0x1b8   : > { %11004 = vst [vmem:[#allocation250_spill] sm:$0xff] %v8149_v34  ;;  %11006 = vst [vmem:[#allocation252_spill] sm:$0xff] %v8156_v30  ;;  %v8171_v16 = vld [vmem:[%s7329_s23 + $0x840] sm:$0xff]  ;;  %v8174_v34 = vld [vmem:[%s7329_s23 + $0x848] sm:$0xff] }
 0x1b9   : > { %11007 = vst [vmem:[#allocation253_spill] sm:$0xff] %v8159_v17  ;;  %11008 = vst [vmem:[#allocation254_spill] sm:$0xff] %v8162_v14  ;;  %v8180_v30 = vld [vmem:[%s7329_s23 + $0x858] sm:$0xff]  ;;  %v8183_v17 = vld [vmem:[%s7329_s23 + $0x860] sm:$0xff] }
 0x1ba   : > { %11010 = vst [vmem:[#allocation256_spill] sm:$0xff] %v8168_v57  ;;  %11011 = vst [vmem:[#allocation257_spill] sm:$0xff] %v8171_v16  ;;  %v8186_v14 = vld [vmem:[%s7329_s23 + $0x868] sm:$0xff]  ;;  %v8192_v57 = vld [vmem:[%s7329_s23 + $0x878] sm:$0xff] }
 0x1bb   : > { %v1580_v2 = vpop.f32.mrb[16].mxu0  ;;  %11012 = vst [vmem:[#allocation258_spill] sm:$0xff] %v8174_v34  ;;  %11014 = vst [vmem:[#allocation260_spill] sm:$0xff] %v8180_v30  ;;  %v8195_v16 = vld [vmem:[%s7329_s23 + $0x880] sm:$0xff]  ;;  %v8198_v34 = vrot.slane %v824_v41, %v7210_v42  ;;  %v8204_v30 = vld [vmem:[%s7329_s23 + $0x890] sm:$0xff] }
 0x1bc   : > { %v5770_v62 = vadd.f32 %v1580_v2, %v7308_v38  ;;  %v1806_v45 = vpop.f32.mrb[16].mxu1  ;;  %v1582_v63 = vpop.f32.mrb[17].mxu0  ;;  %v7432_v2 = vld [vmem:[%s7329_s23 + $0xc8] sm:$0xff]  ;;  %11015 = vst [vmem:[#allocation261_spill] sm:$0xff] %v8183_v17  ;;  %11016 = vst [vmem:[#allocation262_spill] sm:$0xff] %v8186_v14  ;;  %v8207_v17 = vld [vmem:[%s7329_s23 + $0x898] sm:$0xff]  ;;  %v8210_v14 = vrot.slane %v824_v41, %v7218_v50 }
 0x1bd   : > { %v5786_v4 = vadd.f32 %v1806_v45, %v7313_v54  ;;  %v5771_v1 = vadd.f32 %v1582_v63, %v7318_v55  ;;  %v1808_v5 = vpop.f32.mrb[17].mxu1  ;;  %10795 = vst [vmem:[#allocation41_spill] sm:$0xff] %v7432_v2  ;;  %v7439_v63 = vld [vmem:[%s7329_s23 + $0xd8] sm:$0xff]  ;;  %11018 = vst [vmem:[#allocation264_spill] sm:$0xff] %v8192_v57  ;;  %v8219_v42 = vld [vmem:[%s7329_s23 + $0x8a8] sm:$0xff] }
 0x1be   : > { %2309 = vst [vmem:[#allocation2 + $0x20] sm:$0xff] %v5770_v62  ;;  %v5787_v11 = vadd.f32 %v1808_v5, %v7324_v61  ;;  %v7435_v62 = vld [vmem:[%s7329_s23 + $0xd0] sm:$0xff]  ;;  %11019 = vst [vmem:[#allocation265_spill] sm:$0xff] %v8195_v16  ;;  %v8216_v16 = vld [vmem:[%s7329_s23 + $0x8a0] sm:$0xff] }
 0x1bf   : > { %2311 = vst [vmem:[#allocation2 + $0x30] sm:$0xff] %v5786_v4  ;;  %2310 = vst [vmem:[#allocation2 + $0x28] sm:$0xff] %v5771_v1  ;;  %v1586_v15 = vpop.f32.mrb[18].mxu0  ;;  %v7442_v4 = vld [vmem:[%s7329_s23 + $0xe0] sm:$0xff]  ;;  %v7445_v1 = vld [vmem:[%s7329_s23 + $0xe8] sm:$0xff] }
 0x1c0   : > { %2312 = vst [vmem:[#allocation2 + $0x38] sm:$0xff] %v5787_v11  ;;  %v5772_v20 = vadd.f32 %v1586_v15, %v7308_v38  ;;  %v1812_v21 = vpop.f32.mrb[18].mxu1  ;;  %v1588_v13 = vpop.f32.mrb[19].mxu0  ;;  %10796 = vst [vmem:[#allocation42_spill] sm:$0xff] %v7442_v4  ;;  %v7448_v11 = vld [vmem:[%s7329_s23 + $0xf0] sm:$0xff]  ;;  %v7451_v15 = vld [vmem:[%s7329_s23 + $0xf8] sm:$0xff] }
 0x1c1   : > { %v5788_v25 = vadd.f32 %v1812_v21, %v7313_v54  ;;  %v5773_v26 = vadd.f32 %v1588_v13, %v7318_v55  ;;  %v1814_v33 = vpop.f32.mrb[19].mxu1  ;;  %10797 = vst [vmem:[#allocation43_spill] sm:$0xff] %v7445_v1  ;;  %10798 = vst [vmem:[#allocation44_spill] sm:$0xff] %v7448_v11  ;;  %v7729_v11 = vld [vmem:[%s7329_s23 + $0x3a8] sm:$0xff]  ;;  %v7759_v4 = vld [vmem:[%s7329_s23 + $0x3f8] sm:$0xff] }
 0x1c2   : > { %2321 = vst [vmem:[#allocation2 + $0x80] sm:$0xff] %v5772_v20  ;;  %v5789_v31 = vadd.f32 %v1814_v33, %v7324_v61  ;;  %10799 = vst [vmem:[#allocation45_spill] sm:$0xff] %v7451_v15  ;;  %v7454_v20 = vld [vmem:[%s7329_s23 + $0x100] sm:$0xff]  ;;  %v7461_v33 = vld [vmem:[%s7329_s23 + $0x110] sm:$0xff] }
 0x1c3   : > { %2323 = vst [vmem:[#allocation2 + $0x90] sm:$0xff] %v5788_v25  ;;  %2322 = vst [vmem:[#allocation2 + $0x88] sm:$0xff] %v5773_v26  ;;  %v1592_v52 = vpop.f32.mrb[20].mxu0  ;;  %v7458_v26 = vld [vmem:[%s7329_s23 + $0x108] sm:$0xff]  ;;  %v7795_v1 = vld [vmem:[%s7329_s23 + $0x458] sm:$0xff] }
 0x1c4   : > { %2324 = vst [vmem:[#allocation2 + $0x98] sm:$0xff] %v5789_v31  ;;  %v5774_v36 = vadd.f32 %v1592_v52, %v7308_v38  ;;  %v1818_v37 = vpop.f32.mrb[20].mxu1  ;;  %v1594_v39 = vpop.f32.mrb[21].mxu0  ;;  %10800 = vst [vmem:[#allocation46_spill] sm:$0xff] %v7454_v20  ;;  %v7464_v31 = vld [vmem:[%s7329_s23 + $0x118] sm:$0xff]  ;;  %v7522_v20 = vld [vmem:[%s7329_s23 + $0x1a0] sm:$0xff] }
 0x1c5   : > { %v5790_v43 = vadd.f32 %v1818_v37, %v7313_v54  ;;  %v5775_v44 = vadd.f32 %v1594_v39, %v7318_v55  ;;  %v1820_v46 = vpop.f32.mrb[21].mxu1  ;;  %10801 = vst [vmem:[#allocation47_spill] sm:$0xff] %v7458_v26  ;;  %10802 = vst [vmem:[#allocation48_spill] sm:$0xff] %v7461_v33  ;;  %v7469_v39 = vld [vmem:[%s7329_s23 + $0x120] sm:$0xff]  ;;  %v7515_v33 = vld [vmem:[%s7329_s23 + $0x190] sm:$0xff] }
 0x1c6   : > { %2333 = vst [vmem:[#allocation2 + $0xe0] sm:$0xff] %v5774_v36  ;;  %v5791_v45 = vadd.f32 %v1820_v46, %v7324_v61  ;;  %10803 = vst [vmem:[#allocation49_spill] sm:$0xff] %v7464_v31  ;;  %v7531_v31 = vld [vmem:[%s7329_s23 + $0x1b8] sm:$0xff]  ;;  %v7765_v15 = vld [vmem:[%s7329_s23 + $0x408] sm:$0xff] }
 0x1c7   : > { %2335 = vst [vmem:[#allocation2 + $0xf0] sm:$0xff] %v5790_v43  ;;  %2334 = vst [vmem:[#allocation2 + $0xe8] sm:$0xff] %v5775_v44  ;;  %v1598_v5 = vpop.f32.mrb[22].mxu0  ;;  %v7472_v43 = vld [vmem:[%s7329_s23 + $0x128] sm:$0xff]  ;;  %v7475_v44 = vld [vmem:[%s7329_s23 + $0x130] sm:$0xff] }
 0x1c8   : > { %2336 = vst [vmem:[#allocation2 + $0xf8] sm:$0xff] %v5791_v45  ;;  %v5776_v21 = vadd.f32 %v1598_v5, %v7308_v38  ;;  %v1824_v13 = vpop.f32.mrb[22].mxu1  ;;  %v1600_v25 = vpop.f32.mrb[23].mxu0  ;;  %v7479_v45 = vld [vmem:[%s7329_s23 + $0x138] sm:$0xff]  ;;  %v7482_v5 = vld [vmem:[%s7329_s23 + $0x140] sm:$0xff]  ;;  %10815 = vst [vmem:[#allocation61_spill] sm:$0xff] %v7522_v20 }
 0x1c9   : > { %v5792_v52 = vadd.f32 %v1824_v13, %v7313_v54  ;;  %v5777_v36 = vadd.f32 %v1600_v25, %v7318_v55  ;;  %v1826_v37 = vpop.f32.mrb[23].mxu1  ;;  %10804 = vst [vmem:[#allocation50_spill] sm:$0xff] %v7482_v5  ;;  %v7485_v13 = vld [vmem:[%s7329_s23 + $0x148] sm:$0xff]  ;;  %10818 = vst [vmem:[#allocation64_spill] sm:$0xff] %v7531_v31  ;;  %v7595_v20 = vld [vmem:[%s7329_s23 + $0x250] sm:$0xff] }
 0x1ca   : > { %2345 = vst [vmem:[#allocation2 + $0x140] sm:$0xff] %v5776_v21  ;;  %v5793_v46 = vadd.f32 %v1826_v37, %v7324_v61  ;;  %10805 = vst [vmem:[#allocation51_spill] sm:$0xff] %v7485_v13  ;;  %v7494_v21 = vld [vmem:[%s7329_s23 + $0x160] sm:$0xff]  ;;  %v7611_v31 = vld [vmem:[%s7329_s23 + $0x278] sm:$0xff] }
 0x1cb   : > { %2347 = vst [vmem:[#allocation2 + $0x150] sm:$0xff] %v5792_v52  ;;  %2346 = vst [vmem:[#allocation2 + $0x148] sm:$0xff] %v5777_v36  ;;  %v1604_v25 = vpop.f32.mrb[24].mxu0  ;;  %v7498_v52 = vld [vmem:[%s7329_s23 + $0x168] sm:$0xff]  ;;  %v7501_v36 = vld [vmem:[%s7329_s23 + $0x170] sm:$0xff] }
 0x1cc   : > { %10808 = vst [vmem:[#allocation54_spill] sm:$0xff] %v7494_v21  ;;  %2348 = vst [vmem:[#allocation2 + $0x158] sm:$0xff] %v5793_v46  ;;  %v5778_v37 = vadd.f32 %v1604_v25, %v7308_v38  ;;  %v1830_v59 = vpop.f32.mrb[24].mxu1  ;;  %v1606_v49 = vpop.f32.mrb[25].mxu0  ;;  %v7512_v25 = vld [vmem:[%s7329_s23 + $0x188] sm:$0xff]  ;;  %v7519_v21 = vld [vmem:[%s7329_s23 + $0x198] sm:$0xff] }
 0x1cd   : > { %10809 = vst [vmem:[#allocation55_spill] sm:$0xff] %v7498_v52  ;;  %10810 = vst [vmem:[#allocation56_spill] sm:$0xff] %v7501_v36  ;;  %v5794_v27 = vadd.f32 %v1830_v59, %v7313_v54  ;;  %v5779_v24 = vadd.f32 %v1606_v49, %v7318_v55  ;;  %v1832_v46 = vpop.f32.mrb[25].mxu1  ;;  %v7525_v59 = vld [vmem:[%s7329_s23 + $0x1a8] sm:$0xff]  ;;  %v7732_v5 = vld [vmem:[%s7329_s23 + $0x3b0] sm:$0xff] }
 0x1ce   : > { %10813 = vst [vmem:[#allocation59_spill] sm:$0xff] %v7512_v25  ;;  %2357 = vst [vmem:[#allocation2 + $0x1a0] sm:$0xff] %v5778_v37  ;;  %v5795_v36 = vadd.f32 %v1832_v46, %v7324_v61  ;;  %v7534_v37 = vld [vmem:[%s7329_s23 + $0x1c0] sm:$0xff]  ;;  %v7768_v13 = vld [vmem:[%s7329_s23 + $0x410] sm:$0xff] }
 0x1cf   : > { %10814 = vst [vmem:[#allocation60_spill] sm:$0xff] %v7519_v21  ;;  %10816 = vst [vmem:[#allocation62_spill] sm:$0xff] %v7525_v59  ;;  %v1610_v49 = vpop.f32.mrb[26].mxu0  ;;  %v7723_v59 = vld [vmem:[%s7329_s23 + $0x398] sm:$0xff]  ;;  %v8222_v57 = vld [vmem:[%s7329_s23 + $0x8b0] sm:$0xff] }
 0x1d0   : > { %2359 = vst [vmem:[#allocation2 + $0x1b0] sm:$0xff] %v5794_v27  ;;  %2358 = vst [vmem:[#allocation2 + $0x1a8] sm:$0xff] %v5779_v24  ;;  %v5780_v46 = vadd.f32 %v1610_v49, %v7308_v38  ;;  %v1836_v52 = vpop.f32.mrb[26].mxu1  ;;  %v1612_v26 = vpop.f32.mrb[27].mxu0  ;;  %v7538_v27 = vld [vmem:[%s7329_s23 + $0x1c8] sm:$0xff]  ;;  %v7541_v24 = vld [vmem:[%s7329_s23 + $0x1d0] sm:$0xff] }
 0x1d1   : > { %10819 = vst [vmem:[#allocation65_spill] sm:$0xff] %v7534_v37  ;;  %2360 = vst [vmem:[#allocation2 + $0x1b8] sm:$0xff] %v5795_v36  ;;  %v5796_v23 = vadd.f32 %v1836_v52, %v7313_v54  ;;  %v5781_v37 = vadd.f32 %v1612_v26, %v7318_v55  ;;  %v1838_v36 = vpop.f32.mrb[27].mxu1  ;;  %v7552_v49 = vld [vmem:[%s7329_s23 + $0x1e8] sm:$0xff]  ;;  %v8231_v50 = vld [vmem:[%s7329_s23 + $0x8c0] sm:$0xff] }
 0x1d2   : > { %10820 = vst [vmem:[#allocation66_spill] sm:$0xff] %v7538_v27  ;;  %10821 = vst [vmem:[#allocation67_spill] sm:$0xff] %v7541_v24  ;;  %v5797_v24 = vadd.f32 %v1838_v36, %v7324_v61  ;;  %v7562_v27 = vld [vmem:[%s7329_s23 + $0x200] sm:$0xff]  ;;  %v7565_v52 = vld [vmem:[%s7329_s23 + $0x208] sm:$0xff] }
 0x1d3   : > { %2369 = vst [vmem:[#allocation2 + $0x200] sm:$0xff] %v5780_v46  ;;  %10825 = vst [vmem:[#allocation71_spill] sm:$0xff] %v7562_v27  ;;  %v1616_v26 = vpop.f32.mrb[28].mxu0  ;;  %v7574_v46 = vld [vmem:[%s7329_s23 + $0x220] sm:$0xff] }
 0x1d4   : > { %10826 = vst [vmem:[#allocation72_spill] sm:$0xff] %v7565_v52  ;;  %2371 = vst [vmem:[#allocation2 + $0x210] sm:$0xff] %v5796_v23  ;;  %v5782_v36 = vadd.f32 %v1616_v26, %v7308_v38  ;;  %v1842_v58 = vpop.f32.mrb[28].mxu1  ;;  %v1618_v22 = vpop.f32.mrb[29].mxu0  ;;  %v7578_v23 = vld [vmem:[%s7329_s23 + $0x228] sm:$0xff]  ;;  %v7589_v27 = vld [vmem:[%s7329_s23 + $0x240] sm:$0xff] }
 0x1d5   : > { %2370 = vst [vmem:[#allocation2 + $0x208] sm:$0xff] %v5781_v37  ;;  %10829 = vst [vmem:[#allocation75_spill] sm:$0xff] %v7574_v46  ;;  %v7581_v37 = vld [vmem:[%s7329_s23 + $0x230] sm:$0xff]  ;;  %v5798_v40 = vadd.f32 %v1842_v58, %v7313_v54  ;;  %v5783_v46 = vadd.f32 %v1618_v22, %v7318_v55  ;;  %v7592_v26 = vld [vmem:[%s7329_s23 + $0x248] sm:$0xff] }
 0x1d6   : > { %2372 = vst [vmem:[#allocation2 + $0x218] sm:$0xff] %v5797_v24  ;;  %10830 = vst [vmem:[#allocation76_spill] sm:$0xff] %v7578_v23  ;;  %v1844_v24 = vpop.f32.mrb[29].mxu1  ;;  %v7602_v23 = vld [vmem:[%s7329_s23 + $0x260] sm:$0xff]  ;;  %v7605_v58 = vld [vmem:[%s7329_s23 + $0x268] sm:$0xff] }
 0x1d7   : > { %10831 = vst [vmem:[#allocation77_spill] sm:$0xff] %v7581_v37  ;;  %10833 = vst [vmem:[#allocation79_spill] sm:$0xff] %v7589_v27  ;;  %v5799_v37 = vadd.f32 %v1844_v24, %v7324_v61  ;;  %v1622_v22 = vpop.f32.mrb[30].mxu0  ;;  %v7624_v52 = vld [vmem:[%s7329_s23 + $0x298] sm:$0xff] }
 0x1d8   : > { %10834 = vst [vmem:[#allocation80_spill] sm:$0xff] %v7592_v26  ;;  %10835 = vst [vmem:[#allocation81_spill] sm:$0xff] %v7595_v20  ;;  %v5784_v24 = vadd.f32 %v1622_v22, %v7308_v38  ;;  %v7629_v38 = vld [vmem:[%s7329_s23 + $0x2a0] sm:$0xff]  ;;  %v7632_v22 = vld [vmem:[%s7329_s23 + $0x2a8] sm:$0xff] }
 0x1d9   : > { %2381 = vst [vmem:[#allocation2 + $0x260] sm:$0xff] %v5782_v36  ;;  %10837 = vst [vmem:[#allocation83_spill] sm:$0xff] %v7602_v23  ;;  %v7614_v36 = vld [vmem:[%s7329_s23 + $0x280] sm:$0xff]  ;;  %v1848_v23 = vpop.f32.mrb[30].mxu1 }
 0x1da   : > { %10838 = vst [vmem:[#allocation84_spill] sm:$0xff] %v7605_v58  ;;  %2383 = vst [vmem:[#allocation2 + $0x270] sm:$0xff] %v5798_v40  ;;  %v1624_v58 = vpop.f32.mrb[31].mxu0  ;;  %v7618_v40 = vld [vmem:[%s7329_s23 + $0x288] sm:$0xff]  ;;  %v5800_v32 = vadd.f32 %v1848_v23, %v7313_v54  ;;  %v7639_v54 = vld [vmem:[%s7329_s23 + $0x2b8] sm:$0xff] }
 0x1db   : > { %2382 = vst [vmem:[#allocation2 + $0x268] sm:$0xff] %v5783_v46  ;;  %10840 = vst [vmem:[#allocation86_spill] sm:$0xff] %v7611_v31  ;;  %v7621_v46 = vld [vmem:[%s7329_s23 + $0x290] sm:$0xff]  ;;  %v7645_v23 = vld [vmem:[%s7329_s23 + $0x2c8] sm:$0xff] }
 0x1dc   : > { %10841 = vst [vmem:[#allocation87_spill] sm:$0xff] %v7614_v36  ;;  %2384 = vst [vmem:[#allocation2 + $0x278] sm:$0xff] %v5799_v37  ;;  %v5785_v36 = vadd.f32 %v1624_v58, %v7318_v55  ;;  %v1850_v37 = vpop.f32.mrb[31].mxu1  ;;  %v7642_v55 = vld [vmem:[%s7329_s23 + $0x2c0] sm:$0xff]  ;;  %v7648_v58 = vld [vmem:[%s7329_s23 + $0x2d0] sm:$0xff] }
 0x1dd   : > { %10842 = vst [vmem:[#allocation88_spill] sm:$0xff] %v7618_v40  ;;  %10843 = vst [vmem:[#allocation89_spill] sm:$0xff] %v7621_v46  ;;  %v7635_v40 = vld [vmem:[%s7329_s23 + $0x2b0] sm:$0xff]  ;;  %v5801_v46 = vadd.f32 %v1850_v37, %v7324_v61  ;;  %v7654_v61 = vld [vmem:[%s7329_s23 + $0x2e0] sm:$0xff] }
 0x1de   : > { %10844 = vst [vmem:[#allocation90_spill] sm:$0xff] %v7624_v52  ;;  %10845 = vst [vmem:[#allocation91_spill] sm:$0xff] %v7632_v22  ;;  %v7657_v37 = vld [vmem:[%s7329_s23 + $0x2e8] sm:$0xff]  ;;  %v7660_v52 = vld [vmem:[%s7329_s23 + $0x2f0] sm:$0xff] }
 0x1df   : > { %2393 = vst [vmem:[#allocation2 + $0x2c0] sm:$0xff] %v5784_v24  ;;  %10846 = vst [vmem:[#allocation92_spill] sm:$0xff] %v7642_v55  ;;  %v7651_v24 = vld [vmem:[%s7329_s23 + $0x2d8] sm:$0xff]  ;;  %v7672_v55 = vld [vmem:[%s7329_s23 + $0x310] sm:$0xff] }
 0x1e0   : > { %10847 = vst [vmem:[#allocation93_spill] sm:$0xff] %v7645_v23  ;;  %2395 = vst [vmem:[#allocation2 + $0x2d0] sm:$0xff] %v5800_v32  ;;  %v7663_v32 = vld [vmem:[%s7329_s23 + $0x2f8] sm:$0xff]  ;;  %v7693_v31 = vld [vmem:[%s7329_s23 + $0x348] sm:$0xff] }
 0x1e1   : > { %2394 = vst [vmem:[#allocation2 + $0x2c8] sm:$0xff] %v5785_v36  ;;  %10848 = vst [vmem:[#allocation94_spill] sm:$0xff] %v7648_v58  ;;  %v7666_v36 = vld [vmem:[%s7329_s23 + $0x300] sm:$0xff]  ;;  %v7669_v58 = vld [vmem:[%s7329_s23 + $0x308] sm:$0xff] }
 0x1e2   : > { %10849 = vst [vmem:[#allocation95_spill] sm:$0xff] %v7651_v24  ;;  %10850 = vst [vmem:[#allocation96_spill] sm:$0xff] %v7654_v61  ;;  %v7678_v61 = vld [vmem:[%s7329_s23 + $0x320] sm:$0xff]  ;;  %v7696_v23 = vld [vmem:[%s7329_s23 + $0x350] sm:$0xff] }
 0x1e3   : > { %2396 = vst [vmem:[#allocation2 + $0x2d8] sm:$0xff] %v5801_v46  ;;  %10851 = vst [vmem:[#allocation97_spill] sm:$0xff] %v7657_v37  ;;  %v7675_v46 = vld [vmem:[%s7329_s23 + $0x318] sm:$0xff]  ;;  %v7690_v24 = vld [vmem:[%s7329_s23 + $0x340] sm:$0xff] }
 0x1e4   : > { %10852 = vst [vmem:[#allocation98_spill] sm:$0xff] %v7660_v52  ;;  %10853 = vst [vmem:[#allocation99_spill] sm:$0xff] %v7663_v32  ;;  %v7681_v52 = vld [vmem:[%s7329_s23 + $0x328] sm:$0xff]  ;;  %v7684_v32 = vld [vmem:[%s7329_s23 + $0x330] sm:$0xff] }
 0x1e5   : > { %10854 = vst [vmem:[#allocation100_spill] sm:$0xff] %v7678_v61  ;;  %10855 = vst [vmem:[#allocation101_spill] sm:$0xff] %v7681_v52  ;;  %v7687_v37 = vld [vmem:[%s7329_s23 + $0x338] sm:$0xff]  ;;  %v7702_v52 = vld [vmem:[%s7329_s23 + $0x360] sm:$0xff] }
 0x1e6   : > { %10856 = vst [vmem:[#allocation102_spill] sm:$0xff] %v7684_v32  ;;  %10857 = vst [vmem:[#allocation103_spill] sm:$0xff] %v7687_v37  ;;  %v7699_v61 = vld [vmem:[%s7329_s23 + $0x358] sm:$0xff]  ;;  %v7705_v32 = vld [vmem:[%s7329_s23 + $0x368] sm:$0xff] }
 0x1e7   : > { %10858 = vst [vmem:[#allocation104_spill] sm:$0xff] %v7690_v24  ;;  %10859 = vst [vmem:[#allocation105_spill] sm:$0xff] %v7693_v31  ;;  %v7708_v37 = vld [vmem:[%s7329_s23 + $0x370] sm:$0xff]  ;;  %v7711_v24 = vld [vmem:[%s7329_s23 + $0x378] sm:$0xff] }
 0x1e8   : > { %10860 = vst [vmem:[#allocation106_spill] sm:$0xff] %v7696_v23  ;;  %10861 = vst [vmem:[#allocation107_spill] sm:$0xff] %v7699_v61  ;;  %v7714_v31 = vld [vmem:[%s7329_s23 + $0x380] sm:$0xff]  ;;  %v7717_v23 = vld [vmem:[%s7329_s23 + $0x388] sm:$0xff] }
 0x1e9   : > { %10862 = vst [vmem:[#allocation108_spill] sm:$0xff] %v7711_v24  ;;  %10863 = vst [vmem:[#allocation109_spill] sm:$0xff] %v7714_v31  ;;  %v7720_v61 = vld [vmem:[%s7329_s23 + $0x390] sm:$0xff]  ;;  %v7735_v31 = vld [vmem:[%s7329_s23 + $0x3b8] sm:$0xff] }
 0x1ea   : > { %10864 = vst [vmem:[#allocation110_spill] sm:$0xff] %v7717_v23  ;;  %10865 = vst [vmem:[#allocation111_spill] sm:$0xff] %v7720_v61  ;;  %v7738_v23 = vld [vmem:[%s7329_s23 + $0x3c0] sm:$0xff]  ;;  %v7741_v61 = vld [vmem:[%s7329_s23 + $0x3c8] sm:$0xff] }
 0x1eb   : > { %10866 = vst [vmem:[#allocation112_spill] sm:$0xff] %v7723_v59  ;;  %10868 = vst [vmem:[#allocation114_spill] sm:$0xff] %v7729_v11  ;;  %v7744_v59 = vld [vmem:[%s7329_s23 + $0x3d0] sm:$0xff]  ;;  %v7750_v11 = vld [vmem:[%s7329_s23 + $0x3e0] sm:$0xff] }
 0x1ec   : > { %10869 = vst [vmem:[#allocation115_spill] sm:$0xff] %v7732_v5  ;;  %10870 = vst [vmem:[#allocation116_spill] sm:$0xff] %v7735_v31  ;;  %v7753_v5 = vld [vmem:[%s7329_s23 + $0x3e8] sm:$0xff]  ;;  %v7756_v31 = vld [vmem:[%s7329_s23 + $0x3f0] sm:$0xff] }
 0x1ed   : > { %10871 = vst [vmem:[#allocation117_spill] sm:$0xff] %v7738_v23  ;;  %10872 = vst [vmem:[#allocation118_spill] sm:$0xff] %v7750_v11  ;;  %v7771_v11 = vld [vmem:[%s7329_s23 + $0x418] sm:$0xff] }
 0x1ee   : > { %10873 = vst [vmem:[#allocation119_spill] sm:$0xff] %v7753_v5  ;;  %10874 = vst [vmem:[#allocation120_spill] sm:$0xff] %v7756_v31  ;;  %v7774_v5 = vld [vmem:[%s7329_s23 + $0x420] sm:$0xff]  ;;  %v7777_v31 = vld [vmem:[%s7329_s23 + $0x428] sm:$0xff] }
 0x1ef   : > { %10875 = vst [vmem:[#allocation121_spill] sm:$0xff] %v7759_v4  ;;  %10877 = vst [vmem:[#allocation123_spill] sm:$0xff] %v7765_v15  ;;  %v7780_v4 = vld [vmem:[%s7329_s23 + $0x430] sm:$0xff]  ;;  %v7786_v15 = vld [vmem:[%s7329_s23 + $0x440] sm:$0xff] }
 0x1f0   : > { %10878 = vst [vmem:[#allocation124_spill] sm:$0xff] %v7768_v13  ;;  %10879 = vst [vmem:[#allocation125_spill] sm:$0xff] %v7771_v11  ;;  %v7789_v13 = vld [vmem:[%s7329_s23 + $0x448] sm:$0xff]  ;;  %v7792_v11 = vld [vmem:[%s7329_s23 + $0x450] sm:$0xff] }
 0x1f1   : > { %10880 = vst [vmem:[#allocation126_spill] sm:$0xff] %v7774_v5  ;;  %10881 = vst [vmem:[#allocation127_spill] sm:$0xff] %v7777_v31 }
 0x1f2   : > { %10882 = vst [vmem:[#allocation128_spill] sm:$0xff] %v7780_v4  ;;  %10883 = vst [vmem:[#allocation129_spill] sm:$0xff] %v7786_v15  ;;  %v7807_v15 = vld [vmem:[%s7329_s23 + $0x478] sm:$0xff] }
 0x1f3   : > { %10884 = vst [vmem:[#allocation130_spill] sm:$0xff] %v7789_v13  ;;  %10885 = vst [vmem:[#allocation131_spill] sm:$0xff] %v7792_v11  ;;  %v7810_v13 = vld [vmem:[%s7329_s23 + $0x480] sm:$0xff]  ;;  %v7813_v11 = vld [vmem:[%s7329_s23 + $0x488] sm:$0xff] }
 0x1f4   : > { %10886 = vst [vmem:[#allocation132_spill] sm:$0xff] %v7795_v1  ;;  %10890 = vst [vmem:[#allocation136_spill] sm:$0xff] %v7807_v15  ;;  %v7816_v1 = vld [vmem:[%s7329_s23 + $0x490] sm:$0xff] }
 0x1f5   : > { %10891 = vst [vmem:[#allocation137_spill] sm:$0xff] %v7810_v13  ;;  %10892 = vst [vmem:[#allocation138_spill] sm:$0xff] %v7813_v11  ;;  %v7828_v15 = vld [vmem:[%s7329_s23 + $0x4b0] sm:$0xff] }
 0x1f6   : > { %10893 = vst [vmem:[#allocation139_spill] sm:$0xff] %v7816_v1  ;;  %10897 = vst [vmem:[#allocation143_spill] sm:$0xff] %v7828_v15  ;;  %v7849_v15 = vld [vmem:[%s7329_s23 + $0x4e8] sm:$0xff]  ;;  %v7870_v1 = vld [vmem:[%s7329_s23 + $0x520] sm:$0xff] }
 0x1f7   : > { %10904 = vst [vmem:[#allocation150_spill] sm:$0xff] %v7849_v15  ;;  %10911 = vst [vmem:[#allocation157_spill] sm:$0xff] %v7870_v1  ;;  %v7891_v1 = vld [vmem:[%s7329_s23 + $0x558] sm:$0xff]  ;;  %v8153_v13 = vld [vmem:[%s7329_s23 + $0x810] sm:$0xff] }
 0x1f8   : > { %10918 = vst [vmem:[#allocation164_spill] sm:$0xff] %v7891_v1  ;;  %v7912_v1 = vld [vmem:[%s7329_s23 + $0x590] sm:$0xff]  ;;  %11005 = vst [vmem:[#allocation251_spill] sm:$0xff] %v8153_v13  ;;  %v8258_v15 = vld [vmem:[%s7329_s23 + $0x900] sm:$0xff] }
 0x1f9   : > { %10925 = vst [vmem:[#allocation171_spill] sm:$0xff] %v7912_v1  ;;  %v7933_v1 = vld [vmem:[%s7329_s23 + $0x5c8] sm:$0xff]  ;;  %v8177_v13 = vld [vmem:[%s7329_s23 + $0x850] sm:$0xff]  ;;  %11021 = vst [vmem:[#allocation267_spill] sm:$0xff] %v8204_v30 }
 0x1fa   : > { %10932 = vst [vmem:[#allocation178_spill] sm:$0xff] %v7933_v1  ;;  %v7954_v1 = vld [vmem:[%s7329_s23 + $0x600] sm:$0xff]  ;;  %11013 = vst [vmem:[#allocation259_spill] sm:$0xff] %v8177_v13  ;;  %v8201_v13 = vld [vmem:[%s7329_s23 + $0x888] sm:$0xff] }
 0x1fb   : > { %10939 = vst [vmem:[#allocation185_spill] sm:$0xff] %v7954_v1  ;;  %v7975_v1 = vld [vmem:[%s7329_s23 + $0x638] sm:$0xff]  ;;  %11020 = vst [vmem:[#allocation266_spill] sm:$0xff] %v8201_v13  ;;  %v8225_v13 = vrot.slane %v824_v41, %v7225_v48  ;;  %v8264_v11 = vld [vmem:[%s7329_s23 + $0x910] sm:$0xff] }
 0x1fc   : > { %10946 = vst [vmem:[#allocation192_spill] sm:$0xff] %v7975_v1  ;;  %v7996_v1 = vld [vmem:[%s7329_s23 + $0x670] sm:$0xff]  ;;  %11022 = vst [vmem:[#allocation268_spill] sm:$0xff] %v8207_v17  ;;  %v8228_v30 = vld [vmem:[%s7329_s23 + $0x8b8] sm:$0xff] }
 0x1fd   : > { %10953 = vst [vmem:[#allocation199_spill] sm:$0xff] %v7996_v1  ;;  %v8017_v1 = vld [vmem:[%s7329_s23 + $0x6a8] sm:$0xff]  ;;  %11023 = vst [vmem:[#allocation269_spill] sm:$0xff] %v8216_v16  ;;  %v8240_v16 = vld [vmem:[%s7329_s23 + $0x8d8] sm:$0xff] }
 0x1fe   : > { %10960 = vst [vmem:[#allocation206_spill] sm:$0xff] %v8017_v1  ;;  %v8038_v1 = vld [vmem:[%s7329_s23 + $0x6e0] sm:$0xff]  ;;  %11024 = vst [vmem:[#allocation270_spill] sm:$0xff] %v8219_v42  ;;  %v8234_v17 = vld [vmem:[%s7329_s23 + $0x8c8] sm:$0xff] }
 0x1ff   : > { %10967 = vst [vmem:[#allocation213_spill] sm:$0xff] %v8038_v1  ;;  %v8059_v1 = vld [vmem:[%s7329_s23 + $0x718] sm:$0xff]  ;;  %11025 = vst [vmem:[#allocation271_spill] sm:$0xff] %v8222_v57  ;;  %v8243_v42 = vld [vmem:[%s7329_s23 + $0x8e0] sm:$0xff] }
 0x200   : > { %10974 = vst [vmem:[#allocation220_spill] sm:$0xff] %v8059_v1  ;;  %v8080_v1 = vld [vmem:[%s7329_s23 + $0x750] sm:$0xff]  ;;  %11026 = vst [vmem:[#allocation272_spill] sm:$0xff] %v8228_v30  ;;  %v8247_v30 = vld [vmem:[%s7329_s23 + $0x8e8] sm:$0xff] }
 0x201   : > { %10981 = vst [vmem:[#allocation227_spill] sm:$0xff] %v8080_v1  ;;  %v8101_v1 = vld [vmem:[%s7329_s23 + $0x788] sm:$0xff]  ;;  %11027 = vst [vmem:[#allocation273_spill] sm:$0xff] %v8231_v50  ;;  %v8250_v50 = vld [vmem:[%s7329_s23 + $0x8f0] sm:$0xff] }
 0x202   : > { %10988 = vst [vmem:[#allocation234_spill] sm:$0xff] %v8101_v1  ;;  %v8122_v1 = vld [vmem:[%s7329_s23 + $0x7c0] sm:$0xff]  ;;  %11028 = vst [vmem:[#allocation274_spill] sm:$0xff] %v8234_v17  ;;  %v8253_v17 = vld [vmem:[%s7329_s23 + $0x8f8] sm:$0xff] }
 0x203   : > { %10995 = vst [vmem:[#allocation241_spill] sm:$0xff] %v8122_v1  ;;  %v8143_v1 = vld [vmem:[%s7329_s23 + $0x7f8] sm:$0xff]  ;;  %11029 = vst [vmem:[#allocation275_spill] sm:$0xff] %v8237_v56 }
 0x204   : > { %11002 = vst [vmem:[#allocation248_spill] sm:$0xff] %v8143_v1  ;;  %v8165_v1 = vld [vmem:[%s7329_s23 + $0x830] sm:$0xff]  ;;  %11030 = vst [vmem:[#allocation276_spill] sm:$0xff] %v8240_v16 }
 0x205   : > { %11009 = vst [vmem:[#allocation255_spill] sm:$0xff] %v8165_v1  ;;  %v8189_v1 = vld [vmem:[%s7329_s23 + $0x870] sm:$0xff]  ;;  %11031 = vst [vmem:[#allocation277_spill] sm:$0xff] %v8243_v42 }
 0x206   : > { %11017 = vst [vmem:[#allocation263_spill] sm:$0xff] %v8189_v1  ;;  %v8213_v1 = vrot.slane %v824_v41, %v7221_v51  ;;  %11032 = vst [vmem:[#allocation278_spill] sm:$0xff] %v8247_v30  ;;  %v8271_v30 = vld [vmem:[%s7329_s23 + $0x920] sm:$0xff] }
 0x207   : > { %11033 = vst [vmem:[#allocation279_spill] sm:$0xff] %v8250_v50  ;;  %11034 = vst [vmem:[#allocation280_spill] sm:$0xff] %v8253_v17  ;;  %v8268_v17 = vld [vmem:[%s7329_s23 + $0x918] sm:$0xff] }
 0x208   : > { %11035 = vst [vmem:[#allocation281_spill] sm:$0xff] %v8258_v15  ;;  %11037 = vst [vmem:[#allocation283_spill] sm:$0xff] %v8264_v11  ;;  %v8277_v15 = vld [vmem:[%s7329_s23 + $0x930] sm:$0xff]  ;;  %v8280_v11 = vld [vmem:[%s7329_s23 + $0x938] sm:$0xff] }
 0x209   : > { %11038 = vst [vmem:[#allocation284_spill] sm:$0xff] %v8268_v17  ;;  %11039 = vst [vmem:[#allocation285_spill] sm:$0xff] %v8271_v30  ;;  %v8293_v17 = vld [vmem:[%s7329_s23 + $0x958] sm:$0xff] }
 0x20a   : > { %11041 = vst [vmem:[#allocation287_spill] sm:$0xff] %v8277_v15  ;;  %11042 = vst [vmem:[#allocation288_spill] sm:$0xff] %v8280_v11  ;;  %v8298_v11 = vld [vmem:[%s7329_s23 + $0x960] sm:$0xff] }
 0x20b   : > { %11046 = vst [vmem:[#allocation292_spill] sm:$0xff] %v8293_v17  ;;  %11047 = vst [vmem:[#allocation293_spill] sm:$0xff] %v8298_v11  ;;  %v8308_v17 = vld [vmem:[%s7329_s23 + $0x978] sm:$0xff]  ;;  %v8317_v11 = vld [vmem:[%s7329_s23 + $0x990] sm:$0xff] }
 0x20c   : > { %11050 = vst [vmem:[#allocation296_spill] sm:$0xff] %v8308_v17  ;;  %11053 = vst [vmem:[#allocation299_spill] sm:$0xff] %v8317_v11  ;;  %v8333_v17 = vld [vmem:[%s7329_s23 + $0x9b8] sm:$0xff] }
 0x20d   : > { %11058 = vst [vmem:[#allocation304_spill] sm:$0xff] %v8333_v17  ;;  %v8348_v17 = vld [vmem:[%s7329_s23 + $0x9d8] sm:$0xff] }
 0x20e   : > { %11062 = vst [vmem:[#allocation308_spill] sm:$0xff] %v8348_v17  ;;  %v8373_v17 = vld [vmem:[%s7329_s23 + $0xa18] sm:$0xff] }
 0x20f   : > { %11070 = vst [vmem:[#allocation316_spill] sm:$0xff] %v8373_v17  ;;  %v8388_v17 = vld [vmem:[%s7329_s23 + $0xa38] sm:$0xff] }
 0x210   : > { %11074 = vst [vmem:[#allocation320_spill] sm:$0xff] %v8388_v17  ;;  %v8413_v17 = vld [vmem:[%s7329_s23 + $0xa78] sm:$0xff] }
 0x211   : > { %11082 = vst [vmem:[#allocation328_spill] sm:$0xff] %v8413_v17  ;;  %v8428_v17 = vld [vmem:[%s7329_s23 + $0xa98] sm:$0xff] }
 0x212   : > { %11086 = vst [vmem:[#allocation332_spill] sm:$0xff] %v8428_v17  ;;  %v8453_v17 = vld [vmem:[%s7329_s23 + $0xad8] sm:$0xff] }
 0x213   : > { %11094 = vst [vmem:[#allocation340_spill] sm:$0xff] %v8453_v17  ;;  %v8468_v17 = vld [vmem:[%s7329_s23 + $0xaf8] sm:$0xff] }
 0x214   : > { %11098 = vst [vmem:[#allocation344_spill] sm:$0xff] %v8468_v17  ;;  %v8493_v17 = vld [vmem:[%s7329_s23 + $0xb38] sm:$0xff] }
 0x215   : > { %11106 = vst [vmem:[#allocation352_spill] sm:$0xff] %v8493_v17  ;;  %v8508_v17 = vld [vmem:[%s7329_s23 + $0xb58] sm:$0xff] }
 0x216   : > { %11110 = vst [vmem:[#allocation356_spill] sm:$0xff] %v8508_v17  ;;  %v8533_v17 = vld [vmem:[%s7329_s23 + $0xb98] sm:$0xff] }
 0x217   : > { %11118 = vst [vmem:[#allocation364_spill] sm:$0xff] %v8533_v17  ;;  %v8569_v17 = vld [vmem:[%s7329_s23 + $0xbf0] sm:$0xff] }
 0x218   : > { %11127 = vst [vmem:[#allocation373_spill] sm:$0xff] %v8569_v17  ;;  %v8590_v17 = vld [vmem:[%s7329_s23 + $0xc28] sm:$0xff] }
 0x219   : > { %11134 = vst [vmem:[#allocation380_spill] sm:$0xff] %v8590_v17  ;;  %v8611_v17 = vld [vmem:[%s7329_s23 + $0xc60] sm:$0xff] }
 0x21a   : > { %11141 = vst [vmem:[#allocation387_spill] sm:$0xff] %v8611_v17  ;;  %v8635_v17 = vld [vmem:[%s7329_s23 + $0xca0] sm:$0xff] }
 0x21b   : > { %v2032_v51 = vpop.f32.mrb[32].mxu0  ;;  %11149 = vst [vmem:[#allocation395_spill] sm:$0xff] %v8635_v17  ;;  %v8656_v17 = vld [vmem:[%s7329_s23 + $0xcd8] sm:$0xff] }
 0x21c   : > { %v5802_v41 = vadd.f32 %v2032_v51, %v8198_v34  ;;  %v2258_v48 = vpop.f32.mrb[32].mxu1  ;;  %v2034_v57 = vpop.f32.mrb[33].mxu0  ;;  %v8261_v51 = vld [vmem:[%s7329_s23 + $0x908] sm:$0xff]  ;;  %11156 = vst [vmem:[#allocation402_spill] sm:$0xff] %v8656_v17  ;;  %v8677_v17 = vld [vmem:[%s7329_s23 + $0xd10] sm:$0xff] }
 0x21d   : > { %v5818_v56 = vadd.f32 %v2258_v48, %v8210_v14  ;;  %v5803_v16 = vadd.f32 %v2034_v57, %v8213_v1  ;;  %v2260_v42 = vpop.f32.mrb[33].mxu1  ;;  %11036 = vst [vmem:[#allocation282_spill] sm:$0xff] %v8261_v51  ;;  %v8274_v48 = vld [vmem:[%s7329_s23 + $0x928] sm:$0xff]  ;;  %v8304_v51 = vld [vmem:[%s7329_s23 + $0x970] sm:$0xff]  ;;  %11163 = vst [vmem:[#allocation409_spill] sm:$0xff] %v8677_v17 }
 0x21e   : > { %2313 = vst [vmem:[#allocation2 + $0x40] sm:$0xff] %v5802_v41  ;;  %v5819_v50 = vadd.f32 %v2260_v42, %v8225_v13  ;;  %11040 = vst [vmem:[#allocation286_spill] sm:$0xff] %v8274_v48  ;;  %v8283_v41 = vld [vmem:[%s7329_s23 + $0x940] sm:$0xff]  ;;  %v8698_v17 = vld [vmem:[%s7329_s23 + $0xd48] sm:$0xff] }
 0x21f   : > { %2315 = vst [vmem:[#allocation2 + $0x50] sm:$0xff] %v5818_v56  ;;  %2314 = vst [vmem:[#allocation2 + $0x48] sm:$0xff] %v5803_v16  ;;  %v2038_v57 = vpop.f32.mrb[34].mxu0  ;;  %v8287_v56 = vld [vmem:[%s7329_s23 + $0x948] sm:$0xff]  ;;  %v8290_v16 = vld [vmem:[%s7329_s23 + $0x950] sm:$0xff] }
 0x220   : > { %11043 = vst [vmem:[#allocation289_spill] sm:$0xff] %v8283_v41  ;;  %2316 = vst [vmem:[#allocation2 + $0x58] sm:$0xff] %v5819_v50  ;;  %v5804_v42 = vadd.f32 %v2038_v57, %v8198_v34  ;;  %v2264_v30 = vpop.f32.mrb[34].mxu1  ;;  %v2040_v48 = vpop.f32.mrb[35].mxu0  ;;  %v8301_v57 = vld [vmem:[%s7329_s23 + $0x968] sm:$0xff] }
 0x221   : > { %11044 = vst [vmem:[#allocation290_spill] sm:$0xff] %v8287_v56  ;;  %11045 = vst [vmem:[#allocation291_spill] sm:$0xff] %v8290_v16  ;;  %v5820_v15 = vadd.f32 %v2264_v30, %v8210_v14  ;;  %v5805_v41 = vadd.f32 %v2040_v48, %v8213_v1  ;;  %v2266_v50 = vpop.f32.mrb[35].mxu1  ;;  %v8311_v56 = vld [vmem:[%s7329_s23 + $0x980] sm:$0xff]  ;;  %v8314_v30 = vld [vmem:[%s7329_s23 + $0x988] sm:$0xff] }
 0x222   : > { %11048 = vst [vmem:[#allocation294_spill] sm:$0xff] %v8301_v57  ;;  %11049 = vst [vmem:[#allocation295_spill] sm:$0xff] %v8304_v51  ;;  %v5821_v16 = vadd.f32 %v2266_v50, %v8225_v13  ;;  %v8320_v51 = vld [vmem:[%s7329_s23 + $0x998] sm:$0xff]  ;;  %v8344_v57 = vld [vmem:[%s7329_s23 + $0x9d0] sm:$0xff] }
 0x223   : > { %2325 = vst [vmem:[#allocation2 + $0xa0] sm:$0xff] %v5804_v42  ;;  %11051 = vst [vmem:[#allocation297_spill] sm:$0xff] %v8311_v56  ;;  %v2044_v48 = vpop.f32.mrb[36].mxu0  ;;  %v8323_v42 = vld [vmem:[%s7329_s23 + $0x9a0] sm:$0xff] }
 0x224   : > { %11052 = vst [vmem:[#allocation298_spill] sm:$0xff] %v8314_v30  ;;  %2327 = vst [vmem:[#allocation2 + $0xb0] sm:$0xff] %v5820_v15  ;;  %v5806_v50 = vadd.f32 %v2044_v48, %v8198_v34  ;;  %v2270_v56 = vpop.f32.mrb[36].mxu1  ;;  %v2046_v30 = vpop.f32.mrb[37].mxu0  ;;  %v8327_v15 = vld [vmem:[%s7329_s23 + $0x9a8] sm:$0xff] }
 0x225   : > { %2326 = vst [vmem:[#allocation2 + $0xa8] sm:$0xff] %v5805_v41  ;;  %11054 = vst [vmem:[#allocation300_spill] sm:$0xff] %v8320_v51  ;;  %v8330_v41 = vld [vmem:[%s7329_s23 + $0x9b0] sm:$0xff]  ;;  %v5822_v11 = vadd.f32 %v2270_v56, %v8210_v14  ;;  %v8338_v51 = vld [vmem:[%s7329_s23 + $0x9c0] sm:$0xff] }
 0x226   : > { %11055 = vst [vmem:[#allocation301_spill] sm:$0xff] %v8323_v42  ;;  %2328 = vst [vmem:[#allocation2 + $0xb8] sm:$0xff] %v5821_v16  ;;  %v5807_v42 = vadd.f32 %v2046_v30, %v8213_v1  ;;  %v2272_v16 = vpop.f32.mrb[37].mxu1  ;;  %v8341_v48 = vld [vmem:[%s7329_s23 + $0x9c8] sm:$0xff] }
 0x227   : > { %11056 = vst [vmem:[#allocation302_spill] sm:$0xff] %v8327_v15  ;;  %11057 = vst [vmem:[#allocation303_spill] sm:$0xff] %v8330_v41  ;;  %v5823_v41 = vadd.f32 %v2272_v16, %v8225_v13  ;;  %v8351_v15 = vld [vmem:[%s7329_s23 + $0x9e0] sm:$0xff]  ;;  %v8354_v56 = vld [vmem:[%s7329_s23 + $0x9e8] sm:$0xff]  ;;  %v2050_v30 = vpop.f32.mrb[38].mxu0 }
 0x228   : > { %11059 = vst [vmem:[#allocation305_spill] sm:$0xff] %v8338_v51  ;;  %11060 = vst [vmem:[#allocation306_spill] sm:$0xff] %v8341_v48  ;;  %v8357_v51 = vld [vmem:[%s7329_s23 + $0x9f0] sm:$0xff]  ;;  %v5808_v16 = vadd.f32 %v2050_v30, %v8198_v34  ;;  %v8381_v30 = vld [vmem:[%s7329_s23 + $0xa28] sm:$0xff] }
 0x229   : > { %11061 = vst [vmem:[#allocation307_spill] sm:$0xff] %v8344_v57  ;;  %2337 = vst [vmem:[#allocation2 + $0x100] sm:$0xff] %v5806_v50  ;;  %v8360_v57 = vld [vmem:[%s7329_s23 + $0x9f8] sm:$0xff]  ;;  %v8363_v50 = vld [vmem:[%s7329_s23 + $0xa00] sm:$0xff] }
 0x22a   : > { %11063 = vst [vmem:[#allocation309_spill] sm:$0xff] %v8351_v15  ;;  %11064 = vst [vmem:[#allocation310_spill] sm:$0xff] %v8354_v56  ;;  %v2276_v15 = vpop.f32.mrb[38].mxu1  ;;  %v2052_v56 = vpop.f32.mrb[39].mxu0  ;;  %v8384_v48 = vld [vmem:[%s7329_s23 + $0xa30] sm:$0xff] }
 0x22b   : > { %2339 = vst [vmem:[#allocation2 + $0x110] sm:$0xff] %v5822_v11  ;;  %2338 = vst [vmem:[#allocation2 + $0x108] sm:$0xff] %v5807_v42  ;;  %v8367_v11 = vld [vmem:[%s7329_s23 + $0xa08] sm:$0xff]  ;;  %v8370_v42 = vld [vmem:[%s7329_s23 + $0xa10] sm:$0xff] }
 0x22c   : > { %11065 = vst [vmem:[#allocation311_spill] sm:$0xff] %v8357_v51  ;;  %11066 = vst [vmem:[#allocation312_spill] sm:$0xff] %v8360_v57  ;;  %v5824_v51 = vadd.f32 %v2276_v15, %v8210_v14  ;;  %v8378_v57 = vld [vmem:[%s7329_s23 + $0xa20] sm:$0xff]  ;;  %v8394_v15 = vld [vmem:[%s7329_s23 + $0xa48] sm:$0xff] }
 0x22d   : > { %11067 = vst [vmem:[#allocation313_spill] sm:$0xff] %v8363_v50  ;;  %2340 = vst [vmem:[#allocation2 + $0x118] sm:$0xff] %v5823_v41  ;;  %v5809_v50 = vadd.f32 %v2052_v56, %v8213_v1  ;;  %v2278_v41 = vpop.f32.mrb[39].mxu1  ;;  %v2056_v56 = vpop.f32.mrb[40].mxu0 }
 0x22e   : > { %11068 = vst [vmem:[#allocation314_spill] sm:$0xff] %v8367_v11  ;;  %11069 = vst [vmem:[#allocation315_spill] sm:$0xff] %v8370_v42  ;;  %v5825_v42 = vadd.f32 %v2278_v41, %v8225_v13  ;;  %v8391_v11 = vld [vmem:[%s7329_s23 + $0xa40] sm:$0xff]  ;;  %v5810_v41 = vadd.f32 %v2056_v56, %v8198_v34  ;;  %v8421_v56 = vld [vmem:[%s7329_s23 + $0xa88] sm:$0xff] }
 0x22f   : > { %11071 = vst [vmem:[#allocation317_spill] sm:$0xff] %v8378_v57  ;;  %11072 = vst [vmem:[#allocation318_spill] sm:$0xff] %v8381_v30  ;;  %v8397_v57 = vld [vmem:[%s7329_s23 + $0xa50] sm:$0xff] }
 0x230   : > { %11073 = vst [vmem:[#allocation319_spill] sm:$0xff] %v8384_v48  ;;  %2349 = vst [vmem:[#allocation2 + $0x160] sm:$0xff] %v5808_v16  ;;  %v8400_v48 = vld [vmem:[%s7329_s23 + $0xa58] sm:$0xff]  ;;  %v8403_v16 = vld [vmem:[%s7329_s23 + $0xa60] sm:$0xff] }
 0x231   : > { %11075 = vst [vmem:[#allocation321_spill] sm:$0xff] %v8391_v11  ;;  %11076 = vst [vmem:[#allocation322_spill] sm:$0xff] %v8394_v15  ;;  %v2282_v11 = vpop.f32.mrb[40].mxu1  ;;  %v2058_v15 = vpop.f32.mrb[41].mxu0  ;;  %v8424_v30 = vld [vmem:[%s7329_s23 + $0xa90] sm:$0xff] }
 0x232   : > { %2351 = vst [vmem:[#allocation2 + $0x170] sm:$0xff] %v5824_v51  ;;  %2350 = vst [vmem:[#allocation2 + $0x168] sm:$0xff] %v5809_v50  ;;  %v8407_v51 = vld [vmem:[%s7329_s23 + $0xa68] sm:$0xff]  ;;  %v8410_v50 = vld [vmem:[%s7329_s23 + $0xa70] sm:$0xff] }
 0x233   : > { %11077 = vst [vmem:[#allocation323_spill] sm:$0xff] %v8397_v57  ;;  %11078 = vst [vmem:[#allocation324_spill] sm:$0xff] %v8400_v48  ;;  %v5826_v57 = vadd.f32 %v2282_v11, %v8210_v14  ;;  %v8418_v48 = vld [vmem:[%s7329_s23 + $0xa80] sm:$0xff]  ;;  %v8434_v11 = vld [vmem:[%s7329_s23 + $0xaa8] sm:$0xff] }
 0x234   : > { %11079 = vst [vmem:[#allocation325_spill] sm:$0xff] %v8403_v16  ;;  %2352 = vst [vmem:[#allocation2 + $0x178] sm:$0xff] %v5825_v42  ;;  %v5811_v16 = vadd.f32 %v2058_v15, %v8213_v1  ;;  %v2284_v42 = vpop.f32.mrb[41].mxu1  ;;  %v2062_v15 = vpop.f32.mrb[42].mxu0 }
 0x235   : > { %11080 = vst [vmem:[#allocation326_spill] sm:$0xff] %v8407_v51  ;;  %11081 = vst [vmem:[#allocation327_spill] sm:$0xff] %v8410_v50  ;;  %v5827_v50 = vadd.f32 %v2284_v42, %v8225_v13  ;;  %v8431_v51 = vld [vmem:[%s7329_s23 + $0xaa0] sm:$0xff]  ;;  %v5812_v42 = vadd.f32 %v2062_v15, %v8198_v34  ;;  %v8461_v15 = vld [vmem:[%s7329_s23 + $0xae8] sm:$0xff] }
 0x236   : > { %11083 = vst [vmem:[#allocation329_spill] sm:$0xff] %v8418_v48  ;;  %11084 = vst [vmem:[#allocation330_spill] sm:$0xff] %v8421_v56  ;;  %v8437_v48 = vld [vmem:[%s7329_s23 + $0xab0] sm:$0xff] }
 0x237   : > { %11085 = vst [vmem:[#allocation331_spill] sm:$0xff] %v8424_v30  ;;  %2361 = vst [vmem:[#allocation2 + $0x1c0] sm:$0xff] %v5810_v41  ;;  %v8440_v30 = vld [vmem:[%s7329_s23 + $0xab8] sm:$0xff]  ;;  %v8443_v41 = vld [vmem:[%s7329_s23 + $0xac0] sm:$0xff] }
 0x238   : > { %11087 = vst [vmem:[#allocation333_spill] sm:$0xff] %v8431_v51  ;;  %11088 = vst [vmem:[#allocation334_spill] sm:$0xff] %v8434_v11  ;;  %v2288_v51 = vpop.f32.mrb[42].mxu1  ;;  %v2064_v11 = vpop.f32.mrb[43].mxu0  ;;  %v8464_v56 = vld [vmem:[%s7329_s23 + $0xaf0] sm:$0xff] }
 0x239   : > { %2363 = vst [vmem:[#allocation2 + $0x1d0] sm:$0xff] %v5826_v57  ;;  %2362 = vst [vmem:[#allocation2 + $0x1c8] sm:$0xff] %v5811_v16  ;;  %v8447_v57 = vld [vmem:[%s7329_s23 + $0xac8] sm:$0xff]  ;;  %v8450_v16 = vld [vmem:[%s7329_s23 + $0xad0] sm:$0xff] }
 0x23a   : > { %11089 = vst [vmem:[#allocation335_spill] sm:$0xff] %v8437_v48  ;;  %11090 = vst [vmem:[#allocation336_spill] sm:$0xff] %v8440_v30  ;;  %v5828_v48 = vadd.f32 %v2288_v51, %v8210_v14  ;;  %v8458_v30 = vld [vmem:[%s7329_s23 + $0xae0] sm:$0xff]  ;;  %v8474_v51 = vld [vmem:[%s7329_s23 + $0xb08] sm:$0xff] }
 0x23b   : > { %11091 = vst [vmem:[#allocation337_spill] sm:$0xff] %v8443_v41  ;;  %2364 = vst [vmem:[#allocation2 + $0x1d8] sm:$0xff] %v5827_v50  ;;  %v5813_v41 = vadd.f32 %v2064_v11, %v8213_v1  ;;  %v2290_v50 = vpop.f32.mrb[43].mxu1  ;;  %v2068_v11 = vpop.f32.mrb[44].mxu0 }
 0x23c   : > { %11092 = vst [vmem:[#allocation338_spill] sm:$0xff] %v8447_v57  ;;  %11093 = vst [vmem:[#allocation339_spill] sm:$0xff] %v8450_v16  ;;  %v5829_v16 = vadd.f32 %v2290_v50, %v8225_v13  ;;  %v8471_v57 = vld [vmem:[%s7329_s23 + $0xb00] sm:$0xff]  ;;  %v5814_v50 = vadd.f32 %v2068_v11, %v8198_v34  ;;  %v8501_v11 = vld [vmem:[%s7329_s23 + $0xb48] sm:$0xff] }
 0x23d   : > { %11095 = vst [vmem:[#allocation341_spill] sm:$0xff] %v8458_v30  ;;  %11096 = vst [vmem:[#allocation342_spill] sm:$0xff] %v8461_v15  ;;  %v8477_v30 = vld [vmem:[%s7329_s23 + $0xb10] sm:$0xff] }
 0x23e   : > { %11097 = vst [vmem:[#allocation343_spill] sm:$0xff] %v8464_v56  ;;  %2373 = vst [vmem:[#allocation2 + $0x220] sm:$0xff] %v5812_v42  ;;  %v8480_v56 = vld [vmem:[%s7329_s23 + $0xb18] sm:$0xff]  ;;  %v8483_v42 = vld [vmem:[%s7329_s23 + $0xb20] sm:$0xff] }
 0x23f   : > { %11099 = vst [vmem:[#allocation345_spill] sm:$0xff] %v8471_v57  ;;  %11100 = vst [vmem:[#allocation346_spill] sm:$0xff] %v8474_v51  ;;  %v2294_v57 = vpop.f32.mrb[44].mxu1  ;;  %v2070_v51 = vpop.f32.mrb[45].mxu0  ;;  %v8504_v15 = vld [vmem:[%s7329_s23 + $0xb50] sm:$0xff] }
 0x240   : > { %2375 = vst [vmem:[#allocation2 + $0x230] sm:$0xff] %v5828_v48  ;;  %2374 = vst [vmem:[#allocation2 + $0x228] sm:$0xff] %v5813_v41  ;;  %v8487_v48 = vld [vmem:[%s7329_s23 + $0xb28] sm:$0xff]  ;;  %v8490_v41 = vld [vmem:[%s7329_s23 + $0xb30] sm:$0xff] }
 0x241   : > { %11101 = vst [vmem:[#allocation347_spill] sm:$0xff] %v8477_v30  ;;  %11102 = vst [vmem:[#allocation348_spill] sm:$0xff] %v8480_v56  ;;  %v5830_v30 = vadd.f32 %v2294_v57, %v8210_v14  ;;  %v8498_v56 = vld [vmem:[%s7329_s23 + $0xb40] sm:$0xff]  ;;  %v8514_v57 = vld [vmem:[%s7329_s23 + $0xb68] sm:$0xff] }
 0x242   : > { %11103 = vst [vmem:[#allocation349_spill] sm:$0xff] %v8483_v42  ;;  %2376 = vst [vmem:[#allocation2 + $0x238] sm:$0xff] %v5829_v16  ;;  %v5815_v42 = vadd.f32 %v2070_v51, %v8213_v1  ;;  %v2296_v16 = vpop.f32.mrb[45].mxu1  ;;  %v2074_v51 = vpop.f32.mrb[46].mxu0 }
 0x243   : > { %11104 = vst [vmem:[#allocation350_spill] sm:$0xff] %v8487_v48  ;;  %11105 = vst [vmem:[#allocation351_spill] sm:$0xff] %v8490_v41  ;;  %v5831_v41 = vadd.f32 %v2296_v16, %v8225_v13  ;;  %v8511_v48 = vld [vmem:[%s7329_s23 + $0xb60] sm:$0xff]  ;;  %v5816_v16 = vadd.f32 %v2074_v51, %v8198_v34  ;;  %v8541_v51 = vld [vmem:[%s7329_s23 + $0xba8] sm:$0xff] }
 0x244   : > { %11107 = vst [vmem:[#allocation353_spill] sm:$0xff] %v8498_v56  ;;  %11108 = vst [vmem:[#allocation354_spill] sm:$0xff] %v8501_v11  ;;  %v8517_v56 = vld [vmem:[%s7329_s23 + $0xb70] sm:$0xff]  ;;  %v8538_v34 = vld [vmem:[%s7329_s23 + $0xba0] sm:$0xff] }
 0x245   : > { %11109 = vst [vmem:[#allocation355_spill] sm:$0xff] %v8504_v15  ;;  %2385 = vst [vmem:[#allocation2 + $0x280] sm:$0xff] %v5814_v50  ;;  %v8520_v15 = vld [vmem:[%s7329_s23 + $0xb78] sm:$0xff]  ;;  %v8523_v50 = vld [vmem:[%s7329_s23 + $0xb80] sm:$0xff] }
 0x246   : > { %11111 = vst [vmem:[#allocation357_spill] sm:$0xff] %v8511_v48  ;;  %11112 = vst [vmem:[#allocation358_spill] sm:$0xff] %v8514_v57  ;;  %v2300_v48 = vpop.f32.mrb[46].mxu1  ;;  %v2076_v57 = vpop.f32.mrb[47].mxu0 }
 0x247   : > { %2387 = vst [vmem:[#allocation2 + $0x290] sm:$0xff] %v5830_v30  ;;  %2386 = vst [vmem:[#allocation2 + $0x288] sm:$0xff] %v5815_v42  ;;  %v8527_v30 = vld [vmem:[%s7329_s23 + $0xb88] sm:$0xff]  ;;  %v8530_v42 = vld [vmem:[%s7329_s23 + $0xb90] sm:$0xff] }
 0x248   : > { %11113 = vst [vmem:[#allocation359_spill] sm:$0xff] %v8517_v56  ;;  %11114 = vst [vmem:[#allocation360_spill] sm:$0xff] %v8520_v15  ;;  %v5832_v56 = vadd.f32 %v2300_v48, %v8210_v14  ;;  %v8548_v14 = vld [vmem:[%s7329_s23 + $0xbb8] sm:$0xff]  ;;  %v8554_v48 = vld [vmem:[%s7329_s23 + $0xbc8] sm:$0xff] }
 0x249   : > { %11115 = vst [vmem:[#allocation361_spill] sm:$0xff] %v8523_v50  ;;  %2388 = vst [vmem:[#allocation2 + $0x298] sm:$0xff] %v5831_v41  ;;  %v5817_v50 = vadd.f32 %v2076_v57, %v8213_v1  ;;  %v2302_v41 = vpop.f32.mrb[47].mxu1  ;;  %v8551_v1 = vld [vmem:[%s7329_s23 + $0xbc0] sm:$0xff]  ;;  %v8557_v57 = vld [vmem:[%s7329_s23 + $0xbd0] sm:$0xff] }
 0x24a   : > { %11116 = vst [vmem:[#allocation362_spill] sm:$0xff] %v8527_v30  ;;  %11117 = vst [vmem:[#allocation363_spill] sm:$0xff] %v8530_v42  ;;  %v8544_v30 = vld [vmem:[%s7329_s23 + $0xbb0] sm:$0xff]  ;;  %v5833_v42 = vadd.f32 %v2302_v41, %v8225_v13  ;;  %v8563_v13 = vld [vmem:[%s7329_s23 + $0xbe0] sm:$0xff] }
 0x24b   : > { %11119 = vst [vmem:[#allocation365_spill] sm:$0xff] %v8544_v30  ;;  %2397 = vst [vmem:[#allocation2 + $0x2e0] sm:$0xff] %v5816_v16  ;;  %v8560_v16 = vld [vmem:[%s7329_s23 + $0xbd8] sm:$0xff]  ;;  %v8566_v41 = vld [vmem:[%s7329_s23 + $0xbe8] sm:$0xff] }
 0x24c   : > { %11120 = vst [vmem:[#allocation366_spill] sm:$0xff] %v8548_v14  ;;  %11121 = vst [vmem:[#allocation367_spill] sm:$0xff] %v8551_v1  ;;  %v8581_v1 = vld [vmem:[%s7329_s23 + $0xc10] sm:$0xff]  ;;  %v8602_v15 = vld [vmem:[%s7329_s23 + $0xc48] sm:$0xff] }
 0x24d   : > { %11122 = vst [vmem:[#allocation368_spill] sm:$0xff] %v8554_v48  ;;  %2399 = vst [vmem:[#allocation2 + $0x2f0] sm:$0xff] %v5832_v56  ;;  %v8572_v56 = vld [vmem:[%s7329_s23 + $0xbf8] sm:$0xff]  ;;  %v8605_v48 = vld [vmem:[%s7329_s23 + $0xc50] sm:$0xff] }
 0x24e   : > { %2398 = vst [vmem:[#allocation2 + $0x2e8] sm:$0xff] %v5817_v50  ;;  %11123 = vst [vmem:[#allocation369_spill] sm:$0xff] %v8557_v57  ;;  %v8575_v50 = vld [vmem:[%s7329_s23 + $0xc00] sm:$0xff]  ;;  %v8578_v57 = vld [vmem:[%s7329_s23 + $0xc08] sm:$0xff] }
 0x24f   : > { %11124 = vst [vmem:[#allocation370_spill] sm:$0xff] %v8560_v16  ;;  %11125 = vst [vmem:[#allocation371_spill] sm:$0xff] %v8563_v13  ;;  %v8587_v13 = vld [vmem:[%s7329_s23 + $0xc20] sm:$0xff] }
 0x250   : > { %2400 = vst [vmem:[#allocation2 + $0x2f8] sm:$0xff] %v5833_v42  ;;  %11126 = vst [vmem:[#allocation372_spill] sm:$0xff] %v8566_v41  ;;  %v8584_v42 = vld [vmem:[%s7329_s23 + $0xc18] sm:$0xff]  ;;  %v8599_v16 = vld [vmem:[%s7329_s23 + $0xc40] sm:$0xff] }
 0x251   : > { %11128 = vst [vmem:[#allocation374_spill] sm:$0xff] %v8572_v56  ;;  %11129 = vst [vmem:[#allocation375_spill] sm:$0xff] %v8575_v50  ;;  %v8593_v56 = vld [vmem:[%s7329_s23 + $0xc30] sm:$0xff]  ;;  %v8596_v41 = vld [vmem:[%s7329_s23 + $0xc38] sm:$0xff] }
 0x252   : > { %11130 = vst [vmem:[#allocation376_spill] sm:$0xff] %v8578_v57  ;;  %11131 = vst [vmem:[#allocation377_spill] sm:$0xff] %v8581_v1  ;;  %v8632_v1 = vld [vmem:[%s7329_s23 + $0xc98] sm:$0xff]  ;;  %v8641_v50 = vld [vmem:[%s7329_s23 + $0xcb0] sm:$0xff] }
 0x253   : > { %11132 = vst [vmem:[#allocation378_spill] sm:$0xff] %v8584_v42  ;;  %11133 = vst [vmem:[#allocation379_spill] sm:$0xff] %v8587_v13  ;;  %v8608_v13 = vld [vmem:[%s7329_s23 + $0xc58] sm:$0xff]  ;;  %v9697_v42 = vld [vmem:[%s7329_s23 + $0x17b0] sm:$0xff] }
 0x254   : > { %11135 = vst [vmem:[#allocation381_spill] sm:$0xff] %v8593_v56  ;;  %11136 = vst [vmem:[#allocation382_spill] sm:$0xff] %v8596_v41  ;;  %v8614_v56 = vld [vmem:[%s7329_s23 + $0xc68] sm:$0xff]  ;;  %v8617_v41 = vld [vmem:[%s7329_s23 + $0xc70] sm:$0xff] }
 0x255   : > { %11137 = vst [vmem:[#allocation383_spill] sm:$0xff] %v8599_v16  ;;  %11138 = vst [vmem:[#allocation384_spill] sm:$0xff] %v8602_v15  ;;  %v8620_v16 = vld [vmem:[%s7329_s23 + $0xc78] sm:$0xff]  ;;  %v8623_v15 = vld [vmem:[%s7329_s23 + $0xc80] sm:$0xff] }
 0x256   : > { %11139 = vst [vmem:[#allocation385_spill] sm:$0xff] %v8605_v48  ;;  %11140 = vst [vmem:[#allocation386_spill] sm:$0xff] %v8608_v13  ;;  %v8626_v48 = vld [vmem:[%s7329_s23 + $0xc88] sm:$0xff]  ;;  %v8629_v13 = vld [vmem:[%s7329_s23 + $0xc90] sm:$0xff] }
 0x257   : > { %11142 = vst [vmem:[#allocation388_spill] sm:$0xff] %v8614_v56  ;;  %11143 = vst [vmem:[#allocation389_spill] sm:$0xff] %v8617_v41  ;;  %v8638_v41 = vld [vmem:[%s7329_s23 + $0xca8] sm:$0xff]  ;;  %v9715_v57 = vld [vmem:[%s7329_s23 + $0x17e0] sm:$0xff] }
 0x258   : > { %11144 = vst [vmem:[#allocation390_spill] sm:$0xff] %v8620_v16  ;;  %11145 = vst [vmem:[#allocation391_spill] sm:$0xff] %v8623_v15  ;;  %v8644_v15 = vld [vmem:[%s7329_s23 + $0xcb8] sm:$0xff]  ;;  %v9706_v56 = vld [vmem:[%s7329_s23 + $0x17c8] sm:$0xff] }
 0x259   : > { %11146 = vst [vmem:[#allocation392_spill] sm:$0xff] %v8626_v48  ;;  %11147 = vst [vmem:[#allocation393_spill] sm:$0xff] %v8629_v13  ;;  %v8647_v48 = vld [vmem:[%s7329_s23 + $0xcc0] sm:$0xff]  ;;  %v8650_v13 = vld [vmem:[%s7329_s23 + $0xcc8] sm:$0xff] }
 0x25a   : > { %11148 = vst [vmem:[#allocation394_spill] sm:$0xff] %v8632_v1  ;;  %11150 = vst [vmem:[#allocation396_spill] sm:$0xff] %v8638_v41  ;;  %v8653_v1 = vld [vmem:[%s7329_s23 + $0xcd0] sm:$0xff]  ;;  %v8659_v41 = vld [vmem:[%s7329_s23 + $0xce0] sm:$0xff] }
 0x25b   : > { %11151 = vst [vmem:[#allocation397_spill] sm:$0xff] %v8641_v50  ;;  %11152 = vst [vmem:[#allocation398_spill] sm:$0xff] %v8644_v15  ;;  %v8662_v50 = vld [vmem:[%s7329_s23 + $0xce8] sm:$0xff]  ;;  %v8665_v15 = vld [vmem:[%s7329_s23 + $0xcf0] sm:$0xff] }
 0x25c   : > { %11153 = vst [vmem:[#allocation399_spill] sm:$0xff] %v8647_v48  ;;  %11154 = vst [vmem:[#allocation400_spill] sm:$0xff] %v8650_v13  ;;  %v8668_v48 = vld [vmem:[%s7329_s23 + $0xcf8] sm:$0xff]  ;;  %v8671_v13 = vld [vmem:[%s7329_s23 + $0xd00] sm:$0xff] }
 0x25d   : > { %11155 = vst [vmem:[#allocation401_spill] sm:$0xff] %v8653_v1  ;;  %11157 = vst [vmem:[#allocation403_spill] sm:$0xff] %v8659_v41  ;;  %v8674_v1 = vld [vmem:[%s7329_s23 + $0xd08] sm:$0xff]  ;;  %v8680_v41 = vld [vmem:[%s7329_s23 + $0xd18] sm:$0xff] }
 0x25e   : > { %11158 = vst [vmem:[#allocation404_spill] sm:$0xff] %v8662_v50  ;;  %11159 = vst [vmem:[#allocation405_spill] sm:$0xff] %v8665_v15  ;;  %v8683_v50 = vld [vmem:[%s7329_s23 + $0xd20] sm:$0xff]  ;;  %v8686_v15 = vld [vmem:[%s7329_s23 + $0xd28] sm:$0xff] }
 0x25f   : > { %11160 = vst [vmem:[#allocation406_spill] sm:$0xff] %v8668_v48  ;;  %11161 = vst [vmem:[#allocation407_spill] sm:$0xff] %v8671_v13  ;;  %v8689_v48 = vld [vmem:[%s7329_s23 + $0xd30] sm:$0xff]  ;;  %v8692_v13 = vld [vmem:[%s7329_s23 + $0xd38] sm:$0xff] }
 0x260   : > { %11162 = vst [vmem:[#allocation408_spill] sm:$0xff] %v8674_v1  ;;  %11164 = vst [vmem:[#allocation410_spill] sm:$0xff] %v8680_v41  ;;  %v8695_v1 = vld [vmem:[%s7329_s23 + $0xd40] sm:$0xff]  ;;  %v8701_v41 = vld [vmem:[%s7329_s23 + $0xd50] sm:$0xff] }
 0x261   : > { %11165 = vst [vmem:[#allocation411_spill] sm:$0xff] %v8683_v50  ;;  %11166 = vst [vmem:[#allocation412_spill] sm:$0xff] %v8686_v15  ;;  %v8704_v50 = vld [vmem:[%s7329_s23 + $0xd58] sm:$0xff]  ;;  %v8707_v15 = vld [vmem:[%s7329_s23 + $0xd60] sm:$0xff] }
 0x262   : > { %11167 = vst [vmem:[#allocation413_spill] sm:$0xff] %v8689_v48  ;;  %11168 = vst [vmem:[#allocation414_spill] sm:$0xff] %v8692_v13  ;;  %v8710_v48 = vld [vmem:[%s7329_s23 + $0xd68] sm:$0xff]  ;;  %v8713_v13 = vld [vmem:[%s7329_s23 + $0xd70] sm:$0xff] }
 0x263   : > { %11169 = vst [vmem:[#allocation415_spill] sm:$0xff] %v8695_v1  ;;  %11170 = vst [vmem:[#allocation416_spill] sm:$0xff] %v8698_v17  ;;  %v8716_v1 = vld [vmem:[%s7329_s23 + $0xd78] sm:$0xff]  ;;  %v8719_v17 = vld [vmem:[%s7329_s23 + $0xd80] sm:$0xff] }
 0x264   : > { %11171 = vst [vmem:[#allocation417_spill] sm:$0xff] %v8701_v41  ;;  %11172 = vst [vmem:[#allocation418_spill] sm:$0xff] %v8704_v50  ;;  %v8722_v41 = vld [vmem:[%s7329_s23 + $0xd88] sm:$0xff]  ;;  %v8725_v50 = vld [vmem:[%s7329_s23 + $0xd90] sm:$0xff] }
 0x265   : > { %11173 = vst [vmem:[#allocation419_spill] sm:$0xff] %v8707_v15  ;;  %11174 = vst [vmem:[#allocation420_spill] sm:$0xff] %v8710_v48  ;;  %v8728_v15 = vld [vmem:[%s7329_s23 + $0xd98] sm:$0xff]  ;;  %v8731_v48 = vld [vmem:[%s7329_s23 + $0xda0] sm:$0xff] }
 0x266   : > { %11175 = vst [vmem:[#allocation421_spill] sm:$0xff] %v8713_v13  ;;  %11176 = vst [vmem:[#allocation422_spill] sm:$0xff] %v8716_v1  ;;  %v8734_v13 = vld [vmem:[%s7329_s23 + $0xda8] sm:$0xff]  ;;  %v8737_v1 = vld [vmem:[%s7329_s23 + $0xdb0] sm:$0xff] }
 0x267   : > { %11177 = vst [vmem:[#allocation423_spill] sm:$0xff] %v8719_v17  ;;  %11178 = vst [vmem:[#allocation424_spill] sm:$0xff] %v8722_v41  ;;  %v8740_v17 = vld [vmem:[%s7329_s23 + $0xdb8] sm:$0xff]  ;;  %v8743_v41 = vld [vmem:[%s7329_s23 + $0xdc0] sm:$0xff] }
 0x268   : > { %11179 = vst [vmem:[#allocation425_spill] sm:$0xff] %v8725_v50  ;;  %11180 = vst [vmem:[#allocation426_spill] sm:$0xff] %v8728_v15  ;;  %v8746_v50 = vld [vmem:[%s7329_s23 + $0xdc8] sm:$0xff]  ;;  %v8749_v15 = vld [vmem:[%s7329_s23 + $0xdd0] sm:$0xff] }
 0x269   : > { %11181 = vst [vmem:[#allocation427_spill] sm:$0xff] %v8731_v48  ;;  %11182 = vst [vmem:[#allocation428_spill] sm:$0xff] %v8734_v13  ;;  %v8752_v48 = vld [vmem:[%s7329_s23 + $0xdd8] sm:$0xff]  ;;  %v8755_v13 = vld [vmem:[%s7329_s23 + $0xde0] sm:$0xff] }
 0x26a   : > { %11183 = vst [vmem:[#allocation429_spill] sm:$0xff] %v8737_v1  ;;  %11184 = vst [vmem:[#allocation430_spill] sm:$0xff] %v8740_v17  ;;  %v8758_v1 = vld [vmem:[%s7329_s23 + $0xde8] sm:$0xff]  ;;  %v8761_v17 = vld [vmem:[%s7329_s23 + $0xdf0] sm:$0xff] }
 0x26b   : > { %11185 = vst [vmem:[#allocation431_spill] sm:$0xff] %v8743_v41  ;;  %11186 = vst [vmem:[#allocation432_spill] sm:$0xff] %v8746_v50  ;;  %v8764_v41 = vld [vmem:[%s7329_s23 + $0xdf8] sm:$0xff]  ;;  %v8767_v50 = vld [vmem:[%s7329_s23 + $0xe00] sm:$0xff] }
 0x26c   : > { %11187 = vst [vmem:[#allocation433_spill] sm:$0xff] %v8749_v15  ;;  %11188 = vst [vmem:[#allocation434_spill] sm:$0xff] %v8752_v48  ;;  %v8770_v15 = vld [vmem:[%s7329_s23 + $0xe08] sm:$0xff]  ;;  %v8773_v48 = vld [vmem:[%s7329_s23 + $0xe10] sm:$0xff] }
 0x26d   : > { %11189 = vst [vmem:[#allocation435_spill] sm:$0xff] %v8755_v13  ;;  %11190 = vst [vmem:[#allocation436_spill] sm:$0xff] %v8758_v1  ;;  %v8776_v13 = vld [vmem:[%s7329_s23 + $0xe18] sm:$0xff]  ;;  %v8779_v1 = vld [vmem:[%s7329_s23 + $0xe20] sm:$0xff] }
 0x26e   : > { %11191 = vst [vmem:[#allocation437_spill] sm:$0xff] %v8761_v17  ;;  %11192 = vst [vmem:[#allocation438_spill] sm:$0xff] %v8764_v41  ;;  %v8782_v17 = vld [vmem:[%s7329_s23 + $0xe28] sm:$0xff]  ;;  %v8785_v41 = vld [vmem:[%s7329_s23 + $0xe30] sm:$0xff] }
 0x26f   : > { %11193 = vst [vmem:[#allocation439_spill] sm:$0xff] %v8767_v50  ;;  %11194 = vst [vmem:[#allocation440_spill] sm:$0xff] %v8770_v15  ;;  %v8788_v50 = vld [vmem:[%s7329_s23 + $0xe38] sm:$0xff]  ;;  %v8791_v15 = vld [vmem:[%s7329_s23 + $0xe40] sm:$0xff] }
 0x270   : > { %11195 = vst [vmem:[#allocation441_spill] sm:$0xff] %v8773_v48  ;;  %11196 = vst [vmem:[#allocation442_spill] sm:$0xff] %v8776_v13  ;;  %v8794_v48 = vld [vmem:[%s7329_s23 + $0xe48] sm:$0xff]  ;;  %v8797_v13 = vld [vmem:[%s7329_s23 + $0xe50] sm:$0xff] }
 0x271   : > { %11197 = vst [vmem:[#allocation443_spill] sm:$0xff] %v8779_v1  ;;  %11198 = vst [vmem:[#allocation444_spill] sm:$0xff] %v8782_v17  ;;  %v8800_v1 = vld [vmem:[%s7329_s23 + $0xe58] sm:$0xff]  ;;  %v8803_v17 = vld [vmem:[%s7329_s23 + $0xe60] sm:$0xff] }
 0x272   : > { %11199 = vst [vmem:[#allocation445_spill] sm:$0xff] %v8785_v41  ;;  %11200 = vst [vmem:[#allocation446_spill] sm:$0xff] %v8788_v50  ;;  %v8806_v41 = vld [vmem:[%s7329_s23 + $0xe68] sm:$0xff]  ;;  %v8809_v50 = vld [vmem:[%s7329_s23 + $0xe70] sm:$0xff] }
 0x273   : > { %11201 = vst [vmem:[#allocation447_spill] sm:$0xff] %v8791_v15  ;;  %11202 = vst [vmem:[#allocation448_spill] sm:$0xff] %v8794_v48  ;;  %v8812_v15 = vld [vmem:[%s7329_s23 + $0xe78] sm:$0xff]  ;;  %v8815_v48 = vld [vmem:[%s7329_s23 + $0xe80] sm:$0xff] }
 0x274   : > { %11203 = vst [vmem:[#allocation449_spill] sm:$0xff] %v8797_v13  ;;  %11204 = vst [vmem:[#allocation450_spill] sm:$0xff] %v8800_v1  ;;  %v8818_v13 = vld [vmem:[%s7329_s23 + $0xe88] sm:$0xff]  ;;  %v8821_v1 = vld [vmem:[%s7329_s23 + $0xe90] sm:$0xff] }
 0x275   : > { %11205 = vst [vmem:[#allocation451_spill] sm:$0xff] %v8803_v17  ;;  %11206 = vst [vmem:[#allocation452_spill] sm:$0xff] %v8806_v41  ;;  %v8824_v17 = vld [vmem:[%s7329_s23 + $0xe98] sm:$0xff]  ;;  %v8827_v41 = vld [vmem:[%s7329_s23 + $0xea0] sm:$0xff] }
 0x276   : > { %11207 = vst [vmem:[#allocation453_spill] sm:$0xff] %v8809_v50  ;;  %11208 = vst [vmem:[#allocation454_spill] sm:$0xff] %v8812_v15  ;;  %v8830_v50 = vld [vmem:[%s7329_s23 + $0xea8] sm:$0xff]  ;;  %v8833_v15 = vld [vmem:[%s7329_s23 + $0xeb0] sm:$0xff] }
 0x277   : > { %11209 = vst [vmem:[#allocation455_spill] sm:$0xff] %v8815_v48  ;;  %11210 = vst [vmem:[#allocation456_spill] sm:$0xff] %v8818_v13  ;;  %v8836_v48 = vld [vmem:[%s7329_s23 + $0xeb8] sm:$0xff]  ;;  %v8839_v13 = vld [vmem:[%s7329_s23 + $0xec0] sm:$0xff] }
 0x278   : > { %11211 = vst [vmem:[#allocation457_spill] sm:$0xff] %v8821_v1  ;;  %11212 = vst [vmem:[#allocation458_spill] sm:$0xff] %v8824_v17  ;;  %v8842_v1 = vld [vmem:[%s7329_s23 + $0xec8] sm:$0xff]  ;;  %v8845_v17 = vld [vmem:[%s7329_s23 + $0xed0] sm:$0xff] }
 0x279   : > { %11213 = vst [vmem:[#allocation459_spill] sm:$0xff] %v8827_v41  ;;  %11214 = vst [vmem:[#allocation460_spill] sm:$0xff] %v8830_v50  ;;  %v8848_v41 = vld [vmem:[%s7329_s23 + $0xed8] sm:$0xff]  ;;  %v8851_v50 = vld [vmem:[%s7329_s23 + $0xee0] sm:$0xff] }
 0x27a   : > { %11215 = vst [vmem:[#allocation461_spill] sm:$0xff] %v8833_v15  ;;  %11216 = vst [vmem:[#allocation462_spill] sm:$0xff] %v8836_v48  ;;  %v8854_v15 = vld [vmem:[%s7329_s23 + $0xee8] sm:$0xff]  ;;  %v8857_v48 = vld [vmem:[%s7329_s23 + $0xef0] sm:$0xff] }
 0x27b   : > { %11217 = vst [vmem:[#allocation463_spill] sm:$0xff] %v8839_v13  ;;  %11218 = vst [vmem:[#allocation464_spill] sm:$0xff] %v8842_v1  ;;  %v8860_v13 = vld [vmem:[%s7329_s23 + $0xef8] sm:$0xff]  ;;  %v8863_v1 = vld [vmem:[%s7329_s23 + $0xf00] sm:$0xff] }
 0x27c   : > { %11219 = vst [vmem:[#allocation465_spill] sm:$0xff] %v8845_v17  ;;  %11220 = vst [vmem:[#allocation466_spill] sm:$0xff] %v8848_v41  ;;  %v8866_v17 = vld [vmem:[%s7329_s23 + $0xf08] sm:$0xff]  ;;  %v8869_v41 = vld [vmem:[%s7329_s23 + $0xf10] sm:$0xff] }
 0x27d   : > { %11221 = vst [vmem:[#allocation467_spill] sm:$0xff] %v8851_v50  ;;  %11222 = vst [vmem:[#allocation468_spill] sm:$0xff] %v8854_v15  ;;  %v8872_v50 = vld [vmem:[%s7329_s23 + $0xf18] sm:$0xff]  ;;  %v8875_v15 = vld [vmem:[%s7329_s23 + $0xf20] sm:$0xff] }
 0x27e   : > { %11223 = vst [vmem:[#allocation469_spill] sm:$0xff] %v8857_v48  ;;  %11224 = vst [vmem:[#allocation470_spill] sm:$0xff] %v8860_v13  ;;  %v8878_v48 = vld [vmem:[%s7329_s23 + $0xf28] sm:$0xff]  ;;  %v8881_v13 = vld [vmem:[%s7329_s23 + $0xf30] sm:$0xff] }
 0x27f   : > { %11225 = vst [vmem:[#allocation471_spill] sm:$0xff] %v8863_v1  ;;  %11226 = vst [vmem:[#allocation472_spill] sm:$0xff] %v8866_v17  ;;  %v8884_v1 = vld [vmem:[%s7329_s23 + $0xf38] sm:$0xff]  ;;  %v8887_v17 = vld [vmem:[%s7329_s23 + $0xf40] sm:$0xff] }
 0x280   : > { %11227 = vst [vmem:[#allocation473_spill] sm:$0xff] %v8869_v41  ;;  %11228 = vst [vmem:[#allocation474_spill] sm:$0xff] %v8872_v50  ;;  %v8890_v41 = vld [vmem:[%s7329_s23 + $0xf48] sm:$0xff]  ;;  %v8893_v50 = vld [vmem:[%s7329_s23 + $0xf50] sm:$0xff] }
 0x281   : > { %11229 = vst [vmem:[#allocation475_spill] sm:$0xff] %v8875_v15  ;;  %11230 = vst [vmem:[#allocation476_spill] sm:$0xff] %v8878_v48  ;;  %v8896_v15 = vld [vmem:[%s7329_s23 + $0xf58] sm:$0xff]  ;;  %v8899_v48 = vld [vmem:[%s7329_s23 + $0xf60] sm:$0xff] }
 0x282   : > { %11231 = vst [vmem:[#allocation477_spill] sm:$0xff] %v8881_v13  ;;  %11232 = vst [vmem:[#allocation478_spill] sm:$0xff] %v8884_v1  ;;  %v8902_v13 = vld [vmem:[%s7329_s23 + $0xf68] sm:$0xff]  ;;  %v8905_v1 = vld [vmem:[%s7329_s23 + $0xf70] sm:$0xff] }
 0x283   : > { %11233 = vst [vmem:[#allocation479_spill] sm:$0xff] %v8887_v17  ;;  %11234 = vst [vmem:[#allocation480_spill] sm:$0xff] %v8890_v41  ;;  %v8908_v17 = vld [vmem:[%s7329_s23 + $0xf78] sm:$0xff]  ;;  %v8911_v41 = vld [vmem:[%s7329_s23 + $0xf80] sm:$0xff] }
 0x284   : > { %11235 = vst [vmem:[#allocation481_spill] sm:$0xff] %v8893_v50  ;;  %11236 = vst [vmem:[#allocation482_spill] sm:$0xff] %v8896_v15  ;;  %v8914_v50 = vld [vmem:[%s7329_s23 + $0xf88] sm:$0xff]  ;;  %v8917_v15 = vld [vmem:[%s7329_s23 + $0xf90] sm:$0xff] }
 0x285   : > { %11237 = vst [vmem:[#allocation483_spill] sm:$0xff] %v8899_v48  ;;  %11238 = vst [vmem:[#allocation484_spill] sm:$0xff] %v8902_v13  ;;  %v8920_v48 = vld [vmem:[%s7329_s23 + $0xf98] sm:$0xff]  ;;  %v8923_v13 = vld [vmem:[%s7329_s23 + $0xfa0] sm:$0xff] }
 0x286   : > { %11239 = vst [vmem:[#allocation485_spill] sm:$0xff] %v8905_v1  ;;  %11240 = vst [vmem:[#allocation486_spill] sm:$0xff] %v8908_v17  ;;  %v8926_v1 = vld [vmem:[%s7329_s23 + $0xfa8] sm:$0xff]  ;;  %v8929_v17 = vld [vmem:[%s7329_s23 + $0xfb0] sm:$0xff] }
 0x287   : > { %11241 = vst [vmem:[#allocation487_spill] sm:$0xff] %v8911_v41  ;;  %11242 = vst [vmem:[#allocation488_spill] sm:$0xff] %v8914_v50  ;;  %v8932_v41 = vld [vmem:[%s7329_s23 + $0xfb8] sm:$0xff]  ;;  %v8935_v50 = vld [vmem:[%s7329_s23 + $0xfc0] sm:$0xff] }
 0x288   : > { %11243 = vst [vmem:[#allocation489_spill] sm:$0xff] %v8917_v15  ;;  %11244 = vst [vmem:[#allocation490_spill] sm:$0xff] %v8920_v48  ;;  %v8938_v15 = vld [vmem:[%s7329_s23 + $0xfc8] sm:$0xff]  ;;  %v8941_v48 = vld [vmem:[%s7329_s23 + $0xfd0] sm:$0xff] }
 0x289   : > { %11245 = vst [vmem:[#allocation491_spill] sm:$0xff] %v8923_v13  ;;  %11246 = vst [vmem:[#allocation492_spill] sm:$0xff] %v8926_v1  ;;  %v8944_v13 = vld [vmem:[%s7329_s23 + $0xfd8] sm:$0xff]  ;;  %v8947_v1 = vld [vmem:[%s7329_s23 + $0xfe0] sm:$0xff] }
 0x28a   : > { %11247 = vst [vmem:[#allocation493_spill] sm:$0xff] %v8929_v17  ;;  %11248 = vst [vmem:[#allocation494_spill] sm:$0xff] %v8932_v41  ;;  %v8950_v17 = vld [vmem:[%s7329_s23 + $0xfe8] sm:$0xff]  ;;  %v8953_v41 = vld [vmem:[%s7329_s23 + $0xff0] sm:$0xff] }
 0x28b   : > { %11249 = vst [vmem:[#allocation495_spill] sm:$0xff] %v8935_v50  ;;  %11250 = vst [vmem:[#allocation496_spill] sm:$0xff] %v8938_v15  ;;  %v8956_v50 = vld [vmem:[%s7329_s23 + $0xff8] sm:$0xff]  ;;  %v8959_v15 = vld [vmem:[%s7329_s23 + $0x1000] sm:$0xff] }
 0x28c   : > { %11251 = vst [vmem:[#allocation497_spill] sm:$0xff] %v8941_v48  ;;  %11252 = vst [vmem:[#allocation498_spill] sm:$0xff] %v8944_v13  ;;  %v8962_v48 = vld [vmem:[%s7329_s23 + $0x1008] sm:$0xff]  ;;  %v8965_v13 = vld [vmem:[%s7329_s23 + $0x1010] sm:$0xff] }
 0x28d   : > { %11253 = vst [vmem:[#allocation499_spill] sm:$0xff] %v8947_v1  ;;  %11254 = vst [vmem:[#allocation500_spill] sm:$0xff] %v8950_v17  ;;  %v8968_v1 = vld [vmem:[%s7329_s23 + $0x1018] sm:$0xff]  ;;  %v8971_v17 = vld [vmem:[%s7329_s23 + $0x1020] sm:$0xff] }
 0x28e   : > { %11255 = vst [vmem:[#allocation501_spill] sm:$0xff] %v8953_v41  ;;  %11256 = vst [vmem:[#allocation502_spill] sm:$0xff] %v8956_v50  ;;  %v8974_v41 = vld [vmem:[%s7329_s23 + $0x1028] sm:$0xff]  ;;  %v8977_v50 = vld [vmem:[%s7329_s23 + $0x1030] sm:$0xff] }
 0x28f   : > { %11257 = vst [vmem:[#allocation503_spill] sm:$0xff] %v8959_v15  ;;  %11258 = vst [vmem:[#allocation504_spill] sm:$0xff] %v8962_v48  ;;  %v8980_v15 = vld [vmem:[%s7329_s23 + $0x1038] sm:$0xff]  ;;  %v8983_v48 = vld [vmem:[%s7329_s23 + $0x1040] sm:$0xff] }
 0x290   : > { %11259 = vst [vmem:[#allocation505_spill] sm:$0xff] %v8965_v13  ;;  %11260 = vst [vmem:[#allocation506_spill] sm:$0xff] %v8968_v1  ;;  %v8986_v13 = vld [vmem:[%s7329_s23 + $0x1048] sm:$0xff]  ;;  %v8989_v1 = vld [vmem:[%s7329_s23 + $0x1050] sm:$0xff] }
 0x291   : > { %11261 = vst [vmem:[#allocation507_spill] sm:$0xff] %v8971_v17  ;;  %11262 = vst [vmem:[#allocation508_spill] sm:$0xff] %v8974_v41  ;;  %v8992_v17 = vld [vmem:[%s7329_s23 + $0x1058] sm:$0xff]  ;;  %v8995_v41 = vld [vmem:[%s7329_s23 + $0x1060] sm:$0xff] }
 0x292   : > { %11263 = vst [vmem:[#allocation509_spill] sm:$0xff] %v8977_v50  ;;  %11264 = vst [vmem:[#allocation510_spill] sm:$0xff] %v8980_v15  ;;  %v8998_v50 = vld [vmem:[%s7329_s23 + $0x1068] sm:$0xff]  ;;  %v9001_v15 = vld [vmem:[%s7329_s23 + $0x1070] sm:$0xff] }
 0x293   : > { %11265 = vst [vmem:[#allocation511_spill] sm:$0xff] %v8983_v48  ;;  %11266 = vst [vmem:[#allocation512_spill] sm:$0xff] %v8986_v13  ;;  %v9004_v48 = vld [vmem:[%s7329_s23 + $0x1078] sm:$0xff]  ;;  %v9007_v13 = vld [vmem:[%s7329_s23 + $0x1080] sm:$0xff] }
 0x294   : > { %11267 = vst [vmem:[#allocation513_spill] sm:$0xff] %v8989_v1  ;;  %11268 = vst [vmem:[#allocation514_spill] sm:$0xff] %v8992_v17  ;;  %v9010_v1 = vld [vmem:[%s7329_s23 + $0x1088] sm:$0xff]  ;;  %v9013_v17 = vld [vmem:[%s7329_s23 + $0x1090] sm:$0xff] }
 0x295   : > { %11269 = vst [vmem:[#allocation515_spill] sm:$0xff] %v8995_v41  ;;  %11270 = vst [vmem:[#allocation516_spill] sm:$0xff] %v8998_v50  ;;  %v9016_v41 = vld [vmem:[%s7329_s23 + $0x1098] sm:$0xff]  ;;  %v9019_v50 = vld [vmem:[%s7329_s23 + $0x10a0] sm:$0xff] }
 0x296   : > { %11271 = vst [vmem:[#allocation517_spill] sm:$0xff] %v9001_v15  ;;  %11272 = vst [vmem:[#allocation518_spill] sm:$0xff] %v9004_v48  ;;  %v9022_v15 = vld [vmem:[%s7329_s23 + $0x10a8] sm:$0xff]  ;;  %v9025_v48 = vld [vmem:[%s7329_s23 + $0x10b0] sm:$0xff] }
 0x297   : > { %11273 = vst [vmem:[#allocation519_spill] sm:$0xff] %v9007_v13  ;;  %11274 = vst [vmem:[#allocation520_spill] sm:$0xff] %v9010_v1  ;;  %v9028_v13 = vld [vmem:[%s7329_s23 + $0x10b8] sm:$0xff]  ;;  %v9031_v1 = vld [vmem:[%s7329_s23 + $0x10c0] sm:$0xff] }
 0x298   : > { %11275 = vst [vmem:[#allocation521_spill] sm:$0xff] %v9013_v17  ;;  %11276 = vst [vmem:[#allocation522_spill] sm:$0xff] %v9016_v41  ;;  %v9034_v17 = vld [vmem:[%s7329_s23 + $0x10c8] sm:$0xff]  ;;  %v9037_v41 = vld [vmem:[%s7329_s23 + $0x10d0] sm:$0xff] }
 0x299   : > { %11277 = vst [vmem:[#allocation523_spill] sm:$0xff] %v9019_v50  ;;  %11278 = vst [vmem:[#allocation524_spill] sm:$0xff] %v9022_v15  ;;  %v9040_v50 = vld [vmem:[%s7329_s23 + $0x10d8] sm:$0xff]  ;;  %v9043_v15 = vld [vmem:[%s7329_s23 + $0x10e0] sm:$0xff] }
 0x29a   : > { %11279 = vst [vmem:[#allocation525_spill] sm:$0xff] %v9025_v48  ;;  %11280 = vst [vmem:[#allocation526_spill] sm:$0xff] %v9028_v13  ;;  %v9046_v48 = vld [vmem:[%s7329_s23 + $0x10e8] sm:$0xff]  ;;  %v9049_v13 = vld [vmem:[%s7329_s23 + $0x10f0] sm:$0xff] }
 0x29b   : > { %11281 = vst [vmem:[#allocation527_spill] sm:$0xff] %v9031_v1  ;;  %11282 = vst [vmem:[#allocation528_spill] sm:$0xff] %v9034_v17  ;;  %v9052_v1 = vld [vmem:[%s7329_s23 + $0x10f8] sm:$0xff]  ;;  %v9055_v17 = vld [vmem:[%s7329_s23 + $0x1100] sm:$0xff] }
 0x29c   : > { %11283 = vst [vmem:[#allocation529_spill] sm:$0xff] %v9037_v41  ;;  %11284 = vst [vmem:[#allocation530_spill] sm:$0xff] %v9040_v50  ;;  %v9058_v41 = vld [vmem:[%s7329_s23 + $0x1108] sm:$0xff]  ;;  %v9061_v50 = vld [vmem:[%s7329_s23 + $0x1110] sm:$0xff] }
 0x29d   : > { %11285 = vst [vmem:[#allocation531_spill] sm:$0xff] %v9043_v15  ;;  %11286 = vst [vmem:[#allocation532_spill] sm:$0xff] %v9046_v48  ;;  %v9064_v15 = vld [vmem:[%s7329_s23 + $0x1118] sm:$0xff]  ;;  %v9067_v48 = vld [vmem:[%s7329_s23 + $0x1120] sm:$0xff] }
 0x29e   : > { %11287 = vst [vmem:[#allocation533_spill] sm:$0xff] %v9049_v13  ;;  %11288 = vst [vmem:[#allocation534_spill] sm:$0xff] %v9052_v1  ;;  %v9070_v13 = vld [vmem:[%s7329_s23 + $0x1128] sm:$0xff]  ;;  %v9073_v1 = vld [vmem:[%s7329_s23 + $0x1130] sm:$0xff] }
 0x29f   : > { %11289 = vst [vmem:[#allocation535_spill] sm:$0xff] %v9055_v17  ;;  %11290 = vst [vmem:[#allocation536_spill] sm:$0xff] %v9058_v41  ;;  %v9076_v17 = vld [vmem:[%s7329_s23 + $0x1138] sm:$0xff]  ;;  %v9079_v41 = vld [vmem:[%s7329_s23 + $0x1140] sm:$0xff] }
 0x2a0   : > { %11291 = vst [vmem:[#allocation537_spill] sm:$0xff] %v9061_v50  ;;  %11292 = vst [vmem:[#allocation538_spill] sm:$0xff] %v9064_v15  ;;  %v9082_v50 = vld [vmem:[%s7329_s23 + $0x1148] sm:$0xff]  ;;  %v9085_v15 = vld [vmem:[%s7329_s23 + $0x1150] sm:$0xff] }
 0x2a1   : > { %11293 = vst [vmem:[#allocation539_spill] sm:$0xff] %v9067_v48  ;;  %11294 = vst [vmem:[#allocation540_spill] sm:$0xff] %v9070_v13  ;;  %v9088_v48 = vld [vmem:[%s7329_s23 + $0x1158] sm:$0xff]  ;;  %v9091_v13 = vld [vmem:[%s7329_s23 + $0x1160] sm:$0xff] }
 0x2a2   : > { %11295 = vst [vmem:[#allocation541_spill] sm:$0xff] %v9073_v1  ;;  %11296 = vst [vmem:[#allocation542_spill] sm:$0xff] %v9076_v17  ;;  %v9094_v1 = vld [vmem:[%s7329_s23 + $0x1168] sm:$0xff]  ;;  %v9097_v17 = vld [vmem:[%s7329_s23 + $0x1170] sm:$0xff] }
 0x2a3   : > { %11297 = vst [vmem:[#allocation543_spill] sm:$0xff] %v9079_v41  ;;  %11298 = vst [vmem:[#allocation544_spill] sm:$0xff] %v9082_v50  ;;  %v9100_v41 = vld [vmem:[%s7329_s23 + $0x1178] sm:$0xff]  ;;  %v9103_v50 = vld [vmem:[%s7329_s23 + $0x1180] sm:$0xff] }
 0x2a4   : > { %11299 = vst [vmem:[#allocation545_spill] sm:$0xff] %v9085_v15  ;;  %11300 = vst [vmem:[#allocation546_spill] sm:$0xff] %v9088_v48  ;;  %v9106_v15 = vld [vmem:[%s7329_s23 + $0x1188] sm:$0xff]  ;;  %v9109_v48 = vld [vmem:[%s7329_s23 + $0x1190] sm:$0xff] }
 0x2a5   : > { %11301 = vst [vmem:[#allocation547_spill] sm:$0xff] %v9091_v13  ;;  %11302 = vst [vmem:[#allocation548_spill] sm:$0xff] %v9094_v1  ;;  %v9112_v13 = vld [vmem:[%s7329_s23 + $0x1198] sm:$0xff]  ;;  %v9115_v1 = vld [vmem:[%s7329_s23 + $0x11a0] sm:$0xff] }
 0x2a6   : > { %11303 = vst [vmem:[#allocation549_spill] sm:$0xff] %v9097_v17  ;;  %11304 = vst [vmem:[#allocation550_spill] sm:$0xff] %v9100_v41  ;;  %v9118_v17 = vld [vmem:[%s7329_s23 + $0x11a8] sm:$0xff]  ;;  %v9121_v41 = vld [vmem:[%s7329_s23 + $0x11b0] sm:$0xff] }
 0x2a7   : > { %11305 = vst [vmem:[#allocation551_spill] sm:$0xff] %v9103_v50  ;;  %11306 = vst [vmem:[#allocation552_spill] sm:$0xff] %v9106_v15  ;;  %v9124_v50 = vld [vmem:[%s7329_s23 + $0x11b8] sm:$0xff]  ;;  %v9127_v15 = vld [vmem:[%s7329_s23 + $0x11c0] sm:$0xff] }
 0x2a8   : > { %11307 = vst [vmem:[#allocation553_spill] sm:$0xff] %v9109_v48  ;;  %11308 = vst [vmem:[#allocation554_spill] sm:$0xff] %v9112_v13  ;;  %v9130_v48 = vld [vmem:[%s7329_s23 + $0x11c8] sm:$0xff]  ;;  %v9133_v13 = vld [vmem:[%s7329_s23 + $0x11d0] sm:$0xff] }
 0x2a9   : > { %11309 = vst [vmem:[#allocation555_spill] sm:$0xff] %v9115_v1  ;;  %11310 = vst [vmem:[#allocation556_spill] sm:$0xff] %v9118_v17  ;;  %v9136_v1 = vld [vmem:[%s7329_s23 + $0x11d8] sm:$0xff]  ;;  %v9139_v17 = vld [vmem:[%s7329_s23 + $0x11e0] sm:$0xff] }
 0x2aa   : > { %11311 = vst [vmem:[#allocation557_spill] sm:$0xff] %v9121_v41  ;;  %11312 = vst [vmem:[#allocation558_spill] sm:$0xff] %v9124_v50  ;;  %v9142_v41 = vld [vmem:[%s7329_s23 + $0x11e8] sm:$0xff]  ;;  %v9145_v50 = vld [vmem:[%s7329_s23 + $0x11f0] sm:$0xff] }
 0x2ab   : > { %11313 = vst [vmem:[#allocation559_spill] sm:$0xff] %v9127_v15  ;;  %11314 = vst [vmem:[#allocation560_spill] sm:$0xff] %v9130_v48  ;;  %v9148_v15 = vld [vmem:[%s7329_s23 + $0x11f8] sm:$0xff]  ;;  %v9151_v48 = vld [vmem:[%s7329_s23 + $0x1200] sm:$0xff] }
 0x2ac   : > { %11315 = vst [vmem:[#allocation561_spill] sm:$0xff] %v9133_v13  ;;  %11316 = vst [vmem:[#allocation562_spill] sm:$0xff] %v9136_v1  ;;  %v9154_v13 = vld [vmem:[%s7329_s23 + $0x1208] sm:$0xff]  ;;  %v9157_v1 = vld [vmem:[%s7329_s23 + $0x1210] sm:$0xff] }
 0x2ad   : > { %11317 = vst [vmem:[#allocation563_spill] sm:$0xff] %v9139_v17  ;;  %11318 = vst [vmem:[#allocation564_spill] sm:$0xff] %v9142_v41  ;;  %v9160_v17 = vld [vmem:[%s7329_s23 + $0x1218] sm:$0xff]  ;;  %v9163_v41 = vld [vmem:[%s7329_s23 + $0x1220] sm:$0xff] }
 0x2ae   : > { %11319 = vst [vmem:[#allocation565_spill] sm:$0xff] %v9145_v50  ;;  %11320 = vst [vmem:[#allocation566_spill] sm:$0xff] %v9148_v15  ;;  %v9166_v50 = vld [vmem:[%s7329_s23 + $0x1228] sm:$0xff]  ;;  %v9169_v15 = vld [vmem:[%s7329_s23 + $0x1230] sm:$0xff] }
 0x2af   : > { %11321 = vst [vmem:[#allocation567_spill] sm:$0xff] %v9151_v48  ;;  %11322 = vst [vmem:[#allocation568_spill] sm:$0xff] %v9154_v13  ;;  %v9172_v48 = vld [vmem:[%s7329_s23 + $0x1238] sm:$0xff]  ;;  %v9175_v13 = vld [vmem:[%s7329_s23 + $0x1240] sm:$0xff] }
 0x2b0   : > { %11323 = vst [vmem:[#allocation569_spill] sm:$0xff] %v9157_v1  ;;  %11324 = vst [vmem:[#allocation570_spill] sm:$0xff] %v9160_v17  ;;  %v9178_v1 = vld [vmem:[%s7329_s23 + $0x1248] sm:$0xff]  ;;  %v9181_v17 = vld [vmem:[%s7329_s23 + $0x1250] sm:$0xff] }
 0x2b1   : > { %11325 = vst [vmem:[#allocation571_spill] sm:$0xff] %v9163_v41  ;;  %11326 = vst [vmem:[#allocation572_spill] sm:$0xff] %v9166_v50  ;;  %v9184_v41 = vld [vmem:[%s7329_s23 + $0x1258] sm:$0xff]  ;;  %v9187_v50 = vld [vmem:[%s7329_s23 + $0x1260] sm:$0xff] }
 0x2b2   : > { %11327 = vst [vmem:[#allocation573_spill] sm:$0xff] %v9169_v15  ;;  %11328 = vst [vmem:[#allocation574_spill] sm:$0xff] %v9172_v48  ;;  %v9190_v15 = vld [vmem:[%s7329_s23 + $0x1268] sm:$0xff]  ;;  %v9193_v48 = vld [vmem:[%s7329_s23 + $0x1270] sm:$0xff] }
 0x2b3   : > { %11329 = vst [vmem:[#allocation575_spill] sm:$0xff] %v9175_v13  ;;  %11330 = vst [vmem:[#allocation576_spill] sm:$0xff] %v9178_v1  ;;  %v9196_v13 = vld [vmem:[%s7329_s23 + $0x1278] sm:$0xff]  ;;  %v9199_v1 = vld [vmem:[%s7329_s23 + $0x1280] sm:$0xff] }
 0x2b4   : > { %11331 = vst [vmem:[#allocation577_spill] sm:$0xff] %v9181_v17  ;;  %11332 = vst [vmem:[#allocation578_spill] sm:$0xff] %v9184_v41  ;;  %v9202_v17 = vld [vmem:[%s7329_s23 + $0x1288] sm:$0xff]  ;;  %v9205_v41 = vld [vmem:[%s7329_s23 + $0x1290] sm:$0xff] }
 0x2b5   : > { %11333 = vst [vmem:[#allocation579_spill] sm:$0xff] %v9187_v50  ;;  %11334 = vst [vmem:[#allocation580_spill] sm:$0xff] %v9190_v15  ;;  %v9208_v50 = vld [vmem:[%s7329_s23 + $0x1298] sm:$0xff]  ;;  %v9211_v15 = vld [vmem:[%s7329_s23 + $0x12a0] sm:$0xff] }
 0x2b6   : > { %11335 = vst [vmem:[#allocation581_spill] sm:$0xff] %v9193_v48  ;;  %11336 = vst [vmem:[#allocation582_spill] sm:$0xff] %v9196_v13  ;;  %v9214_v48 = vld [vmem:[%s7329_s23 + $0x12a8] sm:$0xff]  ;;  %v9217_v13 = vld [vmem:[%s7329_s23 + $0x12b0] sm:$0xff] }
 0x2b7   : > { %11337 = vst [vmem:[#allocation583_spill] sm:$0xff] %v9199_v1  ;;  %11338 = vst [vmem:[#allocation584_spill] sm:$0xff] %v9202_v17  ;;  %v9220_v1 = vld [vmem:[%s7329_s23 + $0x12b8] sm:$0xff]  ;;  %v9223_v17 = vld [vmem:[%s7329_s23 + $0x12c0] sm:$0xff] }
 0x2b8   : > { %11339 = vst [vmem:[#allocation585_spill] sm:$0xff] %v9205_v41  ;;  %11340 = vst [vmem:[#allocation586_spill] sm:$0xff] %v9208_v50  ;;  %v9226_v41 = vld [vmem:[%s7329_s23 + $0x12c8] sm:$0xff]  ;;  %v9229_v50 = vld [vmem:[%s7329_s23 + $0x12d0] sm:$0xff] }
 0x2b9   : > { %11341 = vst [vmem:[#allocation587_spill] sm:$0xff] %v9211_v15  ;;  %11342 = vst [vmem:[#allocation588_spill] sm:$0xff] %v9214_v48  ;;  %v9232_v15 = vld [vmem:[%s7329_s23 + $0x12d8] sm:$0xff]  ;;  %v9235_v48 = vld [vmem:[%s7329_s23 + $0x12e0] sm:$0xff] }
 0x2ba   : > { %11343 = vst [vmem:[#allocation589_spill] sm:$0xff] %v9217_v13  ;;  %11344 = vst [vmem:[#allocation590_spill] sm:$0xff] %v9220_v1  ;;  %v9238_v13 = vld [vmem:[%s7329_s23 + $0x12e8] sm:$0xff]  ;;  %v9241_v1 = vld [vmem:[%s7329_s23 + $0x12f0] sm:$0xff] }
 0x2bb   : > { %11345 = vst [vmem:[#allocation591_spill] sm:$0xff] %v9223_v17  ;;  %11346 = vst [vmem:[#allocation592_spill] sm:$0xff] %v9226_v41  ;;  %v9244_v17 = vld [vmem:[%s7329_s23 + $0x12f8] sm:$0xff]  ;;  %v9247_v41 = vld [vmem:[%s7329_s23 + $0x1300] sm:$0xff] }
 0x2bc   : > { %11347 = vst [vmem:[#allocation593_spill] sm:$0xff] %v9229_v50  ;;  %11348 = vst [vmem:[#allocation594_spill] sm:$0xff] %v9232_v15  ;;  %v9250_v50 = vld [vmem:[%s7329_s23 + $0x1308] sm:$0xff]  ;;  %v9253_v15 = vld [vmem:[%s7329_s23 + $0x1310] sm:$0xff] }
 0x2bd   : > { %11349 = vst [vmem:[#allocation595_spill] sm:$0xff] %v9235_v48  ;;  %11350 = vst [vmem:[#allocation596_spill] sm:$0xff] %v9238_v13  ;;  %v9256_v48 = vld [vmem:[%s7329_s23 + $0x1318] sm:$0xff]  ;;  %v9259_v13 = vld [vmem:[%s7329_s23 + $0x1320] sm:$0xff] }
 0x2be   : > { %11351 = vst [vmem:[#allocation597_spill] sm:$0xff] %v9241_v1  ;;  %11352 = vst [vmem:[#allocation598_spill] sm:$0xff] %v9244_v17  ;;  %v9262_v1 = vld [vmem:[%s7329_s23 + $0x1328] sm:$0xff]  ;;  %v9265_v17 = vld [vmem:[%s7329_s23 + $0x1330] sm:$0xff] }
 0x2bf   : > { %11353 = vst [vmem:[#allocation599_spill] sm:$0xff] %v9247_v41  ;;  %11354 = vst [vmem:[#allocation600_spill] sm:$0xff] %v9250_v50  ;;  %v9268_v41 = vld [vmem:[%s7329_s23 + $0x1338] sm:$0xff]  ;;  %v9271_v50 = vld [vmem:[%s7329_s23 + $0x1340] sm:$0xff] }
 0x2c0   : > { %11355 = vst [vmem:[#allocation601_spill] sm:$0xff] %v9253_v15  ;;  %11356 = vst [vmem:[#allocation602_spill] sm:$0xff] %v9256_v48  ;;  %v9274_v15 = vld [vmem:[%s7329_s23 + $0x1348] sm:$0xff]  ;;  %v9277_v48 = vld [vmem:[%s7329_s23 + $0x1350] sm:$0xff] }
 0x2c1   : > { %11357 = vst [vmem:[#allocation603_spill] sm:$0xff] %v9259_v13  ;;  %11358 = vst [vmem:[#allocation604_spill] sm:$0xff] %v9262_v1  ;;  %v9280_v13 = vld [vmem:[%s7329_s23 + $0x1358] sm:$0xff]  ;;  %v9283_v1 = vld [vmem:[%s7329_s23 + $0x1360] sm:$0xff] }
 0x2c2   : > { %11359 = vst [vmem:[#allocation605_spill] sm:$0xff] %v9265_v17  ;;  %11360 = vst [vmem:[#allocation606_spill] sm:$0xff] %v9268_v41  ;;  %v9286_v17 = vld [vmem:[%s7329_s23 + $0x1368] sm:$0xff]  ;;  %v9289_v41 = vld [vmem:[%s7329_s23 + $0x1370] sm:$0xff] }
 0x2c3   : > { %11361 = vst [vmem:[#allocation607_spill] sm:$0xff] %v9271_v50  ;;  %11362 = vst [vmem:[#allocation608_spill] sm:$0xff] %v9274_v15  ;;  %v9292_v50 = vld [vmem:[%s7329_s23 + $0x1378] sm:$0xff]  ;;  %v9295_v15 = vld [vmem:[%s7329_s23 + $0x1380] sm:$0xff] }
 0x2c4   : > { %11363 = vst [vmem:[#allocation609_spill] sm:$0xff] %v9277_v48  ;;  %11364 = vst [vmem:[#allocation610_spill] sm:$0xff] %v9280_v13  ;;  %v9298_v48 = vld [vmem:[%s7329_s23 + $0x1388] sm:$0xff]  ;;  %v9301_v13 = vld [vmem:[%s7329_s23 + $0x1390] sm:$0xff] }
 0x2c5   : > { %11365 = vst [vmem:[#allocation611_spill] sm:$0xff] %v9283_v1  ;;  %11366 = vst [vmem:[#allocation612_spill] sm:$0xff] %v9286_v17  ;;  %v9304_v1 = vld [vmem:[%s7329_s23 + $0x1398] sm:$0xff]  ;;  %v9307_v17 = vld [vmem:[%s7329_s23 + $0x13a0] sm:$0xff] }
 0x2c6   : > { %11367 = vst [vmem:[#allocation613_spill] sm:$0xff] %v9289_v41  ;;  %11368 = vst [vmem:[#allocation614_spill] sm:$0xff] %v9292_v50  ;;  %v9310_v41 = vld [vmem:[%s7329_s23 + $0x13a8] sm:$0xff]  ;;  %v9313_v50 = vld [vmem:[%s7329_s23 + $0x13b0] sm:$0xff] }
 0x2c7   : > { %11369 = vst [vmem:[#allocation615_spill] sm:$0xff] %v9295_v15  ;;  %11370 = vst [vmem:[#allocation616_spill] sm:$0xff] %v9298_v48  ;;  %v9316_v15 = vld [vmem:[%s7329_s23 + $0x13b8] sm:$0xff]  ;;  %v9319_v48 = vld [vmem:[%s7329_s23 + $0x13c0] sm:$0xff] }
 0x2c8   : > { %11371 = vst [vmem:[#allocation617_spill] sm:$0xff] %v9301_v13  ;;  %11372 = vst [vmem:[#allocation618_spill] sm:$0xff] %v9304_v1  ;;  %v9322_v13 = vld [vmem:[%s7329_s23 + $0x13c8] sm:$0xff]  ;;  %v9325_v1 = vld [vmem:[%s7329_s23 + $0x13d0] sm:$0xff] }
 0x2c9   : > { %11373 = vst [vmem:[#allocation619_spill] sm:$0xff] %v9307_v17  ;;  %11374 = vst [vmem:[#allocation620_spill] sm:$0xff] %v9310_v41  ;;  %v9328_v17 = vld [vmem:[%s7329_s23 + $0x13d8] sm:$0xff]  ;;  %v9331_v41 = vld [vmem:[%s7329_s23 + $0x13e0] sm:$0xff] }
 0x2ca   : > { %11375 = vst [vmem:[#allocation621_spill] sm:$0xff] %v9313_v50  ;;  %11376 = vst [vmem:[#allocation622_spill] sm:$0xff] %v9316_v15  ;;  %v9334_v50 = vld [vmem:[%s7329_s23 + $0x13e8] sm:$0xff]  ;;  %v9337_v15 = vld [vmem:[%s7329_s23 + $0x13f0] sm:$0xff] }
 0x2cb   : > { %11377 = vst [vmem:[#allocation623_spill] sm:$0xff] %v9319_v48  ;;  %11378 = vst [vmem:[#allocation624_spill] sm:$0xff] %v9322_v13  ;;  %v9340_v48 = vld [vmem:[%s7329_s23 + $0x13f8] sm:$0xff]  ;;  %v9343_v13 = vld [vmem:[%s7329_s23 + $0x1400] sm:$0xff] }
 0x2cc   : > { %11379 = vst [vmem:[#allocation625_spill] sm:$0xff] %v9325_v1  ;;  %11380 = vst [vmem:[#allocation626_spill] sm:$0xff] %v9328_v17  ;;  %v9346_v1 = vld [vmem:[%s7329_s23 + $0x1408] sm:$0xff]  ;;  %v9349_v17 = vld [vmem:[%s7329_s23 + $0x1410] sm:$0xff] }
 0x2cd   : > { %11381 = vst [vmem:[#allocation627_spill] sm:$0xff] %v9331_v41  ;;  %11382 = vst [vmem:[#allocation628_spill] sm:$0xff] %v9334_v50  ;;  %v9352_v41 = vld [vmem:[%s7329_s23 + $0x1418] sm:$0xff]  ;;  %v9355_v50 = vld [vmem:[%s7329_s23 + $0x1420] sm:$0xff] }
 0x2ce   : > { %11383 = vst [vmem:[#allocation629_spill] sm:$0xff] %v9337_v15  ;;  %11384 = vst [vmem:[#allocation630_spill] sm:$0xff] %v9340_v48  ;;  %v9358_v15 = vld [vmem:[%s7329_s23 + $0x1428] sm:$0xff]  ;;  %v9361_v48 = vld [vmem:[%s7329_s23 + $0x1430] sm:$0xff] }
 0x2cf   : > { %11385 = vst [vmem:[#allocation631_spill] sm:$0xff] %v9343_v13  ;;  %11386 = vst [vmem:[#allocation632_spill] sm:$0xff] %v9346_v1  ;;  %v9364_v13 = vld [vmem:[%s7329_s23 + $0x1438] sm:$0xff]  ;;  %v9367_v1 = vld [vmem:[%s7329_s23 + $0x1440] sm:$0xff] }
 0x2d0   : > { %11387 = vst [vmem:[#allocation633_spill] sm:$0xff] %v9349_v17  ;;  %11388 = vst [vmem:[#allocation634_spill] sm:$0xff] %v9352_v41  ;;  %v9370_v17 = vld [vmem:[%s7329_s23 + $0x1448] sm:$0xff]  ;;  %v9373_v41 = vld [vmem:[%s7329_s23 + $0x1450] sm:$0xff] }
 0x2d1   : > { %11389 = vst [vmem:[#allocation635_spill] sm:$0xff] %v9355_v50  ;;  %11390 = vst [vmem:[#allocation636_spill] sm:$0xff] %v9358_v15  ;;  %v9376_v50 = vld [vmem:[%s7329_s23 + $0x1458] sm:$0xff]  ;;  %v9379_v15 = vld [vmem:[%s7329_s23 + $0x1460] sm:$0xff] }
 0x2d2   : > { %11391 = vst [vmem:[#allocation637_spill] sm:$0xff] %v9361_v48  ;;  %11392 = vst [vmem:[#allocation638_spill] sm:$0xff] %v9364_v13  ;;  %v9382_v48 = vld [vmem:[%s7329_s23 + $0x1468] sm:$0xff]  ;;  %v9385_v13 = vld [vmem:[%s7329_s23 + $0x1470] sm:$0xff] }
 0x2d3   : > { %11393 = vst [vmem:[#allocation639_spill] sm:$0xff] %v9367_v1  ;;  %11394 = vst [vmem:[#allocation640_spill] sm:$0xff] %v9370_v17  ;;  %v9388_v1 = vld [vmem:[%s7329_s23 + $0x1478] sm:$0xff]  ;;  %v9391_v17 = vld [vmem:[%s7329_s23 + $0x1480] sm:$0xff] }
 0x2d4   : > { %11395 = vst [vmem:[#allocation641_spill] sm:$0xff] %v9373_v41  ;;  %11396 = vst [vmem:[#allocation642_spill] sm:$0xff] %v9376_v50  ;;  %v9394_v41 = vld [vmem:[%s7329_s23 + $0x1488] sm:$0xff]  ;;  %v9397_v50 = vld [vmem:[%s7329_s23 + $0x1490] sm:$0xff] }
 0x2d5   : > { %11397 = vst [vmem:[#allocation643_spill] sm:$0xff] %v9379_v15  ;;  %11398 = vst [vmem:[#allocation644_spill] sm:$0xff] %v9382_v48  ;;  %v9400_v15 = vld [vmem:[%s7329_s23 + $0x1498] sm:$0xff]  ;;  %v9403_v48 = vld [vmem:[%s7329_s23 + $0x14a0] sm:$0xff] }
 0x2d6   : > { %11399 = vst [vmem:[#allocation645_spill] sm:$0xff] %v9385_v13  ;;  %11400 = vst [vmem:[#allocation646_spill] sm:$0xff] %v9388_v1  ;;  %v9406_v13 = vld [vmem:[%s7329_s23 + $0x14a8] sm:$0xff]  ;;  %v9409_v1 = vld [vmem:[%s7329_s23 + $0x14b0] sm:$0xff] }
 0x2d7   : > { %11401 = vst [vmem:[#allocation647_spill] sm:$0xff] %v9391_v17  ;;  %11402 = vst [vmem:[#allocation648_spill] sm:$0xff] %v9394_v41  ;;  %v9412_v17 = vld [vmem:[%s7329_s23 + $0x14b8] sm:$0xff]  ;;  %v9415_v41 = vld [vmem:[%s7329_s23 + $0x14c0] sm:$0xff] }
 0x2d8   : > { %11403 = vst [vmem:[#allocation649_spill] sm:$0xff] %v9397_v50  ;;  %11404 = vst [vmem:[#allocation650_spill] sm:$0xff] %v9400_v15  ;;  %v9418_v50 = vld [vmem:[%s7329_s23 + $0x14c8] sm:$0xff]  ;;  %v9421_v15 = vld [vmem:[%s7329_s23 + $0x14d0] sm:$0xff] }
 0x2d9   : > { %11405 = vst [vmem:[#allocation651_spill] sm:$0xff] %v9403_v48  ;;  %11406 = vst [vmem:[#allocation652_spill] sm:$0xff] %v9406_v13  ;;  %v9424_v48 = vld [vmem:[%s7329_s23 + $0x14d8] sm:$0xff]  ;;  %v9427_v13 = vld [vmem:[%s7329_s23 + $0x14e0] sm:$0xff] }
 0x2da   : > { %11407 = vst [vmem:[#allocation653_spill] sm:$0xff] %v9409_v1  ;;  %11408 = vst [vmem:[#allocation654_spill] sm:$0xff] %v9412_v17  ;;  %v9430_v1 = vld [vmem:[%s7329_s23 + $0x14e8] sm:$0xff]  ;;  %v9433_v17 = vld [vmem:[%s7329_s23 + $0x14f0] sm:$0xff] }
 0x2db   : > { %11409 = vst [vmem:[#allocation655_spill] sm:$0xff] %v9415_v41  ;;  %11410 = vst [vmem:[#allocation656_spill] sm:$0xff] %v9418_v50  ;;  %v9436_v41 = vld [vmem:[%s7329_s23 + $0x14f8] sm:$0xff]  ;;  %v9439_v50 = vld [vmem:[%s7329_s23 + $0x1500] sm:$0xff] }
 0x2dc   : > { %11411 = vst [vmem:[#allocation657_spill] sm:$0xff] %v9421_v15  ;;  %11412 = vst [vmem:[#allocation658_spill] sm:$0xff] %v9424_v48  ;;  %v9442_v15 = vld [vmem:[%s7329_s23 + $0x1508] sm:$0xff]  ;;  %v9445_v48 = vld [vmem:[%s7329_s23 + $0x1510] sm:$0xff] }
 0x2dd   : > { %11413 = vst [vmem:[#allocation659_spill] sm:$0xff] %v9427_v13  ;;  %11414 = vst [vmem:[#allocation660_spill] sm:$0xff] %v9430_v1  ;;  %v9448_v13 = vld [vmem:[%s7329_s23 + $0x1518] sm:$0xff]  ;;  %v9451_v1 = vld [vmem:[%s7329_s23 + $0x1520] sm:$0xff] }
 0x2de   : > { %11415 = vst [vmem:[#allocation661_spill] sm:$0xff] %v9433_v17  ;;  %11416 = vst [vmem:[#allocation662_spill] sm:$0xff] %v9436_v41  ;;  %v9454_v17 = vld [vmem:[%s7329_s23 + $0x1528] sm:$0xff]  ;;  %v9457_v41 = vld [vmem:[%s7329_s23 + $0x1530] sm:$0xff] }
 0x2df   : > { %11417 = vst [vmem:[#allocation663_spill] sm:$0xff] %v9439_v50  ;;  %11418 = vst [vmem:[#allocation664_spill] sm:$0xff] %v9442_v15  ;;  %v9460_v50 = vld [vmem:[%s7329_s23 + $0x1538] sm:$0xff]  ;;  %v9463_v15 = vld [vmem:[%s7329_s23 + $0x1540] sm:$0xff] }
 0x2e0   : > { %11419 = vst [vmem:[#allocation665_spill] sm:$0xff] %v9445_v48  ;;  %11420 = vst [vmem:[#allocation666_spill] sm:$0xff] %v9448_v13  ;;  %v9466_v48 = vld [vmem:[%s7329_s23 + $0x1548] sm:$0xff]  ;;  %v9469_v13 = vld [vmem:[%s7329_s23 + $0x1550] sm:$0xff] }
 0x2e1   : > { %11421 = vst [vmem:[#allocation667_spill] sm:$0xff] %v9451_v1  ;;  %11422 = vst [vmem:[#allocation668_spill] sm:$0xff] %v9454_v17  ;;  %v9472_v1 = vld [vmem:[%s7329_s23 + $0x1558] sm:$0xff]  ;;  %v9475_v17 = vld [vmem:[%s7329_s23 + $0x1560] sm:$0xff] }
 0x2e2   : > { %11423 = vst [vmem:[#allocation669_spill] sm:$0xff] %v9457_v41  ;;  %11424 = vst [vmem:[#allocation670_spill] sm:$0xff] %v9460_v50  ;;  %v9478_v41 = vld [vmem:[%s7329_s23 + $0x1568] sm:$0xff]  ;;  %v9481_v50 = vld [vmem:[%s7329_s23 + $0x1570] sm:$0xff] }
 0x2e3   : > { %11425 = vst [vmem:[#allocation671_spill] sm:$0xff] %v9463_v15  ;;  %11426 = vst [vmem:[#allocation672_spill] sm:$0xff] %v9466_v48  ;;  %v9484_v15 = vld [vmem:[%s7329_s23 + $0x1578] sm:$0xff]  ;;  %v9487_v48 = vld [vmem:[%s7329_s23 + $0x1580] sm:$0xff] }
 0x2e4   : > { %11427 = vst [vmem:[#allocation673_spill] sm:$0xff] %v9469_v13  ;;  %11428 = vst [vmem:[#allocation674_spill] sm:$0xff] %v9472_v1  ;;  %v9490_v13 = vld [vmem:[%s7329_s23 + $0x1588] sm:$0xff]  ;;  %v9493_v1 = vld [vmem:[%s7329_s23 + $0x1590] sm:$0xff] }
 0x2e5   : > { %11429 = vst [vmem:[#allocation675_spill] sm:$0xff] %v9475_v17  ;;  %11430 = vst [vmem:[#allocation676_spill] sm:$0xff] %v9478_v41  ;;  %v9496_v17 = vld [vmem:[%s7329_s23 + $0x1598] sm:$0xff]  ;;  %v9499_v41 = vld [vmem:[%s7329_s23 + $0x15a0] sm:$0xff] }
 0x2e6   : > { %11431 = vst [vmem:[#allocation677_spill] sm:$0xff] %v9481_v50  ;;  %11432 = vst [vmem:[#allocation678_spill] sm:$0xff] %v9484_v15  ;;  %v9502_v50 = vld [vmem:[%s7329_s23 + $0x15a8] sm:$0xff]  ;;  %v9505_v15 = vld [vmem:[%s7329_s23 + $0x15b0] sm:$0xff] }
 0x2e7   : > { %11433 = vst [vmem:[#allocation679_spill] sm:$0xff] %v9487_v48  ;;  %11434 = vst [vmem:[#allocation680_spill] sm:$0xff] %v9490_v13  ;;  %v9508_v48 = vld [vmem:[%s7329_s23 + $0x15b8] sm:$0xff]  ;;  %v9511_v13 = vld [vmem:[%s7329_s23 + $0x15c0] sm:$0xff] }
 0x2e8   : > { %11435 = vst [vmem:[#allocation681_spill] sm:$0xff] %v9493_v1  ;;  %11436 = vst [vmem:[#allocation682_spill] sm:$0xff] %v9496_v17  ;;  %v9514_v1 = vld [vmem:[%s7329_s23 + $0x15c8] sm:$0xff]  ;;  %v9517_v17 = vld [vmem:[%s7329_s23 + $0x15d0] sm:$0xff] }
 0x2e9   : > { %11437 = vst [vmem:[#allocation683_spill] sm:$0xff] %v9499_v41  ;;  %11438 = vst [vmem:[#allocation684_spill] sm:$0xff] %v9502_v50  ;;  %v9520_v41 = vld [vmem:[%s7329_s23 + $0x15d8] sm:$0xff]  ;;  %v9523_v50 = vld [vmem:[%s7329_s23 + $0x15e0] sm:$0xff] }
 0x2ea   : > { %11439 = vst [vmem:[#allocation685_spill] sm:$0xff] %v9505_v15  ;;  %11440 = vst [vmem:[#allocation686_spill] sm:$0xff] %v9508_v48  ;;  %v9526_v15 = vld [vmem:[%s7329_s23 + $0x15e8] sm:$0xff]  ;;  %v9529_v48 = vld [vmem:[%s7329_s23 + $0x15f0] sm:$0xff] }
 0x2eb   : > { %11441 = vst [vmem:[#allocation687_spill] sm:$0xff] %v9511_v13  ;;  %11442 = vst [vmem:[#allocation688_spill] sm:$0xff] %v9514_v1  ;;  %v9532_v13 = vld [vmem:[%s7329_s23 + $0x15f8] sm:$0xff]  ;;  %v9535_v1 = vld [vmem:[%s7329_s23 + $0x1600] sm:$0xff] }
 0x2ec   : > { %11443 = vst [vmem:[#allocation689_spill] sm:$0xff] %v9517_v17  ;;  %11444 = vst [vmem:[#allocation690_spill] sm:$0xff] %v9520_v41  ;;  %v9538_v17 = vld [vmem:[%s7329_s23 + $0x1608] sm:$0xff]  ;;  %v9541_v41 = vld [vmem:[%s7329_s23 + $0x1610] sm:$0xff] }
 0x2ed   : > { %11445 = vst [vmem:[#allocation691_spill] sm:$0xff] %v9523_v50  ;;  %11446 = vst [vmem:[#allocation692_spill] sm:$0xff] %v9526_v15  ;;  %v9544_v50 = vld [vmem:[%s7329_s23 + $0x1618] sm:$0xff]  ;;  %v9547_v15 = vld [vmem:[%s7329_s23 + $0x1620] sm:$0xff] }
 0x2ee   : > { %11447 = vst [vmem:[#allocation693_spill] sm:$0xff] %v9529_v48  ;;  %11448 = vst [vmem:[#allocation694_spill] sm:$0xff] %v9532_v13  ;;  %v9550_v48 = vld [vmem:[%s7329_s23 + $0x1628] sm:$0xff]  ;;  %v9553_v13 = vld [vmem:[%s7329_s23 + $0x1630] sm:$0xff] }
 0x2ef   : > { %11449 = vst [vmem:[#allocation695_spill] sm:$0xff] %v9535_v1  ;;  %11450 = vst [vmem:[#allocation696_spill] sm:$0xff] %v9538_v17  ;;  %v9556_v1 = vld [vmem:[%s7329_s23 + $0x1638] sm:$0xff]  ;;  %v9559_v17 = vld [vmem:[%s7329_s23 + $0x1640] sm:$0xff] }
 0x2f0   : > { %11451 = vst [vmem:[#allocation697_spill] sm:$0xff] %v9541_v41  ;;  %11452 = vst [vmem:[#allocation698_spill] sm:$0xff] %v9544_v50  ;;  %v9562_v41 = vld [vmem:[%s7329_s23 + $0x1648] sm:$0xff]  ;;  %v9565_v50 = vld [vmem:[%s7329_s23 + $0x1650] sm:$0xff] }
 0x2f1   : > { %11453 = vst [vmem:[#allocation699_spill] sm:$0xff] %v9547_v15  ;;  %11454 = vst [vmem:[#allocation700_spill] sm:$0xff] %v9550_v48  ;;  %v9568_v15 = vld [vmem:[%s7329_s23 + $0x1658] sm:$0xff]  ;;  %v9571_v48 = vld [vmem:[%s7329_s23 + $0x1660] sm:$0xff] }
 0x2f2   : > { %11455 = vst [vmem:[#allocation701_spill] sm:$0xff] %v9553_v13  ;;  %11456 = vst [vmem:[#allocation702_spill] sm:$0xff] %v9556_v1  ;;  %v9574_v13 = vld [vmem:[%s7329_s23 + $0x1668] sm:$0xff]  ;;  %v9577_v1 = vld [vmem:[%s7329_s23 + $0x1670] sm:$0xff] }
 0x2f3   : > { %11457 = vst [vmem:[#allocation703_spill] sm:$0xff] %v9559_v17  ;;  %11458 = vst [vmem:[#allocation704_spill] sm:$0xff] %v9562_v41  ;;  %v9580_v17 = vld [vmem:[%s7329_s23 + $0x1678] sm:$0xff]  ;;  %v9583_v41 = vld [vmem:[%s7329_s23 + $0x1680] sm:$0xff] }
 0x2f4   : > { %11459 = vst [vmem:[#allocation705_spill] sm:$0xff] %v9565_v50  ;;  %11460 = vst [vmem:[#allocation706_spill] sm:$0xff] %v9568_v15  ;;  %v9586_v50 = vld [vmem:[%s7329_s23 + $0x1688] sm:$0xff]  ;;  %v9589_v15 = vld [vmem:[%s7329_s23 + $0x1690] sm:$0xff] }
 0x2f5   : > { %11461 = vst [vmem:[#allocation707_spill] sm:$0xff] %v9571_v48  ;;  %11462 = vst [vmem:[#allocation708_spill] sm:$0xff] %v9574_v13  ;;  %v9592_v48 = vld [vmem:[%s7329_s23 + $0x1698] sm:$0xff]  ;;  %v9595_v13 = vld [vmem:[%s7329_s23 + $0x16a0] sm:$0xff] }
 0x2f6   : > { %11463 = vst [vmem:[#allocation709_spill] sm:$0xff] %v9577_v1  ;;  %11464 = vst [vmem:[#allocation710_spill] sm:$0xff] %v9580_v17  ;;  %v9598_v1 = vld [vmem:[%s7329_s23 + $0x16a8] sm:$0xff]  ;;  %v9601_v17 = vld [vmem:[%s7329_s23 + $0x16b0] sm:$0xff] }
 0x2f7   : > { %11465 = vst [vmem:[#allocation711_spill] sm:$0xff] %v9583_v41  ;;  %11466 = vst [vmem:[#allocation712_spill] sm:$0xff] %v9586_v50  ;;  %v9604_v41 = vld [vmem:[%s7329_s23 + $0x16b8] sm:$0xff]  ;;  %v9607_v50 = vld [vmem:[%s7329_s23 + $0x16c0] sm:$0xff] }
 0x2f8   : > { %11467 = vst [vmem:[#allocation713_spill] sm:$0xff] %v9589_v15  ;;  %11468 = vst [vmem:[#allocation714_spill] sm:$0xff] %v9592_v48  ;;  %v9610_v15 = vld [vmem:[%s7329_s23 + $0x16c8] sm:$0xff]  ;;  %v9613_v48 = vld [vmem:[%s7329_s23 + $0x16d0] sm:$0xff] }
 0x2f9   : > { %11469 = vst [vmem:[#allocation715_spill] sm:$0xff] %v9595_v13  ;;  %11470 = vst [vmem:[#allocation716_spill] sm:$0xff] %v9598_v1  ;;  %v9616_v13 = vld [vmem:[%s7329_s23 + $0x16d8] sm:$0xff]  ;;  %v9619_v1 = vld [vmem:[%s7329_s23 + $0x16e0] sm:$0xff] }
 0x2fa   : > { %11471 = vst [vmem:[#allocation717_spill] sm:$0xff] %v9601_v17  ;;  %11472 = vst [vmem:[#allocation718_spill] sm:$0xff] %v9604_v41  ;;  %v9622_v17 = vld [vmem:[%s7329_s23 + $0x16e8] sm:$0xff]  ;;  %v9625_v41 = vld [vmem:[%s7329_s23 + $0x16f0] sm:$0xff] }
 0x2fb   : > { %11473 = vst [vmem:[#allocation719_spill] sm:$0xff] %v9607_v50  ;;  %11474 = vst [vmem:[#allocation720_spill] sm:$0xff] %v9610_v15  ;;  %v9628_v50 = vld [vmem:[%s7329_s23 + $0x16f8] sm:$0xff]  ;;  %v9631_v15 = vld [vmem:[%s7329_s23 + $0x1700] sm:$0xff] }
 0x2fc   : > { %11475 = vst [vmem:[#allocation721_spill] sm:$0xff] %v9613_v48  ;;  %11476 = vst [vmem:[#allocation722_spill] sm:$0xff] %v9616_v13  ;;  %v9634_v48 = vld [vmem:[%s7329_s23 + $0x1708] sm:$0xff]  ;;  %v9637_v13 = vld [vmem:[%s7329_s23 + $0x1710] sm:$0xff] }
 0x2fd   : > { %11477 = vst [vmem:[#allocation723_spill] sm:$0xff] %v9619_v1  ;;  %11478 = vst [vmem:[#allocation724_spill] sm:$0xff] %v9622_v17  ;;  %v9640_v1 = vld [vmem:[%s7329_s23 + $0x1718] sm:$0xff]  ;;  %v9643_v17 = vld [vmem:[%s7329_s23 + $0x1720] sm:$0xff] }
 0x2fe   : > { %11479 = vst [vmem:[#allocation725_spill] sm:$0xff] %v9625_v41  ;;  %11480 = vst [vmem:[#allocation726_spill] sm:$0xff] %v9628_v50  ;;  %v9646_v41 = vld [vmem:[%s7329_s23 + $0x1728] sm:$0xff]  ;;  %v9649_v50 = vld [vmem:[%s7329_s23 + $0x1730] sm:$0xff] }
 0x2ff   : > { %11481 = vst [vmem:[#allocation727_spill] sm:$0xff] %v9631_v15  ;;  %11482 = vst [vmem:[#allocation728_spill] sm:$0xff] %v9634_v48  ;;  %v9652_v15 = vld [vmem:[%s7329_s23 + $0x1738] sm:$0xff]  ;;  %v9655_v48 = vld [vmem:[%s7329_s23 + $0x1740] sm:$0xff] }
 0x300   : > { %11483 = vst [vmem:[#allocation729_spill] sm:$0xff] %v9637_v13  ;;  %11484 = vst [vmem:[#allocation730_spill] sm:$0xff] %v9640_v1  ;;  %v9658_v13 = vld [vmem:[%s7329_s23 + $0x1748] sm:$0xff]  ;;  %v9661_v1 = vld [vmem:[%s7329_s23 + $0x1750] sm:$0xff] }
 0x301   : > { %11485 = vst [vmem:[#allocation731_spill] sm:$0xff] %v9643_v17  ;;  %11486 = vst [vmem:[#allocation732_spill] sm:$0xff] %v9646_v41  ;;  %v9664_v17 = vld [vmem:[%s7329_s23 + $0x1758] sm:$0xff]  ;;  %v9667_v41 = vld [vmem:[%s7329_s23 + $0x1760] sm:$0xff] }
 0x302   : > { %11487 = vst [vmem:[#allocation733_spill] sm:$0xff] %v9649_v50  ;;  %11488 = vst [vmem:[#allocation734_spill] sm:$0xff] %v9652_v15  ;;  %v9670_v50 = vld [vmem:[%s7329_s23 + $0x1768] sm:$0xff]  ;;  %v9673_v15 = vld [vmem:[%s7329_s23 + $0x1770] sm:$0xff] }
 0x303   : > { %11489 = vst [vmem:[#allocation735_spill] sm:$0xff] %v9655_v48  ;;  %11490 = vst [vmem:[#allocation736_spill] sm:$0xff] %v9658_v13  ;;  %v9676_v48 = vld [vmem:[%s7329_s23 + $0x1778] sm:$0xff]  ;;  %v9679_v13 = vld [vmem:[%s7329_s23 + $0x1780] sm:$0xff] }
 0x304   : > { %11491 = vst [vmem:[#allocation737_spill] sm:$0xff] %v9661_v1  ;;  %11492 = vst [vmem:[#allocation738_spill] sm:$0xff] %v9664_v17  ;;  %v9682_v1 = vld [vmem:[%s7329_s23 + $0x1788] sm:$0xff]  ;;  %v9685_v17 = vld [vmem:[%s7329_s23 + $0x1790] sm:$0xff] }
 0x305   : > { %11493 = vst [vmem:[#allocation739_spill] sm:$0xff] %v9667_v41  ;;  %11494 = vst [vmem:[#allocation740_spill] sm:$0xff] %v9670_v50  ;;  %v9688_v16 = vld [vmem:[%s7329_s23 + $0x1798] sm:$0xff]  ;;  %v9691_v41 = vld [vmem:[%s7329_s23 + $0x17a0] sm:$0xff] }
 0x306   : > { %11495 = vst [vmem:[#allocation741_spill] sm:$0xff] %v9673_v15  ;;  %11496 = vst [vmem:[#allocation742_spill] sm:$0xff] %v9676_v48  ;;  %v9694_v50 = vld [vmem:[%s7329_s23 + $0x17a8] sm:$0xff]  ;;  %v9700_v15 = vld [vmem:[%s7329_s23 + $0x17b8] sm:$0xff] }
 0x307   : > { %11497 = vst [vmem:[#allocation743_spill] sm:$0xff] %v9679_v13  ;;  %11498 = vst [vmem:[#allocation744_spill] sm:$0xff] %v9682_v1  ;;  %v9703_v48 = vld [vmem:[%s7329_s23 + $0x17c0] sm:$0xff]  ;;  %v9709_v13 = vld [vmem:[%s7329_s23 + $0x17d0] sm:$0xff] }
 0x308   : > { %11499 = vst [vmem:[#allocation745_spill] sm:$0xff] %v9685_v17  ;;  %11500 = vst [vmem:[#allocation746_spill] sm:$0xff] %v9688_v16  ;;  %v9712_v1 = vld [vmem:[%s7329_s23 + $0x17d8] sm:$0xff]  ;;  %v9718_v17 = vld [vmem:[%s7329_s23 + $0x17e8] sm:$0xff] }
 0x309   : > { %11501 = vst [vmem:[#allocation747_spill] sm:$0xff] %v9691_v41  ;;  %11502 = vst [vmem:[#allocation748_spill] sm:$0xff] %v9697_v42  ;;  %v9721_v16 = vld [vmem:[%s7329_s23 + $0x17f0] sm:$0xff]  ;;  %v9724_v41 = vld [vmem:[%s7329_s23 + $0x17f8] sm:$0xff] }
 0x30a   : > { %11503 = vst [vmem:[#allocation749_spill] sm:$0xff] %v9700_v15  ;;  %11504 = vst [vmem:[#allocation750_spill] sm:$0xff] %v9703_v48  ;;  %v9734_v48 = vmov 0.0  }
 0x30b   : > { %11505 = vst [vmem:[#allocation751_spill] sm:$0xff] %v9706_v56  ;;  %11506 = vst [vmem:[#allocation752_spill] sm:$0xff] %v9709_v13  ;;  %v9736_v56 = vmov 0.0   ;;  %v9738_v13 = vmov 0.0  }
 0x30c   : > { %11507 = vst [vmem:[#allocation753_spill] sm:$0xff] %v9712_v1  ;;  %11508 = vst [vmem:[#allocation754_spill] sm:$0xff] %v9715_v57  ;;  %v9740_v1 = vmov 0.0  }
 0x30d   : > { %11509 = vst [vmem:[#allocation755_spill] sm:$0xff] %v9718_v17  ;;  %11510 = vst [vmem:[#allocation756_spill] sm:$0xff] %v9721_v16 }
 0x30e   : > { %11511 = vst [vmem:[#allocation757_spill] sm:$0xff] %v9724_v41 }
 0x30f LB: >> { %11512 = vst [vmem:[#allocation758_spill] sm:$0xff] %v6233_v56  ;;  %v11513_v9 = vld [vmem:[#allocation18_spill] sm:$0xff]  ;;  %v11515_v12 = vld [vmem:[#allocation20_spill] sm:$0xff]  ;;  %v11517_v7 = vld [vmem:[#allocation17_spill] sm:$0xff]  ;;  %v5102_v42 = vpack.c.bf16 %v7479_v45, %v7439_v63  ;;  %3328 = vmatprep.mubr.f32.mxu0 %v6237_v13  ;;  %3470 = vmatprep.mubr.f32.mxu1 %v6237_v13  ;;  %s3182_s16 = ssub.s32 7, %s6245_s15  ;;  %s6245_s15 = sphi %s9742_s15, %s3177_s15   ;;  %v6241_v1 = vphi %v9740_v1, %v12271_v1   ;;  %v6237_v13 = vphi %v9738_v13, %v12270_v13   ;;  %v6233_v56 = vphi %v9736_v56, %v12269_v56   ;;  %v6229_v48 = vphi %v9734_v48, %v12268_v48  }
 0x310   : >> { %v11514_v18 = vld [vmem:[#allocation30_spill] sm:$0xff]  ;;  %v11516_v6 = vld [vmem:[#allocation32_spill] sm:$0xff]  ;;  %v11518_v28 = vld [vmem:[#allocation29_spill] sm:$0xff]  ;;  %s12277_s16 = smov (!%p188_p2, %s3182_s16), %s6245_s15  ;;  %s3177_s15 = sadd.s32 1, %s6245_s15  }
 0x311   : >> { %v4970_v16 = vpack.c.bf16 %v11514_v18, %v11513_v9  ;;  %v5098_v57 = vpack.c.bf16 %v11516_v6, %v11515_v12  ;;  %v4972_v41 = vpack.c.bf16 %v11518_v28, %v11517_v7  ;;  %v11519_v10 = vld [vmem:[#allocation19_spill] sm:$0xff]  ;;  %v11521_v2 = vld [vmem:[#allocation41_spill] sm:$0xff]  ;;  %v4976_v9 = vpack.c.bf16 %v7469_v39, %v7429_v47  ;;  %v11523_v21 = vld [vmem:[#allocation60_spill] sm:$0xff]  ;;  %s4478_s17 = sshll.u32 %s12277_s16, 3  ;;  %p3174_p11 = scmp.ge.s32.totalorder %s3177_s15, 8  }
 0x312   : >> { %v11520_v29 = vld [vmem:[#allocation31_spill] sm:$0xff]  ;;  %v4974_v56 = vpack.c.bf16 %v7472_v43, %v11521_v2  ;;  %v5104_v6 = vpack.c.bf16 %v7475_v44, %v7435_v62  ;;  %v11524_v8 = vld [vmem:[#allocation70_spill] sm:$0xff]  ;;  %v11526_v19 = vld [vmem:[#allocation69_spill] sm:$0xff]  ;;  %s10568_s19 = sshra.s32 %s4478_s17, 3  ;;  %s4500_s22 = sshll.u32 (%p3174_p11), %s6315_s28, 12 }
 0x313   : >> { %v5100_v17 = vpack.c.bf16 %v11520_v29, %v11519_v10  ;;  %4971 = vmatprep.subr.bf16.mxu0 %v4970_v16  ;;  %5099 = vmatprep.subr.bf16.mxu1 %v5098_v57  ;;  %v11522_v25 = vld [vmem:[#allocation59_spill] sm:$0xff]  ;;  %v5106_v2 = vpack.c.bf16 %v11524_v8, %v11523_v21  ;;  %v11525_v3 = vld [vmem:[#allocation58_spill] sm:$0xff]  ;;  %v5108_v57 = vpack.c.bf16 %v11526_v19, %v7515_v33  ;;  %v11527_v26 = vld [vmem:[#allocation80_spill] sm:$0xff]  ;;  %s4498_s21 = smul.u32 96, %s10568_s19  ;;  %s4499_s29 = sshll.u32 %s10568_s19, 5 }
 0x314   : >> { %4973 = vmatpush1.bf16.msra.mxu0 %v4972_v41  ;;  %v4978_v7 = vpack.c.bf16 %v7552_v49, %v11522_v25  ;;  %v11528_v22 = vld [vmem:[#allocation91_spill] sm:$0xff]  ;;  %v11529_v0 = vld [vmem:[#allocation82_spill] sm:$0xff]  ;;  %v11531_v20 = vld [vmem:[#allocation81_spill] sm:$0xff]  ;;  %s4213_s8 = scalar_lea.vmem %s9728_s20, %s4499_s29 [#allocation3]  ;;  %s4245_s15 = sshll.u32 (%p3174_p11), %s9728_s20, 4  ;;  %s10657_s15 = int_to_ptr.vmem [resolvable:$true] %s4245_s15 }
 0x315   : >> { %5101 = vmatpush1.bf16.msra.mxu1 %v5100_v17  ;;  %4975 = vmatprep.subr.bf16.mxu0 %v4974_v56  ;;  %v4980_v17 = vpack.c.bf16 %v7549_v35, %v11525_v3  ;;  %v4982_v16 = vpack.c.bf16 %v11528_v22, %v11527_v26  ;;  %v5110_v41 = vpack.c.bf16 %v7639_v54, %v11529_v0  ;;  %v11530_v27 = vld [vmem:[#allocation79_spill] sm:$0xff]  ;;  %v11532_v24 = vld [vmem:[#allocation108_spill] sm:$0xff]  ;;  %v11534_v23 = vld [vmem:[#allocation117_spill] sm:$0xff]  ;;  %s10580_s23 = scalar_lea.vmem [#allocation2], %s4498_s21  ;;  %s4227_s17 = scalar_lea.sflag (%p3174_p11), [#allocation4], %s6345_s13 }
 0x316   : >> { %5103 = vmatprep.subr.bf16.mxu1 %v5102_v42  ;;  %v4988_v56 = vpack.c.bf16 %v7702_v52, %v7666_v36  ;;  %v5116_v42 = vpack.c.bf16 %v7708_v37, %v7672_v55  ;;  %v11533_v31 = vld [vmem:[#allocation127_spill] sm:$0xff]  ;;  %v11535_v5 = vld [vmem:[#allocation126_spill] sm:$0xff]  ;;  %v11536_v4 = vld [vmem:[#allocation128_spill] sm:$0xff]  ;;  %s6111_s19 = scalar_lea.vmem (%p3174_p11), %s10657_s15, 4096  ;;  %s6250_s21 = smov (%p3174_p11), [#allocation3]  }
 0x317   : >> { %v11540_v0 = vld [vmem:[#allocation152_spill] sm:$0xff]  ;;  %v11541_v8 = vld [vmem:[#allocation137_spill] sm:$0xff]  ;;  %v11544_v12 = vld [vmem:[#allocation151_spill] sm:$0xff]  ;;  %p6112_p12 = scmp.ne.s32.totalorder (%p3174_p11), %s10657_s15, %s6111_s19 }
 0x318   : >> { %4977 = vmatpush1.bf16.msra.mxu0 %v4976_v9  ;;  %v4984_v9 = vpack.c.bf16 %v7629_v38, %v11530_v27  ;;  %v11542_v10 = vld [vmem:[#allocation149_spill] sm:$0xff]  ;;  %v11548_v19 = vld [vmem:[#allocation176_spill] sm:$0xff]  ;;  %v11609_v11 = vld [vmem:[#allocation354_spill] sm:$0xff] }
 0x319   : >> { %5105 = vmatpush1.bf16.msra.mxu1 %v5104_v6  ;;  %4979 = vmatprep.subr.bf16.mxu0 %v4978_v7  ;;  %v5112_v6 = vpack.c.bf16 %v7635_v40, %v11531_v20  ;;  %v4986_v7 = vpack.c.bf16 %v7705_v32, %v7669_v58  ;;  %v11611_v14 = vld [vmem:[#allocation366_spill] sm:$0xff]  ;;  %v11614_v30 = vld [vmem:[#allocation365_spill] sm:$0xff]  ;;  %p6113_p13 = pnand (%p3174_p11), %p6112_p12, %p6334_p5 }
 0x31a   : >> { %5107 = vmatprep.subr.bf16.mxu1 %v5106_v2  ;;  %v5114_v2 = vpack.c.bf16 %v11532_v24, %v7675_v46  ;;  %v11737_v15 = vld [vmem:[#allocation749_spill] sm:$0xff]  ;;  %v3193_v24 = vld [vmem:[%s10580_s23 + $0x18] sm:$0xff] }
 0x31b   : >> { %v12190_v21 = vld [vmem:[#allocation565_spill] sm:$0xff]  ;;  %p6114_p0 = pneg (%p3174_p11), %p6113_p13 }
 0x31c   : >> { %4981 = vmatpush1.bf16.msra.mxu0 %v4980_v17  ;;  %v4990_v17 = vpack.c.bf16 %v11533_v31, %v7741_v61  ;;  %v12262_v28 = vld [vmem:[#allocation9_spill] sm:$0xff] }
 0x31d   : >> { %5109 = vmatpush1.bf16.msra.mxu1 %v5108_v57  ;;  %4983 = vmatprep.subr.bf16.mxu0 %v4982_v16  ;;  %v5118_v57 = vpack.c.bf16 %v7783_v53, %v7747_v60  ;;  %v4992_v16 = vpack.c.bf16 %v11535_v5, %v11534_v23  ;;  %v11545_v5 = vld [vmem:[#allocation162_spill] sm:$0xff]  ;;  %v12263_v29 = vsub.s32 4, %v12262_v28 }
 0x31e   : >> { %5111 = vmatprep.subr.bf16.mxu1 %v5110_v41  ;;  %v5120_v41 = vpack.c.bf16 %v11536_v4, %v7744_v59  ;;  %v11546_v4 = vld [vmem:[#allocation174_spill] sm:$0xff] }
 0x320   : >> { %4985 = vmatpush1.bf16.msra.mxu0 %v4984_v9  ;;  %v11537_v9 = vld [vmem:[#allocation138_spill] sm:$0xff] }
 0x321   : >> { %5113 = vmatpush1.bf16.msra.mxu1 %v5112_v6  ;;  %4987 = vmatprep.subr.bf16.mxu0 %v4986_v7  ;;  %v11538_v6 = vld [vmem:[#allocation150_spill] sm:$0xff] }
 0x322   : >> { %5115 = vmatprep.subr.bf16.mxu1 %v5114_v2  ;;  %v4994_v7 = vpack.c.bf16 %v11538_v6, %v11537_v9  ;;  %v11539_v2 = vld [vmem:[#allocation140_spill] sm:$0xff]  ;;  %v11549_v9 = vld [vmem:[#allocation161_spill] sm:$0xff]  ;;  %v11552_v6 = vld [vmem:[#allocation175_spill] sm:$0xff] }
 0x323   : >> { %v5122_v3 = vpack.c.bf16 %v11540_v0, %v11539_v2  ;;  %v11550_v0 = vld [vmem:[#allocation173_spill] sm:$0xff] }
 0x324   : >> { %4989 = vmatpush1.bf16.msra.mxu0 %v4988_v56  ;;  %v4996_v56 = vpack.c.bf16 %v11542_v10, %v11541_v8  ;;  %v11553_v10 = vld [vmem:[#allocation186_spill] sm:$0xff] }
 0x325   : >> { %5117 = vmatpush1.bf16.msra.mxu1 %v5116_v42  ;;  %4991 = vmatprep.subr.bf16.mxu0 %v4990_v17  ;;  %v11543_v42 = vld [vmem:[#allocation139_spill] sm:$0xff]  ;;  %v4998_v17 = vpack.c.bf16 %v11546_v4, %v11545_v5  ;;  %v11557_v4 = vld [vmem:[#allocation185_spill] sm:$0xff] }
 0x326   : >> { %5119 = vmatprep.subr.bf16.mxu1 %v5118_v57  ;;  %v5124_v18 = vpack.c.bf16 %v11544_v12, %v11543_v42  ;;  %v11547_v57 = vld [vmem:[#allocation164_spill] sm:$0xff]  ;;  %v11554_v12 = vld [vmem:[#allocation198_spill] sm:$0xff] }
 0x327   : >> { %v5126_v20 = vpack.c.bf16 %v11548_v19, %v11547_v57  ;;  %v5002_v8 = vpack.c.bf16 %v11554_v12, %v11553_v10  ;;  %v11558_v19 = vld [vmem:[#allocation197_spill] sm:$0xff] }
 0x328   : >> { %4993 = vmatpush1.bf16.msra.mxu0 %v4992_v16  ;;  %v5000_v16 = vpack.c.bf16 %v11550_v0, %v11549_v9  ;;  %v5004_v5 = vpack.c.bf16 %v11558_v19, %v11557_v4  ;;  %v11561_v9 = vld [vmem:[#allocation210_spill] sm:$0xff]  ;;  %v11565_v10 = vld [vmem:[#allocation209_spill] sm:$0xff] }
 0x329   : >> { %5121 = vmatpush1.bf16.msra.mxu1 %v5120_v41  ;;  %4995 = vmatprep.subr.bf16.mxu0 %v4994_v7  ;;  %v11551_v41 = vld [vmem:[#allocation163_spill] sm:$0xff]  ;;  %v11556_v7 = vld [vmem:[#allocation200_spill] sm:$0xff]  ;;  %v11562_v0 = vld [vmem:[#allocation222_spill] sm:$0xff] }
 0x32a   : >> { %5123 = vmatprep.subr.bf16.mxu1 %v5122_v3  ;;  %v5128_v2 = vpack.c.bf16 %v11552_v6, %v11551_v41  ;;  %v11555_v3 = vld [vmem:[#allocation188_spill] sm:$0xff]  ;;  %v11566_v12 = vld [vmem:[#allocation221_spill] sm:$0xff]  ;;  %v11569_v4 = vld [vmem:[#allocation234_spill] sm:$0xff] }
 0x32b   : >> { %v5130_v42 = vpack.c.bf16 %v11556_v7, %v11555_v3  ;;  %v11564_v41 = vld [vmem:[#allocation224_spill] sm:$0xff]  ;;  %v11568_v3 = vld [vmem:[#allocation223_spill] sm:$0xff]  ;;  %v11570_v19 = vld [vmem:[#allocation246_spill] sm:$0xff] }
 0x32c   : >> { %4997 = vmatpush1.bf16.msra.mxu0 %v4996_v56  ;;  %v11560_v56 = vld [vmem:[#allocation199_spill] sm:$0xff] }
 0x32d   : >> { %5125 = vmatpush1.bf16.msra.mxu1 %v5124_v18  ;;  %4999 = vmatprep.subr.bf16.mxu0 %v4998_v17  ;;  %v11559_v18 = vld [vmem:[#allocation187_spill] sm:$0xff]  ;;  %v5006_v17 = vpack.c.bf16 %v11562_v0, %v11561_v9  ;;  %v11573_v9 = vld [vmem:[#allocation233_spill] sm:$0xff] }
 0x32e   : >> { %5127 = vmatprep.subr.bf16.mxu1 %v5126_v20  ;;  %v5132_v57 = vpack.c.bf16 %v11560_v56, %v11559_v18  ;;  %v11563_v20 = vld [vmem:[#allocation212_spill] sm:$0xff]  ;;  %v11574_v0 = vld [vmem:[#allocation245_spill] sm:$0xff] }
 0x32f   : >> { %v5134_v6 = vpack.c.bf16 %v11564_v41, %v11563_v20  ;;  %v11572_v18 = vld [vmem:[#allocation248_spill] sm:$0xff]  ;;  %v11576_v20 = vld [vmem:[#allocation247_spill] sm:$0xff] }
 0x330   : >> { %5001 = vmatpush1.bf16.msra.mxu0 %v5000_v16  ;;  %v5008_v16 = vpack.c.bf16 %v11566_v12, %v11565_v10  ;;  %v11577_v10 = vld [vmem:[#allocation258_spill] sm:$0xff] }
 0x331   : >> { %5129 = vmatpush1.bf16.msra.mxu1 %v5128_v2  ;;  %5003 = vmatprep.subr.bf16.mxu0 %v5002_v8  ;;  %v11567_v2 = vld [vmem:[#allocation211_spill] sm:$0xff]  ;;  %v5010_v8 = vpack.c.bf16 %v11570_v19, %v11569_v4  ;;  %v11578_v12 = vld [vmem:[#allocation270_spill] sm:$0xff]  ;;  %v11581_v4 = vld [vmem:[#allocation257_spill] sm:$0xff] }
 0x332   : >> { %5131 = vmatprep.subr.bf16.mxu1 %v5130_v42  ;;  %v5136_v7 = vpack.c.bf16 %v11568_v3, %v11567_v2  ;;  %v11571_v42 = vld [vmem:[#allocation236_spill] sm:$0xff]  ;;  %v11582_v19 = vld [vmem:[#allocation269_spill] sm:$0xff] }
 0x333   : >> { %v5138_v56 = vpack.c.bf16 %v11572_v18, %v11571_v42  ;;  %v11580_v2 = vld [vmem:[#allocation272_spill] sm:$0xff]  ;;  %v11584_v42 = vld [vmem:[#allocation271_spill] sm:$0xff] }
 0x334   : >> { %5005 = vmatpush1.bf16.msra.mxu0 %v5004_v5  ;;  %v5012_v5 = vpack.c.bf16 %v11574_v0, %v11573_v9  ;;  %v11585_v9 = vld [vmem:[#allocation282_spill] sm:$0xff] }
 0x335   : >> { %5133 = vmatpush1.bf16.msra.mxu1 %v5132_v57  ;;  %5007 = vmatprep.subr.bf16.mxu0 %v5006_v17  ;;  %v11575_v57 = vld [vmem:[#allocation235_spill] sm:$0xff]  ;;  %v5014_v17 = vpack.c.bf16 %v11578_v12, %v11577_v10  ;;  %v11586_v0 = vld [vmem:[#allocation294_spill] sm:$0xff]  ;;  %v11589_v10 = vld [vmem:[#allocation281_spill] sm:$0xff] }
 0x336   : >> { %5135 = vmatprep.subr.bf16.mxu1 %v5134_v6  ;;  %v5140_v41 = vpack.c.bf16 %v11576_v20, %v11575_v57  ;;  %v11579_v6 = vld [vmem:[#allocation260_spill] sm:$0xff]  ;;  %v11590_v12 = vld [vmem:[#allocation293_spill] sm:$0xff] }
 0x337   : >> { %v5142_v3 = vpack.c.bf16 %v11580_v2, %v11579_v6  ;;  %v11588_v57 = vld [vmem:[#allocation296_spill] sm:$0xff]  ;;  %v11592_v6 = vld [vmem:[#allocation295_spill] sm:$0xff] }
 0x338   : >> { %5009 = vmatpush1.bf16.msra.mxu0 %v5008_v16  ;;  %v5016_v16 = vpack.c.bf16 %v11582_v19, %v11581_v4  ;;  %v11593_v4 = vld [vmem:[#allocation306_spill] sm:$0xff] }
 0x339   : >> { %5137 = vmatpush1.bf16.msra.mxu1 %v5136_v7  ;;  %5011 = vmatprep.subr.bf16.mxu0 %v5010_v8  ;;  %v11583_v7 = vld [vmem:[#allocation259_spill] sm:$0xff]  ;;  %v5018_v8 = vpack.c.bf16 %v11586_v0, %v11585_v9  ;;  %v11594_v19 = vld [vmem:[#allocation318_spill] sm:$0xff]  ;;  %v11597_v9 = vld [vmem:[#allocation305_spill] sm:$0xff] }
 0x33a   : >> { %5139 = vmatprep.subr.bf16.mxu1 %v5138_v56  ;;  %v5144_v18 = vpack.c.bf16 %v11584_v42, %v11583_v7  ;;  %v11587_v56 = vld [vmem:[#allocation284_spill] sm:$0xff]  ;;  %v11598_v0 = vld [vmem:[#allocation317_spill] sm:$0xff] }
 0x33b   : >> { %v5146_v20 = vpack.c.bf16 %v11588_v57, %v11587_v56  ;;  %v11596_v7 = vld [vmem:[#allocation320_spill] sm:$0xff]  ;;  %v11600_v56 = vld [vmem:[#allocation319_spill] sm:$0xff] }
 0x33c   : >> { %5013 = vmatpush1.bf16.msra.mxu0 %v5012_v5  ;;  %v5020_v5 = vpack.c.bf16 %v11590_v12, %v11589_v10  ;;  %v11601_v10 = vld [vmem:[#allocation330_spill] sm:$0xff] }
 0x33d   : >> { %5141 = vmatpush1.bf16.msra.mxu1 %v5140_v41  ;;  %5015 = vmatprep.subr.bf16.mxu0 %v5014_v17  ;;  %v11591_v41 = vld [vmem:[#allocation283_spill] sm:$0xff]  ;;  %v5022_v17 = vpack.c.bf16 %v11594_v19, %v11593_v4  ;;  %v11602_v12 = vld [vmem:[#allocation342_spill] sm:$0xff]  ;;  %v11605_v4 = vld [vmem:[#allocation329_spill] sm:$0xff] }
 0x33e   : >> { %5143 = vmatprep.subr.bf16.mxu1 %v5142_v3  ;;  %v5148_v2 = vpack.c.bf16 %v11592_v6, %v11591_v41  ;;  %v11595_v3 = vld [vmem:[#allocation308_spill] sm:$0xff]  ;;  %v11606_v19 = vld [vmem:[#allocation341_spill] sm:$0xff] }
 0x33f   : >> { %v5150_v42 = vpack.c.bf16 %v11596_v7, %v11595_v3  ;;  %v11604_v41 = vld [vmem:[#allocation344_spill] sm:$0xff]  ;;  %v11608_v3 = vld [vmem:[#allocation343_spill] sm:$0xff] }
 0x340   : >> { %5017 = vmatpush1.bf16.msra.mxu0 %v5016_v16  ;;  %v5024_v16 = vpack.c.bf16 %v11598_v0, %v11597_v9  ;;  %v11612_v0 = vld [vmem:[#allocation353_spill] sm:$0xff] }
 0x341   : >> { %5145 = vmatpush1.bf16.msra.mxu1 %v5144_v18  ;;  %5019 = vmatprep.subr.bf16.mxu0 %v5018_v8  ;;  %v11599_v18 = vld [vmem:[#allocation307_spill] sm:$0xff]  ;;  %v5026_v8 = vpack.c.bf16 %v11602_v12, %v11601_v10  ;;  %v11616_v10 = vld [vmem:[#allocation388_spill] sm:$0xff] }
 0x342   : >> { %5147 = vmatprep.subr.bf16.mxu1 %v5146_v20  ;;  %v5152_v57 = vpack.c.bf16 %v11600_v56, %v11599_v18  ;;  %v11603_v20 = vld [vmem:[#allocation332_spill] sm:$0xff]  ;;  %v11613_v18 = vld [vmem:[#allocation355_spill] sm:$0xff] }
 0x343   : >> { %v5154_v6 = vpack.c.bf16 %v11604_v41, %v11603_v20  ;;  %v5160_v56 = vpack.c.bf16 %v11614_v30, %v11613_v18  ;;  %v11618_v20 = vld [vmem:[#allocation390_spill] sm:$0xff] }
 0x344   : >> { %5021 = vmatpush1.bf16.msra.mxu0 %v5020_v5  ;;  %v5028_v5 = vpack.c.bf16 %v11606_v19, %v11605_v4  ;;  %v11620_v4 = vld [vmem:[#allocation387_spill] sm:$0xff] }
 0x345   : >> { %5149 = vmatpush1.bf16.msra.mxu1 %v5148_v2  ;;  %5023 = vmatprep.subr.bf16.mxu0 %v5022_v17  ;;  %v11607_v2 = vld [vmem:[#allocation331_spill] sm:$0xff]  ;;  %v5030_v17 = vpack.c.bf16 %v8541_v51, %v11609_v11 }
 0x346   : >> { %5151 = vmatprep.subr.bf16.mxu1 %v5150_v42  ;;  %v5156_v7 = vpack.c.bf16 %v11608_v3, %v11607_v2  ;;  %v11610_v42 = vld [vmem:[#allocation356_spill] sm:$0xff]  ;;  %v11622_v2 = vld [vmem:[#allocation389_spill] sm:$0xff] }
 0x347   : >> { %v5158_v9 = vpack.c.bf16 %v11611_v14, %v11610_v42  ;;  %v11624_v42 = vld [vmem:[#allocation412_spill] sm:$0xff]  ;;  %v12187_v14 = vld [vmem:[#allocation551_spill] sm:$0xff] }
 0x348   : >> { %5025 = vmatpush1.bf16.msra.mxu0 %v5024_v16  ;;  %v5032_v16 = vpack.c.bf16 %v8538_v34, %v11612_v0  ;;  %v11626_v0 = vld [vmem:[#allocation414_spill] sm:$0xff] }
 0x349   : >> { %5153 = vmatpush1.bf16.msra.mxu1 %v5152_v57  ;;  %5027 = vmatprep.subr.bf16.mxu0 %v5026_v8  ;;  %v11615_v57 = vld [vmem:[#allocation376_spill] sm:$0xff]  ;;  %v11617_v8 = vld [vmem:[#allocation378_spill] sm:$0xff] }
 0x34a   : >> { %5155 = vmatprep.subr.bf16.mxu1 %v5154_v6  ;;  %v5034_v12 = vpack.c.bf16 %v11616_v10, %v11615_v57  ;;  %v5162_v41 = vpack.c.bf16 %v11618_v20, %v11617_v8  ;;  %v11619_v6 = vld [vmem:[#allocation375_spill] sm:$0xff]  ;;  %v11629_v10 = vld [vmem:[#allocation401_spill] sm:$0xff] }
 0x34b   : >> { %v5036_v19 = vpack.c.bf16 %v11620_v4, %v11619_v6  ;;  %v11630_v8 = vld [vmem:[#allocation413_spill] sm:$0xff]  ;;  %v11633_v4 = vld [vmem:[#allocation426_spill] sm:$0xff] }
 0x34c   : >> { %5029 = vmatpush1.bf16.msra.mxu0 %v5028_v5  ;;  %v11621_v5 = vld [vmem:[#allocation377_spill] sm:$0xff]  ;;  %v5168_v20 = vpack.c.bf16 %v11630_v8, %v11629_v10  ;;  %v11642_v10 = vld [vmem:[#allocation462_spill] sm:$0xff] }
 0x34d   : >> { %5157 = vmatpush1.bf16.msra.mxu1 %v5156_v7  ;;  %5031 = vmatprep.subr.bf16.mxu0 %v5030_v17  ;;  %v5164_v3 = vpack.c.bf16 %v11622_v2, %v11621_v5  ;;  %v11623_v7 = vld [vmem:[#allocation400_spill] sm:$0xff]  ;;  %v11634_v5 = vld [vmem:[#allocation438_spill] sm:$0xff] }
 0x34e   : >> { %5159 = vmatprep.subr.bf16.mxu1 %v5158_v9  ;;  %v5038_v17 = vpack.c.bf16 %v11624_v42, %v11623_v7  ;;  %v11625_v9 = vld [vmem:[#allocation402_spill] sm:$0xff]  ;;  %v5170_v2 = vpack.c.bf16 %v11634_v5, %v11633_v4  ;;  %v11637_v42 = vld [vmem:[#allocation425_spill] sm:$0xff] }
 0x34f   : >> { %v5166_v18 = vpack.c.bf16 %v11626_v0, %v11625_v9  ;;  %v11638_v9 = vld [vmem:[#allocation437_spill] sm:$0xff] }
 0x350   : >> { %5033 = vmatpush1.bf16.msra.mxu0 %v5032_v16  ;;  %v11627_v16 = vld [vmem:[#allocation399_spill] sm:$0xff]  ;;  %v5172_v0 = vpack.c.bf16 %v11638_v9, %v11637_v42  ;;  %v11646_v4 = vld [vmem:[#allocation461_spill] sm:$0xff]  ;;  %v11650_v42 = vld [vmem:[#allocation486_spill] sm:$0xff] }
 0x351   : >> { %5161 = vmatpush1.bf16.msra.mxu1 %v5160_v56  ;;  %5035 = vmatprep.subr.bf16.mxu0 %v5034_v12  ;;  %v11628_v56 = vld [vmem:[#allocation411_spill] sm:$0xff]  ;;  %v11631_v12 = vld [vmem:[#allocation424_spill] sm:$0xff] }
 0x352   : >> { %5163 = vmatprep.subr.bf16.mxu1 %v5162_v41  ;;  %v5040_v57 = vpack.c.bf16 %v11628_v56, %v11627_v16  ;;  %v11632_v41 = vld [vmem:[#allocation436_spill] sm:$0xff]  ;;  %v11641_v56 = vld [vmem:[#allocation450_spill] sm:$0xff] }
 0x353   : >> { %3329 = vmatmul.mubr.f32.vlgmr.msra.gmra.mrb[0].mxu0 %v6241_v1  ;;  %v5042_v6 = vpack.c.bf16 %v11632_v41, %v11631_v12  ;;  %v5174_v8 = vpack.c.bf16 %v11642_v10, %v11641_v56  ;;  %v11643_v12 = vld [vmem:[#allocation447_spill] sm:$0xff]  ;;  %v11654_v56 = vld [vmem:[#allocation485_spill] sm:$0xff] }
 0x354   : >> { %3471 = vmatmul.mubr.f32.vlgmr.msra.gmra.mrb[0].mxu1 %v6241_v1  ;;  %5037 = vmatpush1.bf16.msra.mxu0 %v5036_v19  ;;  %v11635_v19 = vld [vmem:[#allocation423_spill] sm:$0xff] }
 0x355   : >> { %5165 = vmatpush1.bf16.msra.mxu1 %v5164_v3  ;;  %5039 = vmatprep.subr.bf16.mxu0 %v5038_v17  ;;  %v11636_v3 = vld [vmem:[#allocation435_spill] sm:$0xff]  ;;  %v11639_v17 = vld [vmem:[#allocation448_spill] sm:$0xff] }
 0x356   : >> { %5167 = vmatprep.subr.bf16.mxu1 %v5166_v18  ;;  %3399 = vmatprep.mubr.f32.mxu0 %v6229_v48  ;;  %v5044_v7 = vpack.c.bf16 %v11636_v3, %v11635_v19  ;;  %v11640_v18 = vld [vmem:[#allocation460_spill] sm:$0xff]  ;;  %v11644_v41 = vld [vmem:[#allocation459_spill] sm:$0xff] }
 0x357   : >> { %3541 = vmatprep.mubr.f32.mxu1 %v6229_v48  ;;  %v5046_v16 = vpack.c.bf16 %v11640_v18, %v11639_v17  ;;  %v11647_v19 = vld [vmem:[#allocation472_spill] sm:$0xff]  ;;  %v11651_v17 = vld [vmem:[#allocation471_spill] sm:$0xff] }
 0x358   : >> { %5041 = vmatpush1.bf16.msra.mxu0 %v5040_v57  ;;  %v5048_v57 = vpack.c.bf16 %v11644_v41, %v11643_v12  ;;  %v11648_v3 = vld [vmem:[#allocation484_spill] sm:$0xff]  ;;  %v11652_v18 = vld [vmem:[#allocation483_spill] sm:$0xff] }
 0x359   : >> { %5169 = vmatpush1.bf16.msra.mxu1 %v5168_v20  ;;  %5043 = vmatprep.subr.bf16.mxu0 %v5042_v6  ;;  %v11645_v20 = vld [vmem:[#allocation449_spill] sm:$0xff]  ;;  %v5050_v6 = vpack.c.bf16 %v11648_v3, %v11647_v19  ;;  %v11655_v12 = vld [vmem:[#allocation496_spill] sm:$0xff]  ;;  %v11659_v19 = vld [vmem:[#allocation495_spill] sm:$0xff] }
 0x35a   : >> { %5171 = vmatprep.subr.bf16.mxu1 %v5170_v2  ;;  %v5176_v5 = vpack.c.bf16 %v11646_v4, %v11645_v20  ;;  %v11649_v2 = vld [vmem:[#allocation474_spill] sm:$0xff]  ;;  %v11656_v41 = vld [vmem:[#allocation508_spill] sm:$0xff]  ;;  %v11660_v3 = vld [vmem:[#allocation507_spill] sm:$0xff] }
 0x35b   : >> { %v5178_v9 = vpack.c.bf16 %v11650_v42, %v11649_v2  ;;  %v11658_v20 = vld [vmem:[#allocation510_spill] sm:$0xff]  ;;  %v11662_v2 = vld [vmem:[#allocation509_spill] sm:$0xff] }
 0x35c   : >> { %5045 = vmatpush1.bf16.msra.mxu0 %v5044_v7  ;;  %v5052_v7 = vpack.c.bf16 %v11652_v18, %v11651_v17  ;;  %v11663_v17 = vld [vmem:[#allocation520_spill] sm:$0xff] }
 0x35d   : >> { %5173 = vmatpush1.bf16.msra.mxu1 %v5172_v0  ;;  %5047 = vmatprep.subr.bf16.mxu0 %v5046_v16  ;;  %v11653_v0 = vld [vmem:[#allocation473_spill] sm:$0xff]  ;;  %v5054_v16 = vpack.c.bf16 %v11656_v41, %v11655_v12  ;;  %v11664_v18 = vld [vmem:[#allocation532_spill] sm:$0xff]  ;;  %v11667_v12 = vld [vmem:[#allocation519_spill] sm:$0xff] }
 0x35e   : >> { %5175 = vmatprep.subr.bf16.mxu1 %v5174_v8  ;;  %v5180_v10 = vpack.c.bf16 %v11654_v56, %v11653_v0  ;;  %v11657_v8 = vld [vmem:[#allocation498_spill] sm:$0xff]  ;;  %v11668_v41 = vld [vmem:[#allocation531_spill] sm:$0xff] }
 0x35f   : >> { %v5182_v4 = vpack.c.bf16 %v11658_v20, %v11657_v8  ;;  %v11666_v0 = vld [vmem:[#allocation534_spill] sm:$0xff]  ;;  %v11670_v8 = vld [vmem:[#allocation533_spill] sm:$0xff] }
 0x360   : >> { %5049 = vmatpush1.bf16.msra.mxu0 %v5048_v57  ;;  %v5056_v57 = vpack.c.bf16 %v11660_v3, %v11659_v19  ;;  %v11671_v19 = vld [vmem:[#allocation544_spill] sm:$0xff] }
 0x361   : >> { %5177 = vmatpush1.bf16.msra.mxu1 %v5176_v5  ;;  %5051 = vmatprep.subr.bf16.mxu0 %v5050_v6  ;;  %v11661_v5 = vld [vmem:[#allocation497_spill] sm:$0xff]  ;;  %v5058_v6 = vpack.c.bf16 %v11664_v18, %v11663_v17  ;;  %v11672_v3 = vld [vmem:[#allocation556_spill] sm:$0xff]  ;;  %v11675_v17 = vld [vmem:[#allocation543_spill] sm:$0xff] }
 0x362   : >> { %5179 = vmatprep.subr.bf16.mxu1 %v5178_v9  ;;  %v5184_v42 = vpack.c.bf16 %v11662_v2, %v11661_v5  ;;  %v11665_v9 = vld [vmem:[#allocation522_spill] sm:$0xff]  ;;  %v11676_v18 = vld [vmem:[#allocation555_spill] sm:$0xff] }
 0x363   : >> { %v5186_v56 = vpack.c.bf16 %v11666_v0, %v11665_v9  ;;  %v11674_v5 = vld [vmem:[#allocation558_spill] sm:$0xff]  ;;  %v11678_v9 = vld [vmem:[#allocation557_spill] sm:$0xff] }
 0x364   : >> { %5053 = vmatpush1.bf16.msra.mxu0 %v5052_v7  ;;  %v5060_v7 = vpack.c.bf16 %v11668_v41, %v11667_v12  ;;  %v11679_v12 = vld [vmem:[#allocation568_spill] sm:$0xff] }
 0x365   : >> { %5181 = vmatpush1.bf16.msra.mxu1 %v5180_v10  ;;  %5055 = vmatprep.subr.bf16.mxu0 %v5054_v16  ;;  %v11669_v10 = vld [vmem:[#allocation521_spill] sm:$0xff]  ;;  %v5062_v16 = vpack.c.bf16 %v11672_v3, %v11671_v19  ;;  %v11680_v41 = vld [vmem:[#allocation580_spill] sm:$0xff]  ;;  %v11683_v19 = vld [vmem:[#allocation567_spill] sm:$0xff] }
 0x366   : >> { %5183 = vmatprep.subr.bf16.mxu1 %v5182_v4  ;;  %v5188_v20 = vpack.c.bf16 %v11670_v8, %v11669_v10  ;;  %v11673_v4 = vld [vmem:[#allocation546_spill] sm:$0xff]  ;;  %v11684_v3 = vld [vmem:[#allocation579_spill] sm:$0xff] }
 0x367   : >> { %v5190_v2 = vpack.c.bf16 %v11674_v5, %v11673_v4  ;;  %v11682_v10 = vld [vmem:[#allocation582_spill] sm:$0xff]  ;;  %v11686_v4 = vld [vmem:[#allocation581_spill] sm:$0xff] }
 0x368   : >> { %5057 = vmatpush1.bf16.msra.mxu0 %v5056_v57  ;;  %v5064_v57 = vpack.c.bf16 %v11676_v18, %v11675_v17  ;;  %v11687_v17 = vld [vmem:[#allocation592_spill] sm:$0xff] }
 0x369   : >> { %5185 = vmatpush1.bf16.msra.mxu1 %v5184_v42  ;;  %5059 = vmatprep.subr.bf16.mxu0 %v5058_v6  ;;  %v11677_v42 = vld [vmem:[#allocation545_spill] sm:$0xff]  ;;  %v5066_v6 = vpack.c.bf16 %v11680_v41, %v11679_v12  ;;  %v11688_v18 = vld [vmem:[#allocation604_spill] sm:$0xff]  ;;  %v11691_v12 = vld [vmem:[#allocation591_spill] sm:$0xff] }
 0x36a   : >> { %5187 = vmatprep.subr.bf16.mxu1 %v5186_v56  ;;  %v5192_v0 = vpack.c.bf16 %v11678_v9, %v11677_v42  ;;  %v11681_v56 = vld [vmem:[#allocation570_spill] sm:$0xff]  ;;  %v11692_v41 = vld [vmem:[#allocation603_spill] sm:$0xff] }
 0x36b   : >> { %v5194_v8 = vpack.c.bf16 %v11682_v10, %v11681_v56  ;;  %v11690_v42 = vld [vmem:[#allocation606_spill] sm:$0xff]  ;;  %v11694_v56 = vld [vmem:[#allocation605_spill] sm:$0xff] }
 0x36c   : >> { %5061 = vmatpush1.bf16.msra.mxu0 %v5060_v7  ;;  %v5068_v7 = vpack.c.bf16 %v11684_v3, %v11683_v19  ;;  %v11695_v19 = vld [vmem:[#allocation616_spill] sm:$0xff] }
 0x36d   : >> { %5189 = vmatpush1.bf16.msra.mxu1 %v5188_v20  ;;  %5063 = vmatprep.subr.bf16.mxu0 %v5062_v16  ;;  %v11685_v20 = vld [vmem:[#allocation569_spill] sm:$0xff]  ;;  %v5070_v16 = vpack.c.bf16 %v11688_v18, %v11687_v17  ;;  %v11696_v3 = vld [vmem:[#allocation628_spill] sm:$0xff]  ;;  %v11699_v17 = vld [vmem:[#allocation615_spill] sm:$0xff] }
 0x36e   : >> { %5191 = vmatprep.subr.bf16.mxu1 %v5190_v2  ;;  %v5196_v5 = vpack.c.bf16 %v11686_v4, %v11685_v20  ;;  %v11689_v2 = vld [vmem:[#allocation594_spill] sm:$0xff]  ;;  %v11700_v18 = vld [vmem:[#allocation627_spill] sm:$0xff] }
 0x36f   : >> { %v5198_v9 = vpack.c.bf16 %v11690_v42, %v11689_v2  ;;  %v11698_v20 = vld [vmem:[#allocation630_spill] sm:$0xff]  ;;  %v11702_v2 = vld [vmem:[#allocation629_spill] sm:$0xff] }
 0x370   : >> { %5065 = vmatpush1.bf16.msra.mxu0 %v5064_v57  ;;  %v5072_v57 = vpack.c.bf16 %v11692_v41, %v11691_v12  ;;  %v11703_v12 = vld [vmem:[#allocation640_spill] sm:$0xff] }
 0x371   : >> { %5193 = vmatpush1.bf16.msra.mxu1 %v5192_v0  ;;  %5067 = vmatprep.subr.bf16.mxu0 %v5066_v6  ;;  %v11693_v0 = vld [vmem:[#allocation593_spill] sm:$0xff]  ;;  %v5074_v6 = vpack.c.bf16 %v11696_v3, %v11695_v19  ;;  %v11704_v41 = vld [vmem:[#allocation652_spill] sm:$0xff]  ;;  %v11707_v19 = vld [vmem:[#allocation639_spill] sm:$0xff] }
 0x372   : >> { %5195 = vmatprep.subr.bf16.mxu1 %v5194_v8  ;;  %v5200_v10 = vpack.c.bf16 %v11694_v56, %v11693_v0  ;;  %v11697_v8 = vld [vmem:[#allocation618_spill] sm:$0xff]  ;;  %v11708_v3 = vld [vmem:[#allocation651_spill] sm:$0xff] }
 0x373   : >> { %v5202_v4 = vpack.c.bf16 %v11698_v20, %v11697_v8  ;;  %v11706_v0 = vld [vmem:[#allocation654_spill] sm:$0xff]  ;;  %v11710_v8 = vld [vmem:[#allocation653_spill] sm:$0xff] }
 0x374   : >> { %5069 = vmatpush1.bf16.msra.mxu0 %v5068_v7  ;;  %v5076_v7 = vpack.c.bf16 %v11700_v18, %v11699_v17  ;;  %v11711_v17 = vld [vmem:[#allocation664_spill] sm:$0xff] }
 0x375   : >> { %5197 = vmatpush1.bf16.msra.mxu1 %v5196_v5  ;;  %5071 = vmatprep.subr.bf16.mxu0 %v5070_v16  ;;  %v11701_v5 = vld [vmem:[#allocation617_spill] sm:$0xff]  ;;  %v5078_v16 = vpack.c.bf16 %v11704_v41, %v11703_v12  ;;  %v11712_v18 = vld [vmem:[#allocation676_spill] sm:$0xff]  ;;  %v11715_v12 = vld [vmem:[#allocation663_spill] sm:$0xff] }
 0x376   : >> { %5199 = vmatprep.subr.bf16.mxu1 %v5198_v9  ;;  %v5204_v42 = vpack.c.bf16 %v11702_v2, %v11701_v5  ;;  %v11705_v9 = vld [vmem:[#allocation642_spill] sm:$0xff]  ;;  %v11716_v41 = vld [vmem:[#allocation675_spill] sm:$0xff] }
 0x377   : >> { %v5206_v56 = vpack.c.bf16 %v11706_v0, %v11705_v9  ;;  %v11714_v5 = vld [vmem:[#allocation678_spill] sm:$0xff]  ;;  %v11718_v9 = vld [vmem:[#allocation677_spill] sm:$0xff] }
 0x378   : >> { %5073 = vmatpush1.bf16.msra.mxu0 %v5072_v57  ;;  %v5080_v57 = vpack.c.bf16 %v11708_v3, %v11707_v19  ;;  %v11719_v19 = vld [vmem:[#allocation688_spill] sm:$0xff] }
 0x379   : >> { %5201 = vmatpush1.bf16.msra.mxu1 %v5200_v10  ;;  %5075 = vmatprep.subr.bf16.mxu0 %v5074_v6  ;;  %v11709_v10 = vld [vmem:[#allocation641_spill] sm:$0xff]  ;;  %v5082_v6 = vpack.c.bf16 %v11712_v18, %v11711_v17  ;;  %v11720_v3 = vld [vmem:[#allocation700_spill] sm:$0xff]  ;;  %v11723_v17 = vld [vmem:[#allocation687_spill] sm:$0xff] }
 0x37a   : >> { %5203 = vmatprep.subr.bf16.mxu1 %v5202_v4  ;;  %v5208_v20 = vpack.c.bf16 %v11710_v8, %v11709_v10  ;;  %v11713_v4 = vld [vmem:[#allocation666_spill] sm:$0xff]  ;;  %v11724_v18 = vld [vmem:[#allocation699_spill] sm:$0xff] }
 0x37b   : >> { %v5210_v2 = vpack.c.bf16 %v11714_v5, %v11713_v4  ;;  %v11722_v10 = vld [vmem:[#allocation702_spill] sm:$0xff]  ;;  %v11726_v4 = vld [vmem:[#allocation701_spill] sm:$0xff] }
 0x37c   : >> { %5077 = vmatpush1.bf16.msra.mxu0 %v5076_v7  ;;  %v5084_v7 = vpack.c.bf16 %v11716_v41, %v11715_v12  ;;  %v11727_v12 = vld [vmem:[#allocation712_spill] sm:$0xff] }
 0x37d   : >> { %5205 = vmatpush1.bf16.msra.mxu1 %v5204_v42  ;;  %5079 = vmatprep.subr.bf16.mxu0 %v5078_v16  ;;  %v11717_v42 = vld [vmem:[#allocation665_spill] sm:$0xff]  ;;  %v5086_v16 = vpack.c.bf16 %v11720_v3, %v11719_v19  ;;  %v11728_v41 = vld [vmem:[#allocation724_spill] sm:$0xff]  ;;  %v11731_v19 = vld [vmem:[#allocation711_spill] sm:$0xff] }
 0x37e   : >> { %5207 = vmatprep.subr.bf16.mxu1 %v5206_v56  ;;  %v5212_v0 = vpack.c.bf16 %v11718_v9, %v11717_v42  ;;  %v11721_v56 = vld [vmem:[#allocation690_spill] sm:$0xff]  ;;  %v11732_v3 = vld [vmem:[#allocation723_spill] sm:$0xff] }
 0x37f   : >> { %v5214_v8 = vpack.c.bf16 %v11722_v10, %v11721_v56  ;;  %v11730_v42 = vld [vmem:[#allocation726_spill] sm:$0xff]  ;;  %v11734_v56 = vld [vmem:[#allocation725_spill] sm:$0xff] }
 0x380   : >> { %5081 = vmatpush1.bf16.msra.mxu0 %v5080_v57  ;;  %v5088_v57 = vpack.c.bf16 %v11724_v18, %v11723_v17  ;;  %v11735_v17 = vld [vmem:[#allocation736_spill] sm:$0xff] }
 0x381   : >> { %5209 = vmatpush1.bf16.msra.mxu1 %v5208_v20  ;;  %5083 = vmatprep.subr.bf16.mxu0 %v5082_v6  ;;  %v11725_v20 = vld [vmem:[#allocation689_spill] sm:$0xff]  ;;  %v5090_v6 = vpack.c.bf16 %v11728_v41, %v11727_v12  ;;  %v11741_v12 = vld [vmem:[#allocation748_spill] sm:$0xff] }
 0x382   : >> { %5211 = vmatprep.subr.bf16.mxu1 %v5210_v2  ;;  %v5216_v5 = vpack.c.bf16 %v11726_v4, %v11725_v20  ;;  %v11729_v2 = vld [vmem:[#allocation714_spill] sm:$0xff]  ;;  %v11738_v20 = vld [vmem:[#allocation735_spill] sm:$0xff] }
 0x383   : >> { %v5218_v9 = vpack.c.bf16 %v11730_v42, %v11729_v2  ;;  %v11739_v4 = vld [vmem:[#allocation747_spill] sm:$0xff]  ;;  %v11742_v2 = vld [vmem:[#allocation22_spill] sm:$0xff] }
 0x384   : >> { %5085 = vmatpush1.bf16.msra.mxu0 %v5084_v7  ;;  %v5092_v7 = vpack.c.bf16 %v11732_v3, %v11731_v19  ;;  %v11743_v42 = vld [vmem:[#allocation34_spill] sm:$0xff]  ;;  %v11745_v19 = vld [vmem:[#allocation36_spill] sm:$0xff] }
 0x385   : >> { %5213 = vmatpush1.bf16.msra.mxu1 %v5212_v0  ;;  %5087 = vmatprep.subr.bf16.mxu0 %v5086_v16  ;;  %v11733_v0 = vld [vmem:[#allocation713_spill] sm:$0xff]  ;;  %v5094_v16 = vpack.c.bf16 %v9694_v50, %v11735_v17  ;;  %v11749_v17 = vld [vmem:[#allocation35_spill] sm:$0xff] }
 0x386   : >> { %5215 = vmatprep.subr.bf16.mxu1 %v5214_v8  ;;  %v5220_v10 = vpack.c.bf16 %v11734_v56, %v11733_v0  ;;  %v11736_v8 = vld [vmem:[#allocation738_spill] sm:$0xff]  ;;  %v11746_v0 = vld [vmem:[#allocation21_spill] sm:$0xff] }
 0x387   : >> { %v5222_v18 = vpack.c.bf16 %v11737_v15, %v11736_v8  ;;  %v11747_v56 = vld [vmem:[#allocation33_spill] sm:$0xff]  ;;  %v12188_v15 = vld [vmem:[#allocation563_spill] sm:$0xff] }
 0x388   : >> { %5089 = vmatpush1.bf16.msra.mxu0 %v5088_v57  ;;  %v5096_v57 = vpack.c.bf16 %v11739_v4, %v11738_v20  ;;  %v11750_v20 = vld [vmem:[#allocation43_spill] sm:$0xff] }
 0x389   : >> { %5217 = vmatpush1.bf16.msra.mxu1 %v5216_v5  ;;  %5091 = vmatprep.subr.bf16.mxu0 %v5090_v6  ;;  %v11740_v5 = vld [vmem:[#allocation737_spill] sm:$0xff]  ;;  %v5226_v6 = vpack.c.bf16 %v11743_v42, %v11742_v2  ;;  %v11751_v4 = vld [vmem:[#allocation51_spill] sm:$0xff]  ;;  %v11754_v2 = vld [vmem:[#allocation758_spill] sm:$0xff] }
 0x38a   : >> { %5219 = vmatprep.subr.bf16.mxu1 %v5218_v9  ;;  %v5224_v41 = vpack.c.bf16 %v11741_v12, %v11740_v5  ;;  %v11744_v9 = vld [vmem:[#allocation24_spill] sm:$0xff]  ;;  %v11753_v5 = vld [vmem:[#allocation53_spill] sm:$0xff] }
 0x38b   : >> { %v5354_v3 = vpack.c.bf16 %v11745_v19, %v11744_v9  ;;  %v11757_v9 = vld [vmem:[#allocation44_spill] sm:$0xff] }
 0x38c   : >> { %5093 = vmatpush1.bf16.msra.mxu0 %v5092_v7  ;;  %v5228_v7 = vpack.c.bf16 %v11747_v56, %v11746_v0  ;;  %v11758_v19 = vld [vmem:[#allocation52_spill] sm:$0xff] }
 0x38d   : >> { %5221 = vmatpush1.bf16.msra.mxu1 %v5220_v10  ;;  %5095 = vmatprep.subr.bf16.mxu0 %v5094_v16  ;;  %v11748_v10 = vld [vmem:[#allocation23_spill] sm:$0xff]  ;;  %v5230_v16 = vpack.c.bf16 %v11751_v4, %v11750_v20  ;;  %v5360_v0 = vpack.c.bf16 %v11758_v19, %v11757_v9  ;;  %v11769_v9 = vld [vmem:[#allocation86_spill] sm:$0xff] }
 0x38e   : >> { %5223 = vmatprep.subr.bf16.mxu1 %v5222_v18  ;;  %v5356_v8 = vpack.c.bf16 %v11749_v17, %v11748_v10  ;;  %v11752_v18 = vld [vmem:[#allocation45_spill] sm:$0xff]  ;;  %v11761_v10 = vld [vmem:[#allocation64_spill] sm:$0xff]  ;;  %v11762_v17 = vld [vmem:[#allocation74_spill] sm:$0xff] }
 0x38f   : >> { %v5358_v12 = vpack.c.bf16 %v11753_v5, %v11752_v18  ;;  %v5362_v20 = vpack.c.bf16 %v11762_v17, %v11761_v10  ;;  %v11765_v18 = vld [vmem:[#allocation63_spill] sm:$0xff]  ;;  %v11766_v5 = vld [vmem:[#allocation73_spill] sm:$0xff]  ;;  %v11772_v10 = vld [vmem:[#allocation92_spill] sm:$0xff] }
 0x390   : >> { %5097 = vmatpush1.bf16.msra.mxu0 %v5096_v57  ;;  %v11755_v57 = vld [vmem:[#allocation42_spill] sm:$0xff]  ;;  %v11770_v19 = vld [vmem:[#allocation95_spill] sm:$0xff] }
 0x391   : >> { %5225 = vmatpush1.bf16.msra.mxu1 %v5224_v41  ;;  %5227 = vmatprep.subr.bf16.mxu0 %v5226_v6  ;;  %v11756_v41 = vld [vmem:[#allocation50_spill] sm:$0xff] }
 0x392   : >> { %5355 = vmatprep.subr.bf16.mxu1 %v5354_v3  ;;  %v5232_v42 = vpack.c.bf16 %v11756_v41, %v11755_v57  ;;  %v11759_v6 = vld [vmem:[#allocation62_spill] sm:$0xff]  ;;  %v11760_v3 = vld [vmem:[#allocation72_spill] sm:$0xff]  ;;  %v5364_v57 = vpack.c.bf16 %v11766_v5, %v11765_v18 }
 0x393   : >> { %3400 = vmatmul.mubr.f32.vlgmr.msra.gmra.mrb[0].mxu0 %v11754_v2  ;;  %v5234_v56 = vpack.c.bf16 %v11760_v3, %v11759_v6  ;;  %v5366_v6 = vpack.c.bf16 %v11770_v19, %v11769_v9  ;;  %v11771_v3 = vld [vmem:[#allocation83_spill] sm:$0xff]  ;;  %v11774_v17 = vld [vmem:[#allocation94_spill] sm:$0xff]  ;;  %v11778_v18 = vld [vmem:[#allocation112_spill] sm:$0xff] }
 0x394   : >> { %3542 = vmatmul.mubr.f32.vlgmr.msra.gmra.mrb[0].mxu1 %v11754_v2  ;;  %5229 = vmatpush1.bf16.msra.mxu0 %v5228_v7  ;;  %v11763_v7 = vld [vmem:[#allocation61_spill] sm:$0xff]  ;;  %v11782_v9 = vld [vmem:[#allocation111_spill] sm:$0xff] }
 0x395   : >> { %5357 = vmatpush1.bf16.msra.mxu1 %v5356_v8  ;;  %5231 = vmatprep.subr.bf16.mxu0 %v5230_v16  ;;  %v11764_v8 = vld [vmem:[#allocation71_spill] sm:$0xff]  ;;  %v11767_v16 = vld [vmem:[#allocation84_spill] sm:$0xff] }
 0x396   : >> { %5359 = vmatprep.subr.bf16.mxu1 %v5358_v12  ;;  %3612 = vmatprep.mubr.f32.mxu0 %v6237_v13  ;;  %v5236_v4 = vpack.c.bf16 %v11764_v8, %v11763_v7  ;;  %v11768_v12 = vld [vmem:[#allocation93_spill] sm:$0xff]  ;;  %v11776_v8 = vld [vmem:[#allocation110_spill] sm:$0xff] }
 0x397   : >> { %3754 = vmatprep.mubr.f32.mxu1 %v6237_v13  ;;  %v5238_v41 = vpack.c.bf16 %v11768_v12, %v11767_v16  ;;  %v11775_v7 = vld [vmem:[#allocation101_spill] sm:$0xff]  ;;  %v11779_v16 = vld [vmem:[#allocation100_spill] sm:$0xff] }
 0x398   : >> { %5233 = vmatpush1.bf16.msra.mxu0 %v5232_v42  ;;  %v5240_v42 = vpack.c.bf16 %v11772_v10, %v11771_v3  ;;  %v11780_v12 = vld [vmem:[#allocation109_spill] sm:$0xff]  ;;  %v11783_v3 = vld [vmem:[#allocation119_spill] sm:$0xff]  ;;  %v11784_v10 = vld [vmem:[#allocation130_spill] sm:$0xff] }
 0x399   : >> { %5361 = vmatpush1.bf16.msra.mxu1 %v5360_v0  ;;  %5235 = vmatprep.subr.bf16.mxu0 %v5234_v56  ;;  %v11773_v0 = vld [vmem:[#allocation85_spill] sm:$0xff]  ;;  %v5242_v56 = vpack.c.bf16 %v11776_v8, %v11775_v7  ;;  %v11787_v7 = vld [vmem:[#allocation118_spill] sm:$0xff] }
 0x39a   : >> { %5363 = vmatprep.subr.bf16.mxu1 %v5362_v20  ;;  %v5368_v11 = vpack.c.bf16 %v11774_v17, %v11773_v0  ;;  %v11777_v20 = vld [vmem:[#allocation103_spill] sm:$0xff]  ;;  %v11786_v0 = vld [vmem:[#allocation132_spill] sm:$0xff]  ;;  %v11788_v8 = vld [vmem:[#allocation129_spill] sm:$0xff] }
 0x39b   : >> { %v5370_v5 = vpack.c.bf16 %v11778_v18, %v11777_v20  ;;  %v11790_v20 = vld [vmem:[#allocation131_spill] sm:$0xff] }
 0x39c   : >> { %5237 = vmatpush1.bf16.msra.mxu0 %v5236_v4  ;;  %v5244_v4 = vpack.c.bf16 %v11780_v12, %v11779_v16  ;;  %v11791_v16 = vld [vmem:[#allocation142_spill] sm:$0xff] }
 0x39d   : >> { %5365 = vmatpush1.bf16.msra.mxu1 %v5364_v57  ;;  %5239 = vmatprep.subr.bf16.mxu0 %v5238_v41  ;;  %v11781_v57 = vld [vmem:[#allocation102_spill] sm:$0xff]  ;;  %v5246_v41 = vpack.c.bf16 %v11784_v10, %v11783_v3  ;;  %v11795_v3 = vld [vmem:[#allocation141_spill] sm:$0xff] }
 0x39e   : >> { %5367 = vmatprep.subr.bf16.mxu1 %v5366_v6  ;;  %v5372_v19 = vpack.c.bf16 %v11782_v9, %v11781_v57  ;;  %v11785_v6 = vld [vmem:[#allocation121_spill] sm:$0xff]  ;;  %v11792_v12 = vld [vmem:[#allocation154_spill] sm:$0xff]  ;;  %v11794_v57 = vld [vmem:[#allocation156_spill] sm:$0xff] }
 0x39f   : >> { %v5374_v17 = vpack.c.bf16 %v11786_v0, %v11785_v6  ;;  %v11796_v10 = vld [vmem:[#allocation153_spill] sm:$0xff]  ;;  %v11798_v6 = vld [vmem:[#allocation155_spill] sm:$0xff] }
 0x3a0   : >> { %5241 = vmatpush1.bf16.msra.mxu0 %v5240_v42  ;;  %v5248_v42 = vpack.c.bf16 %v11788_v8, %v11787_v7  ;;  %v11799_v7 = vld [vmem:[#allocation166_spill] sm:$0xff] }
 0x3a1   : >> { %5369 = vmatpush1.bf16.msra.mxu1 %v5368_v11  ;;  %5243 = vmatprep.subr.bf16.mxu0 %v5242_v56  ;;  %v11789_v11 = vld [vmem:[#allocation120_spill] sm:$0xff]  ;;  %v5250_v56 = vpack.c.bf16 %v11792_v12, %v11791_v16  ;;  %v11800_v8 = vld [vmem:[#allocation178_spill] sm:$0xff]  ;;  %v11803_v16 = vld [vmem:[#allocation165_spill] sm:$0xff] }
 0x3a2   : >> { %5371 = vmatprep.subr.bf16.mxu1 %v5370_v5  ;;  %v5376_v18 = vpack.c.bf16 %v11790_v20, %v11789_v11  ;;  %v11793_v5 = vld [vmem:[#allocation144_spill] sm:$0xff]  ;;  %v11804_v12 = vld [vmem:[#allocation177_spill] sm:$0xff] }
 0x3a3   : >> { %v5378_v9 = vpack.c.bf16 %v11794_v57, %v11793_v5  ;;  %v11802_v11 = vld [vmem:[#allocation180_spill] sm:$0xff]  ;;  %v11806_v5 = vld [vmem:[#allocation179_spill] sm:$0xff] }
 0x3a4   : >> { %5245 = vmatpush1.bf16.msra.mxu0 %v5244_v4  ;;  %v5252_v4 = vpack.c.bf16 %v11796_v10, %v11795_v3  ;;  %v11807_v3 = vld [vmem:[#allocation190_spill] sm:$0xff] }
 0x3a5   : >> { %5373 = vmatpush1.bf16.msra.mxu1 %v5372_v19  ;;  %5247 = vmatprep.subr.bf16.mxu0 %v5246_v41  ;;  %v11797_v19 = vld [vmem:[#allocation143_spill] sm:$0xff]  ;;  %v5254_v41 = vpack.c.bf16 %v11800_v8, %v11799_v7  ;;  %v11808_v10 = vld [vmem:[#allocation202_spill] sm:$0xff]  ;;  %v11811_v7 = vld [vmem:[#allocation189_spill] sm:$0xff] }
 0x3a6   : >> { %5375 = vmatprep.subr.bf16.mxu1 %v5374_v17  ;;  %v5380_v0 = vpack.c.bf16 %v11798_v6, %v11797_v19  ;;  %v11801_v17 = vld [vmem:[#allocation168_spill] sm:$0xff]  ;;  %v11812_v8 = vld [vmem:[#allocation201_spill] sm:$0xff] }
 0x3a7   : >> { %v5382_v20 = vpack.c.bf16 %v11802_v11, %v11801_v17  ;;  %v11810_v19 = vld [vmem:[#allocation204_spill] sm:$0xff]  ;;  %v11814_v17 = vld [vmem:[#allocation203_spill] sm:$0xff] }
 0x3a8   : >> { %5249 = vmatpush1.bf16.msra.mxu0 %v5248_v42  ;;  %v5256_v42 = vpack.c.bf16 %v11804_v12, %v11803_v16  ;;  %v11815_v16 = vld [vmem:[#allocation214_spill] sm:$0xff] }
 0x3a9   : >> { %5377 = vmatpush1.bf16.msra.mxu1 %v5376_v18  ;;  %5251 = vmatprep.subr.bf16.mxu0 %v5250_v56  ;;  %v11805_v18 = vld [vmem:[#allocation167_spill] sm:$0xff]  ;;  %v5258_v56 = vpack.c.bf16 %v11808_v10, %v11807_v3  ;;  %v11816_v12 = vld [vmem:[#allocation226_spill] sm:$0xff]  ;;  %v11819_v3 = vld [vmem:[#allocation213_spill] sm:$0xff] }
 0x3aa   : >> { %5379 = vmatprep.subr.bf16.mxu1 %v5378_v9  ;;  %v5384_v57 = vpack.c.bf16 %v11806_v5, %v11805_v18  ;;  %v11809_v9 = vld [vmem:[#allocation192_spill] sm:$0xff]  ;;  %v11820_v10 = vld [vmem:[#allocation225_spill] sm:$0xff] }
 0x3ab   : >> { %v5386_v6 = vpack.c.bf16 %v11810_v19, %v11809_v9  ;;  %v11818_v18 = vld [vmem:[#allocation228_spill] sm:$0xff]  ;;  %v11822_v9 = vld [vmem:[#allocation227_spill] sm:$0xff] }
 0x3ac   : >> { %5253 = vmatpush1.bf16.msra.mxu0 %v5252_v4  ;;  %v5260_v4 = vpack.c.bf16 %v11812_v8, %v11811_v7  ;;  %v11823_v7 = vld [vmem:[#allocation238_spill] sm:$0xff] }
 0x3ad   : >> { %5381 = vmatpush1.bf16.msra.mxu1 %v5380_v0  ;;  %5255 = vmatprep.subr.bf16.mxu0 %v5254_v41  ;;  %v11813_v0 = vld [vmem:[#allocation191_spill] sm:$0xff]  ;;  %v5262_v41 = vpack.c.bf16 %v11816_v12, %v11815_v16  ;;  %v11824_v8 = vld [vmem:[#allocation250_spill] sm:$0xff]  ;;  %v11827_v16 = vld [vmem:[#allocation237_spill] sm:$0xff] }
 0x3ae   : >> { %5383 = vmatprep.subr.bf16.mxu1 %v5382_v20  ;;  %v5388_v11 = vpack.c.bf16 %v11814_v17, %v11813_v0  ;;  %v11817_v20 = vld [vmem:[#allocation216_spill] sm:$0xff]  ;;  %v11828_v12 = vld [vmem:[#allocation249_spill] sm:$0xff] }
 0x3af   : >> { %v5390_v5 = vpack.c.bf16 %v11818_v18, %v11817_v20  ;;  %v11826_v0 = vld [vmem:[#allocation252_spill] sm:$0xff]  ;;  %v11830_v20 = vld [vmem:[#allocation251_spill] sm:$0xff] }
 0x3b0   : >> { %5257 = vmatpush1.bf16.msra.mxu0 %v5256_v42  ;;  %v5264_v42 = vpack.c.bf16 %v11820_v10, %v11819_v3  ;;  %v11831_v3 = vld [vmem:[#allocation262_spill] sm:$0xff] }
 0x3b1   : >> { %5385 = vmatpush1.bf16.msra.mxu1 %v5384_v57  ;;  %5259 = vmatprep.subr.bf16.mxu0 %v5258_v56  ;;  %v11821_v57 = vld [vmem:[#allocation215_spill] sm:$0xff]  ;;  %v5266_v56 = vpack.c.bf16 %v11824_v8, %v11823_v7  ;;  %v11832_v10 = vld [vmem:[#allocation274_spill] sm:$0xff]  ;;  %v11835_v7 = vld [vmem:[#allocation261_spill] sm:$0xff] }
 0x3b2   : >> { %5387 = vmatprep.subr.bf16.mxu1 %v5386_v6  ;;  %v5392_v19 = vpack.c.bf16 %v11822_v9, %v11821_v57  ;;  %v11825_v6 = vld [vmem:[#allocation240_spill] sm:$0xff]  ;;  %v11836_v8 = vld [vmem:[#allocation273_spill] sm:$0xff] }
 0x3b3   : >> { %v5394_v17 = vpack.c.bf16 %v11826_v0, %v11825_v6  ;;  %v11834_v57 = vld [vmem:[#allocation276_spill] sm:$0xff]  ;;  %v11838_v6 = vld [vmem:[#allocation275_spill] sm:$0xff] }
 0x3b4   : >> { %5261 = vmatpush1.bf16.msra.mxu0 %v5260_v4  ;;  %v5268_v4 = vpack.c.bf16 %v11828_v12, %v11827_v16  ;;  %v11839_v16 = vld [vmem:[#allocation286_spill] sm:$0xff] }
 0x3b5   : >> { %5389 = vmatpush1.bf16.msra.mxu1 %v5388_v11  ;;  %5263 = vmatprep.subr.bf16.mxu0 %v5262_v41  ;;  %v11829_v11 = vld [vmem:[#allocation239_spill] sm:$0xff]  ;;  %v5270_v41 = vpack.c.bf16 %v11832_v10, %v11831_v3  ;;  %v11840_v12 = vld [vmem:[#allocation298_spill] sm:$0xff]  ;;  %v11843_v3 = vld [vmem:[#allocation285_spill] sm:$0xff] }
 0x3b6   : >> { %5391 = vmatprep.subr.bf16.mxu1 %v5390_v5  ;;  %v5396_v18 = vpack.c.bf16 %v11830_v20, %v11829_v11  ;;  %v11833_v5 = vld [vmem:[#allocation264_spill] sm:$0xff]  ;;  %v11844_v10 = vld [vmem:[#allocation297_spill] sm:$0xff] }
 0x3b7   : >> { %v5398_v9 = vpack.c.bf16 %v11834_v57, %v11833_v5  ;;  %v11842_v11 = vld [vmem:[#allocation300_spill] sm:$0xff]  ;;  %v11846_v5 = vld [vmem:[#allocation299_spill] sm:$0xff] }
 0x3b8   : >> { %5265 = vmatpush1.bf16.msra.mxu0 %v5264_v42  ;;  %v5272_v42 = vpack.c.bf16 %v11836_v8, %v11835_v7  ;;  %v11847_v7 = vld [vmem:[#allocation310_spill] sm:$0xff] }
 0x3b9   : >> { %5393 = vmatpush1.bf16.msra.mxu1 %v5392_v19  ;;  %5267 = vmatprep.subr.bf16.mxu0 %v5266_v56  ;;  %v11837_v19 = vld [vmem:[#allocation263_spill] sm:$0xff]  ;;  %v5274_v56 = vpack.c.bf16 %v11840_v12, %v11839_v16  ;;  %v11848_v8 = vld [vmem:[#allocation322_spill] sm:$0xff]  ;;  %v11851_v16 = vld [vmem:[#allocation309_spill] sm:$0xff] }
 0x3ba   : >> { %5395 = vmatprep.subr.bf16.mxu1 %v5394_v17  ;;  %v5400_v0 = vpack.c.bf16 %v11838_v6, %v11837_v19  ;;  %v11841_v17 = vld [vmem:[#allocation288_spill] sm:$0xff]  ;;  %v11852_v12 = vld [vmem:[#allocation321_spill] sm:$0xff] }
 0x3bb   : >> { %v5402_v20 = vpack.c.bf16 %v11842_v11, %v11841_v17  ;;  %v11850_v19 = vld [vmem:[#allocation324_spill] sm:$0xff]  ;;  %v11854_v17 = vld [vmem:[#allocation323_spill] sm:$0xff] }
 0x3bc   : >> { %5269 = vmatpush1.bf16.msra.mxu0 %v5268_v4  ;;  %v5276_v4 = vpack.c.bf16 %v11844_v10, %v11843_v3  ;;  %v11855_v3 = vld [vmem:[#allocation334_spill] sm:$0xff] }
 0x3bd   : >> { %5397 = vmatpush1.bf16.msra.mxu1 %v5396_v18  ;;  %5271 = vmatprep.subr.bf16.mxu0 %v5270_v41  ;;  %v11845_v18 = vld [vmem:[#allocation287_spill] sm:$0xff]  ;;  %v5278_v41 = vpack.c.bf16 %v11848_v8, %v11847_v7  ;;  %v11856_v10 = vld [vmem:[#allocation346_spill] sm:$0xff]  ;;  %v11859_v7 = vld [vmem:[#allocation333_spill] sm:$0xff] }
 0x3be   : >> { %5399 = vmatprep.subr.bf16.mxu1 %v5398_v9  ;;  %v5404_v57 = vpack.c.bf16 %v11846_v5, %v11845_v18  ;;  %v11849_v9 = vld [vmem:[#allocation312_spill] sm:$0xff]  ;;  %v11860_v8 = vld [vmem:[#allocation345_spill] sm:$0xff] }
 0x3bf   : >> { %v5406_v6 = vpack.c.bf16 %v11850_v19, %v11849_v9  ;;  %v11858_v18 = vld [vmem:[#allocation348_spill] sm:$0xff]  ;;  %v11862_v9 = vld [vmem:[#allocation347_spill] sm:$0xff] }
 0x3c0   : >> { %5273 = vmatpush1.bf16.msra.mxu0 %v5272_v42  ;;  %v5280_v42 = vpack.c.bf16 %v11852_v12, %v11851_v16  ;;  %v11863_v16 = vld [vmem:[#allocation358_spill] sm:$0xff]  ;;  %v11864_v12 = vld [vmem:[#allocation368_spill] sm:$0xff] }
 0x3c1   : >> { %5401 = vmatpush1.bf16.msra.mxu1 %v5400_v0  ;;  %5275 = vmatprep.subr.bf16.mxu0 %v5274_v56  ;;  %v11853_v0 = vld [vmem:[#allocation311_spill] sm:$0xff]  ;;  %v5282_v56 = vpack.c.bf16 %v11856_v10, %v11855_v3  ;;  %v11867_v3 = vld [vmem:[#allocation357_spill] sm:$0xff] }
 0x3c2   : >> { %5403 = vmatprep.subr.bf16.mxu1 %v5402_v20  ;;  %v5408_v11 = vpack.c.bf16 %v11854_v17, %v11853_v0  ;;  %v11857_v20 = vld [vmem:[#allocation336_spill] sm:$0xff]  ;;  %v11866_v0 = vld [vmem:[#allocation370_spill] sm:$0xff]  ;;  %v11868_v10 = vld [vmem:[#allocation367_spill] sm:$0xff] }
 0x3c3   : >> { %v5410_v5 = vpack.c.bf16 %v11858_v18, %v11857_v20  ;;  %v11870_v20 = vld [vmem:[#allocation369_spill] sm:$0xff] }
 0x3c4   : >> { %5277 = vmatpush1.bf16.msra.mxu0 %v5276_v4  ;;  %v5284_v4 = vpack.c.bf16 %v11860_v8, %v11859_v7  ;;  %v11871_v7 = vld [vmem:[#allocation380_spill] sm:$0xff] }
 0x3c5   : >> { %5405 = vmatpush1.bf16.msra.mxu1 %v5404_v57  ;;  %5279 = vmatprep.subr.bf16.mxu0 %v5278_v41  ;;  %v11861_v57 = vld [vmem:[#allocation335_spill] sm:$0xff]  ;;  %v5286_v41 = vpack.c.bf16 %v11864_v12, %v11863_v16  ;;  %v11872_v8 = vld [vmem:[#allocation392_spill] sm:$0xff] }
 0x3c6   : >> { %5407 = vmatprep.subr.bf16.mxu1 %v5406_v6  ;;  %v5412_v19 = vpack.c.bf16 %v11862_v9, %v11861_v57  ;;  %v11865_v6 = vld [vmem:[#allocation360_spill] sm:$0xff]  ;;  %v11874_v57 = vld [vmem:[#allocation394_spill] sm:$0xff]  ;;  %v11875_v16 = vld [vmem:[#allocation379_spill] sm:$0xff] }
 0x3c7   : >> { %v5414_v17 = vpack.c.bf16 %v11866_v0, %v11865_v6  ;;  %v11876_v12 = vld [vmem:[#allocation391_spill] sm:$0xff]  ;;  %v11878_v6 = vld [vmem:[#allocation393_spill] sm:$0xff] }
 0x3c8   : >> { %5281 = vmatpush1.bf16.msra.mxu0 %v5280_v42  ;;  %v5288_v42 = vpack.c.bf16 %v11868_v10, %v11867_v3  ;;  %v11879_v3 = vld [vmem:[#allocation404_spill] sm:$0xff] }
 0x3c9   : >> { %5409 = vmatpush1.bf16.msra.mxu1 %v5408_v11  ;;  %5283 = vmatprep.subr.bf16.mxu0 %v5282_v56  ;;  %v11869_v11 = vld [vmem:[#allocation359_spill] sm:$0xff]  ;;  %v5290_v56 = vpack.c.bf16 %v11872_v8, %v11871_v7  ;;  %v11880_v10 = vld [vmem:[#allocation416_spill] sm:$0xff]  ;;  %v11885_v8 = vld [vmem:[#allocation405_spill] sm:$0xff] }
 0x3ca   : >> { %5411 = vmatprep.subr.bf16.mxu1 %v5410_v5  ;;  %v5416_v18 = vpack.c.bf16 %v11870_v20, %v11869_v11  ;;  %v11873_v5 = vld [vmem:[#allocation382_spill] sm:$0xff] }
 0x3cb   : >> { %v5418_v9 = vpack.c.bf16 %v11874_v57, %v11873_v5  ;;  %v11882_v11 = vld [vmem:[#allocation418_spill] sm:$0xff]  ;;  %v11886_v5 = vld [vmem:[#allocation417_spill] sm:$0xff] }
 0x3cc   : >> { %5285 = vmatpush1.bf16.msra.mxu0 %v5284_v4  ;;  %v5292_v4 = vpack.c.bf16 %v11876_v12, %v11875_v16  ;;  %v5424_v57 = vpack.c.bf16 %v11886_v5, %v11885_v8  ;;  %v11889_v12 = vld [vmem:[#allocation430_spill] sm:$0xff] }
 0x3cd   : >> { %5413 = vmatpush1.bf16.msra.mxu1 %v5412_v19  ;;  %5287 = vmatprep.subr.bf16.mxu0 %v5286_v41  ;;  %v11877_v19 = vld [vmem:[#allocation381_spill] sm:$0xff]  ;;  %v5294_v41 = vpack.c.bf16 %v11880_v10, %v11879_v3  ;;  %v11898_v8 = vld [vmem:[#allocation466_spill] sm:$0xff] }
 0x3ce   : >> { %5415 = vmatprep.subr.bf16.mxu1 %v5414_v17  ;;  %v5420_v0 = vpack.c.bf16 %v11878_v6, %v11877_v19  ;;  %v11881_v17 = vld [vmem:[#allocation406_spill] sm:$0xff]  ;;  %v11893_v10 = vld [vmem:[#allocation429_spill] sm:$0xff] }
 0x3cf   : >> { %v5422_v20 = vpack.c.bf16 %v11882_v11, %v11881_v17  ;;  %v11890_v19 = vld [vmem:[#allocation442_spill] sm:$0xff]  ;;  %v11894_v17 = vld [vmem:[#allocation441_spill] sm:$0xff] }
 0x3d0   : >> { %5289 = vmatpush1.bf16.msra.mxu0 %v5288_v42  ;;  %v11883_v42 = vld [vmem:[#allocation403_spill] sm:$0xff]  ;;  %v5426_v6 = vpack.c.bf16 %v11890_v19, %v11889_v12  ;;  %v5428_v11 = vpack.c.bf16 %v11894_v17, %v11893_v10  ;;  %v11902_v12 = vld [vmem:[#allocation465_spill] sm:$0xff]  ;;  %v11906_v10 = vld [vmem:[#allocation490_spill] sm:$0xff] }
 0x3d1   : >> { %5417 = vmatpush1.bf16.msra.mxu1 %v5416_v18  ;;  %5291 = vmatprep.subr.bf16.mxu0 %v5290_v56  ;;  %v11884_v18 = vld [vmem:[#allocation415_spill] sm:$0xff]  ;;  %v11887_v56 = vld [vmem:[#allocation428_spill] sm:$0xff] }
 0x3d2   : >> { %5419 = vmatprep.subr.bf16.mxu1 %v5418_v9  ;;  %v5296_v7 = vpack.c.bf16 %v11884_v18, %v11883_v42  ;;  %v11888_v9 = vld [vmem:[#allocation440_spill] sm:$0xff]  ;;  %v11897_v18 = vld [vmem:[#allocation454_spill] sm:$0xff] }
 0x3d3   : >> { %3613 = vmatmul.mubr.f32.vlgmr.msra.gmra.mrb[2].mxu0 %v6241_v1  ;;  %v5298_v16 = vpack.c.bf16 %v11888_v9, %v11887_v56  ;;  %v5430_v5 = vpack.c.bf16 %v11898_v8, %v11897_v18  ;;  %v11899_v56 = vld [vmem:[#allocation451_spill] sm:$0xff]  ;;  %v11910_v18 = vld [vmem:[#allocation489_spill] sm:$0xff] }
 0x3d4   : >> { %3755 = vmatmul.mubr.f32.vlgmr.msra.gmra.mrb[2].mxu1 %v6241_v1  ;;  %5293 = vmatpush1.bf16.msra.mxu0 %v5292_v4  ;;  %v11891_v4 = vld [vmem:[#allocation427_spill] sm:$0xff] }
 0x3d5   : >> { %5421 = vmatpush1.bf16.msra.mxu1 %v5420_v0  ;;  %5295 = vmatprep.subr.bf16.mxu0 %v5294_v41  ;;  %v11892_v0 = vld [vmem:[#allocation439_spill] sm:$0xff]  ;;  %v11895_v41 = vld [vmem:[#allocation452_spill] sm:$0xff] }
 0x3d6   : >> { %5423 = vmatprep.subr.bf16.mxu1 %v5422_v20  ;;  %3683 = vmatprep.mubr.f32.mxu0 %v6229_v48  ;;  %v5300_v3 = vpack.c.bf16 %v11892_v0, %v11891_v4  ;;  %v11896_v20 = vld [vmem:[#allocation464_spill] sm:$0xff]  ;;  %v11900_v9 = vld [vmem:[#allocation463_spill] sm:$0xff] }
 0x3d7   : >> { %3825 = vmatprep.mubr.f32.mxu1 %v6229_v48  ;;  %v5302_v42 = vpack.c.bf16 %v11896_v20, %v11895_v41  ;;  %v11903_v4 = vld [vmem:[#allocation476_spill] sm:$0xff]  ;;  %v11907_v41 = vld [vmem:[#allocation475_spill] sm:$0xff] }
 0x3d8   : >> { %5297 = vmatpush1.bf16.msra.mxu0 %v5296_v7  ;;  %v5304_v7 = vpack.c.bf16 %v11900_v9, %v11899_v56  ;;  %v11904_v0 = vld [vmem:[#allocation488_spill] sm:$0xff]  ;;  %v11908_v20 = vld [vmem:[#allocation487_spill] sm:$0xff] }
 0x3d9   : >> { %5425 = vmatpush1.bf16.msra.mxu1 %v5424_v57  ;;  %5299 = vmatprep.subr.bf16.mxu0 %v5298_v16  ;;  %v11901_v57 = vld [vmem:[#allocation453_spill] sm:$0xff]  ;;  %v5306_v16 = vpack.c.bf16 %v11904_v0, %v11903_v4  ;;  %v11911_v56 = vld [vmem:[#allocation500_spill] sm:$0xff]  ;;  %v11915_v4 = vld [vmem:[#allocation499_spill] sm:$0xff] }
 0x3da   : >> { %5427 = vmatprep.subr.bf16.mxu1 %v5426_v6  ;;  %v5432_v19 = vpack.c.bf16 %v11902_v12, %v11901_v57  ;;  %v11905_v6 = vld [vmem:[#allocation478_spill] sm:$0xff]  ;;  %v11912_v9 = vld [vmem:[#allocation512_spill] sm:$0xff]  ;;  %v11916_v0 = vld [vmem:[#allocation511_spill] sm:$0xff] }
 0x3db   : >> { %v5434_v17 = vpack.c.bf16 %v11906_v10, %v11905_v6  ;;  %v11914_v57 = vld [vmem:[#allocation514_spill] sm:$0xff]  ;;  %v11918_v6 = vld [vmem:[#allocation513_spill] sm:$0xff] }
 0x3dc   : >> { %5301 = vmatpush1.bf16.msra.mxu0 %v5300_v3  ;;  %v5308_v3 = vpack.c.bf16 %v11908_v20, %v11907_v41  ;;  %v11919_v41 = vld [vmem:[#allocation524_spill] sm:$0xff] }
 0x3dd   : >> { %5429 = vmatpush1.bf16.msra.mxu1 %v5428_v11  ;;  %5303 = vmatprep.subr.bf16.mxu0 %v5302_v42  ;;  %v11909_v11 = vld [vmem:[#allocation477_spill] sm:$0xff]  ;;  %v5310_v42 = vpack.c.bf16 %v11912_v9, %v11911_v56  ;;  %v11920_v20 = vld [vmem:[#allocation536_spill] sm:$0xff]  ;;  %v11923_v56 = vld [vmem:[#allocation523_spill] sm:$0xff] }
 0x3de   : >> { %5431 = vmatprep.subr.bf16.mxu1 %v5430_v5  ;;  %v5436_v8 = vpack.c.bf16 %v11910_v18, %v11909_v11  ;;  %v11913_v5 = vld [vmem:[#allocation502_spill] sm:$0xff]  ;;  %v11924_v9 = vld [vmem:[#allocation535_spill] sm:$0xff] }
 0x3df   : >> { %v5438_v12 = vpack.c.bf16 %v11914_v57, %v11913_v5  ;;  %v11922_v11 = vld [vmem:[#allocation538_spill] sm:$0xff]  ;;  %v11926_v5 = vld [vmem:[#allocation537_spill] sm:$0xff] }
 0x3e0   : >> { %5305 = vmatpush1.bf16.msra.mxu0 %v5304_v7  ;;  %v5312_v7 = vpack.c.bf16 %v11916_v0, %v11915_v4  ;;  %v11927_v4 = vld [vmem:[#allocation548_spill] sm:$0xff] }
 0x3e1   : >> { %5433 = vmatpush1.bf16.msra.mxu1 %v5432_v19  ;;  %5307 = vmatprep.subr.bf16.mxu0 %v5306_v16  ;;  %v11917_v19 = vld [vmem:[#allocation501_spill] sm:$0xff]  ;;  %v5314_v16 = vpack.c.bf16 %v11920_v20, %v11919_v41  ;;  %v11928_v0 = vld [vmem:[#allocation560_spill] sm:$0xff]  ;;  %v11931_v41 = vld [vmem:[#allocation547_spill] sm:$0xff] }
 0x3e2   : >> { %5435 = vmatprep.subr.bf16.mxu1 %v5434_v17  ;;  %v5440_v10 = vpack.c.bf16 %v11918_v6, %v11917_v19  ;;  %v11921_v17 = vld [vmem:[#allocation526_spill] sm:$0xff]  ;;  %v11932_v20 = vld [vmem:[#allocation559_spill] sm:$0xff] }
 0x3e3   : >> { %v5442_v18 = vpack.c.bf16 %v11922_v11, %v11921_v17  ;;  %v11930_v19 = vld [vmem:[#allocation562_spill] sm:$0xff]  ;;  %v11934_v17 = vld [vmem:[#allocation561_spill] sm:$0xff] }
 0x3e4   : >> { %5309 = vmatpush1.bf16.msra.mxu0 %v5308_v3  ;;  %v5316_v3 = vpack.c.bf16 %v11924_v9, %v11923_v56  ;;  %v11935_v56 = vld [vmem:[#allocation572_spill] sm:$0xff] }
 0x3e5   : >> { %5437 = vmatpush1.bf16.msra.mxu1 %v5436_v8  ;;  %5311 = vmatprep.subr.bf16.mxu0 %v5310_v42  ;;  %v11925_v8 = vld [vmem:[#allocation525_spill] sm:$0xff]  ;;  %v5318_v42 = vpack.c.bf16 %v11928_v0, %v11927_v4  ;;  %v11936_v9 = vld [vmem:[#allocation584_spill] sm:$0xff]  ;;  %v11939_v4 = vld [vmem:[#allocation571_spill] sm:$0xff] }
 0x3e6   : >> { %5439 = vmatprep.subr.bf16.mxu1 %v5438_v12  ;;  %v5444_v57 = vpack.c.bf16 %v11926_v5, %v11925_v8  ;;  %v11929_v12 = vld [vmem:[#allocation550_spill] sm:$0xff]  ;;  %v11940_v0 = vld [vmem:[#allocation583_spill] sm:$0xff] }
 0x3e7   : >> { %v5446_v6 = vpack.c.bf16 %v11930_v19, %v11929_v12  ;;  %v11938_v8 = vld [vmem:[#allocation586_spill] sm:$0xff]  ;;  %v11942_v12 = vld [vmem:[#allocation585_spill] sm:$0xff] }
 0x3e8   : >> { %5313 = vmatpush1.bf16.msra.mxu0 %v5312_v7  ;;  %v5320_v7 = vpack.c.bf16 %v11932_v20, %v11931_v41  ;;  %v11943_v41 = vld [vmem:[#allocation596_spill] sm:$0xff] }
 0x3e9   : >> { %5441 = vmatpush1.bf16.msra.mxu1 %v5440_v10  ;;  %5315 = vmatprep.subr.bf16.mxu0 %v5314_v16  ;;  %v11933_v10 = vld [vmem:[#allocation549_spill] sm:$0xff]  ;;  %v5322_v16 = vpack.c.bf16 %v11936_v9, %v11935_v56  ;;  %v11944_v20 = vld [vmem:[#allocation608_spill] sm:$0xff]  ;;  %v11947_v56 = vld [vmem:[#allocation595_spill] sm:$0xff] }
 0x3ea   : >> { %5443 = vmatprep.subr.bf16.mxu1 %v5442_v18  ;;  %v5448_v11 = vpack.c.bf16 %v11934_v17, %v11933_v10  ;;  %v11937_v18 = vld [vmem:[#allocation574_spill] sm:$0xff]  ;;  %v11948_v9 = vld [vmem:[#allocation607_spill] sm:$0xff] }
 0x3eb   : >> { %v5450_v5 = vpack.c.bf16 %v11938_v8, %v11937_v18  ;;  %v11946_v10 = vld [vmem:[#allocation610_spill] sm:$0xff]  ;;  %v11950_v18 = vld [vmem:[#allocation609_spill] sm:$0xff] }
 0x3ec   : >> { %5317 = vmatpush1.bf16.msra.mxu0 %v5316_v3  ;;  %v5324_v3 = vpack.c.bf16 %v11940_v0, %v11939_v4  ;;  %v11951_v4 = vld [vmem:[#allocation620_spill] sm:$0xff] }
 0x3ed   : >> { %5445 = vmatpush1.bf16.msra.mxu1 %v5444_v57  ;;  %5319 = vmatprep.subr.bf16.mxu0 %v5318_v42  ;;  %v11941_v57 = vld [vmem:[#allocation573_spill] sm:$0xff]  ;;  %v5326_v42 = vpack.c.bf16 %v11944_v20, %v11943_v41  ;;  %v11952_v0 = vld [vmem:[#allocation632_spill] sm:$0xff]  ;;  %v11955_v41 = vld [vmem:[#allocation619_spill] sm:$0xff] }
 0x3ee   : >> { %5447 = vmatprep.subr.bf16.mxu1 %v5446_v6  ;;  %v5452_v19 = vpack.c.bf16 %v11942_v12, %v11941_v57  ;;  %v11945_v6 = vld [vmem:[#allocation598_spill] sm:$0xff]  ;;  %v11956_v20 = vld [vmem:[#allocation631_spill] sm:$0xff] }
 0x3ef   : >> { %v5454_v17 = vpack.c.bf16 %v11946_v10, %v11945_v6  ;;  %v11954_v57 = vld [vmem:[#allocation634_spill] sm:$0xff]  ;;  %v11958_v6 = vld [vmem:[#allocation633_spill] sm:$0xff] }
 0x3f0   : >> { %5321 = vmatpush1.bf16.msra.mxu0 %v5320_v7  ;;  %v5328_v7 = vpack.c.bf16 %v11948_v9, %v11947_v56  ;;  %v11959_v56 = vld [vmem:[#allocation644_spill] sm:$0xff] }
 0x3f1   : >> { %5449 = vmatpush1.bf16.msra.mxu1 %v5448_v11  ;;  %5323 = vmatprep.subr.bf16.mxu0 %v5322_v16  ;;  %v11949_v11 = vld [vmem:[#allocation597_spill] sm:$0xff]  ;;  %v5330_v16 = vpack.c.bf16 %v11952_v0, %v11951_v4  ;;  %v11960_v9 = vld [vmem:[#allocation656_spill] sm:$0xff]  ;;  %v11963_v4 = vld [vmem:[#allocation643_spill] sm:$0xff] }
 0x3f2   : >> { %5451 = vmatprep.subr.bf16.mxu1 %v5450_v5  ;;  %v5456_v8 = vpack.c.bf16 %v11950_v18, %v11949_v11  ;;  %v11953_v5 = vld [vmem:[#allocation622_spill] sm:$0xff]  ;;  %v11964_v0 = vld [vmem:[#allocation655_spill] sm:$0xff] }
 0x3f3   : >> { %v5458_v12 = vpack.c.bf16 %v11954_v57, %v11953_v5  ;;  %v11962_v11 = vld [vmem:[#allocation658_spill] sm:$0xff]  ;;  %v11966_v5 = vld [vmem:[#allocation657_spill] sm:$0xff] }
 0x3f4   : >> { %5325 = vmatpush1.bf16.msra.mxu0 %v5324_v3  ;;  %v5332_v3 = vpack.c.bf16 %v11956_v20, %v11955_v41  ;;  %v11967_v41 = vld [vmem:[#allocation668_spill] sm:$0xff] }
 0x3f5   : >> { %5453 = vmatpush1.bf16.msra.mxu1 %v5452_v19  ;;  %5327 = vmatprep.subr.bf16.mxu0 %v5326_v42  ;;  %v11957_v19 = vld [vmem:[#allocation621_spill] sm:$0xff]  ;;  %v5334_v42 = vpack.c.bf16 %v11960_v9, %v11959_v56  ;;  %v11968_v20 = vld [vmem:[#allocation680_spill] sm:$0xff]  ;;  %v11971_v56 = vld [vmem:[#allocation667_spill] sm:$0xff] }
 0x3f6   : >> { %5455 = vmatprep.subr.bf16.mxu1 %v5454_v17  ;;  %v5460_v10 = vpack.c.bf16 %v11958_v6, %v11957_v19  ;;  %v11961_v17 = vld [vmem:[#allocation646_spill] sm:$0xff]  ;;  %v11972_v9 = vld [vmem:[#allocation679_spill] sm:$0xff] }
 0x3f7   : >> { %v5462_v18 = vpack.c.bf16 %v11962_v11, %v11961_v17  ;;  %v11970_v19 = vld [vmem:[#allocation682_spill] sm:$0xff]  ;;  %v11974_v17 = vld [vmem:[#allocation681_spill] sm:$0xff] }
 0x3f8   : >> { %5329 = vmatpush1.bf16.msra.mxu0 %v5328_v7  ;;  %v5336_v7 = vpack.c.bf16 %v11964_v0, %v11963_v4  ;;  %v11975_v4 = vld [vmem:[#allocation692_spill] sm:$0xff] }
 0x3f9   : >> { %5457 = vmatpush1.bf16.msra.mxu1 %v5456_v8  ;;  %5331 = vmatprep.subr.bf16.mxu0 %v5330_v16  ;;  %v11965_v8 = vld [vmem:[#allocation645_spill] sm:$0xff]  ;;  %v5338_v16 = vpack.c.bf16 %v11968_v20, %v11967_v41  ;;  %v11976_v0 = vld [vmem:[#allocation704_spill] sm:$0xff]  ;;  %v11979_v41 = vld [vmem:[#allocation691_spill] sm:$0xff] }
 0x3fa   : >> { %5459 = vmatprep.subr.bf16.mxu1 %v5458_v12  ;;  %v5464_v57 = vpack.c.bf16 %v11966_v5, %v11965_v8  ;;  %v11969_v12 = vld [vmem:[#allocation670_spill] sm:$0xff]  ;;  %v11980_v20 = vld [vmem:[#allocation703_spill] sm:$0xff] }
 0x3fb   : >> { %v5466_v6 = vpack.c.bf16 %v11970_v19, %v11969_v12  ;;  %v11978_v8 = vld [vmem:[#allocation706_spill] sm:$0xff]  ;;  %v11982_v12 = vld [vmem:[#allocation705_spill] sm:$0xff] }
 0x3fc   : >> { %5333 = vmatpush1.bf16.msra.mxu0 %v5332_v3  ;;  %v5340_v3 = vpack.c.bf16 %v11972_v9, %v11971_v56  ;;  %v11983_v56 = vld [vmem:[#allocation716_spill] sm:$0xff] }
 0x3fd   : >> { %5461 = vmatpush1.bf16.msra.mxu1 %v5460_v10  ;;  %5335 = vmatprep.subr.bf16.mxu0 %v5334_v42  ;;  %v11973_v10 = vld [vmem:[#allocation669_spill] sm:$0xff]  ;;  %v5342_v42 = vpack.c.bf16 %v11976_v0, %v11975_v4  ;;  %v11984_v9 = vld [vmem:[#allocation728_spill] sm:$0xff]  ;;  %v11987_v4 = vld [vmem:[#allocation715_spill] sm:$0xff] }
 0x3fe   : >> { %5463 = vmatprep.subr.bf16.mxu1 %v5462_v18  ;;  %v5468_v11 = vpack.c.bf16 %v11974_v17, %v11973_v10  ;;  %v11977_v18 = vld [vmem:[#allocation694_spill] sm:$0xff]  ;;  %v11988_v0 = vld [vmem:[#allocation727_spill] sm:$0xff] }
 0x3ff   : >> { %v5470_v5 = vpack.c.bf16 %v11978_v8, %v11977_v18  ;;  %v11986_v10 = vld [vmem:[#allocation730_spill] sm:$0xff]  ;;  %v11990_v18 = vld [vmem:[#allocation729_spill] sm:$0xff] }
 0x400   : >> { %5337 = vmatpush1.bf16.msra.mxu0 %v5336_v7  ;;  %v5344_v7 = vpack.c.bf16 %v11980_v20, %v11979_v41  ;;  %v11991_v41 = vld [vmem:[#allocation740_spill] sm:$0xff]  ;;  %v11992_v20 = vld [vmem:[#allocation751_spill] sm:$0xff] }
 0x401   : >> { %5465 = vmatpush1.bf16.msra.mxu1 %v5464_v57  ;;  %5339 = vmatprep.subr.bf16.mxu0 %v5338_v16  ;;  %v11981_v57 = vld [vmem:[#allocation693_spill] sm:$0xff]  ;;  %v5346_v16 = vpack.c.bf16 %v11984_v9, %v11983_v56  ;;  %v11995_v56 = vld [vmem:[#allocation739_spill] sm:$0xff]  ;;  %v11996_v9 = vld [vmem:[#allocation750_spill] sm:$0xff] }
 0x402   : >> { %5467 = vmatprep.subr.bf16.mxu1 %v5466_v6  ;;  %v5472_v19 = vpack.c.bf16 %v11982_v12, %v11981_v57  ;;  %v11985_v6 = vld [vmem:[#allocation718_spill] sm:$0xff]  ;;  %v11994_v57 = vld [vmem:[#allocation753_spill] sm:$0xff] }
 0x403   : >> { %v5474_v17 = vpack.c.bf16 %v11986_v10, %v11985_v6  ;;  %v11998_v6 = vld [vmem:[#allocation752_spill] sm:$0xff] }
 0x404   : >> { %5341 = vmatpush1.bf16.msra.mxu0 %v5340_v3  ;;  %v5348_v3 = vpack.c.bf16 %v11988_v0, %v11987_v4  ;;  %v11999_v4 = vld [vmem:[#allocation26_spill] sm:$0xff] }
 0x405   : >> { %5469 = vmatpush1.bf16.msra.mxu1 %v5468_v11  ;;  %5343 = vmatprep.subr.bf16.mxu0 %v5342_v42  ;;  %v11989_v11 = vld [vmem:[#allocation717_spill] sm:$0xff]  ;;  %v5350_v42 = vpack.c.bf16 %v11992_v20, %v11991_v41  ;;  %v12000_v0 = vld [vmem:[#allocation38_spill] sm:$0xff] }
 0x406   : >> { %5471 = vmatprep.subr.bf16.mxu1 %v5470_v5  ;;  %v5476_v8 = vpack.c.bf16 %v11990_v18, %v11989_v11  ;;  %v11993_v5 = vld [vmem:[#allocation742_spill] sm:$0xff]  ;;  %v12002_v11 = vld [vmem:[#allocation40_spill] sm:$0xff]  ;;  %v12003_v41 = vld [vmem:[#allocation25_spill] sm:$0xff] }
 0x407   : >> { %v5478_v12 = vpack.c.bf16 %v11994_v57, %v11993_v5  ;;  %v12004_v20 = vld [vmem:[#allocation37_spill] sm:$0xff]  ;;  %v12006_v5 = vld [vmem:[#allocation39_spill] sm:$0xff] }
 0x408   : >> { %5345 = vmatpush1.bf16.msra.mxu0 %v5344_v7  ;;  %v5352_v7 = vpack.c.bf16 %v11996_v9, %v11995_v56  ;;  %v12007_v56 = vld [vmem:[#allocation47_spill] sm:$0xff] }
 0x409   : >> { %5473 = vmatpush1.bf16.msra.mxu1 %v5472_v19  ;;  %5347 = vmatprep.subr.bf16.mxu0 %v5346_v16  ;;  %v11997_v19 = vld [vmem:[#allocation741_spill] sm:$0xff]  ;;  %v5482_v16 = vpack.c.bf16 %v12000_v0, %v11999_v4  ;;  %v12008_v9 = vld [vmem:[#allocation55_spill] sm:$0xff]  ;;  %v12013_v0 = vld [vmem:[#allocation48_spill] sm:$0xff] }
 0x40a   : >> { %5475 = vmatprep.subr.bf16.mxu1 %v5474_v17  ;;  %v5480_v10 = vpack.c.bf16 %v11998_v6, %v11997_v19  ;;  %v12001_v17 = vld [vmem:[#allocation28_spill] sm:$0xff]  ;;  %v12010_v19 = vld [vmem:[#allocation57_spill] sm:$0xff] }
 0x40b   : >> { %v5610_v18 = vpack.c.bf16 %v12002_v11, %v12001_v17  ;;  %v12014_v17 = vld [vmem:[#allocation56_spill] sm:$0xff] }
 0x40c   : >> { %5349 = vmatpush1.bf16.msra.mxu0 %v5348_v3  ;;  %v5484_v3 = vpack.c.bf16 %v12004_v20, %v12003_v41  ;;  %v5616_v11 = vpack.c.bf16 %v12014_v17, %v12013_v0  ;;  %v12017_v20 = vld [vmem:[#allocation68_spill] sm:$0xff]  ;;  %v12026_v0 = vld [vmem:[#allocation99_spill] sm:$0xff] }
 0x40d   : >> { %5477 = vmatpush1.bf16.msra.mxu1 %v5476_v8  ;;  %5351 = vmatprep.subr.bf16.mxu0 %v5350_v42  ;;  %v12005_v8 = vld [vmem:[#allocation27_spill] sm:$0xff]  ;;  %v5486_v42 = vpack.c.bf16 %v12008_v9, %v12007_v56 }
 0x40e   : >> { %5479 = vmatprep.subr.bf16.mxu1 %v5478_v12  ;;  %v5612_v57 = vpack.c.bf16 %v12006_v5, %v12005_v8  ;;  %v12009_v12 = vld [vmem:[#allocation49_spill] sm:$0xff]  ;;  %v12018_v8 = vld [vmem:[#allocation78_spill] sm:$0xff]  ;;  %v12021_v9 = vld [vmem:[#allocation67_spill] sm:$0xff] }
 0x40f   : >> { %v5614_v6 = vpack.c.bf16 %v12010_v19, %v12009_v12  ;;  %v5618_v5 = vpack.c.bf16 %v12018_v8, %v12017_v20  ;;  %v12022_v12 = vld [vmem:[#allocation77_spill] sm:$0xff]  ;;  %v12030_v20 = vld [vmem:[#allocation98_spill] sm:$0xff] }
 0x410   : >> { %5353 = vmatpush1.bf16.msra.mxu0 %v5352_v7  ;;  %v12011_v7 = vld [vmem:[#allocation46_spill] sm:$0xff]  ;;  %v5620_v19 = vpack.c.bf16 %v12022_v12, %v12021_v9  ;;  %v12034_v9 = vld [vmem:[#allocation116_spill] sm:$0xff] }
 0x411   : >> { %5481 = vmatpush1.bf16.msra.mxu1 %v5480_v10  ;;  %5483 = vmatprep.subr.bf16.mxu0 %v5482_v16  ;;  %v12012_v10 = vld [vmem:[#allocation54_spill] sm:$0xff] }
 0x412   : >> { %5611 = vmatprep.subr.bf16.mxu1 %v5610_v18  ;;  %v5488_v4 = vpack.c.bf16 %v12012_v10, %v12011_v7  ;;  %v12015_v16 = vld [vmem:[#allocation66_spill] sm:$0xff]  ;;  %v12016_v18 = vld [vmem:[#allocation76_spill] sm:$0xff] }
 0x413   : >> { %3684 = vmatmul.mubr.f32.vlgmr.msra.gmra.mrb[2].mxu0 %v11754_v2  ;;  %v5490_v41 = vpack.c.bf16 %v12016_v18, %v12015_v16  ;;  %v12025_v10 = vld [vmem:[#allocation90_spill] sm:$0xff]  ;;  %v12027_v16 = vld [vmem:[#allocation87_spill] sm:$0xff]  ;;  %v12028_v18 = vld [vmem:[#allocation96_spill] sm:$0xff] }
 0x414   : >> { %3826 = vmatmul.mubr.f32.vlgmr.msra.gmra.mrb[2].mxu1 %v11754_v2  ;;  %5485 = vmatpush1.bf16.msra.mxu0 %v5484_v3  ;;  %v12019_v3 = vld [vmem:[#allocation65_spill] sm:$0xff]  ;;  %v5622_v17 = vpack.c.bf16 %v12026_v0, %v12025_v10  ;;  %v12038_v10 = vld [vmem:[#allocation115_spill] sm:$0xff] }
 0x415   : >> { %5613 = vmatpush1.bf16.msra.mxu1 %v5612_v57  ;;  %5487 = vmatprep.subr.bf16.mxu0 %v5486_v42  ;;  %v12020_v57 = vld [vmem:[#allocation75_spill] sm:$0xff]  ;;  %v12023_v42 = vld [vmem:[#allocation88_spill] sm:$0xff] }
 0x416   : >> { %5615 = vmatprep.subr.bf16.mxu1 %v5614_v6  ;;  %3896 = vmatprep.mubr.f32.mxu0 %v6237_v13  ;;  %v5492_v56 = vpack.c.bf16 %v12020_v57, %v12019_v3  ;;  %v12024_v6 = vld [vmem:[#allocation97_spill] sm:$0xff]  ;;  %v12032_v57 = vld [vmem:[#allocation114_spill] sm:$0xff] }
 0x417   : >> { %4038 = vmatprep.mubr.f32.mxu1 %v6237_v13  ;;  %v5494_v7 = vpack.c.bf16 %v12024_v6, %v12023_v42  ;;  %v12031_v3 = vld [vmem:[#allocation105_spill] sm:$0xff]  ;;  %v12035_v42 = vld [vmem:[#allocation104_spill] sm:$0xff] }
 0x418   : >> { %5489 = vmatpush1.bf16.msra.mxu0 %v5488_v4  ;;  %v5496_v4 = vpack.c.bf16 %v12028_v18, %v12027_v16  ;;  %v12036_v6 = vld [vmem:[#allocation113_spill] sm:$0xff]  ;;  %v12039_v16 = vld [vmem:[#allocation123_spill] sm:$0xff]  ;;  %v12040_v18 = vld [vmem:[#allocation134_spill] sm:$0xff] }
 0x419   : >> { %5617 = vmatpush1.bf16.msra.mxu1 %v5616_v11  ;;  %5491 = vmatprep.subr.bf16.mxu0 %v5490_v41  ;;  %v12029_v11 = vld [vmem:[#allocation89_spill] sm:$0xff]  ;;  %v5498_v41 = vpack.c.bf16 %v12032_v57, %v12031_v3  ;;  %v12043_v3 = vld [vmem:[#allocation122_spill] sm:$0xff] }
 0x41a   : >> { %5619 = vmatprep.subr.bf16.mxu1 %v5618_v5  ;;  %v5624_v8 = vpack.c.bf16 %v12030_v20, %v12029_v11  ;;  %v12033_v5 = vld [vmem:[#allocation107_spill] sm:$0xff]  ;;  %v12042_v11 = vld [vmem:[#allocation136_spill] sm:$0xff]  ;;  %v12044_v57 = vld [vmem:[#allocation133_spill] sm:$0xff] }
 0x41b   : >> { %v5626_v12 = vpack.c.bf16 %v12034_v9, %v12033_v5  ;;  %v12046_v5 = vld [vmem:[#allocation135_spill] sm:$0xff] }
 0x41c   : >> { %5493 = vmatpush1.bf16.msra.mxu0 %v5492_v56  ;;  %v5500_v56 = vpack.c.bf16 %v12036_v6, %v12035_v42  ;;  %v12047_v42 = vld [vmem:[#allocation146_spill] sm:$0xff] }
 0x41d   : >> { %5621 = vmatpush1.bf16.msra.mxu1 %v5620_v19  ;;  %5495 = vmatprep.subr.bf16.mxu0 %v5494_v7  ;;  %v12037_v19 = vld [vmem:[#allocation106_spill] sm:$0xff]  ;;  %v5502_v7 = vpack.c.bf16 %v12040_v18, %v12039_v16  ;;  %v12051_v16 = vld [vmem:[#allocation145_spill] sm:$0xff] }
 0x41e   : >> { %5623 = vmatprep.subr.bf16.mxu1 %v5622_v17  ;;  %v5628_v0 = vpack.c.bf16 %v12038_v10, %v12037_v19  ;;  %v12041_v17 = vld [vmem:[#allocation125_spill] sm:$0xff]  ;;  %v12048_v6 = vld [vmem:[#allocation158_spill] sm:$0xff]  ;;  %v12050_v19 = vld [vmem:[#allocation160_spill] sm:$0xff] }
 0x41f   : >> { %v5630_v20 = vpack.c.bf16 %v12042_v11, %v12041_v17  ;;  %v12052_v18 = vld [vmem:[#allocation157_spill] sm:$0xff]  ;;  %v12054_v17 = vld [vmem:[#allocation159_spill] sm:$0xff] }
 0x420   : >> { %5497 = vmatpush1.bf16.msra.mxu0 %v5496_v4  ;;  %v5504_v4 = vpack.c.bf16 %v12044_v57, %v12043_v3  ;;  %v12055_v3 = vld [vmem:[#allocation170_spill] sm:$0xff] }
 0x421   : >> { %5625 = vmatpush1.bf16.msra.mxu1 %v5624_v8  ;;  %5499 = vmatprep.subr.bf16.mxu0 %v5498_v41  ;;  %v12045_v8 = vld [vmem:[#allocation124_spill] sm:$0xff]  ;;  %v5506_v41 = vpack.c.bf16 %v12048_v6, %v12047_v42  ;;  %v12056_v57 = vld [vmem:[#allocation182_spill] sm:$0xff]  ;;  %v12059_v42 = vld [vmem:[#allocation169_spill] sm:$0xff] }
 0x422   : >> { %5627 = vmatprep.subr.bf16.mxu1 %v5626_v12  ;;  %v5632_v9 = vpack.c.bf16 %v12046_v5, %v12045_v8  ;;  %v12049_v12 = vld [vmem:[#allocation148_spill] sm:$0xff]  ;;  %v12060_v6 = vld [vmem:[#allocation181_spill] sm:$0xff] }
 0x423   : >> { %v5634_v10 = vpack.c.bf16 %v12050_v19, %v12049_v12  ;;  %v12058_v8 = vld [vmem:[#allocation184_spill] sm:$0xff]  ;;  %v12062_v12 = vld [vmem:[#allocation183_spill] sm:$0xff] }
 0x424   : >> { %5501 = vmatpush1.bf16.msra.mxu0 %v5500_v56  ;;  %v5508_v56 = vpack.c.bf16 %v12052_v18, %v12051_v16  ;;  %v12063_v16 = vld [vmem:[#allocation194_spill] sm:$0xff] }
 0x425   : >> { %5629 = vmatpush1.bf16.msra.mxu1 %v5628_v0  ;;  %5503 = vmatprep.subr.bf16.mxu0 %v5502_v7  ;;  %v12053_v0 = vld [vmem:[#allocation147_spill] sm:$0xff]  ;;  %v5510_v7 = vpack.c.bf16 %v12056_v57, %v12055_v3  ;;  %v12064_v18 = vld [vmem:[#allocation206_spill] sm:$0xff]  ;;  %v12067_v3 = vld [vmem:[#allocation193_spill] sm:$0xff] }
 0x426   : >> { %5631 = vmatprep.subr.bf16.mxu1 %v5630_v20  ;;  %v5636_v11 = vpack.c.bf16 %v12054_v17, %v12053_v0  ;;  %v12057_v20 = vld [vmem:[#allocation172_spill] sm:$0xff]  ;;  %v12068_v57 = vld [vmem:[#allocation205_spill] sm:$0xff] }
 0x427   : >> { %v5638_v5 = vpack.c.bf16 %v12058_v8, %v12057_v20  ;;  %v12066_v0 = vld [vmem:[#allocation208_spill] sm:$0xff]  ;;  %v12070_v20 = vld [vmem:[#allocation207_spill] sm:$0xff] }
 0x428   : >> { %5505 = vmatpush1.bf16.msra.mxu0 %v5504_v4  ;;  %v5512_v4 = vpack.c.bf16 %v12060_v6, %v12059_v42  ;;  %v12071_v42 = vld [vmem:[#allocation218_spill] sm:$0xff] }
 0x429   : >> { %5633 = vmatpush1.bf16.msra.mxu1 %v5632_v9  ;;  %5507 = vmatprep.subr.bf16.mxu0 %v5506_v41  ;;  %v12061_v9 = vld [vmem:[#allocation171_spill] sm:$0xff]  ;;  %v5514_v41 = vpack.c.bf16 %v12064_v18, %v12063_v16  ;;  %v12072_v6 = vld [vmem:[#allocation230_spill] sm:$0xff]  ;;  %v12075_v16 = vld [vmem:[#allocation217_spill] sm:$0xff] }
 0x42a   : >> { %5635 = vmatprep.subr.bf16.mxu1 %v5634_v10  ;;  %v5640_v19 = vpack.c.bf16 %v12062_v12, %v12061_v9  ;;  %v12065_v10 = vld [vmem:[#allocation196_spill] sm:$0xff]  ;;  %v12076_v18 = vld [vmem:[#allocation229_spill] sm:$0xff] }
 0x42b   : >> { %v5642_v17 = vpack.c.bf16 %v12066_v0, %v12065_v10  ;;  %v12074_v9 = vld [vmem:[#allocation232_spill] sm:$0xff]  ;;  %v12078_v10 = vld [vmem:[#allocation231_spill] sm:$0xff] }
 0x42c   : >> { %5509 = vmatpush1.bf16.msra.mxu0 %v5508_v56  ;;  %v5516_v56 = vpack.c.bf16 %v12068_v57, %v12067_v3  ;;  %v12079_v3 = vld [vmem:[#allocation242_spill] sm:$0xff] }
 0x42d   : >> { %5637 = vmatpush1.bf16.msra.mxu1 %v5636_v11  ;;  %5511 = vmatprep.subr.bf16.mxu0 %v5510_v7  ;;  %v12069_v11 = vld [vmem:[#allocation195_spill] sm:$0xff]  ;;  %v5518_v7 = vpack.c.bf16 %v12072_v6, %v12071_v42  ;;  %v12080_v57 = vld [vmem:[#allocation254_spill] sm:$0xff]  ;;  %v12083_v42 = vld [vmem:[#allocation241_spill] sm:$0xff] }
 0x42e   : >> { %5639 = vmatprep.subr.bf16.mxu1 %v5638_v5  ;;  %v5644_v8 = vpack.c.bf16 %v12070_v20, %v12069_v11  ;;  %v12073_v5 = vld [vmem:[#allocation220_spill] sm:$0xff]  ;;  %v12084_v6 = vld [vmem:[#allocation253_spill] sm:$0xff] }
 0x42f   : >> { %v5646_v12 = vpack.c.bf16 %v12074_v9, %v12073_v5  ;;  %v12082_v11 = vld [vmem:[#allocation256_spill] sm:$0xff]  ;;  %v12086_v5 = vld [vmem:[#allocation255_spill] sm:$0xff] }
 0x430   : >> { %5513 = vmatpush1.bf16.msra.mxu0 %v5512_v4  ;;  %v5520_v4 = vpack.c.bf16 %v12076_v18, %v12075_v16  ;;  %v12087_v16 = vld [vmem:[#allocation266_spill] sm:$0xff] }
 0x431   : >> { %5641 = vmatpush1.bf16.msra.mxu1 %v5640_v19  ;;  %5515 = vmatprep.subr.bf16.mxu0 %v5514_v41  ;;  %v12077_v19 = vld [vmem:[#allocation219_spill] sm:$0xff]  ;;  %v5522_v41 = vpack.c.bf16 %v12080_v57, %v12079_v3  ;;  %v12088_v18 = vld [vmem:[#allocation278_spill] sm:$0xff]  ;;  %v12091_v3 = vld [vmem:[#allocation265_spill] sm:$0xff] }
 0x432   : >> { %5643 = vmatprep.subr.bf16.mxu1 %v5642_v17  ;;  %v5648_v0 = vpack.c.bf16 %v12078_v10, %v12077_v19  ;;  %v12081_v17 = vld [vmem:[#allocation244_spill] sm:$0xff]  ;;  %v12092_v57 = vld [vmem:[#allocation277_spill] sm:$0xff] }
 0x433   : >> { %v5650_v20 = vpack.c.bf16 %v12082_v11, %v12081_v17  ;;  %v12090_v19 = vld [vmem:[#allocation280_spill] sm:$0xff]  ;;  %v12094_v17 = vld [vmem:[#allocation279_spill] sm:$0xff] }
 0x434   : >> { %5517 = vmatpush1.bf16.msra.mxu0 %v5516_v56  ;;  %v5524_v56 = vpack.c.bf16 %v12084_v6, %v12083_v42  ;;  %v12095_v42 = vld [vmem:[#allocation290_spill] sm:$0xff] }
 0x435   : >> { %5645 = vmatpush1.bf16.msra.mxu1 %v5644_v8  ;;  %5519 = vmatprep.subr.bf16.mxu0 %v5518_v7  ;;  %v12085_v8 = vld [vmem:[#allocation243_spill] sm:$0xff]  ;;  %v5526_v7 = vpack.c.bf16 %v12088_v18, %v12087_v16  ;;  %v12096_v6 = vld [vmem:[#allocation302_spill] sm:$0xff]  ;;  %v12099_v16 = vld [vmem:[#allocation289_spill] sm:$0xff] }
 0x436   : >> { %5647 = vmatprep.subr.bf16.mxu1 %v5646_v12  ;;  %v5652_v9 = vpack.c.bf16 %v12086_v5, %v12085_v8  ;;  %v12089_v12 = vld [vmem:[#allocation268_spill] sm:$0xff]  ;;  %v12100_v18 = vld [vmem:[#allocation301_spill] sm:$0xff] }
 0x437   : >> { %v5654_v10 = vpack.c.bf16 %v12090_v19, %v12089_v12  ;;  %v12098_v8 = vld [vmem:[#allocation304_spill] sm:$0xff]  ;;  %v12102_v12 = vld [vmem:[#allocation303_spill] sm:$0xff] }
 0x438   : >> { %5521 = vmatpush1.bf16.msra.mxu0 %v5520_v4  ;;  %v5528_v4 = vpack.c.bf16 %v12092_v57, %v12091_v3  ;;  %v12103_v3 = vld [vmem:[#allocation314_spill] sm:$0xff] }
 0x439   : >> { %5649 = vmatpush1.bf16.msra.mxu1 %v5648_v0  ;;  %5523 = vmatprep.subr.bf16.mxu0 %v5522_v41  ;;  %v12093_v0 = vld [vmem:[#allocation267_spill] sm:$0xff]  ;;  %v5530_v41 = vpack.c.bf16 %v12096_v6, %v12095_v42  ;;  %v12104_v57 = vld [vmem:[#allocation326_spill] sm:$0xff]  ;;  %v12107_v42 = vld [vmem:[#allocation313_spill] sm:$0xff] }
 0x43a   : >> { %5651 = vmatprep.subr.bf16.mxu1 %v5650_v20  ;;  %v5656_v11 = vpack.c.bf16 %v12094_v17, %v12093_v0  ;;  %v12097_v20 = vld [vmem:[#allocation292_spill] sm:$0xff]  ;;  %v12108_v6 = vld [vmem:[#allocation325_spill] sm:$0xff] }
 0x43b   : >> { %v5658_v5 = vpack.c.bf16 %v12098_v8, %v12097_v20  ;;  %v12106_v0 = vld [vmem:[#allocation328_spill] sm:$0xff]  ;;  %v12110_v20 = vld [vmem:[#allocation327_spill] sm:$0xff] }
 0x43c   : >> { %5525 = vmatpush1.bf16.msra.mxu0 %v5524_v56  ;;  %v5532_v56 = vpack.c.bf16 %v12100_v18, %v12099_v16  ;;  %v12111_v16 = vld [vmem:[#allocation338_spill] sm:$0xff] }
 0x43d   : >> { %5653 = vmatpush1.bf16.msra.mxu1 %v5652_v9  ;;  %5527 = vmatprep.subr.bf16.mxu0 %v5526_v7  ;;  %v12101_v9 = vld [vmem:[#allocation291_spill] sm:$0xff]  ;;  %v5534_v7 = vpack.c.bf16 %v12104_v57, %v12103_v3  ;;  %v12112_v18 = vld [vmem:[#allocation350_spill] sm:$0xff]  ;;  %v12115_v3 = vld [vmem:[#allocation337_spill] sm:$0xff] }
 0x43e   : >> { %5655 = vmatprep.subr.bf16.mxu1 %v5654_v10  ;;  %v5660_v19 = vpack.c.bf16 %v12102_v12, %v12101_v9  ;;  %v12105_v10 = vld [vmem:[#allocation316_spill] sm:$0xff]  ;;  %v12116_v57 = vld [vmem:[#allocation349_spill] sm:$0xff] }
 0x43f   : >> { %v5662_v17 = vpack.c.bf16 %v12106_v0, %v12105_v10  ;;  %v12114_v9 = vld [vmem:[#allocation352_spill] sm:$0xff]  ;;  %v12118_v10 = vld [vmem:[#allocation351_spill] sm:$0xff] }
 0x440   : >> { %5529 = vmatpush1.bf16.msra.mxu0 %v5528_v4  ;;  %v5536_v4 = vpack.c.bf16 %v12108_v6, %v12107_v42  ;;  %v12119_v42 = vld [vmem:[#allocation362_spill] sm:$0xff]  ;;  %v12120_v6 = vld [vmem:[#allocation372_spill] sm:$0xff] }
 0x441   : >> { %5657 = vmatpush1.bf16.msra.mxu1 %v5656_v11  ;;  %5531 = vmatprep.subr.bf16.mxu0 %v5530_v41  ;;  %v12109_v11 = vld [vmem:[#allocation315_spill] sm:$0xff]  ;;  %v5538_v41 = vpack.c.bf16 %v12112_v18, %v12111_v16  ;;  %v12123_v16 = vld [vmem:[#allocation361_spill] sm:$0xff] }
 0x442   : >> { %5659 = vmatprep.subr.bf16.mxu1 %v5658_v5  ;;  %v5664_v8 = vpack.c.bf16 %v12110_v20, %v12109_v11  ;;  %v12113_v5 = vld [vmem:[#allocation340_spill] sm:$0xff]  ;;  %v12122_v11 = vld [vmem:[#allocation374_spill] sm:$0xff]  ;;  %v12124_v18 = vld [vmem:[#allocation371_spill] sm:$0xff] }
 0x443   : >> { %v5666_v12 = vpack.c.bf16 %v12114_v9, %v12113_v5  ;;  %v12126_v5 = vld [vmem:[#allocation373_spill] sm:$0xff] }
 0x444   : >> { %5533 = vmatpush1.bf16.msra.mxu0 %v5532_v56  ;;  %v5540_v56 = vpack.c.bf16 %v12116_v57, %v12115_v3  ;;  %v12127_v3 = vld [vmem:[#allocation384_spill] sm:$0xff] }
 0x445   : >> { %5661 = vmatpush1.bf16.msra.mxu1 %v5660_v19  ;;  %5535 = vmatprep.subr.bf16.mxu0 %v5534_v7  ;;  %v12117_v19 = vld [vmem:[#allocation339_spill] sm:$0xff]  ;;  %v5542_v7 = vpack.c.bf16 %v12120_v6, %v12119_v42  ;;  %v12128_v57 = vld [vmem:[#allocation396_spill] sm:$0xff] }
 0x446   : >> { %5663 = vmatprep.subr.bf16.mxu1 %v5662_v17  ;;  %v5668_v0 = vpack.c.bf16 %v12118_v10, %v12117_v19  ;;  %v12121_v17 = vld [vmem:[#allocation364_spill] sm:$0xff]  ;;  %v12130_v19 = vld [vmem:[#allocation398_spill] sm:$0xff]  ;;  %v12131_v42 = vld [vmem:[#allocation383_spill] sm:$0xff] }
 0x447   : >> { %v5670_v20 = vpack.c.bf16 %v12122_v11, %v12121_v17  ;;  %v12132_v6 = vld [vmem:[#allocation395_spill] sm:$0xff]  ;;  %v12134_v17 = vld [vmem:[#allocation397_spill] sm:$0xff] }
 0x448   : >> { %5537 = vmatpush1.bf16.msra.mxu0 %v5536_v4  ;;  %v5544_v4 = vpack.c.bf16 %v12124_v18, %v12123_v16  ;;  %v12135_v16 = vld [vmem:[#allocation408_spill] sm:$0xff] }
 0x449   : >> { %5665 = vmatpush1.bf16.msra.mxu1 %v5664_v8  ;;  %5539 = vmatprep.subr.bf16.mxu0 %v5538_v41  ;;  %v12125_v8 = vld [vmem:[#allocation363_spill] sm:$0xff]  ;;  %v5546_v41 = vpack.c.bf16 %v12128_v57, %v12127_v3  ;;  %v12136_v18 = vld [vmem:[#allocation420_spill] sm:$0xff]  ;;  %v12141_v57 = vld [vmem:[#allocation409_spill] sm:$0xff] }
 0x44a   : >> { %5667 = vmatprep.subr.bf16.mxu1 %v5666_v12  ;;  %v5672_v9 = vpack.c.bf16 %v12126_v5, %v12125_v8  ;;  %v12129_v12 = vld [vmem:[#allocation386_spill] sm:$0xff] }
 0x44b   : >> { %v5674_v10 = vpack.c.bf16 %v12130_v19, %v12129_v12  ;;  %v12138_v8 = vld [vmem:[#allocation422_spill] sm:$0xff]  ;;  %v12142_v12 = vld [vmem:[#allocation421_spill] sm:$0xff] }
 0x44c   : >> { %5541 = vmatpush1.bf16.msra.mxu0 %v5540_v56  ;;  %v5548_v56 = vpack.c.bf16 %v12132_v6, %v12131_v42  ;;  %v5680_v19 = vpack.c.bf16 %v12142_v12, %v12141_v57  ;;  %v12145_v6 = vld [vmem:[#allocation434_spill] sm:$0xff] }
 0x44d   : >> { %5669 = vmatpush1.bf16.msra.mxu1 %v5668_v0  ;;  %5543 = vmatprep.subr.bf16.mxu0 %v5542_v7  ;;  %v12133_v0 = vld [vmem:[#allocation385_spill] sm:$0xff]  ;;  %v5550_v7 = vpack.c.bf16 %v12136_v18, %v12135_v16  ;;  %v12154_v57 = vld [vmem:[#allocation470_spill] sm:$0xff] }
 0x44e   : >> { %5671 = vmatprep.subr.bf16.mxu1 %v5670_v20  ;;  %v5676_v11 = vpack.c.bf16 %v12134_v17, %v12133_v0  ;;  %v12137_v20 = vld [vmem:[#allocation410_spill] sm:$0xff]  ;;  %v12149_v18 = vld [vmem:[#allocation433_spill] sm:$0xff] }
 0x44f   : >> { %v5678_v5 = vpack.c.bf16 %v12138_v8, %v12137_v20  ;;  %v12146_v0 = vld [vmem:[#allocation446_spill] sm:$0xff]  ;;  %v12150_v20 = vld [vmem:[#allocation445_spill] sm:$0xff] }
 0x450   : >> { %5545 = vmatpush1.bf16.msra.mxu0 %v5544_v4  ;;  %v12139_v4 = vld [vmem:[#allocation407_spill] sm:$0xff]  ;;  %v5682_v17 = vpack.c.bf16 %v12146_v0, %v12145_v6  ;;  %v5684_v8 = vpack.c.bf16 %v12150_v20, %v12149_v18  ;;  %v12158_v6 = vld [vmem:[#allocation469_spill] sm:$0xff]  ;;  %v12162_v18 = vld [vmem:[#allocation494_spill] sm:$0xff] }
 0x451   : >> { %5673 = vmatpush1.bf16.msra.mxu1 %v5672_v9  ;;  %5547 = vmatprep.subr.bf16.mxu0 %v5546_v41  ;;  %v12140_v9 = vld [vmem:[#allocation419_spill] sm:$0xff]  ;;  %v12143_v41 = vld [vmem:[#allocation432_spill] sm:$0xff] }
 0x452   : >> { %5675 = vmatprep.subr.bf16.mxu1 %v5674_v10  ;;  %v5552_v3 = vpack.c.bf16 %v12140_v9, %v12139_v4  ;;  %v12144_v10 = vld [vmem:[#allocation444_spill] sm:$0xff]  ;;  %v12153_v9 = vld [vmem:[#allocation458_spill] sm:$0xff] }
 0x453   : >> { %3897 = vmatmul.mubr.f32.vlgmr.msra.gmra.mrb[4].mxu0 %v6241_v1  ;;  %v5554_v42 = vpack.c.bf16 %v12144_v10, %v12143_v41  ;;  %v5686_v12 = vpack.c.bf16 %v12154_v57, %v12153_v9  ;;  %v12155_v41 = vld [vmem:[#allocation455_spill] sm:$0xff]  ;;  %v12166_v9 = vld [vmem:[#allocation493_spill] sm:$0xff] }
 0x454   : >> { %4039 = vmatmul.mubr.f32.vlgmr.msra.gmra.mrb[4].mxu1 %v6241_v1  ;;  %5549 = vmatpush1.bf16.msra.mxu0 %v5548_v56  ;;  %v12147_v56 = vld [vmem:[#allocation431_spill] sm:$0xff] }
 0x455   : >> { %5677 = vmatpush1.bf16.msra.mxu1 %v5676_v11  ;;  %5551 = vmatprep.subr.bf16.mxu0 %v5550_v7  ;;  %v12148_v11 = vld [vmem:[#allocation443_spill] sm:$0xff]  ;;  %v12151_v7 = vld [vmem:[#allocation456_spill] sm:$0xff] }
 0x456   : >> { %5679 = vmatprep.subr.bf16.mxu1 %v5678_v5  ;;  %3967 = vmatprep.mubr.f32.mxu0 %v6229_v48  ;;  %v5556_v16 = vpack.c.bf16 %v12148_v11, %v12147_v56  ;;  %v12152_v5 = vld [vmem:[#allocation468_spill] sm:$0xff]  ;;  %v12156_v10 = vld [vmem:[#allocation467_spill] sm:$0xff] }
 0x457   : >> { %4109 = vmatprep.mubr.f32.mxu1 %v6229_v48  ;;  %v5558_v4 = vpack.c.bf16 %v12152_v5, %v12151_v7  ;;  %v12159_v56 = vld [vmem:[#allocation480_spill] sm:$0xff]  ;;  %v12163_v7 = vld [vmem:[#allocation479_spill] sm:$0xff] }
 0x458   : >> { %5553 = vmatpush1.bf16.msra.mxu0 %v5552_v3  ;;  %v5560_v3 = vpack.c.bf16 %v12156_v10, %v12155_v41  ;;  %v12160_v11 = vld [vmem:[#allocation492_spill] sm:$0xff]  ;;  %v12164_v5 = vld [vmem:[#allocation491_spill] sm:$0xff] }
 0x459   : >> { %5681 = vmatpush1.bf16.msra.mxu1 %v5680_v19  ;;  %5555 = vmatprep.subr.bf16.mxu0 %v5554_v42  ;;  %v12157_v19 = vld [vmem:[#allocation457_spill] sm:$0xff]  ;;  %v5562_v42 = vpack.c.bf16 %v12160_v11, %v12159_v56  ;;  %v12167_v41 = vld [vmem:[#allocation504_spill] sm:$0xff]  ;;  %v12171_v56 = vld [vmem:[#allocation503_spill] sm:$0xff] }
 0x45a   : >> { %5683 = vmatprep.subr.bf16.mxu1 %v5682_v17  ;;  %v5688_v0 = vpack.c.bf16 %v12158_v6, %v12157_v19  ;;  %v12161_v17 = vld [vmem:[#allocation482_spill] sm:$0xff]  ;;  %v12168_v10 = vld [vmem:[#allocation516_spill] sm:$0xff]  ;;  %v12172_v11 = vld [vmem:[#allocation515_spill] sm:$0xff] }
 0x45b   : >> { %v5690_v20 = vpack.c.bf16 %v12162_v18, %v12161_v17  ;;  %v12170_v19 = vld [vmem:[#allocation518_spill] sm:$0xff]  ;;  %v12174_v17 = vld [vmem:[#allocation517_spill] sm:$0xff] }
 0x45c   : >> { %5557 = vmatpush1.bf16.msra.mxu0 %v5556_v16  ;;  %v5564_v16 = vpack.c.bf16 %v12164_v5, %v12163_v7  ;;  %v12175_v7 = vld [vmem:[#allocation528_spill] sm:$0xff] }
 0x45d   : >> { %5685 = vmatpush1.bf16.msra.mxu1 %v5684_v8  ;;  %5559 = vmatprep.subr.bf16.mxu0 %v5558_v4  ;;  %v12165_v8 = vld [vmem:[#allocation481_spill] sm:$0xff]  ;;  %v5566_v4 = vpack.c.bf16 %v12168_v10, %v12167_v41  ;;  %v12176_v5 = vld [vmem:[#allocation540_spill] sm:$0xff] }
 0x45e   : >> { %5687 = vmatprep.subr.bf16.mxu1 %v5686_v12  ;;  %v5692_v57 = vpack.c.bf16 %v12166_v9, %v12165_v8  ;;  %v12169_v12 = vld [vmem:[#allocation506_spill] sm:$0xff] }
 0x45f   : >> { %v5694_v6 = vpack.c.bf16 %v12170_v19, %v12169_v12  ;;  %v12178_v8 = vld [vmem:[#allocation542_spill] sm:$0xff]  ;;  %v12179_v12 = vld [vmem:[#allocation527_spill] sm:$0xff] }
 0x460   : >> { %5561 = vmatpush1.bf16.msra.mxu0 %v5560_v3  ;;  %v5568_v3 = vpack.c.bf16 %v12172_v11, %v12171_v56  ;;  %v12180_v19 = vld [vmem:[#allocation539_spill] sm:$0xff]  ;;  %v12182_v56 = vld [vmem:[#allocation541_spill] sm:$0xff] }
 0x461   : >> { %5689 = vmatpush1.bf16.msra.mxu1 %v5688_v0  ;;  %5563 = vmatprep.subr.bf16.mxu0 %v5562_v42  ;;  %v12173_v0 = vld [vmem:[#allocation505_spill] sm:$0xff]  ;;  %v5570_v42 = vpack.c.bf16 %v12176_v5, %v12175_v7  ;;  %v12185_v5 = vld [vmem:[#allocation554_spill] sm:$0xff] }
 0x462   : >> { %5691 = vmatprep.subr.bf16.mxu1 %v5690_v20  ;;  %v5696_v18 = vpack.c.bf16 %v12174_v17, %v12173_v0  ;;  %v12177_v20 = vld [vmem:[#allocation530_spill] sm:$0xff]  ;;  %v12183_v0 = vld [vmem:[#allocation552_spill] sm:$0xff] }
 0x463   : >> { %v5698_v9 = vpack.c.bf16 %v12178_v8, %v12177_v20  ;;  %v12184_v17 = vld [vmem:[#allocation564_spill] sm:$0xff]  ;;  %v12186_v20 = vld [vmem:[#allocation566_spill] sm:$0xff] }
 0x464   : >> { %5565 = vmatpush1.bf16.msra.mxu0 %v5564_v16  ;;  %v5574_v7 = vpack.c.bf16 %v12184_v17, %v12183_v0  ;;  %v5702_v8 = vpack.c.bf16 %v12186_v20, %v12185_v5  ;;  %v12195_v0 = vld [vmem:[#allocation575_spill] sm:$0xff]  ;;  %v12201_v20 = vld [vmem:[#allocation602_spill] sm:$0xff] }
 0x465   : >> { %5693 = vmatpush1.bf16.msra.mxu1 %v5692_v57  ;;  %5567 = vmatprep.subr.bf16.mxu0 %v5566_v4  ;;  %v5572_v4 = vpack.c.bf16 %v12180_v19, %v12179_v12  ;;  %v12191_v12 = vld [vmem:[#allocation576_spill] sm:$0xff]  ;;  %v12193_v19 = vld [vmem:[#allocation578_spill] sm:$0xff] }
 0x466   : >> { %5695 = vmatprep.subr.bf16.mxu1 %v5694_v6  ;;  %v10473_v41 = vpop.f32.mrb[0].mxu0  ;;  %v12181_v6 = vld [vmem:[#allocation529_spill] sm:$0xff] }
 0x467   : >> { %v10475_v10 = vpop.f32.mrb[0].mxu1  ;;  %v10477_v16 = vpop.f32.mrb[1].mxu0  ;;  %v5700_v11 = vpack.c.bf16 %v12182_v56, %v12181_v6  ;;  %v12194_v6 = vld [vmem:[#allocation590_spill] sm:$0xff] }
 0x468   : >> { %v10479_v57 = vpop.f32.mrb[1].mxu1  ;;  %5569 = vmatpush1.bf16.msra.mxu0 %v5568_v3  ;;  %v5576_v3 = vpack.c.bf16 %v12188_v15, %v12187_v14  ;;  %v5706_v56 = vpack.c.bf16 %v12194_v6, %v12193_v19  ;;  %v12197_v15 = vld [vmem:[#allocation577_spill] sm:$0xff] }
 0x469   : >> { %5697 = vmatpush1.bf16.msra.mxu1 %v5696_v18  ;;  %5571 = vmatprep.subr.bf16.mxu0 %v5570_v42  ;;  %v12189_v18 = vld [vmem:[#allocation553_spill] sm:$0xff]  ;;  %v12192_v42 = vld [vmem:[#allocation588_spill] sm:$0xff] }
 0x46a   : >> { %5699 = vmatprep.subr.bf16.mxu1 %v5698_v9  ;;  %v5704_v22 = vpack.c.bf16 %v12190_v21, %v12189_v18  ;;  %v5578_v9 = vpack.c.bf16 %v12192_v42, %v12191_v12  ;;  %v12198_v14 = vld [vmem:[#allocation589_spill] sm:$0xff]  ;;  %v12199_v21 = vld [vmem:[#allocation600_spill] sm:$0xff] }
 0x46b   : >> { %v5708_v17 = vpack.c.bf16 %v12198_v14, %v12197_v15  ;;  %v12205_v42 = vld [vmem:[#allocation601_spill] sm:$0xff]  ;;  %v12210_v15 = vld [vmem:[#allocation638_spill] sm:$0xff] }
 0x46c   : >> { %5573 = vmatpush1.bf16.msra.mxu0 %v5572_v4  ;;  %v12196_v4 = vld [vmem:[#allocation587_spill] sm:$0xff]  ;;  %v12206_v19 = vld [vmem:[#allocation613_spill] sm:$0xff] }
 0x46d   : >> { %5701 = vmatpush1.bf16.msra.mxu1 %v5700_v11  ;;  %5575 = vmatprep.subr.bf16.mxu0 %v5574_v7  ;;  %v5580_v11 = vpack.c.bf16 %v12196_v4, %v12195_v0  ;;  %v12200_v7 = vld [vmem:[#allocation612_spill] sm:$0xff]  ;;  %v5712_v6 = vpack.c.bf16 %v12206_v19, %v12205_v42  ;;  %v12209_v4 = vld [vmem:[#allocation626_spill] sm:$0xff] }
 0x46e   : >> { %5703 = vmatprep.subr.bf16.mxu1 %v5702_v8  ;;  %v5582_v5 = vpack.c.bf16 %v12200_v7, %v12199_v21  ;;  %v12202_v8 = vld [vmem:[#allocation614_spill] sm:$0xff]  ;;  %v12207_v0 = vld [vmem:[#allocation624_spill] sm:$0xff]  ;;  %v5714_v14 = vpack.c.bf16 %v12210_v15, %v12209_v4  ;;  %v12213_v7 = vld [vmem:[#allocation625_spill] sm:$0xff] }
 0x46f   : >> { %v5710_v18 = vpack.c.bf16 %v12202_v8, %v12201_v20  ;;  %v12214_v20 = vld [vmem:[#allocation637_spill] sm:$0xff]  ;;  %v12218_v42 = vld [vmem:[#allocation662_spill] sm:$0xff] }
 0x470   : >> { %5577 = vmatpush1.bf16.msra.mxu0 %v5576_v3  ;;  %v12203_v3 = vld [vmem:[#allocation599_spill] sm:$0xff]  ;;  %v5716_v8 = vpack.c.bf16 %v12214_v20, %v12213_v7  ;;  %v12222_v15 = vld [vmem:[#allocation649_spill] sm:$0xff]  ;;  %v6249_v7 = vmov 0   ;;  %v12225_v20 = vld [vmem:[#allocation684_spill] sm:$0xff] }
 0x471   : >> { %5705 = vmatpush1.bf16.msra.mxu1 %v5704_v22  ;;  %5579 = vmatprep.subr.bf16.mxu0 %v5578_v9  ;;  %v12204_v22 = vld [vmem:[#allocation611_spill] sm:$0xff]  ;;  %v12208_v9 = vld [vmem:[#allocation636_spill] sm:$0xff] }
 0x472   : >> { %5707 = vmatprep.subr.bf16.mxu1 %v5706_v56  ;;  %v5584_v12 = vpack.c.bf16 %v12204_v22, %v12203_v3  ;;  %v5586_v56 = vpack.c.bf16 %v12208_v9, %v12207_v0  ;;  %v12217_v22 = vld [vmem:[#allocation650_spill] sm:$0xff]  ;;  %v4200_v0 = vstv %s12277_s16  ;;  %v12219_v9 = vld [vmem:[#allocation16_spill] sm:$0xff]  ;;  %6070 = vset.pattern.permute.xlu0 %v6249_v7  ;;  %s10654_s16 = scalar_lea.hbm (%p3174_p11), %s10731_s6, %s4500_s22 }
 0x473   : >> { %v5718_v19 = vpack.c.bf16 %v12218_v42, %v12217_v22  ;;  %vm4201_vm4 = vcmp.lt.s32.totalorder %v4200_v0, %v12219_v9  ;;  %v12227_v22 = vld [vmem:[#allocation686_spill] sm:$0xff]  ;;  %v12230_v9 = vld [vmem:[#allocation673_spill] sm:$0xff] }
 0x474   : >> { %5581 = vmatpush1.bf16.msra.mxu0 %v5580_v11  ;;  %v12211_v11 = vld [vmem:[#allocation623_spill] sm:$0xff] }
 0x475   : >> { %5709 = vmatpush1.bf16.msra.mxu1 %v5708_v17  ;;  %5583 = vmatprep.subr.bf16.mxu0 %v5582_v5  ;;  %v12212_v17 = vld [vmem:[#allocation635_spill] sm:$0xff]  ;;  %v12215_v5 = vld [vmem:[#allocation648_spill] sm:$0xff] }
 0x476   : >> { %5711 = vmatprep.subr.bf16.mxu1 %v5710_v18  ;;  %v5588_v21 = vpack.c.bf16 %v12212_v17, %v12211_v11  ;;  %v12216_v18 = vld [vmem:[#allocation660_spill] sm:$0xff]  ;;  %v12223_v11 = vld [vmem:[#allocation661_spill] sm:$0xff] }
 0x477   : >> { %v5590_v3 = vpack.c.bf16 %v12216_v18, %v12215_v5  ;;  %v5720_v17 = vpack.c.bf16 %v12223_v11, %v12222_v15  ;;  %v12226_v18 = vld [vmem:[#allocation674_spill] sm:$0xff] }
 0x478   : >> { %5585 = vmatpush1.bf16.msra.mxu0 %v5584_v12  ;;  %v12220_v12 = vld [vmem:[#allocation647_spill] sm:$0xff]  ;;  %v5722_v42 = vpack.c.bf16 %v12227_v22, %v12226_v18  ;;  %v12234_v11 = vld [vmem:[#allocation698_spill] sm:$0xff]  ;;  %v12239_v18 = vld [vmem:[#allocation709_spill] sm:$0xff] }
 0x479   : >> { %5713 = vmatpush1.bf16.msra.mxu1 %v5712_v6  ;;  %5587 = vmatprep.subr.bf16.mxu0 %v5586_v56  ;;  %v12221_v6 = vld [vmem:[#allocation659_spill] sm:$0xff]  ;;  %v4202_v56 = vsel %vm4201_vm4, 1, %v6249_v7 }
 0x47a   : >> { %5715 = vmatprep.subr.bf16.mxu1 %v5714_v14  ;;  %v5592_v4 = vpack.c.bf16 %v12221_v6, %v12220_v12  ;;  %v12224_v14 = vld [vmem:[#allocation672_spill] sm:$0xff]  ;;  %4204 = vperm.xlu0 %6070, %v4202_v56   ;;  %v12231_v12 = vld [vmem:[#allocation685_spill] sm:$0xff]  ;;  %v12236_v7 = vld [vmem:[#allocation695_spill] sm:$0xff] }
 0x47b   : >> { %v5594_v5 = vpack.c.bf16 %v12225_v20, %v12224_v14  ;;  %v5724_v6 = vpack.c.bf16 %v12231_v12, %v12230_v9  ;;  %v12235_v14 = vld [vmem:[#allocation710_spill] sm:$0xff]  ;;  %v12237_v56 = vld [vmem:[#allocation707_spill] sm:$0xff] }
 0x47c   : >> { %5589 = vmatpush1.bf16.msra.mxu0 %v5588_v21  ;;  %v12228_v21 = vld [vmem:[#allocation671_spill] sm:$0xff]  ;;  %v5726_v20 = vpack.c.bf16 %v12235_v14, %v12234_v11  ;;  %v12243_v9 = vld [vmem:[#allocation734_spill] sm:$0xff]  ;;  %v12247_v11 = vld [vmem:[#allocation733_spill] sm:$0xff] }
 0x47d   : >> { %5717 = vmatpush1.bf16.msra.mxu1 %v5716_v8  ;;  %5591 = vmatprep.subr.bf16.mxu0 %v5590_v3  ;;  %v12229_v8 = vld [vmem:[#allocation683_spill] sm:$0xff]  ;;  %v12232_v3 = vld [vmem:[#allocation696_spill] sm:$0xff] }
 0x47e   : >> { %5719 = vmatprep.subr.bf16.mxu1 %v5718_v19  ;;  %v5596_v0 = vpack.c.bf16 %v12229_v8, %v12228_v21  ;;  %v12233_v19 = vld [vmem:[#allocation708_spill] sm:$0xff] }
 0x47f   : >> { %v5598_v15 = vpack.c.bf16 %v12233_v19, %v12232_v3  ;;  %v12240_v21 = vld [vmem:[#allocation720_spill] sm:$0xff]  ;;  %v12244_v3 = vld [vmem:[#allocation719_spill] sm:$0xff] }
 0x480   : >> { %5593 = vmatpush1.bf16.msra.mxu0 %v5592_v4  ;;  %v5600_v4 = vpack.c.bf16 %v12237_v56, %v12236_v7  ;;  %v12241_v8 = vld [vmem:[#allocation732_spill] sm:$0xff]  ;;  %v12245_v19 = vld [vmem:[#allocation731_spill] sm:$0xff] }
 0x481   : >> { %5721 = vmatpush1.bf16.msra.mxu1 %v5720_v17  ;;  %5595 = vmatprep.subr.bf16.mxu0 %v5594_v5  ;;  %v12238_v17 = vld [vmem:[#allocation697_spill] sm:$0xff]  ;;  %v5602_v5 = vpack.c.bf16 %v12241_v8, %v12240_v21  ;;  %v12248_v7 = vld [vmem:[#allocation744_spill] sm:$0xff]  ;;  %v12249_v56 = vld [vmem:[#allocation755_spill] sm:$0xff] }
 0x482   : >> { %5723 = vmatprep.subr.bf16.mxu1 %v5722_v42  ;;  %v5728_v22 = vpack.c.bf16 %v12239_v18, %v12238_v17  ;;  %v12242_v42 = vld [vmem:[#allocation722_spill] sm:$0xff]  ;;  %v12251_v17 = vld [vmem:[#allocation757_spill] sm:$0xff]  ;;  %v12252_v21 = vld [vmem:[#allocation743_spill] sm:$0xff] }
 0x483   : >> { %v5730_v12 = vpack.c.bf16 %v12243_v9, %v12242_v42  ;;  %v12254_v8 = vld [vmem:[#allocation745_spill] sm:$0xff]  ;;  %v12255_v42 = vld [vmem:[#allocation756_spill] sm:$0xff] }
 0x484   : >> { %5597 = vmatpush1.bf16.msra.mxu0 %v5596_v0  ;;  %v5604_v0 = vpack.c.bf16 %v12245_v19, %v12244_v3  ;;  %v5736_v9 = vpack.c.bf16 %v12255_v42, %v12254_v8  ;;  %v3192_v8 = vld [vmem:[%s10580_s23 + $0x10] sm:$0xff] }
 0x485   : >> { %5725 = vmatpush1.bf16.msra.mxu1 %v5724_v6  ;;  %5599 = vmatprep.subr.bf16.mxu0 %v5598_v15  ;;  %v12246_v6 = vld [vmem:[#allocation721_spill] sm:$0xff]  ;;  %v5606_v15 = vpack.c.bf16 %v12249_v56, %v12248_v7  ;;  %v12259_v56 = vld [vmem:[#allocation12_spill] sm:$0xff] }
 0x486   : >> { %5727 = vmatprep.subr.bf16.mxu1 %v5726_v20  ;;  %v5732_v14 = vpack.c.bf16 %v12247_v11, %v12246_v6  ;;  %v12250_v20 = vld [vmem:[#allocation746_spill] sm:$0xff] }
 0x487   : >> { %v5734_v18 = vpack.c.bf16 %v12251_v17, %v12250_v20  ;;  %v12257_v6 = vld [vmem:[#allocation14_spill] sm:$0xff]  ;;  %v12261_v17 = vld [vmem:[#allocation13_spill] sm:$0xff] }
 0x488   : >> { %5601 = vmatpush1.bf16.msra.mxu0 %v5600_v4  ;;  %v12253_v4 = vld [vmem:[#allocation754_spill] sm:$0xff]  ;;  %v3211_v20 = vrot.slane %v12257_v6, %v12259_v56 }
 0x489   : >> { %5729 = vmatpush1.bf16.msra.mxu1 %v5728_v22  ;;  %5603 = vmatprep.subr.bf16.mxu0 %v5602_v5  ;;  %v5608_v22 = vpack.c.bf16 %v12253_v4, %v12252_v21  ;;  %v3190_v4 = vld [vmem:[%s10580_s23] sm:$0xff] }
 0x48a   : >> { %5731 = vmatprep.subr.bf16.mxu1 %v5730_v12  ;;  %v5931_v42 = vadd.f32 %v10477_v16, %v3211_v20  ;;  %v12264_v16 = vsub.s32 6, %v12262_v28 }
 0x48c   : >> { %5605 = vmatpush1.bf16.msra.mxu0 %v5604_v0  ;;  %v12256_v0 = vld [vmem:[#allocation10_spill] sm:$0xff]  ;;  %v3231_v20 = vrot.slane %v12257_v6, %v12264_v16 }
 0x48d   : >> { %5733 = vmatpush1.bf16.msra.mxu1 %v5732_v14  ;;  %5607 = vmatprep.subr.bf16.mxu0 %v5606_v15  ;;  %v3207_v11 = vrot.slane %v12257_v6, %v12256_v0  ;;  %v12258_v14 = vld [vmem:[#allocation11_spill] sm:$0xff]  ;;  %v12260_v15 = vmov %v12259_v56 }
 0x48e   : >> { %5735 = vmatprep.subr.bf16.mxu1 %v5734_v18  ;;  %v3215_v7 = vrot.slane %v12257_v6, %v12258_v14  ;;  %v3219_v18 = vrot.slane %v12257_v6, %v12261_v17 }
 0x48f   : >> { %v5930_v21 = vadd.f32 %v10473_v41, %v3207_v11 }
 0x490   : >> { %5609 = vmatpush1.bf16.msra.mxu0 %v5608_v22  ;;  %v5932_v22 = vadd.f32 %v10475_v10, %v3215_v7  ;;  %v5933_v56 = vadd.f32 %v10479_v57, %v3219_v18  ;;  %v3223_v10 = vrot.slane %v12257_v6, %v12263_v29  ;;  %v12265_v18 = vsub.s32 5, %v12262_v28  ;;  %v3194_v29 = vld [vmem:[%s10580_s23 + $0x20] sm:$0xff] }
 0x491   : >> { %5737 = vmatpush1.bf16.msra.mxu1 %v5736_v9  ;;  %v3191_v9 = vld [vmem:[%s10580_s23 + $0x8] sm:$0xff]  ;;  %v4116_v23 = vadd.f32 %v5930_v21, %v3190_v4 }
 0x492   : >> { %v4118_v25 = vadd.f32 %v5932_v22, %v3192_v8  ;;  %v4117_v41 = vadd.f32 %v5931_v42, %v3191_v9  ;;  %v4119_v11 = vadd.f32 %v5933_v56, %v3193_v24  ;;  %v3227_v21 = vrot.slane %v12257_v6, %v12265_v18  ;;  %v3196_v22 = vld [vmem:[%s10580_s23 + $0x30] sm:$0xff]  ;;  %v3195_v42 = vld [vmem:[%s10580_s23 + $0x28] sm:$0xff] }
 0x493   : >> { %3968 = vmatmul.mubr.f32.vlgmr.msra.gmra.mrb[4].mxu0 %v11754_v2  ;;  %v4480_v26 = vmul.f32 -1.442695, %v4116_v23  ;;  %v12266_v23 = vsub.s32 7, %v12262_v28 }
 0x494   : >> { %4110 = vmatmul.mubr.f32.vlgmr.msra.gmra.mrb[4].mxu1 %v11754_v2  ;;  %v4482_v27 = vmul.f32 -1.442695, %v4118_v25  ;;  %v4481_v7 = vmul.f32 -1.442695, %v4117_v41  ;;  %v4483_v57 = vmul.f32 -1.442695, %v4119_v11 }
 0x495   : >> { %6071 = vpow2.f32 %v4480_v26  ;;  %v3235_v25 = vrot.slane %v12257_v6, %v12266_v23  ;;  %v3197_v41 = vld [vmem:[%s10580_s23 + $0x38] sm:$0xff] }
 0x496   : >> { %6073 = vpow2.f32 %v4482_v27 }
 0x497   : >> { %6075 = vpow2.f32 %v4481_v7 }
 0x498   : >> { %6077 = vpow2.f32 %v4483_v57 }
 0x49f   : >> { %v6072_v30 = vpop.eup %6071 }
 0x4a0   : >> { %v6074_v31 = vpop.eup %6073  ;;  %v4132_v7 = vadd.f32 1.0, %v6072_v30 }
 0x4a1   : >> { %v6076_v27 = vpop.eup %6075 }
 0x4e6   : >> { %v3685_v5 = vpop.f32.mrb[2].mxu0 }
 0x4e7   : >> { %v3827_v12 = vpop.f32.mrb[2].mxu1  ;;  %v3687_v3 = vpop.f32.mrb[3].mxu0  ;;  %v5934_v24 = vadd.f32 %v3685_v5, %v3223_v10 }
 0x4e8   : >> { %v3829_v19 = vpop.f32.mrb[3].mxu1  ;;  %v5936_v4 = vadd.f32 %v3827_v12, %v3231_v20  ;;  %v5935_v8 = vadd.f32 %v3687_v3, %v3227_v21  ;;  %v6078_v10 = vpop.eup %6077  ;;  %v4134_v12 = vadd.f32 1.0, %v6074_v31  ;;  %v4133_v3 = vadd.f32 1.0, %v6076_v27  ;;  %v12267_v21 = vld [vmem:[#allocation15_spill] sm:$0xff] }
 0x4e9   : >> { %v5937_v9 = vadd.f32 %v3829_v19, %v3235_v25  ;;  %v4144_v56 = vadd.f32 %v5934_v24, %v3194_v29  ;;  %v4135_v19 = vadd.f32 1.0, %v6078_v10  ;;  %v3239_v25 = vrot.slane %v12267_v21, %v12256_v0  ;;  %v3200_v10 = vld [vmem:[%s10580_s23 + $0x50] sm:$0xff]  ;;  %v3201_v0 = vld [vmem:[%s10580_s23 + $0x58] sm:$0xff] }
 0x4ea   : >> { %v4146_v11 = vadd.f32 %v5936_v4, %v3196_v22  ;;  %v4145_v16 = vadd.f32 %v5935_v8, %v3195_v42  ;;  %v3247_v24 = vrot.slane %v12267_v21, %v12258_v14  ;;  %v3251_v31 = vrot.slane %v12267_v21, %v12261_v17 }
 0x4eb   : >> { %v4147_v18 = vadd.f32 %v5937_v9, %v3197_v41  ;;  %v4484_v26 = vmul.f32 -1.442695, %v4144_v56 }
 0x4ec   : >> { %v4486_v28 = vmul.f32 -1.442695, %v4146_v11  ;;  %v4485_v23 = vmul.f32 -1.442695, %v4145_v16 }
 0x4ed   : >> { %v4487_v5 = vmul.f32 -1.442695, %v4147_v18  ;;  %6079 = vpow2.f32 %v4484_v26 }
 0x4ee   : >> { %6081 = vpow2.f32 %v4486_v28  ;;  %v3243_v28 = vrot.slane %v12267_v21, %v12260_v15 }
 0x4ef   : >> { %6083 = vpow2.f32 %v4485_v23 }
 0x4f0   : >> { %6085 = vpow2.f32 %v4487_v5  ;;  %v3198_v5 = vld [vmem:[%s10580_s23 + $0x40] sm:$0xff] }
 0x4f1   : >> { %6087 = vrcp.f32 %v4132_v7 }
 0x4f2   : >> { %6089 = vrcp.f32 %v4134_v12 }
 0x4f3   : >> { %6091 = vrcp.f32 %v4133_v3 }
 0x4f4   : >> { %6093 = vrcp.f32 %v4135_v19 }
 0x4f7   : >> { %v6080_v20 = vpop.eup %6079 }
 0x4f8   : >> { %v6082_v57 = vpop.eup %6081  ;;  %v4160_v4 = vadd.f32 1.0, %v6080_v20 }
 0x4f9   : >> { %v6084_v30 = vpop.eup %6083  ;;  %v4162_v8 = vadd.f32 1.0, %v6082_v57  ;;  %v3199_v57 = vld [vmem:[%s10580_s23 + $0x48] sm:$0xff]  ;;  %s6115_s23 = sshll.u32 (%p3174_p11), %s6250_s21, 4  ;;  %s6116_s23 = int_to_ptr.vmem [resolvable:$false] %s6115_s23 }
 0x4fa   : >> { %v6086_v29 = vpop.eup %6085  ;;  %v4161_v41 = vadd.f32 1.0, %v6084_v30  ;;  %6095 = vrcp.f32 %v4160_v4  ;;  %s6117_s29 = scalar_lea.vmem (%p3174_p11), %s6116_s23, 8192  ;;  %p6118_p1 = scmp.lt.s32.totalorder (%p3174_p11), %s10657_s15, %s6116_s23 }
 0x4fb   : >> { %v6088_v22 = vpop.eup %6087  ;;  %v4163_v27 = vadd.f32 1.0, %v6086_v29  ;;  %6097 = vrcp.f32 %v4162_v8  ;;  %p6119_p2 = scmp.lt.s32.totalorder (%p3174_p11), %s6117_s29, %s6111_s19 }
 0x4fc   : >> { %v6090_v56 = vpop.eup %6089  ;;  %6099 = vrcp.f32 %v4161_v41 }
 0x4fd   : >> { %v6092_v23 = vpop.eup %6091  ;;  %6101 = vrcp.f32 %v4163_v27  ;;  %p6120_p3 = por (%p3174_p11), %p6119_p2, %p6118_p1 }
 0x4fe   : >> { %v6094_v3 = vpop.eup %6093 }
 0x4ff   : > { %p6121_p4 = pnand (%p3174_p11), %p6120_p3, %p6114_p0 }
 0x566   : >> { %v3969_v42 = vpop.f32.mrb[4].mxu0 }
 0x567   : >> { %v4111_v9 = vpop.f32.mrb[4].mxu1  ;;  %v5938_v11 = vadd.f32 %v3969_v42, %v3239_v25  ;;  %v3971_v18 = vpop.f32.mrb[5].mxu0 }
 0x568   : >> { %v5940_v16 = vadd.f32 %v4111_v9, %v3247_v24  ;;  %v4113_v26 = vpop.f32.mrb[5].mxu1  ;;  %v5939_v7 = vadd.f32 %v3971_v18, %v3243_v28  ;;  %v6096_v28 = vpop.eup %6095 }
 0x569   : >> { %v5941_v12 = vadd.f32 %v4113_v26, %v3251_v31  ;;  %v4172_v19 = vmul.f32 %v6088_v22, %v5938_v11  ;;  %v6098_v31 = vpop.eup %6097  ;;  %v4184_v9 = vsub.f32 1.0, %v6096_v28 }
 0x56a   : >> { %v4174_v20 = vmul.f32 %v6090_v56, %v5940_v16  ;;  %v4173_v6 = vmul.f32 %v6092_v23, %v5939_v7  ;;  %v6100_v4 = vpop.eup %6099  ;;  %v4205_v56 = vpop.permute.xlu0 %4204  ;;  %v4186_v11 = vsub.f32 1.0, %v6098_v31  ;;  %v4192_v16 = vmul.f32 %v6241_v1, %v6096_v28 }
 0x56b   : >> { %v4175_v30 = vmul.f32 %v6094_v3, %v5941_v12  ;;  %v4176_v25 = vadd.f32 %v4172_v19, %v3198_v5  ;;  %v6102_v22 = vpop.eup %6101  ;;  %v4185_v18 = vsub.f32 1.0, %v6100_v4  ;;  %v4194_v26 = vmul.f32 %v11754_v2, %v6098_v31 }
 0x56c   : >> { %v4178_v24 = vadd.f32 %v4174_v20, %v3200_v10  ;;  %v4177_v42 = vadd.f32 %v4173_v6, %v3199_v57  ;;  %v4187_v23 = vsub.f32 1.0, %v6102_v22  ;;  %vm4206_vm5 = vcmp.eq.s32.totalorder %v4205_v56, 1 }
 0x56d   : >> { %v4179_v29 = vadd.f32 %v4175_v30, %v3201_v0  ;;  %6103 = vtanh.f32 %v4176_v25  ;;  %v4193_v10 = vmul.f32 %v6237_v13, %v6100_v4  ;;  %v4195_v3 = vmul.f32 %v6229_v48, %v6102_v22 }
 0x56e   : >> { %6105 = vtanh.f32 %v4178_v24 }
 0x56f   : >> { %6107 = vtanh.f32 %v4177_v42 }
 0x570   : >> { %6109 = vtanh.f32 %v4179_v29 }
 0x577   : >> { %v6104_v8 = vpop.eup %6103 }
 0x578   : >> { %v6106_v41 = vpop.eup %6105  ;;  %v4188_v6 = vmul.f32 %v6104_v8, %v4184_v9 }
 0x579   : >> { %v6108_v0 = vpop.eup %6107  ;;  %v4190_v27 = vmul.f32 %v6106_v41, %v4186_v11 }
 0x57a   : >> { %v6110_v5 = vpop.eup %6109  ;;  %v4189_v7 = vmul.f32 %v6108_v0, %v4185_v18  ;;  %v4196_v12 = vadd.f32 %v4192_v16, %v4188_v6  ;;  %3176 = sbr.rel (!%p3174_p11) target bundleno = 783 (0x30f), region = 114 }
 0x57b   : >> { %v4191_v19 = vmul.f32 %v6110_v5, %v4187_v23  ;;  %v4198_v20 = vadd.f32 %v4194_v26, %v4190_v27 }
 0x57c   : >> { %v4197_v57 = vadd.f32 %v4193_v10, %v4189_v7  ;;  %v4207_v30 = vsel %vm4206_vm5, %v4196_v12, 0.0  ;;  %v4218_v25 = vsel %vm4206_vm5, %v4196_v12, %v6241_v1  }
 0x57d   : >> { %v4199_v24 = vadd.f32 %v4195_v3, %v4191_v19  ;;  %v4209_v42 = vsel %vm4206_vm5, %v4198_v20, 0.0  ;;  %4214 = vst [vmem:[%s4213_s8] sm:$0xff] %v4207_v30  ;;  %v4220_v29 = vsel %vm4206_vm5, %v4198_v20, %v11754_v2   ;;  %v12271_v1 = vmov %v4218_v25  ;;  %4222 = vst [vmem:[%s9732_s9] sm:$0xff] (%p3174_p11), %v4218_v25 }
 0x57e   : >> { %v4208_v28 = vsel %vm4206_vm5, %v4197_v57, 0.0  ;;  %4216 = vst [vmem:[%s4213_s8 + $0x10] sm:$0xff] %v4209_v42  ;;  %v4219_v31 = vsel %vm4206_vm5, %v4197_v57, %v6237_v13   ;;  %v12269_v56 = vmov %v4220_v29  ;;  %4224 = vst [vmem:[%s9732_s9 + $0x10] sm:$0xff] (%p3174_p11), %v4220_v29 }
 0x57f   : >> { %v4210_v4 = vsel %vm4206_vm5, %v4199_v24, 0.0  ;;  %4215 = vst [vmem:[%s4213_s8 + $0x8] sm:$0xff] %v4208_v28  ;;  %v4221_v22 = vsel %vm4206_vm5, %v4199_v24, %v6229_v48   ;;  %v12270_v13 = vmov %v4219_v31  ;;  %4223 = vst [vmem:[%s9732_s9 + $0x8] sm:$0xff] (%p3174_p11), %v4219_v31 }
 0x580   : >> { %4217 = vst [vmem:[%s4213_s8 + $0x18] sm:$0xff] %v4210_v4  ;;  %v12268_v48 = vmov %v4221_v22  ;;  %4225 = vst [vmem:[%s9732_s9 + $0x18] sm:$0xff] (%p3174_p11), %v4221_v22 }
 0x581   : > { %6124 = shalt.err (!%p6121_p4)
}
 0x582   : > { %s6125_s20 = scalar_lea.hbm %s10654_s16, 4096  ;;  %s6129_s14 = scalar_lea.hbm %s10731_s6, 8192 }
 0x583   : > { %p6126_p7 = scmp.ne.s32.totalorder %s10654_s16, %s6125_s20  ;;  %p6130_p10 = scmp.lt.u32.totalorder %s10654_s16, %s10731_s6 }
 0x584   : > { %p6131_p11 = scmp.lt.u32.totalorder %s6129_s14, %s6125_s20  ;;  %p6133_p13 = scmp.lt.u32.totalorder %s6125_s20, %s10654_s16 }
 0x585   : > { %p6127_p8 = pnand %p6126_p7, %p6334_p5 }
 0x586   : > { %p6132_p12 = por %p6131_p11, %p6130_p10 }
 0x587   : > { %p6128_p9 = pneg %p6127_p8 }
 0x588   : > { %p6134_p0 = por %p6133_p13, %p6132_p12 }
 0x58a   : > { %p6135_p1 = pnand %p6134_p0, %p6128_p9 }
 0x58c   : > { %6138 = shalt.err (!%p6135_p1)
}
 0x58d   : > { %s6251_s19 = smov 512   ;;  %s6252_s23 = smov 32  }
 0x58e   : > { %5957 = dma.vmem_to_hbm [thread:$0]  (%p6334_p5), %s10657_s15, 4096, %s10654_s16, %s4227_s17, %s6251_s19, %s6251_s19, %s6252_s23  }
 0x58f   : > { %s4501_s29 = sshll.u32 %s6315_s28, 9  ;;  %s4262_s8 = sshll.u32 %s9732_s9, 4  ;;  %s4263_s8 = int_to_ptr.vmem [resolvable:$true] %s4262_s8 }
 0x590   : > { %s10688_s14 = scalar_lea.hbm %s10732_s7, %s4501_s29  ;;  %s4232_s18 = scalar_lea.sflag [#allocation6], %s6345_s13 }
 0x591   : > { %s6139_s21 = scalar_lea.vmem %s4263_s8, 512  ;;  %s6253_s0 = smov [#allocation5]  }
 0x592   : > { %p6140_p2 = scmp.ne.s32.totalorder %s4263_s8, %s6139_s21  ;;  %s6143_s1 = sshll.u32 %s6253_s0, 4  ;;  %s6144_s1 = int_to_ptr.vmem [resolvable:$false] %s6143_s1 }
 0x593   : > { %s6145_s2 = scalar_lea.vmem %s6144_s1, 1024  ;;  %p6146_p7 = scmp.lt.s32.totalorder %s4263_s8, %s6144_s1 }
 0x594   : > { %p6141_p3 = pnand %p6140_p2, %p6334_p5  ;;  %p6147_p8 = scmp.lt.s32.totalorder %s6145_s2, %s6139_s21 }
 0x596   : > { %p6142_p4 = pneg %p6141_p3  ;;  %p6148_p9 = por %p6147_p8, %p6146_p7 }
 0x598   : > { %p6149_p10 = pnand %p6148_p9, %p6142_p4 }
 0x59a   : > { %6152 = shalt.err (!%p6149_p10)
}
 0x59b   : > { %s6153_s28 = scalar_lea.hbm %s10688_s14, 512  ;;  %s6157_s0 = scalar_lea.hbm %s10732_s7, 1024 }
 0x59c   : > { %p6154_p11 = scmp.ne.s32.totalorder %s10688_s14, %s6153_s28  ;;  %p6158_p0 = scmp.lt.u32.totalorder %s10688_s14, %s10732_s7 }
 0x59d   : > { %p6159_p1 = scmp.lt.u32.totalorder %s6157_s0, %s6153_s28  ;;  %p6161_p3 = scmp.lt.u32.totalorder %s6153_s28, %s10688_s14 }
 0x59e   : > { %p6155_p12 = pnand %p6154_p11, %p6334_p5 }
 0x59f   : > { %p6160_p2 = por %p6159_p1, %p6158_p0 }
 0x5a0   : > { %p6156_p13 = pneg %p6155_p12 }
 0x5a1   : > { %p6162_p4 = por %p6161_p3, %p6160_p2 }
 0x5a3   : > { %p6163_p7 = pnand %p6162_p4, %p6156_p13 }
 0x5a5   : > { %6166 = shalt.err (!%p6163_p7)
}
 0x5a6   : > { %5958 = dma.vmem_to_hbm [thread:$0]  (%p6334_p5), %s4263_s8, 512, %s10688_s14, %s4232_s18  }
 0x5a7 PF: > { %p5968_p8 = scmp.ge.s32.totalorder %s6225_s27, 2  ;;  %s4274_s2 = sand.u32 1, %s6213_s24  }
 0x5a8   : > { %s4275_s15 = scalar_lea.sflag [#allocation4], %s4274_s2 }
 0x5a9   : > { %p5962_p9 = pnand %p5968_p8, %p6338_p6 }
 0x5ab   : > { %6204 = dma.done.wait (!%p5962_p9), %s4275_s15, 4096  }
 0x5ac   : > { %6206 = vsyncadd (!%p5962_p9), %s4275_s15, 4294963200  ;;  %s4284_s17 = scalar_lea.sflag [#allocation6], %s4274_s2 }
 0x5ad   : > { %6208 = dma.done.wait (!%p5962_p9), %s4284_s17, 512  }
 0x5ae   : > { %6210 = vsyncadd (!%p5962_p9), %s4284_s17, 4294966784  ;;  %p21_p5 = scmp.ge.s32.totalorder %s6319_s30, 4   ;;  %s12272_s24 = smov %s6217_s25 }
 0x5af   : > { %s12273_s25 = smov %s6221_s26  ;;  %s12274_s26 = smov %s6330_s10 }
 0x5b0   : > { %s12275_s27 = smov %s6319_s30  ;;  %23 = sbr.rel (!%p21_p5) target bundleno = 9 (0x9), region = 125 }
 0x5b7   :  { %4289 = vsyncpa [#allocation4], 1 }
 0x5b8   :  { %4291 = vsyncpa [#allocation4 + $0x1], 1 }
 0x5b9   :  { %4292 = vsyncpa [#allocation6], 1 }
 0x5ba   :  { %4294 = vsyncpa [#allocation6 + $0x1], 1 }

</bundles_post_ra>
